<compile_context>
chip_gen: v7x
topology: tpu7x:2x2x1
jax: 0.10.0
libtpu: 0.0.40
codegen_flags: <defaults>
</compile_context>

<pallas_src>
import functools

import jax
import jax.numpy as jnp
from jax.experimental import pallas as pl
from jax.experimental.pallas import tpu as pltpu

NUM_LAYERS = 12
D_IN = 768
D_OUT = 512


def _content_projector_kernel(x_ref, w_ref, b_ref, o_ref, acc_ref, *,
                              true_s, s_blk, needs_mask):
    # x_ref:   (L_BLK, B, S_BLK, D_IN)
    # w_ref:   (L_BLK, D_OUT, D_IN)
    # b_ref:   (L_BLK, 1, D_OUT)
    # o_ref:   (L_BLK, B, D_OUT)
    # acc_ref: (L_BLK, B, D_IN) f32 scratch — running sum over the sequence axis
    s = pl.program_id(1)

    @pl.when(s == 0)
    def _():
        acc_ref[...] = jnp.zeros_like(acc_ref)

    # Upcast before the VPU reduction (bf16-safe; no-op for f32 inputs).
    x = x_ref[...].astype(jnp.float32)                       # (L_BLK, B, S_BLK, D_IN)
    if needs_mask:
        # Last S-tile may be padded by Pallas: zero out rows >= true_s.
        row = s * s_blk + jax.lax.broadcasted_iota(jnp.int32, x.shape, 2)
        x = jnp.where(row < true_s, x, jnp.zeros_like(x))

    # AdaptiveAvgPool2d((1, 768)) with last dim == 768 is a mean over S;
    # accumulate the partial sum here, divide by the true S at the end.
    acc_ref[...] += jnp.sum(x, axis=2)                       # (L_BLK, B, D_IN) f32

    @pl.when(s == pl.num_programs(1) - 1)
    def _():
        x_gap = acc_ref[...] * (1.0 / true_s)                # (L_BLK, B, D_IN) f32
        w = w_ref[...].astype(jnp.float32)                   # (L_BLK, D_OUT, D_IN)
        # Batched matmul contracting D_IN directly — no in-kernel transpose.
        y = jnp.einsum("lbd,lod->lbo", x_gap, w,
                       preferred_element_type=jnp.float32)   # (L_BLK, B, D_OUT)
        o_ref[...] = (y + b_ref[...].astype(jnp.float32)).astype(o_ref.dtype)


def _pick_l_block(num_layers):
    for cand in (4, 3, 2):
        if num_layers % cand == 0:
            return cand
    return 1


def _pick_s_block(l_blk, b, s, d_in, itemsize, budget_bytes=6 * 1024 * 1024):
    """Largest S tile (multiple of 8) whose data block stays under `budget_bytes`."""
    bytes_per_row = l_blk * b * d_in * itemsize
    max_rows = max(budget_bytes // bytes_per_row, 8)
    if s <= max_rows:
        return s                                   # whole S in one step (full-dim block)
    return int(max(8, (max_rows // 8) * 8))        # tail handled by masking


def content_projector_forward(data, weights, biases):
    """data: (L, B, S, D_IN), weights: (L, D_OUT, D_IN), biases: (L, D_OUT)
    returns (B, L, D_OUT), matching torch.stack(..., dim=1)."""
    L, B, S, Din = data.shape
    Dout = weights.shape[1]
    biases3 = biases.reshape(L, 1, Dout)

    l_blk = _pick_l_block(L)
    s_blk = _pick_s_block(l_blk, B, S, Din, data.dtype.itemsize)
    n_s = pl.cdiv(S, s_blk)
    needs_mask = (S % s_blk) != 0

    kernel = functools.partial(
        _content_projector_kernel,
        true_s=S, s_blk=s_blk, needs_mask=needs_mask)

    bytes_accessed = (data.size * data.dtype.itemsize
                      + weights.size * weights.dtype.itemsize
                      + biases3.size * biases3.dtype.itemsize
                      + L * B * Dout * data.dtype.itemsize)
    cost = pl.CostEstimate(
        flops=2 * L * B * Din * Dout + L * B * S * Din,
        transcendentals=0,
        bytes_accessed=bytes_accessed)

    out = pl.pallas_call(
        kernel,
        out_shape=jax.ShapeDtypeStruct((L, B, Dout), data.dtype),
        grid_spec=pltpu.PrefetchScalarGridSpec(
            num_scalar_prefetch=0,
            # layer-block axis (independent -> parallel), S-reduction axis last.
            grid=(L // l_blk, n_s),
            in_specs=[
                pl.BlockSpec((l_blk, B, s_blk, Din), lambda l, s: (l, 0, s, 0)),
                pl.BlockSpec((l_blk, Dout, Din), lambda l, s: (l, 0, 0)),
                pl.BlockSpec((l_blk, 1, Dout), lambda l, s: (l, 0, 0)),
            ],
            out_specs=pl.BlockSpec((l_blk, B, Dout), lambda l, s: (l, 0, 0)),
            scratch_shapes=[pltpu.VMEM((l_blk, B, Din), jnp.float32)],
        ),
        compiler_params=pltpu.CompilerParams(
            dimension_semantics=("parallel", "arbitrary"),
            vmem_limit_bytes=48 * 1024 * 1024,
        ),
        cost_estimate=cost,
    )(data, weights, biases3)

    return jnp.transpose(out, (1, 0, 2))  # (B, L, D_OUT)


def _reference(data, weights, biases):
    x_gap = jnp.mean(data, axis=2)                                   # (L, B, D_IN)
    y = jnp.einsum("lbd,lod->lbo", x_gap, weights) + biases[:, None, :]
    return jnp.transpose(y, (1, 0, 2))                               # (B, L, D_OUT)


if __name__ == "__main__":
    key = jax.random.PRNGKey(0)
    k_x, k_w, k_b = jax.random.split(key, 3)

    B, S = 2, 8  # small batch / seq; feature dims fixed by the module (768 -> 512, 12 layers)
    data = jax.random.normal(k_x, (NUM_LAYERS, B, S, D_IN), dtype=jnp.float32)

    # Deterministic synthetic Linear params (PyTorch-style uniform(-1/sqrt(fan_in), ...)).
    bound = 1.0 / (D_IN ** 0.5)
    weights = jax.random.uniform(k_w, (NUM_LAYERS, D_OUT, D_IN), jnp.float32, -bound, bound)
    biases = jax.random.uniform(k_b, (NUM_LAYERS, D_OUT), jnp.float32, -bound, bound)

    out = content_projector_forward(data, weights, biases)
    out = jax.block_until_ready(out)

    ref = _reference(data, weights, biases)
    assert out.shape == (B, NUM_LAYERS, D_OUT), out.shape
    assert jnp.allclose(out, ref, atol=1e-4, rtol=1e-4), "mismatch vs pure-JAX reference"

    print("KERNEL_OK")
</pallas_src>

<mosaic_0001>
module attributes {stable_mosaic.version = 11 : i64} {
  func.func @_content_projector_kernel(%arg0: i32, %arg1: i32, %arg2: memref<4x2x8x768xf32, #tpu.memory_space<vmem>>, %arg3: memref<4x512x768xf32, #tpu.memory_space<vmem>>, %arg4: memref<4x1x512xf32, #tpu.memory_space<vmem>>, %arg5: memref<4x2x512xf32, #tpu.memory_space<vmem>>, %arg6: memref<4x2x768xf32, #tpu.memory_space<vmem>>) attributes {dimension_semantics = [#tpu.dimension_semantics<parallel>, #tpu.dimension_semantics<arbitrary>], iteration_bounds = array<i64: 3, 1>, scalar_prefetch = 0 : i64, scratch_operands = 1 : i64, tpu.core_type = #tpu.core_type<tc>, window_params = [{transform_indices = @transform_0, window_bounds = array<i64: 4, 2, 8, 768>}, {transform_indices = @transform_1, window_bounds = array<i64: 4, 512, 768>}, {transform_indices = @transform_2, window_bounds = array<i64: 4, 1, 512>}, {transform_indices = @transform_3, window_bounds = array<i64: 4, 2, 512>}]} {
    %c0_i32 = arith.constant 0 : i32
    %0 = arith.cmpi eq, %arg1, %c0_i32 : i32
    %1 = arith.extui %0 : i1 to i32
    %c0_i32_0 = arith.constant 0 : i32
    %2 = arith.cmpi ne, %1, %c0_i32_0 : i32
    scf.if %2 {
      %cst_12 = arith.constant 0.000000e+00 : f32
      %11 = vector.broadcast %cst_12 : f32 to vector<4x2x768xf32>
      %c0_13 = arith.constant 0 : index
      %c0_14 = arith.constant 0 : index
      %c0_15 = arith.constant 0 : index
      %12 = vector.load %arg6[%c0_13, %c0_14, %c0_15] : memref<4x2x768xf32, #tpu.memory_space<vmem>>, vector<4x2x768xf32>
      tpu.vector_store %arg6[%c0_13, %c0_14, %c0_15], %11 {strides = array<i32>} : memref<4x2x768xf32, #tpu.memory_space<vmem>>, vector<4x2x768xf32>,
    } else {
    }
    %c0 = arith.constant 0 : index
    %c0_1 = arith.constant 0 : index
    %c0_2 = arith.constant 0 : index
    %c0_3 = arith.constant 0 : index
    %3 = vector.load %arg2[%c0, %c0_1, %c0_2, %c0_3] : memref<4x2x8x768xf32, #tpu.memory_space<vmem>>, vector<4x2x8x768xf32>
    %c0_4 = arith.constant 0 : index
    %c0_5 = arith.constant 0 : index
    %c0_6 = arith.constant 0 : index
    %4 = vector.load %arg6[%c0_4, %c0_5, %c0_6] : memref<4x2x768xf32, #tpu.memory_space<vmem>>, vector<4x2x768xf32>
    %cst = arith.constant dense<0.000000e+00> : vector<4x2x768xf32>
    %5 = vector.multi_reduction <add>, %3, %cst [2] : vector<4x2x8x768xf32> to vector<4x2x768xf32>
    %6 = arith.addf %4, %5 : vector<4x2x768xf32>
    %c0_7 = arith.constant 0 : index
    %c0_8 = arith.constant 0 : index
    %c0_9 = arith.constant 0 : index
    %7 = vector.load %arg6[%c0_7, %c0_8, %c0_9] : memref<4x2x768xf32, #tpu.memory_space<vmem>>, vector<4x2x768xf32>
    tpu.vector_store %arg6[%c0_7, %c0_8, %c0_9], %6 {strides = array<i32>} : memref<4x2x768xf32, #tpu.memory_space<vmem>>, vector<4x2x768xf32>,
    %c0_i32_10 = arith.constant 0 : i32
    %8 = arith.cmpi eq, %arg1, %c0_i32_10 : i32
    %9 = arith.extui %8 : i1 to i32
    %c0_i32_11 = arith.constant 0 : i32
    %10 = arith.cmpi ne, %9, %c0_i32_11 : i32
    scf.if %10 {
      %c0_12 = arith.constant 0 : index
      %c0_13 = arith.constant 0 : index
      %c0_14 = arith.constant 0 : index
      %11 = vector.load %arg6[%c0_12, %c0_13, %c0_14] : memref<4x2x768xf32, #tpu.memory_space<vmem>>, vector<4x2x768xf32>
      %cst_15 = arith.constant 1.250000e-01 : f32
      %12 = vector.broadcast %cst_15 : f32 to vector<4x2x768xf32>
      %13 = arith.mulf %11, %12 : vector<4x2x768xf32>
      %c0_16 = arith.constant 0 : index
      %c0_17 = arith.constant 0 : index
      %c0_18 = arith.constant 0 : index
      %14 = vector.load %arg3[%c0_16, %c0_17, %c0_18] : memref<4x512x768xf32, #tpu.memory_space<vmem>>, vector<4x512x768xf32>
      "tpu.trace_start"() <{level = 10 : i32, message = "lbd,lod->lbo"}> : () -> ()
      %cst_19 = arith.constant dense<0.000000e+00> : vector<4x2x512xf32>
      %15 = tpu.matmul %13, %14, %cst_19 {dimension_numbers = #tpu.dot_dimension_numbers<[2], [2], [1], [1], [0, 0, 0, 1, 1, 1], [0], [0]>} : vector<4x2x768xf32>, vector<4x512x768xf32>, vector<4x2x512xf32> -> vector<4x2x512xf32>
      "tpu.trace_stop"() : () -> ()
      %c0_20 = arith.constant 0 : index
      %c0_21 = arith.constant 0 : index
      %c0_22 = arith.constant 0 : index
      %16 = vector.load %arg4[%c0_20, %c0_21, %c0_22] : memref<4x1x512xf32, #tpu.memory_space<vmem>>, vector<4x1x512xf32>
      %17 = vector.broadcast %16 : vector<4x1x512xf32> to vector<4x2x512xf32>
      %18 = arith.addf %15, %17 : vector<4x2x512xf32>
      %c0_23 = arith.constant 0 : index
      %c0_24 = arith.constant 0 : index
      %c0_25 = arith.constant 0 : index
      %19 = vector.load %arg5[%c0_23, %c0_24, %c0_25] : memref<4x2x512xf32, #tpu.memory_space<vmem>>, vector<4x2x512xf32>
      tpu.vector_store %arg5[%c0_23, %c0_24, %c0_25], %18 {strides = array<i32>} : memref<4x2x512xf32, #tpu.memory_space<vmem>>, vector<4x2x512xf32>,
    } else {
    }
    return
  }
  func.func @transform_0(%arg0: i32, %arg1: i32) -> (i32, i32, i32, i32) {
    %c0_i32 = arith.constant 0 : i32
    %c0_i32_0 = arith.constant 0 : i32
    %c0_i32_1 = arith.constant 0 : i32
    return %arg0, %c0_i32, %arg1, %c0_i32_0 : i32, i32, i32, i32
  }
  func.func @transform_1(%arg0: i32, %arg1: i32) -> (i32, i32, i32) {
    %c0_i32 = arith.constant 0 : i32
    %c0_i32_0 = arith.constant 0 : i32
    %c0_i32_1 = arith.constant 0 : i32
    return %arg0, %c0_i32, %c0_i32_0 : i32, i32, i32
  }
  func.func @transform_2(%arg0: i32, %arg1: i32) -> (i32, i32, i32) {
    %c0_i32 = arith.constant 0 : i32
    %c0_i32_0 = arith.constant 0 : i32
    %c0_i32_1 = arith.constant 0 : i32
    return %arg0, %c0_i32, %c0_i32_0 : i32, i32, i32
  }
  func.func @transform_3(%arg0: i32, %arg1: i32) -> (i32, i32, i32) {
    %c0_i32 = arith.constant 0 : i32
    %c0_i32_0 = arith.constant 0 : i32
    %c0_i32_1 = arith.constant 0 : i32
    return %arg0, %c0_i32, %c0_i32_0 : i32, i32, i32
  }
}

</mosaic_0001>

<bundles_post_ra>
// kernel: tpu_custom_call.1
= control target key start
LH: loop header
LB: loop body
LE: loop exit
PB: predicated region body
PF: predicated region fallthrough
CT: control target
= control target key end

     0   :  { %s8686_s0 = inlined_call_operand.hbm [shape: f32[12,2,8,768], index: 0, kind: input, shape index: {}]   ;;  %s8687_s1 = inlined_call_operand.hbm [shape: f32[12,512,768], index: 1, kind: input, shape index: {}]   ;;  %s8688_s2 = inlined_call_operand.hbm [shape: f32[12,1,512], index: 2, kind: input, shape index: {}]   ;;  %s8689_s3 = inlined_call_operand.hbm [shape: f32[12,2,512], index: 3, kind: output, shape index: {}]  }
   0x1   :  { %8696 = sst [smem:[#allocation16_spill]] %s8686_s0 }
   0x2   :  { %8697 = sst [smem:[#allocation17_spill]] %s8687_s1 }
   0x3   :  { %8 = vsyncpa [#allocation4], 0 }
   0x4   :  { %10 = vsyncpa [#allocation4 + $0x1], 0 }
   0x5   :  { %11 = vsyncpa [#allocation7], 0 }
   0x6   :  { %13 = vsyncpa [#allocation7 + $0x1], 0 }
   0x7   :  { %14 = vsyncpa [#allocation5], 0 }
   0x8   :  { %16 = vsyncpa [#allocation5 + $0x1], 0  ;;  %s6599_s12 = smov 0   ;;  %s6601_s13 = smov 0  }
   0x9   :  { %s6603_s14 = smov 0   ;;  %s6605_s15 = smov 0  }
   0xa   :  { %s6607_s16 = smov 0   ;;  %s6609_s17 = smov 0  }
   0xb LB: > { %8698 = sst [smem:[#allocation13_spill]] %s6561_s16  ;;  %s6630_s18 = sadd.s32 4294967295, %s6565_s17   ;;  %s6565_s17 = sphi %s6609_s17, %s22_s17   ;;  %s6561_s16 = sphi %s6607_s16, %s8720_s16   ;;  %s6557_s15 = sphi %s6605_s15, %s8719_s15   ;;  %s6553_s14 = sphi %s6603_s14, %s8723_s14   ;;  %s6549_s13 = sphi %s6601_s13, %s8722_s13   ;;  %s6545_s12 = sphi %s6599_s12, %s8721_s12  }
   0xc   : > { %s4693_s19 = sadd.s32 4294967294, %s6565_s17   ;;  %s34_s20 = sadd.s32 1, %s6561_s16 }
   0xd   : > { %s43_s21 = sadd.s32 1, %s6553_s14  ;;  %p36_p0 = scmp.ge.s32.totalorder %s34_s20, 3 }
   0xe   : > { %p50_p1 = scmp.ne.s32.totalorder %s6553_s14, %s6549_s13  ;;  %p51_p2 = scmp.eq.s32.totalorder %s6565_s17, 0 }
   0xf   : > { %p56_p3 = scmp.ne.s32.totalorder %s6549_s13, %s6545_s12  ;;  %s8725_s20 = smov (%p36_p0, %s34_s20), 0 }
  0x10   : > { %8699 = sst [smem:[#allocation14_spill]] %s8725_s20  ;;  %p52_p4 = por %p51_p2, %p50_p1 }
  0x11   : > { %p57_p5 = scmp.eq.s32.totalorder %s6630_s18, 0  ;;  %s38_s22 = ssub.s32 %s6561_s16, %s8725_s20 }
  0x12   : > { %p132_p6 = scmp.eq.s32.totalorder %s6630_s18, 2  ;;  %p41_p7 = scmp.eq.s32.totalorder %s38_s22, 0 }
  0x13   : > { %p6646_p8 = por %p57_p5, %p56_p3  ;;  %p138_p10 = scmp.eq.s32.totalorder %s4693_s19, 2 }
  0x14   : > { %p6650_p9 = por %p132_p6, %p50_p1  ;;  %p6331_p12 = scmp.lt.s32.totalorder %s6565_s17, 3 }
  0x15   : > { %s8700_s23 = scalar_select %p6646_p8, 1, 0 }
  0x16   : > { %s8701_s24 = scalar_select %p6650_p9, 1, 0 }
  0x17   : > { %s6655_s25 = scalar_select %p41_p7, %s6553_s14, %s43_s21  }
  0x18   : > { %p6657_p11 = por %p138_p10, %p56_p3  ;;  %s6663_s27 = sand.u32 1, %s6553_s14  }
  0x19   : > { %8702 = sst [smem:[#allocation15_spill]] %s6655_s25  ;;  %p6665_p13 = pnand %p6331_p12, %p52_p4 }
  0x1a   : > { %s8703_s26 = scalar_select %p6657_p11, 1, 0 }
  0x1b   : > { %s182_s29 = sand.u32 1, %s6565_s17   ;;  %s6305_s30 = smul.u32 12288, %s6663_s27 }
  0x1c   : > { %s6306_s4 = smul.u32 196608, %s6561_s16  ;;  %s8705_s1 = sld [smem:[#allocation17_spill]] }
  0x1d   : > { %s186_s8 = scalar_lea.vmem [#allocation6], %s6305_s30  ;;  %s6681_s10 = scalar_lea.sflag [#allocation7], %s182_s29 }
  0x1e   : > { %s194_s9 = sshll.u32 %s186_s8, 4  ;;  %p6687_p3 = pneg %p6665_p13  ;;  %s6678_s9 = int_to_ptr.vmem [resolvable:$true] %s194_s9 }
  0x22   : > { %s6676_s7 = scalar_lea.hbm %s8705_s1, %s6306_s4  ;;  %s6394_s30 = scalar_lea.hbm %s8705_s1, 589824 }
  0x23   : > { %s6389_s11 = scalar_lea.hbm %s6676_s7, 196608  ;;  %p6395_p6 = scmp.lt.u32.totalorder %s6676_s7, %s8705_s1 }
  0x24   : > { %p6390_p2 = scmp.ne.s32.totalorder %s6676_s7, %s6389_s11  ;;  %p6396_p7 = scmp.lt.u32.totalorder %s6394_s30, %s6389_s11 }
  0x25   : > { %p6398_p12 = scmp.lt.u32.totalorder %s6389_s11, %s6676_s7 }
  0x26   : > { %p6392_p4 = pnand %p6687_p3, %p6390_p2  ;;  %p6397_p10 = por %p6396_p7, %p6395_p6 }
  0x28   : > { %p6393_p5 = pneg %p6392_p4  ;;  %p6399_p0 = por %p6398_p12, %p6397_p10 }
  0x2a   : > { %p6400_p1 = pnand %p6399_p0, %p6393_p5 }
  0x2c   : > { %6403 = shalt.err (!%p6400_p1)
}
  0x2d   : > { %s6404_s29 = scalar_lea.vmem %s6678_s9, 196608  ;;  %s6567_s6 = smov [#allocation6]  }
  0x2e   : > { %p6405_p2 = scmp.ne.s32.totalorder %s6678_s9, %s6404_s29  ;;  %s6409_s8 = sshll.u32 %s6567_s6, 4  ;;  %s6410_s8 = int_to_ptr.vmem [resolvable:$false] %s6409_s8 }
  0x2f   : > { %s6411_s21 = scalar_lea.vmem %s6410_s8, 393216  ;;  %p6412_p9 = scmp.lt.s32.totalorder %s6678_s9, %s6410_s8 }
  0x30   : > { %p6407_p4 = pnand %p6405_p2, %p6687_p3  ;;  %p6413_p8 = scmp.lt.s32.totalorder %s6411_s21, %s6404_s29 }
  0x32   : > { %p6408_p11 = pneg %p6407_p4  ;;  %p6414_p6 = por %p6413_p8, %p6412_p9 }
  0x34   : > { %p6415_p7 = pnand %p6414_p6, %p6408_p11 }
  0x36   : > { %6418 = shalt.err (!%p6415_p7)
}
  0x37   : > { %s8692_s11 = smov 768   ;;  %s8693_s22 = smov 48  }
  0x38   : > { %6323 = dma.hbm_to_vmem [thread:$0]  (!%p6665_p13), %s6676_s7, 196608, %s6678_s9, %s6681_s10, %s8692_s11, %s8692_s11, %s8693_s22  }
  0x39   : > { %p8707_p8 = scmp.lt.s32.totalorder %s6565_s17, 4  ;;  %p8708_p9 = scmp.ge.s32.totalorder %s6565_s17, 1 }
  0x3a   : > { %s6303_s4 = smul.u32 384, %s6663_s27  ;;  %s4716_s6 = sshll.u32 %s6561_s16, 8 }
  0x3b   : > { %p6718_p11 = pnand %p8708_p9, %p8707_p8  ;;  %s6304_s29 = smul.u32 6144, %s6561_s16 }
  0x3c   : > { %s8710_s0 = sld [smem:[#allocation16_spill]]  ;;  %s162_s7 = scalar_lea.vmem [#allocation3], %s6303_s4 }
  0x3d   : > { %s8709_s30 = scalar_select %p6718_p11, 1, 0 }
  0x3e   : > { %s172_s9 = sshll.u32 %s162_s7, 4  ;;  %s6736_s20 = scalar_lea.hbm %s8688_s2, %s4716_s6  ;;  %s6731_s9 = int_to_ptr.vmem [resolvable:$true] %s172_s9 }
  0x3f   : > { %s159_s5 = scalar_lea.sflag [#allocation4], %s6663_s27 }
  0x42   : > { %s6729_s1 = scalar_lea.hbm %s8710_s0, %s6304_s29  ;;  %s6424_s21 = scalar_lea.hbm %s8710_s0, 18432 }
  0x43   : > { %s6419_s16 = scalar_lea.hbm %s6729_s1, 6144  ;;  %p6425_p10 = scmp.lt.u32.totalorder %s6729_s1, %s8710_s0 }
  0x44   : > { %p6420_p0 = scmp.ne.s32.totalorder %s6729_s1, %s6419_s16  ;;  %p6426_p12 = scmp.lt.u32.totalorder %s6424_s21, %s6419_s16 }
  0x45   : > { %p6428_p4 = scmp.lt.u32.totalorder %s6419_s16, %s6729_s1 }
  0x46   : > { %p6422_p1 = pnand %p6420_p0, %p6687_p3  ;;  %p6427_p2 = por %p6426_p12, %p6425_p10 }
  0x48   : > { %p6423_p5 = pneg %p6422_p1  ;;  %p6429_p6 = por %p6428_p4, %p6427_p2 }
  0x4a   : > { %p6430_p7 = pnand %p6429_p6, %p6423_p5 }
  0x4c   : > { %6433 = shalt.err (!%p6430_p7)
}
  0x4d   : > { %s6434_s11 = scalar_lea.vmem %s6731_s9, 6144  ;;  %s6570_s22 = smov [#allocation3]  }
  0x4e   : > { %p6435_p8 = scmp.ne.s32.totalorder %s6731_s9, %s6434_s11  ;;  %s6439_s6 = sshll.u32 %s6570_s22, 4  ;;  %s6440_s6 = int_to_ptr.vmem [resolvable:$false] %s6439_s6 }
  0x4f   : > { %s6441_s25 = scalar_lea.vmem %s6440_s6, 12288  ;;  %p6442_p1 = scmp.lt.s32.totalorder %s6731_s9, %s6440_s6 }
  0x50   : > { %p6437_p9 = pnand %p6435_p8, %p6687_p3  ;;  %p6443_p11 = scmp.lt.s32.totalorder %s6441_s25, %s6434_s11 }
  0x52   : > { %p6438_p0 = pneg %p6437_p9  ;;  %p6444_p10 = por %p6443_p11, %p6442_p1 }
  0x54   : > { %p6445_p12 = pnand %p6444_p10, %p6438_p0 }
  0x56   : > { %6448 = shalt.err (!%p6445_p12)
}
  0x57   : > { %s8711_s16 = smov 48   ;;  %s8712_s7 = smov 768  }
  0x58   : > { %6320 = dma.hbm_to_vmem [thread:$0]  (!%p6665_p13), %s6729_s1, 6144, %s6731_s9, %s159_s5, %s8712_s7, %s8712_s7, %s8711_s16  }
  0x59   : > { %s8713_s29 = sshll.u32 %s6663_s27, 4  ;;  %s6449_s4 = scalar_lea.hbm %s6736_s20, 256 }
  0x5a   : > { %s208_s8 = scalar_lea.vmem [#allocation8], %s8713_s29  ;;  %p6450_p11 = scmp.ne.s32.totalorder %s6736_s20, %s6449_s4 }
  0x5b   : > { %s216_s21 = sshll.u32 %s208_s8, 4  ;;  %s6454_s6 = scalar_lea.hbm %s8688_s2, 768  ;;  %s6767_s21 = int_to_ptr.vmem [resolvable:$true] %s216_s21 }
  0x5c   : > { %p6452_p5 = pnand %p6450_p11, %p6687_p3  ;;  %p6455_p4 = scmp.lt.u32.totalorder %s6736_s20, %s8688_s2 }
  0x5d   : > { %p6456_p6 = scmp.lt.u32.totalorder %s6454_s6, %s6449_s4  ;;  %p6458_p8 = scmp.lt.u32.totalorder %s6449_s4, %s6736_s20 }
  0x5e   : > { %p6453_p2 = pneg %p6452_p5 }
  0x5f   : > { %p6457_p7 = por %p6456_p6, %p6455_p4 }
  0x61   : > { %p6459_p9 = por %p6458_p8, %p6457_p7 }
  0x63   : > { %p6460_p0 = pnand %p6459_p9, %p6453_p2 }
  0x65   : > { %6463 = shalt.err (!%p6460_p0)
}
  0x66   : > { %s6464_s1 = scalar_lea.vmem %s6767_s21, 256  ;;  %s6571_s27 = smov [#allocation8]  }
  0x67   : > { %p6465_p1 = scmp.ne.s32.totalorder %s6767_s21, %s6464_s1  ;;  %s6469_s5 = sshll.u32 %s6571_s27, 4  ;;  %s6470_s5 = int_to_ptr.vmem [resolvable:$false] %s6469_s5 }
  0x68   : > { %s6471_s0 = scalar_lea.vmem %s6470_s5, 512  ;;  %p6472_p11 = scmp.lt.s32.totalorder %s6767_s21, %s6470_s5 }
  0x69   : > { %p6467_p10 = pnand %p6465_p1, %p6687_p3  ;;  %p6473_p5 = scmp.lt.s32.totalorder %s6471_s0, %s6464_s1 }
  0x6b   : > { %p6468_p12 = pneg %p6467_p10  ;;  %p6474_p4 = por %p6473_p5, %p6472_p11 }
  0x6d   : > { %p6475_p6 = pnand %p6474_p4, %p6468_p12 }
  0x6f   : > { %6478 = shalt.err (!%p6475_p6)
}
  0x70   : > { %s6572_s9 = smov 64   ;;  %s6573_s16 = smov 4  }
  0x71   : > { %6326 = dma.hbm_to_vmem [thread:$0]  (!%p6665_p13), %s6736_s20, 256, %s6767_s21, %s6681_s10, %s6572_s9, %s6572_s9, %s6573_s16  }
  0x72   : > { %p8714_p3 = scmp.ne.s32.totalorder %s8709_s30, 0 }
  0x73   : > { %s6794_s19 = sand.u32 (!%p8714_p3), 1, %s6549_s13   ;;  %p8715_p2 = scmp.ne.s32.totalorder (!%p8714_p3), %s8700_s23, 0 }
  0x74   : > { %228 = sbr.rel (%p8714_p3) target bundleno = 1905 (0x771), region = 32  ;;  %s231_s29 = scalar_lea.sflag (!%p8714_p3), [#allocation4], %s6794_s19 }
  0x75   : > { %s6307_s7 = smul.u32 (!%p8714_p3), 384, %s6794_s19 }
  0x77   : > { %s6798_s8 = scalar_lea.vmem (!%p8714_p3), [#allocation3], %s6307_s7 }
  0x7b   : > { %6532 = dma.done.wait (%p8715_p2), %s231_s29, 6144  }
  0x7c   : > { %6534 = vsyncadd (%p8715_p2), %s231_s29, 4294961152  ;;  %s239_s20 = sand.u32 1, %s6630_s18   ;;  %s6308_s28 = smul.u32 12288, %s6794_s19 }
  0x7d   : > { %s240_s10 = scalar_lea.sflag [#allocation7], %s239_s20 }
  0x7e   : > { %s6806_s30 = scalar_lea.vmem [#allocation6], %s6308_s28 }
  0x7f   : > { %6536 = dma.done.wait (%p8715_p2), %s240_s10, 196864  }
  0x80   : > { %6538 = vsyncadd (%p8715_p2), %s240_s10, 4294770432  ;;  %v6574_v0 = vmov 0.0   ;;  %v999_v1 = vld [vmem:[%s6806_s30 + $0x8] sm:$0xff]  ;;  %v1005_v2 = vld [vmem:[%s6806_s30 + $0x38] sm:$0xff]  ;;  %vm898_vm0 = vcmask 1041409   ;;  %vm900_vm1 = vcmask 1043459  }
  0x81   : > { %294 = vst [vmem:[#allocation2 + $0x8] sm:$0xf] %v6574_v0  ;;  %296 = vst [vmem:[#allocation2 + $0x14] sm:$0xf] %v6574_v0  ;;  %v1191_v3 = vld [vmem:[%s6806_s30 + $0x608] sm:$0xff]  ;;  %v4719_v4 = vpack.c.bf16 %v1005_v2, %v999_v1  ;;  %v1197_v5 = vld [vmem:[%s6806_s30 + $0x638] sm:$0xff] }
  0x82   : > { %298 = vst [vmem:[#allocation2 + $0x20] sm:$0xf] %v6574_v0  ;;  %300 = vst [vmem:[#allocation2 + $0x2c] sm:$0xf] %v6574_v0  ;;  %v998_v6 = vld [vmem:[%s6806_s30] sm:$0xff]  ;;  %v1004_v7 = vld [vmem:[%s6806_s30 + $0x30] sm:$0xff]  ;;  %v4911_v8 = vpack.c.bf16 %v1197_v5, %v1191_v3 }
  0x83   : > { %v4721_v9 = vpack.c.bf16 %v1004_v7, %v998_v6  ;;  %v1190_v10 = vld [vmem:[%s6806_s30 + $0x600] sm:$0xff]  ;;  %v1196_v11 = vld [vmem:[%s6806_s30 + $0x630] sm:$0xff]  ;;  %v1011_v12 = vld [vmem:[%s6806_s30 + $0x68] sm:$0xff]  ;;  %4720 = vmatprep.subr.bf16.mxu0 %v4719_v4  ;;  %vm902_vm2 = vcmask 1045509   ;;  %vm904_vm3 = vcmask 1047559   ;;  %s4707_s18 = sshll.u32 %s6794_s19, 4 }
  0x84   : > { %v4913_v13 = vpack.c.bf16 %v1196_v11, %v1190_v10  ;;  %v1017_v14 = vld [vmem:[%s6806_s30 + $0x98] sm:$0xff]  ;;  %v1203_v15 = vld [vmem:[%s6806_s30 + $0x668] sm:$0xff]  ;;  %4912 = vmatprep.subr.bf16.mxu1 %v4911_v8  ;;  %v1010_v19 = vld [vmem:[%s6806_s30 + $0x60] sm:$0xff]  ;;  %v6575_v11 = vmov 1983009808   ;;  %s7530_s23 = scalar_lea.vmem [#allocation8], %s4707_s18 }
  0x85   : > { %v1209_v16 = vld [vmem:[%s6806_s30 + $0x698] sm:$0xff]  ;;  %4722 = vmatpush1.bf16.xpose.msra.mxu0 %v4721_v9  ;;  %v4723_v17 = vpack.c.bf16 %v1017_v14, %v1011_v12  ;;  %v1016_v20 = vld [vmem:[%s6806_s30 + $0x90] sm:$0xff]  ;;  %v1202_v21 = vld [vmem:[%s6806_s30 + $0x660] sm:$0xff]  ;;  %v6864_v12 = vunpack.c.l.s4 %v6575_v11  ;;  %s4708_s21 = sshll.u32 %s6794_s19, 5  ;;  %s4718_s22 = sshll.u32 %s6557_s15, 9 }
  0x86   : > { %v4915_v18 = vpack.c.bf16 %v1209_v16, %v1203_v15  ;;  %4914 = vmatpush1.bf16.xpose.msra.mxu1 %v4913_v13  ;;  %v1208_v22 = vld [vmem:[%s6806_s30 + $0x690] sm:$0xff]  ;;  %v1023_v23 = vld [vmem:[%s6806_s30 + $0xc8] sm:$0xff]  ;;  %v1029_v24 = vld [vmem:[%s6806_s30 + $0xf8] sm:$0xff]  ;;  %v4725_v27 = vpack.c.bf16 %v1016_v20, %v1010_v19  ;;  %v698_v13 = vlaneseq  ;;  %s7569_s4 = scalar_lea.vmem [#allocation9], %s4708_s21  ;;  %s8637_s1 = scalar_lea.hbm %s8689_s3, %s4718_s22 }
  0x87   : > { %4724 = vmatprep.subr.bf16.mxu0 %v4723_v17  ;;  %v1215_v25 = vld [vmem:[%s6806_s30 + $0x6c8] sm:$0xff]  ;;  %v1221_v26 = vld [vmem:[%s6806_s30 + $0x6f8] sm:$0xff]  ;;  %v4917_v28 = vpack.c.bf16 %v1208_v22, %v1202_v21  ;;  %v4727_v29 = vpack.c.bf16 %v1029_v24, %v1023_v23  ;;  %v1022_v31 = vld [vmem:[%s6806_s30 + $0xc0] sm:$0xff]  ;;  %s4565_s11 = sshll.u32 %s7569_s4, 4  ;;  %s4551_s27 = scalar_lea.sflag [#allocation5], %s6794_s19  ;;  %s8631_s11 = int_to_ptr.vmem [resolvable:$true] %s4565_s11 }
  0x88   : > { %4916 = vmatprep.subr.bf16.mxu1 %v4915_v18  ;;  %v4919_v30 = vpack.c.bf16 %v1221_v26, %v1215_v25  ;;  %v1028_v32 = vld [vmem:[%s6806_s30 + $0xf0] sm:$0xff]  ;;  %v1214_v33 = vld [vmem:[%s6806_s30 + $0x6c0] sm:$0xff]  ;;  %v1035_v35 = vld [vmem:[%s6806_s30 + $0x128] sm:$0xff]  ;;  %s6479_s5 = scalar_lea.vmem %s8631_s11, 512  ;;  %p8716_p7 = scmp.ne.s32.totalorder %s8701_s24, 0 }
  0x89   : > { %v1220_v34 = vld [vmem:[%s6806_s30 + $0x6f0] sm:$0xff]  ;;  %v1041_v36 = vld [vmem:[%s6806_s30 + $0x158] sm:$0xff]  ;;  %v1227_v37 = vld [vmem:[%s6806_s30 + $0x728] sm:$0xff]  ;;  %v4729_v39 = vpack.c.bf16 %v1028_v32, %v1022_v31  ;;  %p6480_p13 = scmp.ne.s32.totalorder %s8631_s11, %s6479_s5  ;;  %s6576_s15 = smov [#allocation9]  }
  0x8a   : > { %v1233_v38 = vld [vmem:[%s6806_s30 + $0x758] sm:$0xff]  ;;  %v4921_v40 = vpack.c.bf16 %v1220_v34, %v1214_v33  ;;  %v4731_v41 = vpack.c.bf16 %v1041_v36, %v1035_v35  ;;  %v1034_v43 = vld [vmem:[%s6806_s30 + $0x120] sm:$0xff]  ;;  %v1040_v44 = vld [vmem:[%s6806_s30 + $0x150] sm:$0xff]  ;;  %s6483_s0 = sshll.u32 %s6576_s15, 4  ;;  %s6484_s0 = int_to_ptr.vmem [resolvable:$false] %s6483_s0 }
  0x8b   : > { %v4923_v42 = vpack.c.bf16 %v1233_v38, %v1227_v37  ;;  %v1226_v45 = vld [vmem:[%s6806_s30 + $0x720] sm:$0xff]  ;;  %v1232_v46 = vld [vmem:[%s6806_s30 + $0x750] sm:$0xff]  ;;  %v1047_v47 = vld [vmem:[%s6806_s30 + $0x188] sm:$0xff]  ;;  %v4733_v51 = vpack.c.bf16 %v1040_v44, %v1034_v43  ;;  %p6481_p8 = pnand %p6480_p13, %p8716_p7  ;;  %s6485_s9 = scalar_lea.vmem %s6484_s0, 1024 }
  0x8c   : > { %v1053_v48 = vld [vmem:[%s6806_s30 + $0x1b8] sm:$0xff]  ;;  %v1239_v49 = vld [vmem:[%s6806_s30 + $0x788] sm:$0xff]  ;;  %v4925_v52 = vpack.c.bf16 %v1232_v46, %v1226_v45  ;;  %v1046_v55 = vld [vmem:[%s6806_s30 + $0x180] sm:$0xff]  ;;  %p6486_p0 = scmp.lt.s32.totalorder %s8631_s11, %s6484_s0  ;;  %p6487_p1 = scmp.lt.s32.totalorder %s6485_s9, %s6479_s5 }
  0x8d   : > { %4726 = vmatpush1.bf16.xpose.msra.mxu0 %v4725_v27  ;;  %v1245_v50 = vld [vmem:[%s6806_s30 + $0x7b8] sm:$0xff]  ;;  %v4735_v53 = vpack.c.bf16 %v1053_v48, %v1047_v47  ;;  %v1052_v56 = vld [vmem:[%s6806_s30 + $0x1b0] sm:$0xff]  ;;  %v1238_v57 = vld [vmem:[%s6806_s30 + $0x780] sm:$0xff]  ;;  %v697_v27 = vunpack.c.0.s8 %v6864_v12  ;;  %p6482_p9 = pneg %p6481_p8 }
  0x8e   : > { %4918 = vmatpush1.bf16.xpose.msra.mxu1 %v4917_v28  ;;  %4728 = vmatprep.subr.bf16.mxu0 %v4727_v29  ;;  %v4927_v54 = vpack.c.bf16 %v1245_v50, %v1239_v49  ;;  %v1244_v58 = vld [vmem:[%s6806_s30 + $0x7b0] sm:$0xff]  ;;  %v1059_v59 = vld [vmem:[%s6806_s30 + $0x1e8] sm:$0xff]  ;;  %v1065_v60 = vld [vmem:[%s6806_s30 + $0x218] sm:$0xff]  ;;  %v4737_v63 = vpack.c.bf16 %v1052_v56, %v1046_v55  ;;  %v6886_v28 = vshrl.u32 %v698_v13, 7  ;;  %p6488_p10 = por %p6487_p1, %p6486_p0 }
  0x8f   : > { %4920 = vmatprep.subr.bf16.mxu1 %v4919_v30  ;;  %v1251_v61 = vld [vmem:[%s6806_s30 + $0x7e8] sm:$0xff]  ;;  %v1257_v62 = vld [vmem:[%s6806_s30 + $0x818] sm:$0xff]  ;;  %v4929_v0 = vpack.c.bf16 %v1244_v58, %v1238_v57  ;;  %v4739_v1 = vpack.c.bf16 %v1065_v60, %v1059_v59  ;;  %v1058_v3 = vld [vmem:[%s6806_s30 + $0x1e0] sm:$0xff] }
  0x90   : > { %v4931_v2 = vpack.c.bf16 %v1257_v62, %v1251_v61  ;;  %v1064_v4 = vld [vmem:[%s6806_s30 + $0x210] sm:$0xff]  ;;  %v1250_v5 = vld [vmem:[%s6806_s30 + $0x7e0] sm:$0xff]  ;;  %v1071_v7 = vld [vmem:[%s6806_s30 + $0x248] sm:$0xff]  ;;  %p6489_p12 = pnand %p6488_p10, %p6482_p9 }
  0x91   : > { %v1256_v6 = vld [vmem:[%s6806_s30 + $0x810] sm:$0xff]  ;;  %v1077_v8 = vld [vmem:[%s6806_s30 + $0x278] sm:$0xff]  ;;  %v1263_v9 = vld [vmem:[%s6806_s30 + $0x848] sm:$0xff]  ;;  %v4741_v17 = vpack.c.bf16 %v1064_v4, %v1058_v3 }
  0x92   : > { %v1269_v10 = vld [vmem:[%s6806_s30 + $0x878] sm:$0xff]  ;;  %v1070_v14 = vld [vmem:[%s6806_s30 + $0x240] sm:$0xff]  ;;  %v1076_v15 = vld [vmem:[%s6806_s30 + $0x270] sm:$0xff]  ;;  %v4933_v21 = vpack.c.bf16 %v1256_v6, %v1250_v5  ;;  %v4743_v22 = vpack.c.bf16 %v1077_v8, %v1071_v7 }
  0x93   : > { %v6869_v16 = vld [vmem:[%s6806_s30 + $0x840] sm:$0xff]  ;;  %v6872_v18 = vld [vmem:[%s6806_s30 + $0x870] sm:$0xff]  ;;  %v6875_v19 = vld [vmem:[%s6806_s30 + $0x2a8] sm:$0xff]  ;;  %v4935_v25 = vpack.c.bf16 %v1269_v10, %v1263_v9  ;;  %v4745_v29 = vpack.c.bf16 %v1076_v15, %v1070_v14 }
  0x94   : > { %v1089_v20 = vld [vmem:[%s6806_s30 + $0x2d8] sm:$0xff]  ;;  %v6879_v23 = vld [vmem:[%s6806_s30 + $0x8a8] sm:$0xff]  ;;  %v301_v26 = vld [vmem:[%s6798_s8] sm:$0xff]  ;;  %v4937_v30 = vpack.c.bf16 %v6872_v18, %v6869_v16 }
  0x95   : > { %4730 = vmatpush1.bf16.xpose.msra.mxu0 %v4729_v39  ;;  %v6882_v24 = vld [vmem:[%s6806_s30 + $0x8d8] sm:$0xff]  ;;  %v4747_v31 = vpack.c.bf16 %v1089_v20, %v6875_v19  ;;  %v302_v32 = vld [vmem:[%s6798_s8 + $0x8] sm:$0xff]  ;;  %v303_v33 = vld [vmem:[%s6798_s8 + $0x10] sm:$0xff]  ;;  %v357_v35 = vrot.slane %v301_v26, 4 }
  0x96   : > { %4922 = vmatpush1.bf16.xpose.msra.mxu1 %v4921_v40  ;;  %4732 = vmatprep.subr.bf16.mxu0 %v4731_v41  ;;  %v304_v34 = vld [vmem:[%s6798_s8 + $0x18] sm:$0xff]  ;;  %v4939_v36 = vpack.c.bf16 %v6882_v24, %v6879_v23  ;;  %v307_v37 = vld [vmem:[%s6798_s8 + $0x30] sm:$0xff]  ;;  %v309_v39 = vld [vmem:[%s6798_s8 + $0x40] sm:$0xff]  ;;  %v363_v40 = vrot.slane %v302_v32, 4  ;;  %v369_v41 = vrot.slane %v303_v33, 4 }
  0x97   : > { %4924 = vmatprep.subr.bf16.mxu1 %v4923_v42  ;;  %v308_v38 = vld [vmem:[%s6798_s8 + $0x38] sm:$0xff]  ;;  %v375_v42 = vrot.slane %v304_v34, 4  ;;  %v310_v43 = vld [vmem:[%s6798_s8 + $0x48] sm:$0xff]  ;;  %v358_v44 = vadd.f32 %v357_v35, %v301_v26  ;;  %v393_v45 = vrot.slane %v307_v37, 4  ;;  %v405_v47 = vrot.slane %v309_v39, 4  ;;  %v1082_v13 = vld [vmem:[%s6806_s30 + $0x2a0] sm:$0xff] }
  0x98   : > { %v399_v46 = vrot.slane %v308_v38, 4  ;;  %v364_v48 = vadd.f32 %v363_v40, %v302_v32  ;;  %v370_v49 = vadd.f32 %v369_v41, %v303_v33  ;;  %v1088_v14 = vld [vmem:[%s6806_s30 + $0x2d0] sm:$0xff]  ;;  %v1274_v15 = vld [vmem:[%s6806_s30 + $0x8a0] sm:$0xff] }
  0x99   : > { %v376_v50 = vadd.f32 %v375_v42, %v304_v34  ;;  %v406_v55 = vadd.f32 %v405_v47, %v309_v39  ;;  %v1280_v20 = vld [vmem:[%s6806_s30 + $0x8d0] sm:$0xff]  ;;  %v6911_v34 = vsub.s32 %v697_v27, %v6886_v28  ;;  %v4749_v35 = vpack.c.bf16 %v1088_v14, %v1082_v13 }
  0x9a   : > { %v365_v56 = vrot.slane %v364_v48, 2  ;;  %v371_v57 = vrot.slane %v370_v49, 2  ;;  %v4941_v39 = vpack.c.bf16 %v1280_v20, %v1274_v15  ;;  %v1100_v47 = vld [vmem:[%s6806_s30 + $0x330] sm:$0xff] }
  0x9b   : > { %v377_v58 = vrot.slane %v376_v50, 2  ;;  %v1316_v20 = vld [vmem:[%s6806_s30 + $0x9f0] sm:$0xff] }
  0x9d   : > { %4734 = vmatpush1.bf16.xpose.msra.mxu0 %v4733_v51  ;;  %v411_v51 = vrot.slane %v310_v43, 4 }
  0x9e   : > { %4926 = vmatpush1.bf16.xpose.msra.mxu1 %v4925_v52  ;;  %4736 = vmatprep.subr.bf16.mxu0 %v4735_v53  ;;  %v359_v52 = vrot.slane %v358_v44, 2  ;;  %v394_v53 = vadd.f32 %v393_v45, %v307_v37 }
  0x9f   : > { %4928 = vmatprep.subr.bf16.mxu1 %v4927_v54  ;;  %v400_v54 = vadd.f32 %v399_v46, %v308_v38  ;;  %v412_v59 = vadd.f32 %v411_v51, %v310_v43  ;;  %v1094_v46 = vld [vmem:[%s6806_s30 + $0x300] sm:$0xff]  ;;  %v1113_v51 = vld [vmem:[%s6806_s30 + $0x398] sm:$0xff] }
  0xa0   : > { %v360_v60 = vadd.f32 %v359_v52, %v358_v44  ;;  %v395_v61 = vrot.slane %v394_v53, 2 }
  0xa1   : > { %v401_v62 = vrot.slane %v400_v54, 2  ;;  %v413_v3 = vrot.slane %v412_v59, 2 }
  0xa2   : > { %v361_v4 = vrot.slane %v360_v60, 1  ;;  %v396_v5 = vadd.f32 %v395_v61, %v394_v53 }
  0xa3   : > { %v402_v6 = vadd.f32 %v401_v62, %v400_v54  ;;  %v414_v11 = vadd.f32 %v413_v3, %v412_v59  ;;  %v1299_v54 = vld [vmem:[%s6806_s30 + $0x968] sm:$0xff] }
  0xa4   : > { %v362_v16 = vadd.f32 %v361_v4, %v360_v60  ;;  %v1304_v4 = vld [vmem:[%s6806_s30 + $0x990] sm:$0xff] }
  0xa5   : > { %4738 = vmatpush1.bf16.xpose.msra.mxu0 %v4737_v63  ;;  %v407_v63 = vrot.slane %v406_v55, 2  ;;  %v403_v18 = vrot.slane %v402_v6, 1  ;;  %v415_v26 = vrot.slane %v414_v11, 1 }
  0xa6   : > { %4930 = vmatpush1.bf16.xpose.msra.mxu1 %v4929_v0  ;;  %4740 = vmatprep.subr.bf16.mxu0 %v4739_v1  ;;  %v366_v0 = vadd.f32 %v365_v56, %v364_v48  ;;  %v372_v1 = vadd.f32 %v371_v57, %v370_v49  ;;  %v1286_v48 = vld [vmem:[%s6806_s30 + $0x900] sm:$0xff]  ;;  %v1292_v49 = vld [vmem:[%s6806_s30 + $0x930] sm:$0xff]  ;;  %v4753_v56 = vpack.c.bf16 %v1100_v47, %v1094_v46  ;;  %v1155_v46 = vld [vmem:[%s6806_s30 + $0x4e8] sm:$0xff] }
  0xa7   : > { %4932 = vmatprep.subr.bf16.mxu1 %v4931_v2  ;;  %v378_v2 = vadd.f32 %v377_v58, %v376_v50  ;;  %v408_v7 = vadd.f32 %v407_v63, %v406_v55  ;;  %v404_v32 = vadd.f32 %v403_v18, %v402_v6  ;;  %v1107_v50 = vld [vmem:[%s6806_s30 + $0x368] sm:$0xff]  ;;  %v1305_v55 = vld [vmem:[%s6806_s30 + $0x998] sm:$0xff]  ;;  %v4945_v58 = vpack.c.bf16 %v1292_v49, %v1286_v48  ;;  %v1124_v18 = vld [vmem:[%s6806_s30 + $0x3f0] sm:$0xff] }
  0xa8   : > { %v367_v8 = vrot.slane %v366_v0, 1  ;;  %v373_v9 = vrot.slane %v372_v1, 1  ;;  %v4755_v59 = vpack.c.bf16 %v1113_v51, %v1107_v50  ;;  %v4947_v60 = vpack.c.bf16 %v1305_v55, %v1299_v54  ;;  %v1125_v6 = vld [vmem:[%s6806_s30 + $0x3f8] sm:$0xff]  ;;  %v1347_v48 = vld [vmem:[%s6806_s30 + $0xae8] sm:$0xff]  ;;  %v1154_v54 = vld [vmem:[%s6806_s30 + $0x4e0] sm:$0xff] }
  0xa9   : > { %v379_v10 = vrot.slane %v378_v2, 1  ;;  %v409_v19 = vrot.slane %v408_v7, 1  ;;  %v1161_v47 = vld [vmem:[%s6806_s30 + $0x518] sm:$0xff]  ;;  %v1160_v55 = vld [vmem:[%s6806_s30 + $0x510] sm:$0xff] }
  0xaa   : > { %v368_v23 = vadd.f32 %v367_v8, %v366_v0  ;;  %v374_v24 = vadd.f32 %v373_v9, %v372_v1  ;;  %v1106_v0 = vld [vmem:[%s6806_s30 + $0x360] sm:$0xff]  ;;  %v1112_v1 = vld [vmem:[%s6806_s30 + $0x390] sm:$0xff]  ;;  %v1317_v8 = vld [vmem:[%s6806_s30 + $0x9f8] sm:$0xff] }
  0xab   : > { %v410_v33 = vadd.f32 %v409_v19, %v408_v7  ;;  %v1311_v7 = vld [vmem:[%s6806_s30 + $0x9c8] sm:$0xff]  ;;  %v4757_v9 = vpack.c.bf16 %v1112_v1, %v1106_v0  ;;  %v1310_v19 = vld [vmem:[%s6806_s30 + $0x9c0] sm:$0xff]  ;;  %v1353_v49 = vld [vmem:[%s6806_s30 + $0xb18] sm:$0xff] }
  0xac   : > { %v693_v37 = vcombine.low %v362_v16, %v368_v23  ;;  %v4951_v14 = vpack.c.bf16 %v1317_v8, %v1311_v7  ;;  %v1323_v23 = vld [vmem:[%s6806_s30 + $0xa28] sm:$0xff]  ;;  %v1185_v7 = vld [vmem:[%s6806_s30 + $0x5d8] sm:$0xff] }
  0xad   : > { %4742 = vmatpush1.bf16.xpose.msra.mxu0 %v4741_v17  ;;  %v397_v17 = vrot.slane %v396_v5, 1  ;;  %v1371_v8 = vld [vmem:[%s6806_s30 + $0xba8] sm:$0xff] }
  0xae   : > { %4934 = vmatpush1.bf16.xpose.msra.mxu1 %v4933_v21  ;;  %4744 = vmatprep.subr.bf16.mxu0 %v4743_v22  ;;  %v1095_v21 = vld [vmem:[%s6806_s30 + $0x308] sm:$0xff]  ;;  %v1101_v22 = vld [vmem:[%s6806_s30 + $0x338] sm:$0xff]  ;;  %v701_v43 = vrot.slane %v693_v37, %v6911_v34 }
  0xaf   : > { %4936 = vmatprep.subr.bf16.mxu1 %v4935_v25  ;;  %v380_v25 = vadd.f32 %v379_v10, %v378_v2  ;;  %v4751_v40 = vpack.c.bf16 %v1101_v22, %v1095_v21  ;;  %v1298_v2 = vld [vmem:[%s6806_s30 + $0x960] sm:$0xff]  ;;  %v1131_v21 = vld [vmem:[%s6806_s30 + $0x428] sm:$0xff]  ;;  %v1137_v22 = vld [vmem:[%s6806_s30 + $0x458] sm:$0xff] }
  0xb0   : > { %v1149_v37 = vld [vmem:[%s6806_s30 + $0x4b8] sm:$0xff] }
  0xb1   : > { %v694_v38 = vcombine.low %v374_v24, %v380_v25  ;;  %v1329_v24 = vld [vmem:[%s6806_s30 + $0xa58] sm:$0xff] }
  0xb3   : > { %v708_v12 = vrot.slane %v694_v38, %v6911_v34  ;;  %v1335_v38 = vld [vmem:[%s6806_s30 + $0xa88] sm:$0xff] }
  0xb5   : > { %4746 = vmatpush1.bf16.xpose.msra.mxu0 %v4745_v29  ;;  %v1287_v29 = vld [vmem:[%s6806_s30 + $0x908] sm:$0xff]  ;;  %v709_v52 = vcombine.low %v701_v43, %v708_v12  ;;  %v1142_v12 = vld [vmem:[%s6806_s30 + $0x480] sm:$0xff] }
  0xb6   : > { %4938 = vmatpush1.bf16.xpose.msra.mxu1 %v4937_v30  ;;  %4748 = vmatprep.subr.bf16.mxu0 %v4747_v31  ;;  %v1293_v30 = vld [vmem:[%s6806_s30 + $0x938] sm:$0xff]  ;;  %v398_v31 = vadd.f32 %v397_v17, %v396_v5  ;;  %v1119_v5 = vld [vmem:[%s6806_s30 + $0x3c8] sm:$0xff]  ;;  %v1118_v17 = vld [vmem:[%s6806_s30 + $0x3c0] sm:$0xff] }
  0xb7   : > { %4940 = vmatprep.subr.bf16.mxu1 %v4939_v36  ;;  %v416_v36 = vadd.f32 %v415_v26, %v414_v11  ;;  %v4943_v42 = vpack.c.bf16 %v1293_v30, %v1287_v29  ;;  %v4949_v11 = vpack.c.bf16 %v1304_v4, %v1298_v2  ;;  %v4759_v13 = vpack.c.bf16 %v1125_v6, %v1119_v5  ;;  %v1166_v2 = vld [vmem:[%s6806_s30 + $0x540] sm:$0xff]  ;;  %v1364_v5 = vld [vmem:[%s6806_s30 + $0xb70] sm:$0xff]  ;;  %v1179_v6 = vld [vmem:[%s6806_s30 + $0x5a8] sm:$0xff] }
  0xb8   : > { %v718_v41 = vcombine.low %v398_v31, %v404_v32  ;;  %v4761_v25 = vpack.c.bf16 %v1124_v18, %v1118_v17  ;;  %v4953_v26 = vpack.c.bf16 %v1316_v20, %v1310_v19  ;;  %v4763_v29 = vpack.c.bf16 %v1137_v22, %v1131_v21  ;;  %v1130_v31 = vld [vmem:[%s6806_s30 + $0x420] sm:$0xff]  ;;  %v1136_v32 = vld [vmem:[%s6806_s30 + $0x450] sm:$0xff]  ;;  %v1001_v21 = vld [vmem:[%s6806_s30 + $0x18] sm:$0xff] }
  0xb9   : > { %v719_v27 = vcombine.low %v410_v33, %v416_v36  ;;  %v4955_v30 = vpack.c.bf16 %v1329_v24, %v1323_v23  ;;  %v1322_v33 = vld [vmem:[%s6806_s30 + $0xa20] sm:$0xff]  ;;  %v1143_v36 = vld [vmem:[%s6806_s30 + $0x488] sm:$0xff]  ;;  %v1184_v18 = vld [vmem:[%s6806_s30 + $0x5d0] sm:$0xff] }
  0xba   : > { %v726_v44 = vrot.slane %v718_v41, %v6911_v34  ;;  %v1358_v4 = vld [vmem:[%s6806_s30 + $0xb40] sm:$0xff]  ;;  %v1376_v20 = vld [vmem:[%s6806_s30 + $0xbd0] sm:$0xff]  ;;  %v1007_v22 = vld [vmem:[%s6806_s30 + $0x48] sm:$0xff] }
  0xbb   : > { %v733_v45 = vrot.slane %v719_v27, %v6911_v34  ;;  %v1148_v27 = vld [vmem:[%s6806_s30 + $0x4b0] sm:$0xff]  ;;  %v1178_v17 = vld [vmem:[%s6806_s30 + $0x5a0] sm:$0xff]  ;;  %v1193_v23 = vld [vmem:[%s6806_s30 + $0x618] sm:$0xff] }
  0xbc   : > { %v4769_v50 = vpack.c.bf16 %v1148_v27, %v1142_v12  ;;  %v1370_v19 = vld [vmem:[%s6806_s30 + $0xba0] sm:$0xff]  ;;  %v1199_v24 = vld [vmem:[%s6806_s30 + $0x648] sm:$0xff] }
  0xbd   : > { %4750 = vmatpush1.bf16.xpose.msra.mxu0 %v4749_v35  ;;  %v734_v53 = vcombine.low %v726_v44, %v733_v45  ;;  %v1328_v35 = vld [vmem:[%s6806_s30 + $0xa50] sm:$0xff]  ;;  %v1334_v44 = vld [vmem:[%s6806_s30 + $0xa80] sm:$0xff] }
  0xbe   : > { %4942 = vmatpush1.bf16.xpose.msra.mxu1 %v4941_v39  ;;  %4752 = vmatprep.subr.bf16.mxu0 %v4751_v40  ;;  %v1341_v39 = vld [vmem:[%s6806_s30 + $0xab8] sm:$0xff]  ;;  %v4765_v40 = vpack.c.bf16 %v1136_v32, %v1130_v31  ;;  %v4957_v41 = vpack.c.bf16 %v1328_v35, %v1322_v33  ;;  %v1340_v45 = vld [vmem:[%s6806_s30 + $0xab0] sm:$0xff]  ;;  %v4975_v31 = vpack.c.bf16 %v1199_v24, %v1193_v23  ;;  %v1006_v33 = vld [vmem:[%s6806_s30 + $0x40] sm:$0xff] }
  0xbf   : > { %4944 = vmatprep.subr.bf16.mxu1 %v4943_v42  ;;  %v897_v57 = vrot.slane %v734_v53, 7  ;;  %v4767_v42 = vpack.c.bf16 %v1149_v37, %v1143_v36  ;;  %v4959_v43 = vpack.c.bf16 %v1341_v39, %v1335_v38  ;;  %v4961_v51 = vpack.c.bf16 %v1340_v45, %v1334_v44  ;;  %v1000_v32 = vld [vmem:[%s6806_s30 + $0x10] sm:$0xff]  ;;  %v1198_v36 = vld [vmem:[%s6806_s30 + $0x640] sm:$0xff]  ;;  %v1013_v37 = vld [vmem:[%s6806_s30 + $0x78] sm:$0xff] }
  0xc0   : > { %v4963_v53 = vpack.c.bf16 %v1353_v49, %v1347_v48  ;;  %v1192_v35 = vld [vmem:[%s6806_s30 + $0x610] sm:$0xff]  ;;  %v1019_v38 = vld [vmem:[%s6806_s30 + $0xa8] sm:$0xff]  ;;  %v1018_v45 = vld [vmem:[%s6806_s30 + $0xa0] sm:$0xff] }
  0xc1   : > { %v899_v61 = vsel %vm898_vm0, %v897_v57, %v709_v52  ;;  %v4771_v52 = vpack.c.bf16 %v1161_v47, %v1155_v46  ;;  %v1012_v44 = vld [vmem:[%s6806_s30 + $0x70] sm:$0xff]  ;;  %v1210_v47 = vld [vmem:[%s6806_s30 + $0x6a0] sm:$0xff]  ;;  %v1025_v48 = vld [vmem:[%s6806_s30 + $0xd8] sm:$0xff] }
  0xc2   : > { %v901_v62 = vsel %vm900_vm1, %v897_v57, %v899_v61  ;;  %v1365_v61 = vld [vmem:[%s6806_s30 + $0xb78] sm:$0xff]  ;;  %v1204_v46 = vld [vmem:[%s6806_s30 + $0x670] sm:$0xff]  ;;  %v1031_v49 = vld [vmem:[%s6806_s30 + $0x108] sm:$0xff] }
  0xc3   : > { %v903_v63 = vsel %vm902_vm2, %v897_v57, %v901_v62  ;;  %v4773_v62 = vpack.c.bf16 %v1160_v55, %v1154_v54  ;;  %v1024_v55 = vld [vmem:[%s6806_s30 + $0xd0] sm:$0xff]  ;;  %v1067_v23 = vld [vmem:[%s6806_s30 + $0x228] sm:$0xff]  ;;  %v1253_v24 = vld [vmem:[%s6806_s30 + $0x7f8] sm:$0xff] }
  0xc4   : > { %v905_v3 = vsel %vm904_vm3, %v897_v57, %v903_v63  ;;  %v1352_v57 = vld [vmem:[%s6806_s30 + $0xb10] sm:$0xff] }
  0xc5   : > { %4754 = vmatpush1.bf16.xpose.msra.mxu0 %v4753_v56  ;;  %v6937_v10 = vmul.f32 0.125, %v905_v3  ;;  %v1346_v56 = vld [vmem:[%s6806_s30 + $0xae0] sm:$0xff]  ;;  %v1172_v3 = vld [vmem:[%s6806_s30 + $0x570] sm:$0xff] }
  0xc6   : > { %4946 = vmatpush1.bf16.xpose.msra.mxu1 %v4945_v58  ;;  %4756 = vmatprep.subr.bf16.mxu0 %v4755_v59  ;;  %v1167_v58 = vld [vmem:[%s6806_s30 + $0x548] sm:$0xff]  ;;  %v1173_v59 = vld [vmem:[%s6806_s30 + $0x578] sm:$0xff]  ;;  %v4965_v63 = vpack.c.bf16 %v1352_v57, %v1346_v56  ;;  %v1030_v56 = vld [vmem:[%s6806_s30 + $0x100] sm:$0xff] }
  0xc7   : > { %4948 = vmatprep.subr.bf16.mxu1 %v4947_v60  ;;  %v6941_v15 = vrot.slane %v6937_v10, %v6911_v34  ;;  %v1359_v60 = vld [vmem:[%s6806_s30 + $0xb48] sm:$0xff]  ;;  %v4775_v0 = vpack.c.bf16 %v1173_v59, %v1167_v58  ;;  %v1216_v57 = vld [vmem:[%s6806_s30 + $0x6d0] sm:$0xff]  ;;  %v1222_v58 = vld [vmem:[%s6806_s30 + $0x700] sm:$0xff] }
  0xc8   : > { %v4967_v1 = vpack.c.bf16 %v1365_v61, %v1359_v60  ;;  %v1037_v59 = vld [vmem:[%s6806_s30 + $0x138] sm:$0xff]  ;;  %v1043_v60 = vld [vmem:[%s6806_s30 + $0x168] sm:$0xff] }
  0xc9   : > { %v2639_v16 = vcombine.high %v6941_v15, %v6941_v15  ;;  %v1229_v61 = vld [vmem:[%s6806_s30 + $0x738] sm:$0xff] }
  0xcb   : > { %2719 = vmatprep.mubr.f32.mxu0 %v2639_v16  ;;  %2932 = vmatprep.mubr.f32.mxu1 %v2639_v16 }
  0xcd   : > { %4758 = vmatpush1.bf16.xpose.msra.mxu0 %v4757_v9  ;;  %v1377_v9 = vld [vmem:[%s6806_s30 + $0xbd8] sm:$0xff] }
  0xce   : > { %4950 = vmatpush1.bf16.xpose.msra.mxu1 %v4949_v11  ;;  %4760 = vmatprep.subr.bf16.mxu0 %v4759_v13  ;;  %v4777_v11 = vpack.c.bf16 %v1172_v3, %v1166_v2  ;;  %v4969_v13 = vpack.c.bf16 %v1364_v5, %v1358_v4  ;;  %v4971_v16 = vpack.c.bf16 %v1377_v9, %v1371_v8  ;;  %v1036_v3 = vld [vmem:[%s6806_s30 + $0x130] sm:$0xff]  ;;  %v1042_v4 = vld [vmem:[%s6806_s30 + $0x160] sm:$0xff]  ;;  %v1055_v8 = vld [vmem:[%s6806_s30 + $0x1c8] sm:$0xff] }
  0xcf   : > { %4952 = vmatprep.subr.bf16.mxu1 %v4951_v14  ;;  %v4779_v14 = vpack.c.bf16 %v1185_v7, %v1179_v6  ;;  %v1228_v5 = vld [vmem:[%s6806_s30 + $0x730] sm:$0xff]  ;;  %v1234_v6 = vld [vmem:[%s6806_s30 + $0x760] sm:$0xff]  ;;  %v1049_v7 = vld [vmem:[%s6806_s30 + $0x198] sm:$0xff] }
  0xd0   : > { %v1241_v9 = vld [vmem:[%s6806_s30 + $0x798] sm:$0xff] }
  0xd5   : > { %4762 = vmatpush1.bf16.xpose.msra.mxu0 %v4761_v25  ;;  %v4781_v25 = vpack.c.bf16 %v1184_v18, %v1178_v17  ;;  %v1048_v18 = vld [vmem:[%s6806_s30 + $0x190] sm:$0xff] }
  0xd6   : > { %4954 = vmatpush1.bf16.xpose.msra.mxu1 %v4953_v26  ;;  %4764 = vmatprep.subr.bf16.mxu0 %v4763_v29  ;;  %v4973_v26 = vpack.c.bf16 %v1376_v20, %v1370_v19  ;;  %v4783_v29 = vpack.c.bf16 %v1007_v22, %v1001_v21  ;;  %v1054_v19 = vld [vmem:[%s6806_s30 + $0x1c0] sm:$0xff]  ;;  %v1240_v20 = vld [vmem:[%s6806_s30 + $0x790] sm:$0xff]  ;;  %v1061_v22 = vld [vmem:[%s6806_s30 + $0x1f8] sm:$0xff] }
  0xd7   : > { %4956 = vmatprep.subr.bf16.mxu1 %v4955_v30  ;;  %v2624_v30 = vcombine.high %v6937_v10, %v6937_v10  ;;  %v1211_v10 = vld [vmem:[%s6806_s30 + $0x6a8] sm:$0xff]  ;;  %v1246_v21 = vld [vmem:[%s6806_s30 + $0x7c0] sm:$0xff] }
  0xd9   : > { %v7002_v39 = vrot.slane %v2624_v30, %v6911_v34  ;;  %v4803_v30 = vpack.c.bf16 %v1067_v23, %v1061_v22  ;;  %v1127_v22 = vld [vmem:[%s6806_s30 + $0x408] sm:$0xff]  ;;  %v1313_v23 = vld [vmem:[%s6806_s30 + $0x9d8] sm:$0xff] }
  0xdb   : > { %v2640_v27 = vcombine.high %v7002_v39, %v7002_v39 }
  0xdd   : > { %4766 = vmatpush1.bf16.xpose.msra.mxu0 %v4765_v40  ;;  %v1205_v40 = vld [vmem:[%s6806_s30 + $0x678] sm:$0xff] }
  0xde   : > { %4958 = vmatpush1.bf16.xpose.msra.mxu1 %v4957_v41  ;;  %4768 = vmatprep.subr.bf16.mxu0 %v4767_v42  ;;  %v4785_v41 = vpack.c.bf16 %v1006_v33, %v1000_v32  ;;  %v4977_v42 = vpack.c.bf16 %v1198_v36, %v1192_v35  ;;  %v4979_v12 = vpack.c.bf16 %v1211_v10, %v1205_v40  ;;  %v1060_v32 = vld [vmem:[%s6806_s30 + $0x1f0] sm:$0xff]  ;;  %v1066_v33 = vld [vmem:[%s6806_s30 + $0x220] sm:$0xff]  ;;  %v1265_v40 = vld [vmem:[%s6806_s30 + $0x858] sm:$0xff] }
  0xdf   : > { %4960 = vmatprep.subr.bf16.mxu1 %v4959_v43  ;;  %v4787_v43 = vpack.c.bf16 %v1019_v38, %v1013_v37  ;;  %v1252_v35 = vld [vmem:[%s6806_s30 + $0x7f0] sm:$0xff]  ;;  %v1258_v36 = vld [vmem:[%s6806_s30 + $0x820] sm:$0xff]  ;;  %v1073_v37 = vld [vmem:[%s6806_s30 + $0x258] sm:$0xff] }
  0xe0   : > { %v1079_v38 = vld [vmem:[%s6806_s30 + $0x288] sm:$0xff] }
  0xe1   : > { %v1271_v10 = vld [vmem:[%s6806_s30 + $0x888] sm:$0xff] }
  0xe5   : > { %4770 = vmatpush1.bf16.xpose.msra.mxu0 %v4769_v50  ;;  %v1217_v50 = vld [vmem:[%s6806_s30 + $0x6d8] sm:$0xff] }
  0xe6   : > { %4962 = vmatpush1.bf16.xpose.msra.mxu1 %v4961_v51  ;;  %4772 = vmatprep.subr.bf16.mxu0 %v4771_v52  ;;  %v1223_v51 = vld [vmem:[%s6806_s30 + $0x708] sm:$0xff]  ;;  %v4981_v52 = vpack.c.bf16 %v1210_v47, %v1204_v46  ;;  %v1270_v46 = vld [vmem:[%s6806_s30 + $0x880] sm:$0xff]  ;;  %v1085_v47 = vld [vmem:[%s6806_s30 + $0x2b8] sm:$0xff] }
  0xe7   : > { %4964 = vmatprep.subr.bf16.mxu1 %v4963_v53  ;;  %v4791_v53 = vpack.c.bf16 %v1031_v49, %v1025_v48  ;;  %v4983_v54 = vpack.c.bf16 %v1223_v51, %v1217_v50  ;;  %v1091_v48 = vld [vmem:[%s6806_s30 + $0x2e8] sm:$0xff]  ;;  %v1277_v49 = vld [vmem:[%s6806_s30 + $0x8b8] sm:$0xff] }
  0xe8   : > { %v1283_v50 = vld [vmem:[%s6806_s30 + $0x8e8] sm:$0xff] }
  0xed   : > { %4774 = vmatpush1.bf16.xpose.msra.mxu0 %v4773_v62  ;;  %v1235_v62 = vld [vmem:[%s6806_s30 + $0x768] sm:$0xff] }
  0xee   : > { %4966 = vmatpush1.bf16.xpose.msra.mxu1 %v4965_v63  ;;  %4776 = vmatprep.subr.bf16.mxu0 %v4775_v0  ;;  %v4793_v63 = vpack.c.bf16 %v1030_v56, %v1024_v55  ;;  %v4985_v0 = vpack.c.bf16 %v1222_v58, %v1216_v57  ;;  %v4987_v2 = vpack.c.bf16 %v1235_v62, %v1229_v61  ;;  %v1090_v55 = vld [vmem:[%s6806_s30 + $0x2e0] sm:$0xff]  ;;  %v1276_v56 = vld [vmem:[%s6806_s30 + $0x8b0] sm:$0xff]  ;;  %v1097_v58 = vld [vmem:[%s6806_s30 + $0x318] sm:$0xff] }
  0xef   : > { %4968 = vmatprep.subr.bf16.mxu1 %v4967_v1  ;;  %v4795_v1 = vpack.c.bf16 %v1043_v60, %v1037_v59  ;;  %v1282_v57 = vld [vmem:[%s6806_s30 + $0x8e0] sm:$0xff]  ;;  %v1103_v59 = vld [vmem:[%s6806_s30 + $0x348] sm:$0xff]  ;;  %v1289_v60 = vld [vmem:[%s6806_s30 + $0x918] sm:$0xff] }
  0xf0   : > { %v1295_v61 = vld [vmem:[%s6806_s30 + $0x948] sm:$0xff] }
  0xf5   : > { %4778 = vmatpush1.bf16.xpose.msra.mxu0 %v4777_v11  ;;  %v1247_v11 = vld [vmem:[%s6806_s30 + $0x7c8] sm:$0xff] }
  0xf6   : > { %4970 = vmatpush1.bf16.xpose.msra.mxu1 %v4969_v13  ;;  %4780 = vmatprep.subr.bf16.mxu0 %v4779_v14  ;;  %v4797_v13 = vpack.c.bf16 %v1042_v4, %v1036_v3  ;;  %v4989_v14 = vpack.c.bf16 %v1234_v6, %v1228_v5  ;;  %v4991_v17 = vpack.c.bf16 %v1247_v11, %v1241_v9  ;;  %v1102_v3 = vld [vmem:[%s6806_s30 + $0x340] sm:$0xff]  ;;  %v1288_v4 = vld [vmem:[%s6806_s30 + $0x910] sm:$0xff]  ;;  %v1109_v6 = vld [vmem:[%s6806_s30 + $0x378] sm:$0xff] }
  0xf7   : > { %4972 = vmatprep.subr.bf16.mxu1 %v4971_v16  ;;  %v4799_v16 = vpack.c.bf16 %v1055_v8, %v1049_v7  ;;  %v1294_v5 = vld [vmem:[%s6806_s30 + $0x940] sm:$0xff]  ;;  %v1115_v7 = vld [vmem:[%s6806_s30 + $0x3a8] sm:$0xff]  ;;  %v1301_v8 = vld [vmem:[%s6806_s30 + $0x978] sm:$0xff] }
  0xf8   : > { %v1307_v9 = vld [vmem:[%s6806_s30 + $0x9a8] sm:$0xff] }
  0xfd   : > { %4782 = vmatpush1.bf16.xpose.msra.mxu0 %v4781_v25  ;;  %v1259_v25 = vld [vmem:[%s6806_s30 + $0x828] sm:$0xff] }
  0xfe   : > { %4974 = vmatpush1.bf16.xpose.msra.mxu1 %v4973_v26  ;;  %4784 = vmatprep.subr.bf16.mxu0 %v4783_v29  ;;  %v4801_v26 = vpack.c.bf16 %v1054_v19, %v1048_v18  ;;  %v4993_v29 = vpack.c.bf16 %v1246_v21, %v1240_v20  ;;  %v1114_v18 = vld [vmem:[%s6806_s30 + $0x3a0] sm:$0xff]  ;;  %v1300_v19 = vld [vmem:[%s6806_s30 + $0x970] sm:$0xff]  ;;  %v1121_v21 = vld [vmem:[%s6806_s30 + $0x3d8] sm:$0xff] }
  0xff   : > { %4976 = vmatprep.subr.bf16.mxu1 %v4975_v31  ;;  %v4995_v31 = vpack.c.bf16 %v1259_v25, %v1253_v24  ;;  %v1306_v20 = vld [vmem:[%s6806_s30 + $0x9a0] sm:$0xff]  ;;  %v1319_v24 = vld [vmem:[%s6806_s30 + $0xa08] sm:$0xff] }
 0x104   : > { %2720 = vmatmul.mubr.f32.vlgmr.msra.gmra.mrb[0].mxu0 %v6941_v15 }
 0x105   : > { %4786 = vmatpush1.bf16.xpose.msra.mxu0 %v4785_v41  ;;  %2933 = vmatmul.mubr.f32.vlgmr.msra.gmra.mrb[0].mxu1 %v6941_v15  ;;  %v4789_v15 = vpack.c.bf16 %v1018_v45, %v1012_v44  ;;  %v4805_v41 = vpack.c.bf16 %v1066_v33, %v1060_v32  ;;  %v1078_v44 = vld [vmem:[%s6806_s30 + $0x280] sm:$0xff]  ;;  %v1264_v45 = vld [vmem:[%s6806_s30 + $0x850] sm:$0xff] }
 0x106   : > { %4978 = vmatpush1.bf16.xpose.msra.mxu1 %v4977_v42  ;;  %4788 = vmatprep.subr.bf16.mxu0 %v4787_v43  ;;  %v4997_v42 = vpack.c.bf16 %v1258_v36, %v1252_v35  ;;  %v4807_v43 = vpack.c.bf16 %v1079_v38, %v1073_v37  ;;  %v1126_v32 = vld [vmem:[%s6806_s30 + $0x400] sm:$0xff]  ;;  %v1312_v33 = vld [vmem:[%s6806_s30 + $0x9d0] sm:$0xff]  ;;  %v1133_v36 = vld [vmem:[%s6806_s30 + $0x438] sm:$0xff] }
 0x107   : > { %4980 = vmatprep.subr.bf16.mxu1 %v4979_v12  ;;  %2790 = vmatprep.mubr.f32.mxu0 %v2640_v27  ;;  %v4999_v12 = vpack.c.bf16 %v1271_v10, %v1265_v40  ;;  %v1318_v35 = vld [vmem:[%s6806_s30 + $0xa00] sm:$0xff]  ;;  %v1139_v37 = vld [vmem:[%s6806_s30 + $0x468] sm:$0xff]  ;;  %v1325_v38 = vld [vmem:[%s6806_s30 + $0xa38] sm:$0xff] }
 0x108   : > { %3003 = vmatprep.mubr.f32.mxu1 %v2640_v27  ;;  %v1072_v27 = vld [vmem:[%s6806_s30 + $0x250] sm:$0xff]  ;;  %v1331_v40 = vld [vmem:[%s6806_s30 + $0xa68] sm:$0xff] }
 0x109   : > { %v4809_v51 = vpack.c.bf16 %v1078_v44, %v1072_v27  ;;  %v1138_v27 = vld [vmem:[%s6806_s30 + $0x460] sm:$0xff]  ;;  %v1324_v44 = vld [vmem:[%s6806_s30 + $0xa30] sm:$0xff] }
 0x10d   : > { %4790 = vmatpush1.bf16.xpose.msra.mxu0 %v4789_v15  ;;  %v5001_v15 = vpack.c.bf16 %v1270_v46, %v1264_v45  ;;  %v1330_v45 = vld [vmem:[%s6806_s30 + $0xa60] sm:$0xff]  ;;  %v1145_v46 = vld [vmem:[%s6806_s30 + $0x498] sm:$0xff] }
 0x10e   : > { %4982 = vmatpush1.bf16.xpose.msra.mxu1 %v4981_v52  ;;  %4792 = vmatprep.subr.bf16.mxu0 %v4791_v53  ;;  %v4811_v52 = vpack.c.bf16 %v1091_v48, %v1085_v47  ;;  %v5003_v53 = vpack.c.bf16 %v1283_v50, %v1277_v49  ;;  %v1151_v47 = vld [vmem:[%s6806_s30 + $0x4c8] sm:$0xff]  ;;  %v1337_v48 = vld [vmem:[%s6806_s30 + $0xa98] sm:$0xff] }
 0x10f   : > { %4984 = vmatprep.subr.bf16.mxu1 %v4983_v54  ;;  %v1084_v54 = vld [vmem:[%s6806_s30 + $0x2b0] sm:$0xff]  ;;  %v1343_v49 = vld [vmem:[%s6806_s30 + $0xac8] sm:$0xff] }
 0x110   : > { %v4813_v62 = vpack.c.bf16 %v1090_v55, %v1084_v54  ;;  %v311_v54 = vld [vmem:[%s6798_s8 + $0x50] sm:$0xff]  ;;  %v312_v55 = vld [vmem:[%s6798_s8 + $0x58] sm:$0xff] }
 0x115   : > { %4794 = vmatpush1.bf16.xpose.msra.mxu0 %v4793_v63  ;;  %v5005_v63 = vpack.c.bf16 %v1282_v57, %v1276_v56  ;;  %v1150_v56 = vld [vmem:[%s6806_s30 + $0x4c0] sm:$0xff]  ;;  %v1336_v57 = vld [vmem:[%s6806_s30 + $0xa90] sm:$0xff] }
 0x116   : > { %4986 = vmatpush1.bf16.xpose.msra.mxu1 %v4985_v0  ;;  %4796 = vmatprep.subr.bf16.mxu0 %v4795_v1  ;;  %v4815_v0 = vpack.c.bf16 %v1103_v59, %v1097_v58  ;;  %v5007_v1 = vpack.c.bf16 %v1295_v61, %v1289_v60  ;;  %v1342_v58 = vld [vmem:[%s6806_s30 + $0xac0] sm:$0xff]  ;;  %v417_v59 = vrot.slane %v311_v54, 4  ;;  %v423_v60 = vrot.slane %v312_v55, 4  ;;  %v1157_v61 = vld [vmem:[%s6806_s30 + $0x4f8] sm:$0xff] }
 0x117   : > { %4988 = vmatprep.subr.bf16.mxu1 %v4987_v2  ;;  %v1096_v2 = vld [vmem:[%s6806_s30 + $0x310] sm:$0xff] }
 0x118   : > { %v4817_v11 = vpack.c.bf16 %v1102_v3, %v1096_v2  ;;  %v306_v2 = vld [vmem:[%s6798_s8 + $0x28] sm:$0xff]  ;;  %v418_v3 = vadd.f32 %v417_v59, %v311_v54 }
 0x11d   : > { %4798 = vmatpush1.bf16.xpose.msra.mxu0 %v4797_v13  ;;  %v5009_v13 = vpack.c.bf16 %v1294_v5, %v1288_v4  ;;  %v424_v4 = vadd.f32 %v423_v60, %v312_v55  ;;  %v1373_v55 = vld [vmem:[%s6806_s30 + $0xbb8] sm:$0xff] }
 0x11e   : > { %4990 = vmatpush1.bf16.xpose.msra.mxu1 %v4989_v14  ;;  %4800 = vmatprep.subr.bf16.mxu0 %v4799_v16  ;;  %v4819_v14 = vpack.c.bf16 %v1115_v7, %v1109_v6  ;;  %v5011_v16 = vpack.c.bf16 %v1307_v9, %v1301_v8  ;;  %v387_v7 = vrot.slane %v306_v2, 4  ;;  %v5025_v8 = vpack.c.bf16 %v1342_v58, %v1336_v57 }
 0x11f   : > { %4992 = vmatprep.subr.bf16.mxu1 %v4991_v17  ;;  %v1108_v17 = vld [vmem:[%s6806_s30 + $0x370] sm:$0xff] }
 0x120   : > { %v4821_v25 = vpack.c.bf16 %v1114_v18, %v1108_v17  ;;  %v388_v17 = vadd.f32 %v387_v7, %v306_v2  ;;  %v1003_v7 = vld [vmem:[%s6806_s30 + $0x28] sm:$0xff] }
 0x125   : > { %4802 = vmatpush1.bf16.xpose.msra.mxu0 %v4801_v26  ;;  %v5013_v26 = vpack.c.bf16 %v1306_v20, %v1300_v19 }
 0x126   : > { %4994 = vmatpush1.bf16.xpose.msra.mxu1 %v4993_v29  ;;  %4804 = vmatprep.subr.bf16.mxu0 %v4803_v30  ;;  %v4823_v29 = vpack.c.bf16 %v1127_v22, %v1121_v21  ;;  %v5015_v30 = vpack.c.bf16 %v1319_v24, %v1313_v23  ;;  %v389_v21 = vrot.slane %v388_v17, 2  ;;  %v1156_v22 = vld [vmem:[%s6806_s30 + $0x4f0] sm:$0xff]  ;;  %v1162_v23 = vld [vmem:[%s6806_s30 + $0x520] sm:$0xff] }
 0x127   : > { %4996 = vmatprep.subr.bf16.mxu1 %v4995_v31  ;;  %v1120_v31 = vld [vmem:[%s6806_s30 + $0x3d0] sm:$0xff] }
 0x128   : > { %v4825_v10 = vpack.c.bf16 %v1126_v32, %v1120_v31  ;;  %v1348_v24 = vld [vmem:[%s6806_s30 + $0xaf0] sm:$0xff]  ;;  %v1175_v31 = vld [vmem:[%s6806_s30 + $0x588] sm:$0xff] }
 0x12d   : > { %4806 = vmatpush1.bf16.xpose.msra.mxu0 %v4805_v41  ;;  %v5017_v41 = vpack.c.bf16 %v1318_v35, %v1312_v33  ;;  %v390_v33 = vadd.f32 %v389_v21, %v388_v17  ;;  %v1361_v35 = vld [vmem:[%s6806_s30 + $0xb58] sm:$0xff] }
 0x12e   : > { %4998 = vmatpush1.bf16.xpose.msra.mxu1 %v4997_v42  ;;  %4808 = vmatprep.subr.bf16.mxu0 %v4807_v43  ;;  %v4827_v42 = vpack.c.bf16 %v1139_v37, %v1133_v36  ;;  %v5019_v43 = vpack.c.bf16 %v1331_v40, %v1325_v38  ;;  %v1367_v36 = vld [vmem:[%s6806_s30 + $0xb88] sm:$0xff]  ;;  %v4837_v40 = vpack.c.bf16 %v1162_v23, %v1156_v22  ;;  %v1200_v22 = vld [vmem:[%s6806_s30 + $0x650] sm:$0xff] }
 0x12f   : > { %5000 = vmatprep.subr.bf16.mxu1 %v4999_v12  ;;  %v1132_v12 = vld [vmem:[%s6806_s30 + $0x430] sm:$0xff]  ;;  %v1015_v23 = vld [vmem:[%s6806_s30 + $0x88] sm:$0xff] }
 0x130   : > { %v4829_v50 = vpack.c.bf16 %v1138_v27, %v1132_v12  ;;  %v5031_v27 = vpack.c.bf16 %v1367_v36, %v1361_v35 }
 0x135   : > { %4810 = vmatpush1.bf16.xpose.msra.mxu0 %v4809_v51  ;;  %v5021_v51 = vpack.c.bf16 %v1330_v45, %v1324_v44 }
 0x136   : > { %5002 = vmatpush1.bf16.xpose.msra.mxu1 %v5001_v15  ;;  %4812 = vmatprep.subr.bf16.mxu0 %v4811_v52  ;;  %v4831_v15 = vpack.c.bf16 %v1151_v47, %v1145_v46  ;;  %v5023_v52 = vpack.c.bf16 %v1343_v49, %v1337_v48  ;;  %v1168_v48 = vld [vmem:[%s6806_s30 + $0x550] sm:$0xff]  ;;  %v1174_v49 = vld [vmem:[%s6806_s30 + $0x580] sm:$0xff] }
 0x137   : > { %5004 = vmatprep.subr.bf16.mxu1 %v5003_v53  ;;  %v1144_v53 = vld [vmem:[%s6806_s30 + $0x490] sm:$0xff]  ;;  %v4841_v57 = vpack.c.bf16 %v1174_v49, %v1168_v48  ;;  %v1218_v48 = vld [vmem:[%s6806_s30 + $0x6e0] sm:$0xff] }
 0x138   : > { %v4833_v5 = vpack.c.bf16 %v1150_v56, %v1144_v53  ;;  %v1187_v53 = vld [vmem:[%s6806_s30 + $0x5e8] sm:$0xff]  ;;  %v1224_v49 = vld [vmem:[%s6806_s30 + $0x710] sm:$0xff] }
 0x139   : > { %v1379_v56 = vld [vmem:[%s6806_s30 + $0xbe8] sm:$0xff] }
 0x13d   : > { %4814 = vmatpush1.bf16.xpose.msra.mxu0 %v4813_v62  ;;  %v1163_v62 = vld [vmem:[%s6806_s30 + $0x528] sm:$0xff] }
 0x13e   : > { %5006 = vmatpush1.bf16.xpose.msra.mxu1 %v5005_v63  ;;  %4816 = vmatprep.subr.bf16.mxu0 %v4815_v0  ;;  %v1349_v63 = vld [vmem:[%s6806_s30 + $0xaf8] sm:$0xff]  ;;  %v1355_v0 = vld [vmem:[%s6806_s30 + $0xb28] sm:$0xff]  ;;  %v4835_v9 = vpack.c.bf16 %v1163_v62, %v1157_v61  ;;  %v5035_v62 = vpack.c.bf16 %v1379_v56, %v1373_v55 }
 0x13f   : > { %5008 = vmatprep.subr.bf16.mxu1 %v5007_v1  ;;  %v305_v1 = vld [vmem:[%s6798_s8 + $0x20] sm:$0xff] }
 0x140   : > { %v381_v6 = vrot.slane %v305_v1, 4 }
 0x145   : > { %4818 = vmatpush1.bf16.xpose.msra.mxu0 %v4817_v11  ;;  %v419_v11 = vrot.slane %v418_v3, 2 }
 0x146   : > { %5010 = vmatpush1.bf16.xpose.msra.mxu1 %v5009_v13  ;;  %4820 = vmatprep.subr.bf16.mxu0 %v4819_v14  ;;  %v425_v13 = vrot.slane %v424_v4, 2  ;;  %v5027_v14 = vpack.c.bf16 %v1355_v0, %v1349_v63  ;;  %v350_v63 = vld [vmem:[#allocation2 + $0x8] sm:$0xf] }
 0x147   : > { %5012 = vmatprep.subr.bf16.mxu1 %v5011_v16  ;;  %v382_v16 = vadd.f32 %v381_v6, %v305_v1  ;;  %v420_v18 = vadd.f32 %v419_v11, %v418_v3  ;;  %v1180_v3 = vld [vmem:[%s6806_s30 + $0x5b0] sm:$0xff]  ;;  %v1378_v6 = vld [vmem:[%s6806_s30 + $0xbe0] sm:$0xff]  ;;  %v1201_v11 = vld [vmem:[%s6806_s30 + $0x658] sm:$0xff] }
 0x148   : > { %v426_v19 = vadd.f32 %v425_v13, %v424_v4  ;;  %v1186_v4 = vld [vmem:[%s6806_s30 + $0x5e0] sm:$0xff] }
 0x149   : > { %v383_v20 = vrot.slane %v382_v16, 2  ;;  %v4845_v13 = vpack.c.bf16 %v1186_v4, %v1180_v3 }
 0x14b   : > { %v384_v32 = vadd.f32 %v383_v20, %v382_v16  ;;  %v1194_v20 = vld [vmem:[%s6806_s30 + $0x620] sm:$0xff] }
 0x14d   : > { %4822 = vmatpush1.bf16.xpose.msra.mxu0 %v4821_v25  ;;  %v421_v25 = vrot.slane %v420_v18, 1 }
 0x14e   : > { %5014 = vmatpush1.bf16.xpose.msra.mxu1 %v5013_v26  ;;  %4824 = vmatprep.subr.bf16.mxu0 %v4823_v29  ;;  %v427_v26 = vrot.slane %v426_v19, 1  ;;  %v1354_v29 = vld [vmem:[%s6806_s30 + $0xb20] sm:$0xff] }
 0x14f   : > { %5016 = vmatprep.subr.bf16.mxu1 %v5015_v30  ;;  %v1169_v30 = vld [vmem:[%s6806_s30 + $0x558] sm:$0xff]  ;;  %v422_v37 = vadd.f32 %v421_v25, %v420_v18  ;;  %v1002_v18 = vld [vmem:[%s6806_s30 + $0x20] sm:$0xff] }
 0x150   : > { %v428_v38 = vadd.f32 %v427_v26, %v426_v19  ;;  %v1008_v19 = vld [vmem:[%s6806_s30 + $0x50] sm:$0xff]  ;;  %v1207_v26 = vld [vmem:[%s6806_s30 + $0x688] sm:$0xff] }
 0x152   : > { %v735_v12 = vcombine.low %v422_v37, %v428_v38  ;;  %v1014_v37 = vld [vmem:[%s6806_s30 + $0x80] sm:$0xff]  ;;  %v1020_v38 = vld [vmem:[%s6806_s30 + $0xb0] sm:$0xff] }
 0x154   : > { %v742_v46 = vrot.slane %v735_v12, %v6911_v34  ;;  %v1225_v12 = vld [vmem:[%s6806_s30 + $0x718] sm:$0xff] }
 0x155   : > { %4826 = vmatpush1.bf16.xpose.msra.mxu0 %v4825_v10  ;;  %v385_v10 = vrot.slane %v384_v32, 1 }
 0x156   : > { %5018 = vmatpush1.bf16.xpose.msra.mxu1 %v5017_v41  ;;  %4828 = vmatprep.subr.bf16.mxu0 %v4827_v42  ;;  %v391_v41 = vrot.slane %v390_v33, 1  ;;  %v5029_v42 = vpack.c.bf16 %v1354_v29, %v1348_v24  ;;  %v1021_v24 = vld [vmem:[%s6806_s30 + $0xb8] sm:$0xff] }
 0x157   : > { %5020 = vmatprep.subr.bf16.mxu1 %v5019_v43  ;;  %v4839_v43 = vpack.c.bf16 %v1175_v31, %v1169_v30  ;;  %v386_v44 = vadd.f32 %v385_v10, %v384_v32  ;;  %v1213_v29 = vld [vmem:[%s6806_s30 + $0x6b8] sm:$0xff]  ;;  %v4849_v30 = vpack.c.bf16 %v1008_v19, %v1002_v18  ;;  %v5041_v32 = vpack.c.bf16 %v1200_v22, %v1194_v20  ;;  %v1212_v10 = vld [vmem:[%s6806_s30 + $0x6b0] sm:$0xff]  ;;  %v1062_v20 = vld [vmem:[%s6806_s30 + $0x200] sm:$0xff] }
 0x158   : > { %v392_v45 = vadd.f32 %v391_v41, %v390_v33  ;;  %v4851_v33 = vpack.c.bf16 %v1021_v24, %v1015_v23  ;;  %v5043_v35 = vpack.c.bf16 %v1213_v29, %v1207_v26  ;;  %v1027_v41 = vld [vmem:[%s6806_s30 + $0xe8] sm:$0xff]  ;;  %v1254_v22 = vld [vmem:[%s6806_s30 + $0x800] sm:$0xff]  ;;  %v1260_v23 = vld [vmem:[%s6806_s30 + $0x830] sm:$0xff] }
 0x159   : > { %v1075_v24 = vld [vmem:[%s6806_s30 + $0x268] sm:$0xff]  ;;  %v1273_v29 = vld [vmem:[%s6806_s30 + $0x898] sm:$0xff] }
 0x15a   : > { %v710_v47 = vcombine.low %v386_v44, %v392_v45  ;;  %v1267_v26 = vld [vmem:[%s6806_s30 + $0x868] sm:$0xff] }
 0x15c   : > { %v717_v54 = vrot.slane %v710_v47, %v6911_v34  ;;  %v1032_v47 = vld [vmem:[%s6806_s30 + $0x110] sm:$0xff] }
 0x15d   : > { %4830 = vmatpush1.bf16.xpose.msra.mxu0 %v4829_v50  ;;  %v1360_v50 = vld [vmem:[%s6806_s30 + $0xb50] sm:$0xff] }
 0x15e   : > { %5022 = vmatpush1.bf16.xpose.msra.mxu1 %v5021_v51  ;;  %4832 = vmatprep.subr.bf16.mxu0 %v4831_v15  ;;  %v908_v51 = vrot.slane %v742_v46, 7  ;;  %v1366_v15 = vld [vmem:[%s6806_s30 + $0xb80] sm:$0xff] }
 0x15f   : > { %5024 = vmatprep.subr.bf16.mxu1 %v5023_v52  ;;  %v1181_v52 = vld [vmem:[%s6806_s30 + $0x5b8] sm:$0xff]  ;;  %v5033_v59 = vpack.c.bf16 %v1366_v15, %v1360_v50  ;;  %v1026_v46 = vld [vmem:[%s6806_s30 + $0xe0] sm:$0xff]  ;;  %v1039_v50 = vld [vmem:[%s6806_s30 + $0x148] sm:$0xff] }
 0x160   : > { %v909_v58 = vsel %vm898_vm0, %v908_v51, %v717_v54  ;;  %v4843_v60 = vpack.c.bf16 %v1187_v53, %v1181_v52  ;;  %v1231_v15 = vld [vmem:[%s6806_s30 + $0x748] sm:$0xff]  ;;  %v1237_v52 = vld [vmem:[%s6806_s30 + $0x778] sm:$0xff]  ;;  %v4857_v53 = vpack.c.bf16 %v1032_v47, %v1026_v46  ;;  %v5049_v54 = vpack.c.bf16 %v1224_v49, %v1218_v48  ;;  %v1092_v46 = vld [vmem:[%s6806_s30 + $0x2f0] sm:$0xff] }
 0x161   : > { %v910_v61 = vsel %vm900_vm1, %v908_v51, %v909_v58  ;;  %v5051_v56 = vpack.c.bf16 %v1237_v52, %v1231_v15  ;;  %v1044_v58 = vld [vmem:[%s6806_s30 + $0x170] sm:$0xff]  ;;  %v1278_v47 = vld [vmem:[%s6806_s30 + $0x8c0] sm:$0xff]  ;;  %v1099_v49 = vld [vmem:[%s6806_s30 + $0x328] sm:$0xff] }
 0x162   : > { %v911_v0 = vsel %vm902_vm2, %v908_v51, %v910_v61  ;;  %v1051_v61 = vld [vmem:[%s6806_s30 + $0x1a8] sm:$0xff]  ;;  %v1284_v48 = vld [vmem:[%s6806_s30 + $0x8f0] sm:$0xff]  ;;  %v1297_v15 = vld [vmem:[%s6806_s30 + $0x958] sm:$0xff] }
 0x163   : > { %v912_v1 = vsel %vm904_vm3, %v908_v51, %v911_v0  ;;  %v1045_v51 = vld [vmem:[%s6806_s30 + $0x178] sm:$0xff] }
 0x164   : > { %v964_v2 = vadd.f32 %v912_v1, %v350_v63  ;;  %v4859_v55 = vpack.c.bf16 %v1045_v51, %v1039_v50  ;;  %v1243_v63 = vld [vmem:[%s6806_s30 + $0x7a8] sm:$0xff]  ;;  %v1249_v0 = vld [vmem:[%s6806_s30 + $0x7d8] sm:$0xff] }
 0x165   : > { %4834 = vmatpush1.bf16.xpose.msra.mxu0 %v4833_v5  ;;  %v1372_v5 = vld [vmem:[%s6806_s30 + $0xbb0] sm:$0xff]  ;;  %v5055_v4 = vpack.c.bf16 %v1249_v0, %v1243_v63  ;;  %v1105_v50 = vld [vmem:[%s6806_s30 + $0x358] sm:$0xff]  ;;  %v1291_v51 = vld [vmem:[%s6806_s30 + $0x928] sm:$0xff] }
 0x166   : > { %5026 = vmatpush1.bf16.xpose.msra.mxu1 %v5025_v8  ;;  %4836 = vmatprep.subr.bf16.mxu0 %v4835_v9  ;;  %v1009_v8 = vld [vmem:[%s6806_s30 + $0x58] sm:$0xff]  ;;  %972 = vst [vmem:[#allocation2 + $0x8] sm:$0xf] %v964_v2  ;;  %v1195_v9 = vld [vmem:[%s6806_s30 + $0x628] sm:$0xff] }
 0x167   : > { %5028 = vmatprep.subr.bf16.mxu1 %v5027_v14  ;;  %v5037_v14 = vpack.c.bf16 %v1378_v6, %v1372_v5  ;;  %v4847_v16 = vpack.c.bf16 %v1009_v8, %v1003_v7  ;;  %v5039_v17 = vpack.c.bf16 %v1201_v11, %v1195_v9  ;;  %v1050_v5 = vld [vmem:[%s6806_s30 + $0x1a0] sm:$0xff]  ;;  %v1056_v6 = vld [vmem:[%s6806_s30 + $0x1d0] sm:$0xff]  ;;  %v1063_v9 = vld [vmem:[%s6806_s30 + $0x208] sm:$0xff] }
 0x168   : > { %v1242_v7 = vld [vmem:[%s6806_s30 + $0x7a0] sm:$0xff]  ;;  %v1248_v8 = vld [vmem:[%s6806_s30 + $0x7d0] sm:$0xff]  ;;  %v1069_v11 = vld [vmem:[%s6806_s30 + $0x238] sm:$0xff] }
 0x169   : > { %v4867_v18 = vpack.c.bf16 %v1069_v11, %v1063_v9  ;;  %v1309_v63 = vld [vmem:[%s6806_s30 + $0x9b8] sm:$0xff]  ;;  %v1315_v11 = vld [vmem:[%s6806_s30 + $0x9e8] sm:$0xff] }
 0x16a   : > { %v1129_v9 = vld [vmem:[%s6806_s30 + $0x418] sm:$0xff] }
 0x16d   : > { %4838 = vmatpush1.bf16.xpose.msra.mxu0 %v4837_v40  ;;  %v983_v21 = vld [vmem:[#allocation2 + $0x8] sm:$0xf]  ;;  %v1206_v40 = vld [vmem:[%s6806_s30 + $0x680] sm:$0xff] }
 0x16e   : > { %5030 = vmatpush1.bf16.xpose.msra.mxu1 %v5029_v42  ;;  %4840 = vmatprep.subr.bf16.mxu0 %v4839_v43  ;;  %v991_v25 = vmul.f32 0.125, %v983_v21  ;;  %v1033_v42 = vld [vmem:[%s6806_s30 + $0x118] sm:$0xff]  ;;  %v1219_v43 = vld [vmem:[%s6806_s30 + $0x6e8] sm:$0xff]  ;;  %v1068_v21 = vld [vmem:[%s6806_s30 + $0x230] sm:$0xff] }
 0x16f   : > { %5032 = vmatprep.subr.bf16.mxu1 %v5031_v27  ;;  %v5045_v27 = vpack.c.bf16 %v1212_v10, %v1206_v40  ;;  %v4855_v44 = vpack.c.bf16 %v1033_v42, %v1027_v41  ;;  %v5047_v45 = vpack.c.bf16 %v1225_v12, %v1219_v43  ;;  %v1272_v40 = vld [vmem:[%s6806_s30 + $0x890] sm:$0xff]  ;;  %v1087_v10 = vld [vmem:[%s6806_s30 + $0x2c8] sm:$0xff]  ;;  %v1093_v41 = vld [vmem:[%s6806_s30 + $0x2f8] sm:$0xff] }
 0x170   : > { %v7149_v31 = vrot.slane %v991_v25, %v6911_v34  ;;  %v1081_v25 = vld [vmem:[%s6806_s30 + $0x298] sm:$0xff]  ;;  %v1279_v42 = vld [vmem:[%s6806_s30 + $0x8c8] sm:$0xff] }
 0x171   : > { %v1285_v43 = vld [vmem:[%s6806_s30 + $0x8f8] sm:$0xff] }
 0x172   : > { %v2648_v36 = vcombine.high %v7149_v31, %v7149_v31 }
 0x175   : > { %4842 = vmatpush1.bf16.xpose.msra.mxu0 %v4841_v57  ;;  %v1038_v57 = vld [vmem:[%s6806_s30 + $0x140] sm:$0xff] }
 0x176   : > { %5034 = vmatpush1.bf16.xpose.msra.mxu1 %v5033_v59  ;;  %4844 = vmatprep.subr.bf16.mxu0 %v4843_v60  ;;  %v1230_v59 = vld [vmem:[%s6806_s30 + $0x740] sm:$0xff]  ;;  %v1236_v60 = vld [vmem:[%s6806_s30 + $0x770] sm:$0xff]  ;;  %v4861_v1 = vpack.c.bf16 %v1044_v58, %v1038_v57 }
 0x177   : > { %5036 = vmatprep.subr.bf16.mxu1 %v5035_v62  ;;  %v1057_v62 = vld [vmem:[%s6806_s30 + $0x1d8] sm:$0xff]  ;;  %v5053_v2 = vpack.c.bf16 %v1236_v60, %v1230_v59  ;;  %v1104_v57 = vld [vmem:[%s6806_s30 + $0x350] sm:$0xff]  ;;  %v1290_v58 = vld [vmem:[%s6806_s30 + $0x920] sm:$0xff] }
 0x178   : > { %v4863_v3 = vpack.c.bf16 %v1057_v62, %v1051_v61  ;;  %v1296_v59 = vld [vmem:[%s6806_s30 + $0x950] sm:$0xff]  ;;  %v1111_v60 = vld [vmem:[%s6806_s30 + $0x388] sm:$0xff]  ;;  %v1117_v61 = vld [vmem:[%s6806_s30 + $0x3b8] sm:$0xff] }
 0x179   : > { %v1303_v62 = vld [vmem:[%s6806_s30 + $0x988] sm:$0xff] }
 0x17d   : > { %4846 = vmatpush1.bf16.xpose.msra.mxu0 %v4845_v13  ;;  %v1255_v13 = vld [vmem:[%s6806_s30 + $0x808] sm:$0xff] }
 0x17e   : > { %5038 = vmatpush1.bf16.xpose.msra.mxu1 %v5037_v14  ;;  %4848 = vmatprep.subr.bf16.mxu0 %v4847_v16  ;;  %v1261_v14 = vld [vmem:[%s6806_s30 + $0x838] sm:$0xff]  ;;  %v4865_v16 = vpack.c.bf16 %v1056_v6, %v1050_v5  ;;  %v1116_v5 = vld [vmem:[%s6806_s30 + $0x3b0] sm:$0xff]  ;;  %v1302_v6 = vld [vmem:[%s6806_s30 + $0x980] sm:$0xff] }
 0x17f   : > { %5040 = vmatprep.subr.bf16.mxu1 %v5039_v17  ;;  %v5057_v17 = vpack.c.bf16 %v1248_v8, %v1242_v7  ;;  %v5059_v19 = vpack.c.bf16 %v1261_v14, %v1255_v13  ;;  %v1308_v7 = vld [vmem:[%s6806_s30 + $0x9b0] sm:$0xff]  ;;  %v1123_v8 = vld [vmem:[%s6806_s30 + $0x3e8] sm:$0xff]  ;;  %v1321_v13 = vld [vmem:[%s6806_s30 + $0xa18] sm:$0xff] }
 0x184   : > { %2791 = vmatmul.mubr.f32.vlgmr.msra.gmra.mrb[0].mxu0 %v7002_v39 }
 0x185   : > { %4850 = vmatpush1.bf16.xpose.msra.mxu0 %v4849_v30  ;;  %3004 = vmatmul.mubr.f32.vlgmr.msra.gmra.mrb[0].mxu1 %v7002_v39  ;;  %v4853_v39 = vpack.c.bf16 %v1020_v38, %v1014_v37  ;;  %v4869_v30 = vpack.c.bf16 %v1068_v21, %v1062_v20  ;;  %v1080_v37 = vld [vmem:[%s6806_s30 + $0x290] sm:$0xff]  ;;  %v1266_v38 = vld [vmem:[%s6806_s30 + $0x860] sm:$0xff] }
 0x186   : > { %5042 = vmatpush1.bf16.xpose.msra.mxu1 %v5041_v32  ;;  %4852 = vmatprep.subr.bf16.mxu0 %v4851_v33  ;;  %v5061_v32 = vpack.c.bf16 %v1260_v23, %v1254_v22  ;;  %v4871_v33 = vpack.c.bf16 %v1081_v25, %v1075_v24  ;;  %v1128_v20 = vld [vmem:[%s6806_s30 + $0x410] sm:$0xff]  ;;  %v1314_v21 = vld [vmem:[%s6806_s30 + $0x9e0] sm:$0xff]  ;;  %v1135_v23 = vld [vmem:[%s6806_s30 + $0x448] sm:$0xff] }
 0x187   : > { %5044 = vmatprep.subr.bf16.mxu1 %v5043_v35  ;;  %2861 = vmatprep.mubr.f32.mxu0 %v2648_v36  ;;  %v5063_v35 = vpack.c.bf16 %v1273_v29, %v1267_v26  ;;  %v1320_v22 = vld [vmem:[%s6806_s30 + $0xa10] sm:$0xff]  ;;  %v1141_v24 = vld [vmem:[%s6806_s30 + $0x478] sm:$0xff]  ;;  %v1327_v25 = vld [vmem:[%s6806_s30 + $0xa48] sm:$0xff] }
 0x188   : > { %3074 = vmatprep.mubr.f32.mxu1 %v2648_v36  ;;  %v1074_v36 = vld [vmem:[%s6806_s30 + $0x260] sm:$0xff]  ;;  %v1333_v26 = vld [vmem:[%s6806_s30 + $0xa78] sm:$0xff] }
 0x189   : > { %v4873_v12 = vpack.c.bf16 %v1080_v37, %v1074_v36  ;;  %v1140_v36 = vld [vmem:[%s6806_s30 + $0x470] sm:$0xff]  ;;  %v1326_v37 = vld [vmem:[%s6806_s30 + $0xa40] sm:$0xff] }
 0x18d   : > { %4854 = vmatpush1.bf16.xpose.msra.mxu0 %v4853_v39  ;;  %v5065_v39 = vpack.c.bf16 %v1272_v40, %v1266_v38  ;;  %v1332_v38 = vld [vmem:[%s6806_s30 + $0xa70] sm:$0xff]  ;;  %v1147_v40 = vld [vmem:[%s6806_s30 + $0x4a8] sm:$0xff] }
 0x18e   : > { %5046 = vmatpush1.bf16.xpose.msra.mxu1 %v5045_v27  ;;  %4856 = vmatprep.subr.bf16.mxu0 %v4855_v44  ;;  %v4875_v27 = vpack.c.bf16 %v1093_v41, %v1087_v10  ;;  %v5067_v44 = vpack.c.bf16 %v1285_v43, %v1279_v42  ;;  %v1153_v10 = vld [vmem:[%s6806_s30 + $0x4d8] sm:$0xff]  ;;  %v1339_v41 = vld [vmem:[%s6806_s30 + $0xaa8] sm:$0xff] }
 0x18f   : > { %5048 = vmatprep.subr.bf16.mxu1 %v5047_v45  ;;  %v1086_v45 = vld [vmem:[%s6806_s30 + $0x2c0] sm:$0xff]  ;;  %v1345_v42 = vld [vmem:[%s6806_s30 + $0xad8] sm:$0xff] }
 0x190   : > { %v4877_v52 = vpack.c.bf16 %v1092_v46, %v1086_v45  ;;  %v1152_v45 = vld [vmem:[%s6806_s30 + $0x4d0] sm:$0xff]  ;;  %v1338_v46 = vld [vmem:[%s6806_s30 + $0xaa0] sm:$0xff] }
 0x195   : > { %4858 = vmatpush1.bf16.xpose.msra.mxu0 %v4857_v53  ;;  %v5069_v53 = vpack.c.bf16 %v1284_v48, %v1278_v47  ;;  %v1344_v47 = vld [vmem:[%s6806_s30 + $0xad0] sm:$0xff]  ;;  %v1159_v48 = vld [vmem:[%s6806_s30 + $0x508] sm:$0xff] }
 0x196   : > { %5050 = vmatpush1.bf16.xpose.msra.mxu1 %v5049_v54  ;;  %4860 = vmatprep.subr.bf16.mxu0 %v4859_v55  ;;  %v4879_v54 = vpack.c.bf16 %v1105_v50, %v1099_v49  ;;  %v5071_v55 = vpack.c.bf16 %v1297_v15, %v1291_v51  ;;  %v1165_v49 = vld [vmem:[%s6806_s30 + $0x538] sm:$0xff]  ;;  %v1351_v50 = vld [vmem:[%s6806_s30 + $0xb08] sm:$0xff] }
 0x197   : > { %5052 = vmatprep.subr.bf16.mxu1 %v5051_v56  ;;  %v1098_v56 = vld [vmem:[%s6806_s30 + $0x320] sm:$0xff]  ;;  %v1357_v51 = vld [vmem:[%s6806_s30 + $0xb38] sm:$0xff] }
 0x198   : > { %v4881_v0 = vpack.c.bf16 %v1104_v57, %v1098_v56  ;;  %v5091_v56 = vpack.c.bf16 %v1357_v51, %v1351_v50  ;;  %v1350_v57 = vld [vmem:[%s6806_s30 + $0xb00] sm:$0xff] }
 0x19d   : > { %4862 = vmatpush1.bf16.xpose.msra.mxu0 %v4861_v1  ;;  %v5073_v1 = vpack.c.bf16 %v1296_v59, %v1290_v58  ;;  %v1356_v58 = vld [vmem:[%s6806_s30 + $0xb30] sm:$0xff]  ;;  %v1171_v59 = vld [vmem:[%s6806_s30 + $0x568] sm:$0xff] }
 0x19e   : > { %5054 = vmatpush1.bf16.xpose.msra.mxu1 %v5053_v2  ;;  %4864 = vmatprep.subr.bf16.mxu0 %v4863_v3  ;;  %v4883_v2 = vpack.c.bf16 %v1117_v61, %v1111_v60  ;;  %v5075_v3 = vpack.c.bf16 %v1309_v63, %v1303_v62  ;;  %v1177_v60 = vld [vmem:[%s6806_s30 + $0x598] sm:$0xff]  ;;  %v319_v61 = vld [vmem:[%s6798_s8 + $0x90] sm:$0xff]  ;;  %v321_v63 = vld [vmem:[%s6798_s8 + $0xa0] sm:$0xff] }
 0x19f   : > { %5056 = vmatprep.subr.bf16.mxu1 %v5055_v4  ;;  %v1110_v4 = vld [vmem:[%s6806_s30 + $0x380] sm:$0xff]  ;;  %v320_v62 = vld [vmem:[%s6798_s8 + $0x98] sm:$0xff] }
 0x1a0   : > { %v4885_v14 = vpack.c.bf16 %v1116_v5, %v1110_v4  ;;  %v471_v4 = vrot.slane %v320_v62, 4  ;;  %v477_v5 = vrot.slane %v321_v63, 4 }
 0x1a5   : > { %4866 = vmatpush1.bf16.xpose.msra.mxu0 %v4865_v16  ;;  %v5077_v16 = vpack.c.bf16 %v1308_v7, %v1302_v6 }
 0x1a6   : > { %5058 = vmatpush1.bf16.xpose.msra.mxu1 %v5057_v17  ;;  %4868 = vmatprep.subr.bf16.mxu0 %v4867_v18  ;;  %v4887_v17 = vpack.c.bf16 %v1129_v9, %v1123_v8  ;;  %v5079_v18 = vpack.c.bf16 %v1321_v13, %v1315_v11  ;;  %v472_v9 = vadd.f32 %v471_v4, %v320_v62 }
 0x1a7   : > { %5060 = vmatprep.subr.bf16.mxu1 %v5059_v19  ;;  %v1122_v19 = vld [vmem:[%s6806_s30 + $0x3e0] sm:$0xff]  ;;  %v478_v11 = vadd.f32 %v477_v5, %v321_v63  ;;  %v5093_v13 = vpack.c.bf16 %v1356_v58, %v1350_v57 }
 0x1a8   : > { %v4889_v29 = vpack.c.bf16 %v1128_v20, %v1122_v19  ;;  %v315_v19 = vld [vmem:[%s6798_s8 + $0x70] sm:$0xff] }
 0x1ad   : > { %4870 = vmatpush1.bf16.xpose.msra.mxu0 %v4869_v30  ;;  %v5081_v30 = vpack.c.bf16 %v1320_v22, %v1314_v21  ;;  %v316_v21 = vld [vmem:[%s6798_s8 + $0x78] sm:$0xff] }
 0x1ae   : > { %5062 = vmatpush1.bf16.xpose.msra.mxu1 %v5061_v32  ;;  %4872 = vmatprep.subr.bf16.mxu0 %v4871_v33  ;;  %v4891_v32 = vpack.c.bf16 %v1141_v24, %v1135_v23  ;;  %v5083_v33 = vpack.c.bf16 %v1333_v26, %v1327_v25  ;;  %v441_v24 = vrot.slane %v315_v19, 4  ;;  %v447_v26 = vrot.slane %v316_v21, 4 }
 0x1af   : > { %5064 = vmatprep.subr.bf16.mxu1 %v5063_v35  ;;  %v1134_v35 = vld [vmem:[%s6806_s30 + $0x440] sm:$0xff] }
 0x1b0   : > { %v4893_v43 = vpack.c.bf16 %v1140_v36, %v1134_v35 }
 0x1b5   : > { %4874 = vmatpush1.bf16.xpose.msra.mxu0 %v4873_v12  ;;  %v5085_v12 = vpack.c.bf16 %v1332_v38, %v1326_v37  ;;  %v442_v37 = vadd.f32 %v441_v24, %v315_v19 }
 0x1b6   : > { %5066 = vmatpush1.bf16.xpose.msra.mxu1 %v5065_v39  ;;  %4876 = vmatprep.subr.bf16.mxu0 %v4875_v27  ;;  %v4895_v39 = vpack.c.bf16 %v1153_v10, %v1147_v40  ;;  %v5087_v27 = vpack.c.bf16 %v1345_v42, %v1339_v41  ;;  %v1176_v40 = vld [vmem:[%s6806_s30 + $0x590] sm:$0xff]  ;;  %v1362_v10 = vld [vmem:[%s6806_s30 + $0xb60] sm:$0xff]  ;;  %v448_v42 = vadd.f32 %v447_v26, %v316_v21  ;;  %v1581_v26 = vld [vmem:[%s6806_s30 + $0x1238] sm:$0xff] }
 0x1b7   : > { %5068 = vmatprep.subr.bf16.mxu1 %v5067_v44  ;;  %v1146_v44 = vld [vmem:[%s6806_s30 + $0x4a0] sm:$0xff]  ;;  %v1368_v41 = vld [vmem:[%s6806_s30 + $0xb90] sm:$0xff] }
 0x1b8   : > { %v4897_v15 = vpack.c.bf16 %v1152_v45, %v1146_v44  ;;  %v5097_v57 = vpack.c.bf16 %v1368_v41, %v1362_v10  ;;  %v1380_v21 = vld [vmem:[%s6806_s30 + $0xbf0] sm:$0xff]  ;;  %v1382_v10 = vld [vmem:[%s6806_s30 + $0xc00] sm:$0xff] }
 0x1b9   : > { %v1388_v41 = vld [vmem:[%s6806_s30 + $0xc30] sm:$0xff] }
 0x1bd   : > { %4878 = vmatpush1.bf16.xpose.msra.mxu0 %v4877_v52  ;;  %v5089_v52 = vpack.c.bf16 %v1344_v47, %v1338_v46  ;;  %v443_v46 = vrot.slane %v442_v37, 2 }
 0x1be   : > { %5070 = vmatpush1.bf16.xpose.msra.mxu1 %v5069_v53  ;;  %4880 = vmatprep.subr.bf16.mxu0 %v4879_v54  ;;  %v4899_v53 = vpack.c.bf16 %v1165_v49, %v1159_v48  ;;  %v1158_v54 = vld [vmem:[%s6806_s30 + $0x500] sm:$0xff]  ;;  %v449_v48 = vrot.slane %v448_v42, 2 }
 0x1bf   : > { %5072 = vmatprep.subr.bf16.mxu1 %v5071_v55  ;;  %v1164_v55 = vld [vmem:[%s6806_s30 + $0x530] sm:$0xff] }
 0x1c0   : > { %v4901_v7 = vpack.c.bf16 %v1164_v55, %v1158_v54 }
 0x1c5   : > { %4882 = vmatpush1.bf16.xpose.msra.mxu0 %v4881_v0  ;;  %v1363_v0 = vld [vmem:[%s6806_s30 + $0xb68] sm:$0xff] }
 0x1c6   : > { %5074 = vmatpush1.bf16.xpose.msra.mxu1 %v5073_v1  ;;  %4884 = vmatprep.subr.bf16.mxu0 %v4883_v2  ;;  %v1369_v1 = vld [vmem:[%s6806_s30 + $0xb98] sm:$0xff]  ;;  %v322_v2 = vld [vmem:[%s6798_s8 + $0xa8] sm:$0xff] }
 0x1c7   : > { %5076 = vmatprep.subr.bf16.mxu1 %v5075_v3  ;;  %v465_v3 = vrot.slane %v319_v61, 4  ;;  %v483_v6 = vrot.slane %v322_v2, 4 }
 0x1c9   : > { %v466_v8 = vadd.f32 %v465_v3, %v319_v61  ;;  %v484_v20 = vadd.f32 %v483_v6, %v322_v2 }
 0x1cb   : > { %v467_v25 = vrot.slane %v466_v8, 2 }
 0x1cd   : > { %4886 = vmatpush1.bf16.xpose.msra.mxu0 %v4885_v14  ;;  %v4903_v14 = vpack.c.bf16 %v1177_v60, %v1171_v59  ;;  %v468_v38 = vadd.f32 %v467_v25, %v466_v8  ;;  %v450_v59 = vadd.f32 %v449_v48, %v448_v42  ;;  %v1575_v25 = vld [vmem:[%s6806_s30 + $0x1208] sm:$0xff]  ;;  %v1574_v42 = vld [vmem:[%s6806_s30 + $0x1200] sm:$0xff]  ;;  %v5105_v48 = vpack.c.bf16 %v1388_v41, %v1382_v10  ;;  %v1641_v10 = vld [vmem:[%s6806_s30 + $0x1418] sm:$0xff] }
 0x1ce   : > { %5078 = vmatpush1.bf16.xpose.msra.mxu1 %v5077_v16  ;;  %4888 = vmatprep.subr.bf16.mxu0 %v4887_v17  ;;  %v5095_v16 = vpack.c.bf16 %v1369_v1, %v1363_v0  ;;  %v313_v17 = vld [vmem:[%s6798_s8 + $0x60] sm:$0xff] }
 0x1cf   : > { %5080 = vmatprep.subr.bf16.mxu1 %v5079_v18  ;;  %v314_v18 = vld [vmem:[%s6798_s8 + $0x68] sm:$0xff]  ;;  %v429_v22 = vrot.slane %v313_v17, 4  ;;  %v469_v47 = vrot.slane %v468_v38, 1  ;;  %v451_v2 = vrot.slane %v450_v59, 1 }
 0x1d0   : > { %v435_v23 = vrot.slane %v314_v18, 4 }
 0x1d1   : > { %v430_v35 = vadd.f32 %v429_v22, %v313_v17  ;;  %v470_v60 = vadd.f32 %v469_v47, %v468_v38  ;;  %v1374_v17 = vld [vmem:[%s6806_s30 + $0xbc0] sm:$0xff]  ;;  %v1383_v22 = vld [vmem:[%s6806_s30 + $0xc08] sm:$0xff]  ;;  %v5295_v38 = vpack.c.bf16 %v1581_v26, %v1575_v25 }
 0x1d2   : > { %v436_v36 = vadd.f32 %v435_v23, %v314_v18  ;;  %v1389_v23 = vld [vmem:[%s6806_s30 + $0xc38] sm:$0xff] }
 0x1d3   : > { %v431_v44 = vrot.slane %v430_v35, 2 }
 0x1d4   : > { %v437_v45 = vrot.slane %v436_v36, 2 }
 0x1d5   : > { %4890 = vmatpush1.bf16.xpose.msra.mxu0 %v4889_v29  ;;  %v473_v29 = vrot.slane %v472_v9, 2  ;;  %v432_v54 = vadd.f32 %v431_v44, %v430_v35  ;;  %v5103_v35 = vpack.c.bf16 %v1389_v23, %v1383_v22  ;;  %v1437_v22 = vld [vmem:[%s6806_s30 + $0xdb8] sm:$0xff]  ;;  %v1623_v23 = vld [vmem:[%s6806_s30 + $0x1388] sm:$0xff] }
 0x1d6   : > { %5082 = vmatpush1.bf16.xpose.msra.mxu1 %v5081_v30  ;;  %4892 = vmatprep.subr.bf16.mxu0 %v4891_v32  ;;  %v479_v30 = vrot.slane %v478_v11, 2  ;;  %v485_v32 = vrot.slane %v484_v20, 2  ;;  %v438_v55 = vadd.f32 %v437_v45, %v436_v36  ;;  %v1587_v45 = vld [vmem:[%s6806_s30 + $0x1268] sm:$0xff] }
 0x1d7   : > { %5084 = vmatprep.subr.bf16.mxu1 %v5083_v33  ;;  %v1170_v33 = vld [vmem:[%s6806_s30 + $0x560] sm:$0xff]  ;;  %v433_v61 = vrot.slane %v432_v54, 1 }
 0x1d8   : > { %v486_v51 = vadd.f32 %v485_v32, %v484_v20  ;;  %v439_v62 = vrot.slane %v438_v55, 1 }
 0x1d9   : > { %v434_v5 = vadd.f32 %v433_v61, %v432_v54  ;;  %v1400_v54 = vld [vmem:[%s6806_s30 + $0xc90] sm:$0xff] }
 0x1da   : > { %v487_v4 = vrot.slane %v486_v51, 1  ;;  %v440_v6 = vadd.f32 %v439_v62, %v438_v55  ;;  %v1586_v55 = vld [vmem:[%s6806_s30 + $0x1260] sm:$0xff] }
 0x1dd   : > { %4894 = vmatpush1.bf16.xpose.msra.mxu0 %v4893_v43  ;;  %v474_v43 = vadd.f32 %v473_v29, %v472_v9  ;;  %v452_v9 = vadd.f32 %v451_v2, %v450_v59  ;;  %v1413_v59 = vld [vmem:[%s6806_s30 + $0xcf8] sm:$0xff]  ;;  %v1406_v2 = vld [vmem:[%s6806_s30 + $0xcc0] sm:$0xff] }
 0x1de   : > { %5086 = vmatpush1.bf16.xpose.msra.mxu1 %v5085_v12  ;;  %4896 = vmatprep.subr.bf16.mxu0 %v4895_v39  ;;  %v480_v12 = vadd.f32 %v479_v30, %v478_v11  ;;  %v1183_v39 = vld [vmem:[%s6806_s30 + $0x5c8] sm:$0xff]  ;;  %v488_v11 = vadd.f32 %v487_v4, %v486_v51  ;;  %v1598_v4 = vld [vmem:[%s6806_s30 + $0x12c0] sm:$0xff] }
 0x1df   : > { %5088 = vmatprep.subr.bf16.mxu1 %v5087_v27  ;;  %v1189_v27 = vld [vmem:[%s6806_s30 + $0x5f8] sm:$0xff]  ;;  %v475_v49 = vrot.slane %v474_v43, 1 }
 0x1e0   : > { %v481_v50 = vrot.slane %v480_v12, 1  ;;  %v4907_v58 = vpack.c.bf16 %v1189_v27, %v1183_v39  ;;  %v1395_v39 = vld [vmem:[%s6806_s30 + $0xc68] sm:$0xff]  ;;  %v1401_v27 = vld [vmem:[%s6806_s30 + $0xc98] sm:$0xff] }
 0x1e1   : > { %v476_v0 = vadd.f32 %v475_v49, %v474_v43  ;;  %v5107_v51 = vpack.c.bf16 %v1401_v27, %v1395_v39  ;;  %v1442_v39 = vld [vmem:[%s6806_s30 + $0xde0] sm:$0xff]  ;;  %v1448_v27 = vld [vmem:[%s6806_s30 + $0xe10] sm:$0xff] }
 0x1e2   : > { %v482_v3 = vadd.f32 %v481_v50, %v480_v12  ;;  %v1580_v12 = vld [vmem:[%s6806_s30 + $0x1230] sm:$0xff] }
 0x1e3   : > { %v768_v8 = vcombine.low %v470_v60, %v476_v0  ;;  %v5297_v50 = vpack.c.bf16 %v1580_v12, %v1574_v42  ;;  %v1599_v60 = vld [vmem:[%s6806_s30 + $0x12c8] sm:$0xff] }
 0x1e4   : > { %v769_v19 = vcombine.low %v482_v3, %v488_v11  ;;  %v1412_v3 = vld [vmem:[%s6806_s30 + $0xcf0] sm:$0xff] }
 0x1e5   : > { %4898 = vmatpush1.bf16.xpose.msra.mxu0 %v4897_v15  ;;  %v4905_v15 = vpack.c.bf16 %v1176_v40, %v1170_v33  ;;  %v776_v20 = vrot.slane %v768_v8, %v6911_v34  ;;  %v5101_v33 = vpack.c.bf16 %v1380_v21, %v1374_v17  ;;  %v1611_v8 = vld [vmem:[%s6806_s30 + $0x1328] sm:$0xff]  ;;  %v5113_v11 = vpack.c.bf16 %v1412_v3, %v1406_v2  ;;  %v1418_v17 = vld [vmem:[%s6806_s30 + $0xd20] sm:$0xff]  ;;  %v1472_v3 = vld [vmem:[%s6806_s30 + $0xed0] sm:$0xff] }
 0x1e6   : > { %5090 = vmatpush1.bf16.xpose.msra.mxu1 %v5089_v52  ;;  %4900 = vmatprep.subr.bf16.mxu0 %v4899_v53  ;;  %v1375_v52 = vld [vmem:[%s6806_s30 + $0xbc8] sm:$0xff]  ;;  %v1381_v53 = vld [vmem:[%s6806_s30 + $0xbf8] sm:$0xff]  ;;  %v783_v30 = vrot.slane %v769_v19, %v6911_v34  ;;  %v1610_v19 = vld [vmem:[%s6806_s30 + $0x1320] sm:$0xff] }
 0x1e7   : > { %5092 = vmatprep.subr.bf16.mxu1 %v5091_v56  ;;  %v444_v56 = vadd.f32 %v443_v46, %v442_v37  ;;  %v5099_v1 = vpack.c.bf16 %v1381_v53, %v1375_v52  ;;  %v1593_v46 = vld [vmem:[%s6806_s30 + $0x1298] sm:$0xff]  ;;  %v1394_v53 = vld [vmem:[%s6806_s30 + $0xc60] sm:$0xff]  ;;  %v1431_v21 = vld [vmem:[%s6806_s30 + $0xd88] sm:$0xff] }
 0x1e8   : > { %v784_v37 = vcombine.low %v776_v20, %v783_v30  ;;  %v5109_v62 = vpack.c.bf16 %v1400_v54, %v1394_v53  ;;  %v1616_v20 = vld [vmem:[%s6806_s30 + $0x1350] sm:$0xff]  ;;  %v1454_v54 = vld [vmem:[%s6806_s30 + $0xe40] sm:$0xff] }
 0x1e9   : > { %v445_v63 = vrot.slane %v444_v56, 1  ;;  %v5309_v26 = vpack.c.bf16 %v1616_v20, %v1610_v19  ;;  %v1466_v2 = vld [vmem:[%s6806_s30 + $0xea0] sm:$0xff]  ;;  %v1676_v20 = vld [vmem:[%s6806_s30 + $0x1530] sm:$0xff] }
 0x1ea   : > { %v915_v40 = vrot.slane %v784_v37, 7  ;;  %v1443_v37 = vld [vmem:[%s6806_s30 + $0xde8] sm:$0xff]  ;;  %v1670_v19 = vld [vmem:[%s6806_s30 + $0x1500] sm:$0xff] }
 0x1ed   : > { %4902 = vmatpush1.bf16.xpose.msra.mxu0 %v4901_v7  ;;  %v446_v7 = vadd.f32 %v445_v63, %v444_v56 }
 0x1ee   : > { %5094 = vmatpush1.bf16.xpose.msra.mxu1 %v5093_v13  ;;  %4904 = vmatprep.subr.bf16.mxu0 %v4903_v14  ;;  %v743_v13 = vcombine.low %v434_v5, %v440_v6  ;;  %v1182_v14 = vld [vmem:[%s6806_s30 + $0x5c0] sm:$0xff]  ;;  %v1604_v5 = vld [vmem:[%s6806_s30 + $0x12f0] sm:$0xff]  ;;  %v1419_v6 = vld [vmem:[%s6806_s30 + $0xd28] sm:$0xff] }
 0x1ef   : > { %5096 = vmatprep.subr.bf16.mxu1 %v5095_v16  ;;  %v1188_v16 = vld [vmem:[%s6806_s30 + $0x5f0] sm:$0xff]  ;;  %v744_v18 = vcombine.low %v446_v7, %v452_v9  ;;  %v1425_v7 = vld [vmem:[%s6806_s30 + $0xd58] sm:$0xff] }
 0x1f0   : > { %v751_v24 = vrot.slane %v743_v13, %v6911_v34  ;;  %v4909_v32 = vpack.c.bf16 %v1188_v16, %v1182_v14  ;;  %v1617_v9 = vld [vmem:[%s6806_s30 + $0x1358] sm:$0xff]  ;;  %v5305_v13 = vpack.c.bf16 %v1604_v5, %v1598_v4  ;;  %v5115_v14 = vpack.c.bf16 %v1425_v7, %v1419_v6  ;;  %v1658_v4 = vld [vmem:[%s6806_s30 + $0x14a0] sm:$0xff]  ;;  %v1664_v5 = vld [vmem:[%s6806_s30 + $0x14d0] sm:$0xff] }
 0x1f1   : > { %v758_v29 = vrot.slane %v744_v18, %v6911_v34  ;;  %v5307_v16 = vpack.c.bf16 %v1617_v9, %v1611_v8  ;;  %v1424_v18 = vld [vmem:[%s6806_s30 + $0xd50] sm:$0xff]  ;;  %v1479_v6 = vld [vmem:[%s6806_s30 + $0xf08] sm:$0xff]  ;;  %v1485_v7 = vld [vmem:[%s6806_s30 + $0xf38] sm:$0xff] }
 0x1f2   : > { %v5117_v25 = vpack.c.bf16 %v1424_v18, %v1418_v17  ;;  %v1671_v8 = vld [vmem:[%s6806_s30 + $0x1508] sm:$0xff]  ;;  %v1677_v9 = vld [vmem:[%s6806_s30 + $0x1538] sm:$0xff]  ;;  %v1478_v17 = vld [vmem:[%s6806_s30 + $0xf00] sm:$0xff] }
 0x1f3   : > { %v759_v36 = vcombine.low %v751_v24, %v758_v29  ;;  %v1629_v24 = vld [vmem:[%s6806_s30 + $0x13b8] sm:$0xff]  ;;  %v5119_v29 = vpack.c.bf16 %v1437_v22, %v1431_v21  ;;  %v1484_v18 = vld [vmem:[%s6806_s30 + $0xf30] sm:$0xff]  ;;  %v1491_v21 = vld [vmem:[%s6806_s30 + $0xf68] sm:$0xff] }
 0x1f4   : > { %v5311_v30 = vpack.c.bf16 %v1629_v24, %v1623_v23  ;;  %v1497_v22 = vld [vmem:[%s6806_s30 + $0xf98] sm:$0xff]  ;;  %v1683_v23 = vld [vmem:[%s6806_s30 + $0x1568] sm:$0xff] }
 0x1f5   : > { %4906 = vmatpush1.bf16.xpose.msra.mxu0 %v4905_v15  ;;  %v916_v43 = vsel %vm898_vm0, %v915_v40, %v759_v36  ;;  %v5299_v15 = vpack.c.bf16 %v1593_v46, %v1587_v45  ;;  %v1628_v36 = vld [vmem:[%s6806_s30 + $0x13b0] sm:$0xff]  ;;  %v1455_v46 = vld [vmem:[%s6806_s30 + $0xe48] sm:$0xff]  ;;  %v1689_v24 = vld [vmem:[%s6806_s30 + $0x1598] sm:$0xff] }
 0x1f6   : > { %5098 = vmatpush1.bf16.xpose.msra.mxu1 %v5097_v57  ;;  %4908 = vmatprep.subr.bf16.mxu0 %v4907_v58  ;;  %v917_v44 = vsel %vm900_vm1, %v915_v40, %v916_v43  ;;  %v1592_v57 = vld [vmem:[%s6806_s30 + $0x1290] sm:$0xff]  ;;  %v1407_v58 = vld [vmem:[%s6806_s30 + $0xcc8] sm:$0xff] }
 0x1f7   : > { %5100 = vmatprep.subr.bf16.mxu1 %v5099_v1  ;;  %v918_v47 = vsel %vm902_vm2, %v915_v40, %v917_v44  ;;  %v5301_v63 = vpack.c.bf16 %v1592_v57, %v1586_v55  ;;  %v5111_v0 = vpack.c.bf16 %v1413_v59, %v1407_v58  ;;  %v1634_v44 = vld [vmem:[%s6806_s30 + $0x13e0] sm:$0xff]  ;;  %v1640_v45 = vld [vmem:[%s6806_s30 + $0x1410] sm:$0xff]  ;;  %v1467_v59 = vld [vmem:[%s6806_s30 + $0xea8] sm:$0xff] }
 0x1f8   : > { %v919_v49 = vsel %vm904_vm3, %v915_v40, %v918_v47  ;;  %v1635_v40 = vld [vmem:[%s6806_s30 + $0x13e8] sm:$0xff]  ;;  %v1461_v47 = vld [vmem:[%s6806_s30 + $0xe78] sm:$0xff]  ;;  %v1460_v55 = vld [vmem:[%s6806_s30 + $0xe70] sm:$0xff] }
 0x1f9   : > { %v7300_v52 = vmul.f32 0.125, %v919_v49  ;;  %v5315_v12 = vpack.c.bf16 %v1641_v10, %v1635_v40  ;;  %v1653_v49 = vld [vmem:[%s6806_s30 + $0x1478] sm:$0xff]  ;;  %v1646_v57 = vld [vmem:[%s6806_s30 + $0x1440] sm:$0xff]  ;;  %v1652_v58 = vld [vmem:[%s6806_s30 + $0x1470] sm:$0xff] }
 0x1fa   : > { %v1695_v40 = vld [vmem:[%s6806_s30 + $0x15c8] sm:$0xff]  ;;  %v1701_v10 = vld [vmem:[%s6806_s30 + $0x15f8] sm:$0xff] }
 0x1fb   : > { %v7308_v56 = vrot.slane %v7300_v52, %v6911_v34 }
 0x1fd   : > { %4910 = vmatpush1.bf16.xpose.msra.mxu0 %v4909_v32  ;;  %v3098_v61 = vcombine.high %v7308_v56, %v7308_v56  ;;  %v1430_v32 = vld [vmem:[%s6806_s30 + $0xd80] sm:$0xff] }
 0x1fe   : > { %5102 = vmatpush1.bf16.xpose.msra.mxu1 %v5101_v33  ;;  %5104 = vmatprep.subr.bf16.mxu0 %v5103_v35  ;;  %v1436_v33 = vld [vmem:[%s6806_s30 + $0xdb0] sm:$0xff]  ;;  %v1622_v35 = vld [vmem:[%s6806_s30 + $0x1380] sm:$0xff] }
 0x1ff   : > { %5296 = vmatprep.subr.bf16.mxu1 %v5295_v38  ;;  %v1449_v38 = vld [vmem:[%s6806_s30 + $0xe18] sm:$0xff]  ;;  %v5121_v41 = vpack.c.bf16 %v1436_v33, %v1430_v32  ;;  %v5313_v42 = vpack.c.bf16 %v1628_v36, %v1622_v35  ;;  %v1490_v32 = vld [vmem:[%s6806_s30 + $0xf60] sm:$0xff]  ;;  %v1496_v33 = vld [vmem:[%s6806_s30 + $0xf90] sm:$0xff] }
 0x200   : > { %v5123_v43 = vpack.c.bf16 %v1449_v38, %v1443_v37  ;;  %v1682_v35 = vld [vmem:[%s6806_s30 + $0x1560] sm:$0xff]  ;;  %v1688_v36 = vld [vmem:[%s6806_s30 + $0x1590] sm:$0xff]  ;;  %v1503_v37 = vld [vmem:[%s6806_s30 + $0xfc8] sm:$0xff] }
 0x201   : > { %v1509_v38 = vld [vmem:[%s6806_s30 + $0xff8] sm:$0xff] }
 0x204   : > { %2862 = vmatmul.mubr.f32.vlgmr.msra.gmra.mrb[0].mxu0 %v7149_v31 }
 0x205   : > { %3075 = vmatmul.mubr.f32.vlgmr.msra.gmra.mrb[0].mxu1 %v7149_v31  ;;  %5106 = vmatpush1.bf16.xpose.msra.mxu0 %v5105_v48  ;;  %v1605_v31 = vld [vmem:[%s6806_s30 + $0x12f8] sm:$0xff]  ;;  %v1647_v48 = vld [vmem:[%s6806_s30 + $0x1448] sm:$0xff] }
 0x206   : > { %5298 = vmatpush1.bf16.xpose.msra.mxu1 %v5297_v50  ;;  %5108 = vmatprep.subr.bf16.mxu0 %v5107_v51  ;;  %v5303_v1 = vpack.c.bf16 %v1605_v31, %v1599_v60  ;;  %v5125_v50 = vpack.c.bf16 %v1448_v27, %v1442_v39  ;;  %v5317_v51 = vpack.c.bf16 %v1640_v45, %v1634_v44  ;;  %v1473_v60 = vld [vmem:[%s6806_s30 + $0xed8] sm:$0xff]  ;;  %v1659_v31 = vld [vmem:[%s6806_s30 + $0x14a8] sm:$0xff]  ;;  %v1502_v39 = vld [vmem:[%s6806_s30 + $0xfc0] sm:$0xff] }
 0x207   : > { %5300 = vmatprep.subr.bf16.mxu1 %v5299_v15  ;;  %3178 = vmatprep.mubr.f32.mxu0 %v3098_v61  ;;  %v5127_v15 = vpack.c.bf16 %v1461_v47, %v1455_v46  ;;  %v5319_v53 = vpack.c.bf16 %v1653_v49, %v1647_v48  ;;  %v1508_v27 = vld [vmem:[%s6806_s30 + $0xff0] sm:$0xff]  ;;  %v1694_v44 = vld [vmem:[%s6806_s30 + $0x15c0] sm:$0xff]  ;;  %v1515_v46 = vld [vmem:[%s6806_s30 + $0x1028] sm:$0xff] }
 0x208   : > { %3391 = vmatprep.mubr.f32.mxu1 %v3098_v61  ;;  %v1665_v61 = vld [vmem:[%s6806_s30 + $0x14d8] sm:$0xff]  ;;  %v1700_v45 = vld [vmem:[%s6806_s30 + $0x15f0] sm:$0xff]  ;;  %v1707_v48 = vld [vmem:[%s6806_s30 + $0x1628] sm:$0xff] }
 0x209   : > { %v1521_v47 = vld [vmem:[%s6806_s30 + $0x1058] sm:$0xff] }
 0x20a   : > { %v1713_v49 = vld [vmem:[%s6806_s30 + $0x1658] sm:$0xff] }
 0x20d   : > { %5110 = vmatpush1.bf16.xpose.msra.mxu0 %v5109_v62  ;;  %v5129_v62 = vpack.c.bf16 %v1460_v55, %v1454_v54  ;;  %v1514_v54 = vld [vmem:[%s6806_s30 + $0x1020] sm:$0xff]  ;;  %v1520_v55 = vld [vmem:[%s6806_s30 + $0x1050] sm:$0xff] }
 0x20e   : > { %5302 = vmatpush1.bf16.xpose.msra.mxu1 %v5301_v63  ;;  %5112 = vmatprep.subr.bf16.mxu0 %v5111_v0  ;;  %v5321_v63 = vpack.c.bf16 %v1652_v58, %v1646_v57  ;;  %v5131_v0 = vpack.c.bf16 %v1473_v60, %v1467_v59  ;;  %v1706_v57 = vld [vmem:[%s6806_s30 + $0x1620] sm:$0xff]  ;;  %v1712_v58 = vld [vmem:[%s6806_s30 + $0x1650] sm:$0xff]  ;;  %v1527_v59 = vld [vmem:[%s6806_s30 + $0x1088] sm:$0xff] }
 0x20f   : > { %5304 = vmatprep.subr.bf16.mxu1 %v5303_v1  ;;  %v5323_v1 = vpack.c.bf16 %v1665_v61, %v1659_v31  ;;  %v1533_v60 = vld [vmem:[%s6806_s30 + $0x10b8] sm:$0xff]  ;;  %v1719_v31 = vld [vmem:[%s6806_s30 + $0x1688] sm:$0xff] }
 0x210   : > { %v1725_v61 = vld [vmem:[%s6806_s30 + $0x16b8] sm:$0xff] }
 0x215   : > { %5114 = vmatpush1.bf16.xpose.msra.mxu0 %v5113_v11  ;;  %v5133_v11 = vpack.c.bf16 %v1472_v3, %v1466_v2  ;;  %v1526_v2 = vld [vmem:[%s6806_s30 + $0x1080] sm:$0xff]  ;;  %v1532_v3 = vld [vmem:[%s6806_s30 + $0x10b0] sm:$0xff] }
 0x216   : > { %5306 = vmatpush1.bf16.xpose.msra.mxu1 %v5305_v13  ;;  %5116 = vmatprep.subr.bf16.mxu0 %v5115_v14  ;;  %v5325_v13 = vpack.c.bf16 %v1664_v5, %v1658_v4  ;;  %v5135_v14 = vpack.c.bf16 %v1485_v7, %v1479_v6  ;;  %v1718_v4 = vld [vmem:[%s6806_s30 + $0x1680] sm:$0xff]  ;;  %v1724_v5 = vld [vmem:[%s6806_s30 + $0x16b0] sm:$0xff]  ;;  %v1539_v6 = vld [vmem:[%s6806_s30 + $0x10e8] sm:$0xff] }
 0x217   : > { %5308 = vmatprep.subr.bf16.mxu1 %v5307_v16  ;;  %v5327_v16 = vpack.c.bf16 %v1677_v9, %v1671_v8  ;;  %v1545_v7 = vld [vmem:[%s6806_s30 + $0x1118] sm:$0xff]  ;;  %v1731_v8 = vld [vmem:[%s6806_s30 + $0x16e8] sm:$0xff] }
 0x218   : > { %v1737_v9 = vld [vmem:[%s6806_s30 + $0x1718] sm:$0xff] }
 0x21d   : > { %5118 = vmatpush1.bf16.xpose.msra.mxu0 %v5117_v25  ;;  %v5137_v25 = vpack.c.bf16 %v1484_v18, %v1478_v17  ;;  %v1538_v17 = vld [vmem:[%s6806_s30 + $0x10e0] sm:$0xff]  ;;  %v1544_v18 = vld [vmem:[%s6806_s30 + $0x1110] sm:$0xff] }
 0x21e   : > { %5310 = vmatpush1.bf16.xpose.msra.mxu1 %v5309_v26  ;;  %5120 = vmatprep.subr.bf16.mxu0 %v5119_v29  ;;  %v5329_v26 = vpack.c.bf16 %v1676_v20, %v1670_v19  ;;  %v5139_v29 = vpack.c.bf16 %v1497_v22, %v1491_v21  ;;  %v1730_v19 = vld [vmem:[%s6806_s30 + $0x16e0] sm:$0xff]  ;;  %v1736_v20 = vld [vmem:[%s6806_s30 + $0x1710] sm:$0xff]  ;;  %v1551_v21 = vld [vmem:[%s6806_s30 + $0x1148] sm:$0xff] }
 0x21f   : > { %5312 = vmatprep.subr.bf16.mxu1 %v5311_v30  ;;  %v5331_v30 = vpack.c.bf16 %v1689_v24, %v1683_v23  ;;  %v1557_v22 = vld [vmem:[%s6806_s30 + $0x1178] sm:$0xff]  ;;  %v1743_v23 = vld [vmem:[%s6806_s30 + $0x1748] sm:$0xff] }
 0x220   : > { %v1749_v24 = vld [vmem:[%s6806_s30 + $0x1778] sm:$0xff] }
 0x225   : > { %5122 = vmatpush1.bf16.xpose.msra.mxu0 %v5121_v41  ;;  %v5141_v41 = vpack.c.bf16 %v1496_v33, %v1490_v32  ;;  %v1550_v32 = vld [vmem:[%s6806_s30 + $0x1140] sm:$0xff]  ;;  %v1556_v33 = vld [vmem:[%s6806_s30 + $0x1170] sm:$0xff] }
 0x226   : > { %5314 = vmatpush1.bf16.xpose.msra.mxu1 %v5313_v42  ;;  %5124 = vmatprep.subr.bf16.mxu0 %v5123_v43  ;;  %v5333_v42 = vpack.c.bf16 %v1688_v36, %v1682_v35  ;;  %v5143_v43 = vpack.c.bf16 %v1509_v38, %v1503_v37  ;;  %v1742_v35 = vld [vmem:[%s6806_s30 + $0x1740] sm:$0xff]  ;;  %v1748_v36 = vld [vmem:[%s6806_s30 + $0x1770] sm:$0xff]  ;;  %v1563_v37 = vld [vmem:[%s6806_s30 + $0x11a8] sm:$0xff] }
 0x227   : > { %5316 = vmatprep.subr.bf16.mxu1 %v5315_v12  ;;  %v5335_v12 = vpack.c.bf16 %v1701_v10, %v1695_v40  ;;  %v1569_v38 = vld [vmem:[%s6806_s30 + $0x11d8] sm:$0xff]  ;;  %v1755_v40 = vld [vmem:[%s6806_s30 + $0x17a8] sm:$0xff] }
 0x228   : > { %v1761_v10 = vld [vmem:[%s6806_s30 + $0x17d8] sm:$0xff] }
 0x22d   : > { %5126 = vmatpush1.bf16.xpose.msra.mxu0 %v5125_v50  ;;  %v5145_v50 = vpack.c.bf16 %v1508_v27, %v1502_v39  ;;  %v1562_v39 = vld [vmem:[%s6806_s30 + $0x11a0] sm:$0xff]  ;;  %v1568_v27 = vld [vmem:[%s6806_s30 + $0x11d0] sm:$0xff] }
 0x22e   : > { %5318 = vmatpush1.bf16.xpose.msra.mxu1 %v5317_v51  ;;  %5128 = vmatprep.subr.bf16.mxu0 %v5127_v15  ;;  %v5337_v51 = vpack.c.bf16 %v1700_v45, %v1694_v44  ;;  %v5147_v15 = vpack.c.bf16 %v1521_v47, %v1515_v46  ;;  %v1754_v44 = vld [vmem:[%s6806_s30 + $0x17a0] sm:$0xff]  ;;  %v1760_v45 = vld [vmem:[%s6806_s30 + $0x17d0] sm:$0xff]  ;;  %v1385_v46 = vld [vmem:[%s6806_s30 + $0xc18] sm:$0xff] }
 0x22f   : > { %5320 = vmatprep.subr.bf16.mxu1 %v5319_v53  ;;  %v5339_v53 = vpack.c.bf16 %v1713_v49, %v1707_v48  ;;  %v1391_v47 = vld [vmem:[%s6806_s30 + $0xc48] sm:$0xff]  ;;  %v1577_v48 = vld [vmem:[%s6806_s30 + $0x1218] sm:$0xff] }
 0x230   : > { %v1583_v49 = vld [vmem:[%s6806_s30 + $0x1248] sm:$0xff] }
 0x235   : > { %5130 = vmatpush1.bf16.xpose.msra.mxu0 %v5129_v62  ;;  %v5149_v62 = vpack.c.bf16 %v1520_v55, %v1514_v54  ;;  %v1384_v54 = vld [vmem:[%s6806_s30 + $0xc10] sm:$0xff]  ;;  %v1390_v55 = vld [vmem:[%s6806_s30 + $0xc40] sm:$0xff] }
 0x236   : > { %5322 = vmatpush1.bf16.xpose.msra.mxu1 %v5321_v63  ;;  %5132 = vmatprep.subr.bf16.mxu0 %v5131_v0  ;;  %v5341_v63 = vpack.c.bf16 %v1712_v58, %v1706_v57  ;;  %v5151_v0 = vpack.c.bf16 %v1533_v60, %v1527_v59  ;;  %v1576_v57 = vld [vmem:[%s6806_s30 + $0x1210] sm:$0xff]  ;;  %v3083_v58 = vcombine.high %v7300_v52, %v7300_v52  ;;  %v1582_v59 = vld [vmem:[%s6806_s30 + $0x1240] sm:$0xff]  ;;  %v1397_v60 = vld [vmem:[%s6806_s30 + $0xc78] sm:$0xff] }
 0x237   : > { %5324 = vmatprep.subr.bf16.mxu1 %v5323_v1  ;;  %v5343_v1 = vpack.c.bf16 %v1725_v61, %v1719_v31  ;;  %v1403_v31 = vld [vmem:[%s6806_s30 + $0xca8] sm:$0xff]  ;;  %v1589_v61 = vld [vmem:[%s6806_s30 + $0x1278] sm:$0xff] }
 0x23d   : > { %5134 = vmatpush1.bf16.xpose.msra.mxu0 %v5133_v11  ;;  %v5153_v11 = vpack.c.bf16 %v1532_v3, %v1526_v2  ;;  %v5171_v2 = vpack.c.bf16 %v1403_v31, %v1397_v60  ;;  %v1457_v60 = vld [vmem:[%s6806_s30 + $0xe58] sm:$0xff]  ;;  %v1463_v31 = vld [vmem:[%s6806_s30 + $0xe88] sm:$0xff] }
 0x23e   : > { %5326 = vmatpush1.bf16.xpose.msra.mxu1 %v5325_v13  ;;  %5136 = vmatprep.subr.bf16.mxu0 %v5135_v14  ;;  %v5345_v13 = vpack.c.bf16 %v1724_v5, %v1718_v4  ;;  %v5155_v14 = vpack.c.bf16 %v1545_v7, %v1539_v6  ;;  %v1396_v4 = vld [vmem:[%s6806_s30 + $0xc70] sm:$0xff]  ;;  %v1402_v5 = vld [vmem:[%s6806_s30 + $0xca0] sm:$0xff] }
 0x23f   : > { %5328 = vmatprep.subr.bf16.mxu1 %v5327_v16  ;;  %v5347_v16 = vpack.c.bf16 %v1737_v9, %v1731_v8  ;;  %v1588_v6 = vld [vmem:[%s6806_s30 + $0x1270] sm:$0xff]  ;;  %v1594_v7 = vld [vmem:[%s6806_s30 + $0x12a0] sm:$0xff]  ;;  %v1409_v8 = vld [vmem:[%s6806_s30 + $0xcd8] sm:$0xff] }
 0x240   : > { %v1415_v9 = vld [vmem:[%s6806_s30 + $0xd08] sm:$0xff] }
 0x245   : > { %5138 = vmatpush1.bf16.xpose.msra.mxu0 %v5137_v25  ;;  %v5157_v25 = vpack.c.bf16 %v1544_v18, %v1538_v17  ;;  %v1408_v18 = vld [vmem:[%s6806_s30 + $0xcd0] sm:$0xff] }
 0x246   : > { %5330 = vmatpush1.bf16.xpose.msra.mxu1 %v5329_v26  ;;  %5140 = vmatprep.subr.bf16.mxu0 %v5139_v29  ;;  %v5349_v26 = vpack.c.bf16 %v1736_v20, %v1730_v19  ;;  %v5159_v29 = vpack.c.bf16 %v1557_v22, %v1551_v21  ;;  %v1414_v19 = vld [vmem:[%s6806_s30 + $0xd00] sm:$0xff]  ;;  %v1600_v20 = vld [vmem:[%s6806_s30 + $0x12d0] sm:$0xff]  ;;  %v1421_v22 = vld [vmem:[%s6806_s30 + $0xd38] sm:$0xff] }
 0x247   : > { %5332 = vmatprep.subr.bf16.mxu1 %v5331_v30  ;;  %v5351_v30 = vpack.c.bf16 %v1749_v24, %v1743_v23  ;;  %v1606_v21 = vld [vmem:[%s6806_s30 + $0x1300] sm:$0xff]  ;;  %v1427_v23 = vld [vmem:[%s6806_s30 + $0xd68] sm:$0xff]  ;;  %v1613_v24 = vld [vmem:[%s6806_s30 + $0x1338] sm:$0xff] }
 0x24d   : > { %5142 = vmatpush1.bf16.xpose.msra.mxu0 %v5141_v41  ;;  %v5161_v41 = vpack.c.bf16 %v1556_v33, %v1550_v32  ;;  %v1420_v33 = vld [vmem:[%s6806_s30 + $0xd30] sm:$0xff] }
 0x24e   : > { %5334 = vmatpush1.bf16.xpose.msra.mxu1 %v5333_v42  ;;  %5144 = vmatprep.subr.bf16.mxu0 %v5143_v43  ;;  %v5353_v42 = vpack.c.bf16 %v1748_v36, %v1742_v35  ;;  %v5163_v43 = vpack.c.bf16 %v1569_v38, %v1563_v37  ;;  %v1426_v35 = vld [vmem:[%s6806_s30 + $0xd60] sm:$0xff]  ;;  %v1612_v36 = vld [vmem:[%s6806_s30 + $0x1330] sm:$0xff]  ;;  %v1433_v38 = vld [vmem:[%s6806_s30 + $0xd98] sm:$0xff] }
 0x24f   : > { %5336 = vmatprep.subr.bf16.mxu1 %v5335_v12  ;;  %v5355_v12 = vpack.c.bf16 %v1761_v10, %v1755_v40  ;;  %v1618_v37 = vld [vmem:[%s6806_s30 + $0x1360] sm:$0xff]  ;;  %v1439_v40 = vld [vmem:[%s6806_s30 + $0xdc8] sm:$0xff]  ;;  %v1625_v10 = vld [vmem:[%s6806_s30 + $0x1398] sm:$0xff] }
 0x255   : > { %5146 = vmatpush1.bf16.xpose.msra.mxu0 %v5145_v50  ;;  %v5165_v50 = vpack.c.bf16 %v1568_v27, %v1562_v39  ;;  %v1432_v27 = vld [vmem:[%s6806_s30 + $0xd90] sm:$0xff] }
 0x256   : > { %5338 = vmatpush1.bf16.xpose.msra.mxu1 %v5337_v51  ;;  %5148 = vmatprep.subr.bf16.mxu0 %v5147_v15  ;;  %v5357_v51 = vpack.c.bf16 %v1760_v45, %v1754_v44  ;;  %v5167_v15 = vpack.c.bf16 %v1391_v47, %v1385_v46  ;;  %v1438_v44 = vld [vmem:[%s6806_s30 + $0xdc0] sm:$0xff]  ;;  %v1624_v45 = vld [vmem:[%s6806_s30 + $0x1390] sm:$0xff]  ;;  %v1445_v47 = vld [vmem:[%s6806_s30 + $0xdf8] sm:$0xff] }
 0x257   : > { %5340 = vmatprep.subr.bf16.mxu1 %v5339_v53  ;;  %v5359_v53 = vpack.c.bf16 %v1583_v49, %v1577_v48  ;;  %v1630_v46 = vld [vmem:[%s6806_s30 + $0x13c0] sm:$0xff]  ;;  %v1451_v48 = vld [vmem:[%s6806_s30 + $0xe28] sm:$0xff]  ;;  %v1637_v49 = vld [vmem:[%s6806_s30 + $0x13f8] sm:$0xff] }
 0x25d   : > { %5150 = vmatpush1.bf16.xpose.msra.mxu0 %v5149_v62  ;;  %v1595_v62 = vld [vmem:[%s6806_s30 + $0x12a8] sm:$0xff] }
 0x25e   : > { %5342 = vmatpush1.bf16.xpose.msra.mxu1 %v5341_v63  ;;  %5152 = vmatprep.subr.bf16.mxu0 %v5151_v0  ;;  %v7440_v63 = vrot.slane %v3083_v58, %v6911_v34  ;;  %v5169_v0 = vpack.c.bf16 %v1390_v55, %v1384_v54  ;;  %v5363_v52 = vpack.c.bf16 %v1595_v62, %v1589_v61  ;;  %v1444_v55 = vld [vmem:[%s6806_s30 + $0xdf0] sm:$0xff]  ;;  %v1649_v61 = vld [vmem:[%s6806_s30 + $0x1458] sm:$0xff]  ;;  %v1655_v62 = vld [vmem:[%s6806_s30 + $0x1488] sm:$0xff] }
 0x25f   : > { %5344 = vmatprep.subr.bf16.mxu1 %v5343_v1  ;;  %v5361_v1 = vpack.c.bf16 %v1582_v59, %v1576_v57  ;;  %v1450_v57 = vld [vmem:[%s6806_s30 + $0xe20] sm:$0xff]  ;;  %v1636_v58 = vld [vmem:[%s6806_s30 + $0x13f0] sm:$0xff] }
 0x260   : > { %v3099_v3 = vcombine.high %v7440_v63, %v7440_v63  ;;  %v1642_v59 = vld [vmem:[%s6806_s30 + $0x1420] sm:$0xff] }
 0x265   : > { %5154 = vmatpush1.bf16.xpose.msra.mxu0 %v5153_v11  ;;  %v1601_v11 = vld [vmem:[%s6806_s30 + $0x12d8] sm:$0xff] }
 0x266   : > { %5346 = vmatpush1.bf16.xpose.msra.mxu1 %v5345_v13  ;;  %5156 = vmatprep.subr.bf16.mxu0 %v5155_v14  ;;  %v1607_v13 = vld [vmem:[%s6806_s30 + $0x1308] sm:$0xff]  ;;  %v5365_v14 = vpack.c.bf16 %v1594_v7, %v1588_v6  ;;  %v1654_v6 = vld [vmem:[%s6806_s30 + $0x1480] sm:$0xff]  ;;  %v1469_v7 = vld [vmem:[%s6806_s30 + $0xeb8] sm:$0xff] }
 0x267   : > { %5348 = vmatprep.subr.bf16.mxu1 %v5347_v16  ;;  %v5175_v16 = vpack.c.bf16 %v1415_v9, %v1409_v8  ;;  %v5367_v17 = vpack.c.bf16 %v1607_v13, %v1601_v11  ;;  %v1475_v8 = vld [vmem:[%s6806_s30 + $0xee8] sm:$0xff]  ;;  %v1661_v9 = vld [vmem:[%s6806_s30 + $0x14b8] sm:$0xff] }
 0x268   : > { %v1667_v11 = vld [vmem:[%s6806_s30 + $0x14e8] sm:$0xff] }
 0x26d   : > { %5158 = vmatpush1.bf16.xpose.msra.mxu0 %v5157_v25  ;;  %v1619_v25 = vld [vmem:[%s6806_s30 + $0x1368] sm:$0xff] }
 0x26e   : > { %5350 = vmatpush1.bf16.xpose.msra.mxu1 %v5349_v26  ;;  %5160 = vmatprep.subr.bf16.mxu0 %v5159_v29  ;;  %v5177_v26 = vpack.c.bf16 %v1414_v19, %v1408_v18  ;;  %v5369_v29 = vpack.c.bf16 %v1606_v21, %v1600_v20  ;;  %v5371_v32 = vpack.c.bf16 %v1619_v25, %v1613_v24  ;;  %v1474_v18 = vld [vmem:[%s6806_s30 + $0xee0] sm:$0xff]  ;;  %v1660_v19 = vld [vmem:[%s6806_s30 + $0x14b0] sm:$0xff]  ;;  %v1481_v21 = vld [vmem:[%s6806_s30 + $0xf18] sm:$0xff] }
 0x26f   : > { %5352 = vmatprep.subr.bf16.mxu1 %v5351_v30  ;;  %v5179_v30 = vpack.c.bf16 %v1427_v23, %v1421_v22  ;;  %v1666_v20 = vld [vmem:[%s6806_s30 + $0x14e0] sm:$0xff]  ;;  %v1487_v22 = vld [vmem:[%s6806_s30 + $0xf48] sm:$0xff]  ;;  %v1673_v23 = vld [vmem:[%s6806_s30 + $0x1518] sm:$0xff] }
 0x270   : > { %v1679_v24 = vld [vmem:[%s6806_s30 + $0x1548] sm:$0xff] }
 0x275   : > { %5162 = vmatpush1.bf16.xpose.msra.mxu0 %v5161_v41  ;;  %v1631_v41 = vld [vmem:[%s6806_s30 + $0x13c8] sm:$0xff] }
 0x276   : > { %5354 = vmatpush1.bf16.xpose.msra.mxu1 %v5353_v42  ;;  %5164 = vmatprep.subr.bf16.mxu0 %v5163_v43  ;;  %v5181_v42 = vpack.c.bf16 %v1426_v35, %v1420_v33  ;;  %v5373_v43 = vpack.c.bf16 %v1618_v37, %v1612_v36  ;;  %v5375_v39 = vpack.c.bf16 %v1631_v41, %v1625_v10  ;;  %v1486_v33 = vld [vmem:[%s6806_s30 + $0xf40] sm:$0xff]  ;;  %v1672_v35 = vld [vmem:[%s6806_s30 + $0x1510] sm:$0xff]  ;;  %v1493_v37 = vld [vmem:[%s6806_s30 + $0xf78] sm:$0xff] }
 0x277   : > { %5356 = vmatprep.subr.bf16.mxu1 %v5355_v12  ;;  %v5183_v12 = vpack.c.bf16 %v1439_v40, %v1433_v38  ;;  %v1678_v36 = vld [vmem:[%s6806_s30 + $0x1540] sm:$0xff]  ;;  %v1499_v38 = vld [vmem:[%s6806_s30 + $0xfa8] sm:$0xff]  ;;  %v1685_v40 = vld [vmem:[%s6806_s30 + $0x1578] sm:$0xff] }
 0x278   : > { %v1691_v10 = vld [vmem:[%s6806_s30 + $0x15a8] sm:$0xff] }
 0x27d   : > { %5166 = vmatpush1.bf16.xpose.msra.mxu0 %v5165_v50  ;;  %v1643_v50 = vld [vmem:[%s6806_s30 + $0x1428] sm:$0xff] }
 0x27e   : > { %5358 = vmatpush1.bf16.xpose.msra.mxu1 %v5357_v51  ;;  %5168 = vmatprep.subr.bf16.mxu0 %v5167_v15  ;;  %v5185_v51 = vpack.c.bf16 %v1438_v44, %v1432_v27  ;;  %v5377_v15 = vpack.c.bf16 %v1630_v46, %v1624_v45  ;;  %v5379_v54 = vpack.c.bf16 %v1643_v50, %v1637_v49  ;;  %v1498_v27 = vld [vmem:[%s6806_s30 + $0xfa0] sm:$0xff]  ;;  %v1684_v44 = vld [vmem:[%s6806_s30 + $0x1570] sm:$0xff]  ;;  %v1505_v46 = vld [vmem:[%s6806_s30 + $0xfd8] sm:$0xff] }
 0x27f   : > { %5360 = vmatprep.subr.bf16.mxu1 %v5359_v53  ;;  %v5187_v53 = vpack.c.bf16 %v1451_v48, %v1445_v47  ;;  %v1690_v45 = vld [vmem:[%s6806_s30 + $0x15a0] sm:$0xff]  ;;  %v1511_v47 = vld [vmem:[%s6806_s30 + $0x1008] sm:$0xff]  ;;  %v1697_v48 = vld [vmem:[%s6806_s30 + $0x15d8] sm:$0xff] }
 0x280   : > { %v1703_v49 = vld [vmem:[%s6806_s30 + $0x1608] sm:$0xff] }
 0x284   : > { %3179 = vmatmul.mubr.f32.vlgmr.msra.gmra.mrb[2].mxu0 %v7308_v56 }
 0x285   : > { %5170 = vmatpush1.bf16.xpose.msra.mxu0 %v5169_v0  ;;  %3392 = vmatmul.mubr.f32.vlgmr.msra.gmra.mrb[2].mxu1 %v7308_v56  ;;  %v5173_v56 = vpack.c.bf16 %v1402_v5, %v1396_v4  ;;  %v5189_v0 = vpack.c.bf16 %v1450_v57, %v1444_v55  ;;  %v1462_v4 = vld [vmem:[%s6806_s30 + $0xe80] sm:$0xff]  ;;  %v1648_v5 = vld [vmem:[%s6806_s30 + $0x1450] sm:$0xff] }
 0x286   : > { %5362 = vmatpush1.bf16.xpose.msra.mxu1 %v5361_v1  ;;  %5172 = vmatprep.subr.bf16.mxu0 %v5171_v2  ;;  %v5381_v1 = vpack.c.bf16 %v1642_v59, %v1636_v58  ;;  %v5191_v2 = vpack.c.bf16 %v1463_v31, %v1457_v60  ;;  %v1510_v55 = vld [vmem:[%s6806_s30 + $0x1000] sm:$0xff]  ;;  %v1696_v57 = vld [vmem:[%s6806_s30 + $0x15d0] sm:$0xff]  ;;  %v1517_v59 = vld [vmem:[%s6806_s30 + $0x1038] sm:$0xff]  ;;  %v7526_v31 = vsub.s32 0, %v6886_v28 }
 0x287   : > { %5364 = vmatprep.subr.bf16.mxu1 %v5363_v52  ;;  %3249 = vmatprep.mubr.f32.mxu0 %v3099_v3  ;;  %v5383_v52 = vpack.c.bf16 %v1655_v62, %v1649_v61  ;;  %v1702_v58 = vld [vmem:[%s6806_s30 + $0x1600] sm:$0xff]  ;;  %v1523_v60 = vld [vmem:[%s6806_s30 + $0x1068] sm:$0xff]  ;;  %v1709_v61 = vld [vmem:[%s6806_s30 + $0x1638] sm:$0xff] }
 0x288   : > { %3462 = vmatprep.mubr.f32.mxu1 %v3099_v3  ;;  %v1456_v3 = vld [vmem:[%s6806_s30 + $0xe50] sm:$0xff]  ;;  %v1715_v62 = vld [vmem:[%s6806_s30 + $0x1668] sm:$0xff] }
 0x289   : > { %v5193_v13 = vpack.c.bf16 %v1462_v4, %v1456_v3  ;;  %v5401_v3 = vpack.c.bf16 %v1702_v58, %v1696_v57  ;;  %v7540_v4 = vsub.s32 3, %v6886_v28 }
 0x28d   : > { %5174 = vmatpush1.bf16.xpose.msra.mxu0 %v5173_v56  ;;  %v5385_v56 = vpack.c.bf16 %v1654_v6, %v1648_v5  ;;  %v5211_v5 = vpack.c.bf16 %v1523_v60, %v1517_v59  ;;  %v5403_v6 = vpack.c.bf16 %v1715_v62, %v1709_v61 }
 0x28e   : > { %5366 = vmatpush1.bf16.xpose.msra.mxu1 %v5365_v14  ;;  %5176 = vmatprep.subr.bf16.mxu0 %v5175_v16  ;;  %v5195_v14 = vpack.c.bf16 %v1475_v8, %v1469_v7  ;;  %v5387_v16 = vpack.c.bf16 %v1667_v11, %v1661_v9 }
 0x28f   : > { %5368 = vmatprep.subr.bf16.mxu1 %v5367_v17  ;;  %v1468_v17 = vld [vmem:[%s6806_s30 + $0xeb0] sm:$0xff] }
 0x290   : > { %v5197_v25 = vpack.c.bf16 %v1474_v18, %v1468_v17  ;;  %v1529_v17 = vld [vmem:[%s6806_s30 + $0x1098] sm:$0xff]  ;;  %v1535_v18 = vld [vmem:[%s6806_s30 + $0x10c8] sm:$0xff] }
 0x295   : > { %5178 = vmatpush1.bf16.xpose.msra.mxu0 %v5177_v26  ;;  %v5389_v26 = vpack.c.bf16 %v1666_v20, %v1660_v19 }
 0x296   : > { %5370 = vmatpush1.bf16.xpose.msra.mxu1 %v5369_v29  ;;  %5180 = vmatprep.subr.bf16.mxu0 %v5179_v30  ;;  %v5199_v29 = vpack.c.bf16 %v1487_v22, %v1481_v21  ;;  %v5391_v30 = vpack.c.bf16 %v1679_v24, %v1673_v23  ;;  %v1721_v22 = vld [vmem:[%s6806_s30 + $0x1698] sm:$0xff]  ;;  %v1727_v23 = vld [vmem:[%s6806_s30 + $0x16c8] sm:$0xff] }
 0x297   : > { %5372 = vmatprep.subr.bf16.mxu1 %v5371_v32  ;;  %v1480_v32 = vld [vmem:[%s6806_s30 + $0xf10] sm:$0xff] }
 0x298   : > { %v5201_v41 = vpack.c.bf16 %v1486_v33, %v1480_v32  ;;  %v5215_v33 = vpack.c.bf16 %v1535_v18, %v1529_v17 }
 0x29d   : > { %5182 = vmatpush1.bf16.xpose.msra.mxu0 %v5181_v42  ;;  %v5393_v42 = vpack.c.bf16 %v1678_v36, %v1672_v35  ;;  %v5407_v36 = vpack.c.bf16 %v1727_v23, %v1721_v22 }
 0x29e   : > { %5374 = vmatpush1.bf16.xpose.msra.mxu1 %v5373_v43  ;;  %5184 = vmatprep.subr.bf16.mxu0 %v5183_v12  ;;  %v5203_v43 = vpack.c.bf16 %v1499_v38, %v1493_v37  ;;  %v5395_v12 = vpack.c.bf16 %v1691_v10, %v1685_v40  ;;  %v1528_v40 = vld [vmem:[%s6806_s30 + $0x1090] sm:$0xff] }
 0x29f   : > { %5376 = vmatprep.subr.bf16.mxu1 %v5375_v39  ;;  %v1492_v39 = vld [vmem:[%s6806_s30 + $0xf70] sm:$0xff] }
 0x2a0   : > { %v5205_v50 = vpack.c.bf16 %v1498_v27, %v1492_v39  ;;  %v323_v10 = vld [vmem:[%s6798_s8 + $0xb0] sm:$0xff]  ;;  %v1726_v39 = vld [vmem:[%s6806_s30 + $0x16c0] sm:$0xff] }
 0x2a1   : > { %v489_v27 = vrot.slane %v323_v10, 4 }
 0x2a5   : > { %5186 = vmatpush1.bf16.xpose.msra.mxu0 %v5185_v51  ;;  %v5397_v51 = vpack.c.bf16 %v1690_v45, %v1684_v44  ;;  %v1541_v45 = vld [vmem:[%s6806_s30 + $0x10f8] sm:$0xff] }
 0x2a6   : > { %5378 = vmatpush1.bf16.xpose.msra.mxu1 %v5377_v15  ;;  %5188 = vmatprep.subr.bf16.mxu0 %v5187_v53  ;;  %v5207_v15 = vpack.c.bf16 %v1511_v47, %v1505_v46  ;;  %v5399_v53 = vpack.c.bf16 %v1703_v49, %v1697_v48  ;;  %v1547_v46 = vld [vmem:[%s6806_s30 + $0x1128] sm:$0xff]  ;;  %v1733_v47 = vld [vmem:[%s6806_s30 + $0x16f8] sm:$0xff] }
 0x2a7   : > { %5380 = vmatprep.subr.bf16.mxu1 %v5379_v54  ;;  %v1504_v54 = vld [vmem:[%s6806_s30 + $0xfd0] sm:$0xff]  ;;  %v1739_v49 = vld [vmem:[%s6806_s30 + $0x1728] sm:$0xff]  ;;  %v5219_v59 = vpack.c.bf16 %v1547_v46, %v1541_v45 }
 0x2a8   : > { %v5411_v61 = vpack.c.bf16 %v1739_v49, %v1733_v47 }
 0x2ad   : > { %5190 = vmatpush1.bf16.xpose.msra.mxu0 %v5189_v0  ;;  %v5209_v0 = vpack.c.bf16 %v1510_v55, %v1504_v54 }
 0x2ae   : > { %5382 = vmatpush1.bf16.xpose.msra.mxu1 %v5381_v1  ;;  %5192 = vmatprep.subr.bf16.mxu0 %v5191_v2  ;;  %v2534_v1 = vld [vmem:[%s7530_s23] sm:$0xf]  ;;  %v7534_v2 = vsub.s32 2, %v6886_v28 }
 0x2af   : > { %5384 = vmatprep.subr.bf16.mxu1 %v5383_v52  ;;  %v7537_v52 = vsub.s32 1, %v6886_v28  ;;  %v2545_v7 = vrot.slane %v2534_v1, %v7526_v31  ;;  %v2557_v11 = vrot.slane %v2534_v1, %v7540_v4  ;;  %v1522_v28 = vld [vmem:[%s6806_s30 + $0x1060] sm:$0xff] }
 0x2b0   : > { %v2553_v8 = vrot.slane %v2534_v1, %v7534_v2 }
 0x2b1   : > { %v2549_v9 = vrot.slane %v2534_v1, %v7537_v52 }
 0x2b5   : > { %5194 = vmatpush1.bf16.xpose.msra.mxu0 %v5193_v13  ;;  %v1516_v13 = vld [vmem:[%s6806_s30 + $0x1030] sm:$0xff] }
 0x2b6   : > { %5386 = vmatpush1.bf16.xpose.msra.mxu1 %v5385_v56  ;;  %5196 = vmatprep.subr.bf16.mxu0 %v5195_v14  ;;  %v1708_v56 = vld [vmem:[%s6806_s30 + $0x1630] sm:$0xff] }
 0x2b7   : > { %5388 = vmatprep.subr.bf16.mxu1 %v5387_v16  ;;  %v1714_v16 = vld [vmem:[%s6806_s30 + $0x1660] sm:$0xff] }
 0x2b8   : > { %v5405_v32 = vpack.c.bf16 %v1714_v16, %v1708_v56  ;;  %v1553_v56 = vld [vmem:[%s6806_s30 + $0x1158] sm:$0xff] }
 0x2bd   : > { %5198 = vmatpush1.bf16.xpose.msra.mxu0 %v5197_v25 }
 0x2be   : > { %5390 = vmatpush1.bf16.xpose.msra.mxu1 %v5389_v26  ;;  %5200 = vmatprep.subr.bf16.mxu0 %v5199_v29  ;;  %v5213_v29 = vpack.c.bf16 %v1522_v28, %v1516_v13  ;;  %v1738_v28 = vld [vmem:[%s6806_s30 + $0x1720] sm:$0xff] }
 0x2bf   : > { %5392 = vmatprep.subr.bf16.mxu1 %v5391_v30 }
 0x2c5   : > { %5202 = vmatpush1.bf16.xpose.msra.mxu0 %v5201_v41  ;;  %v324_v41 = vld [vmem:[%s6798_s8 + $0xb8] sm:$0xff] }
 0x2c6   : > { %5394 = vmatpush1.bf16.xpose.msra.mxu1 %v5393_v42  ;;  %5204 = vmatprep.subr.bf16.mxu0 %v5203_v43  ;;  %v1534_v43 = vld [vmem:[%s6806_s30 + $0x10c0] sm:$0xff]  ;;  %v495_v44 = vrot.slane %v324_v41, 4 }
 0x2c7   : > { %5396 = vmatprep.subr.bf16.mxu1 %v5395_v12  ;;  %v1720_v12 = vld [vmem:[%s6806_s30 + $0x1690] sm:$0xff] }
 0x2c8   : > { %v496_v57 = vadd.f32 %v495_v44, %v324_v41  ;;  %v5409_v58 = vpack.c.bf16 %v1726_v39, %v1720_v12  ;;  %v1750_v41 = vld [vmem:[%s6806_s30 + $0x1780] sm:$0xff]  ;;  %v1763_v44 = vld [vmem:[%s6806_s30 + $0x17e8] sm:$0xff] }
 0x2ca   : > { %v497_v1 = vrot.slane %v496_v57, 2 }
 0x2cd   : > { %5206 = vmatpush1.bf16.xpose.msra.mxu0 %v5205_v50  ;;  %v317_v50 = vld [vmem:[%s6798_s8 + $0x80] sm:$0xff] }
 0x2ce   : > { %5398 = vmatpush1.bf16.xpose.msra.mxu1 %v5397_v51  ;;  %5208 = vmatprep.subr.bf16.mxu0 %v5207_v15  ;;  %v318_v51 = vld [vmem:[%s6798_s8 + $0x88] sm:$0xff]  ;;  %v490_v15 = vadd.f32 %v489_v27, %v323_v10  ;;  %v453_v54 = vrot.slane %v317_v50, 4  ;;  %v1744_v10 = vld [vmem:[%s6806_s30 + $0x1750] sm:$0xff]  ;;  %v1757_v27 = vld [vmem:[%s6806_s30 + $0x17b8] sm:$0xff] }
 0x2cf   : > { %5400 = vmatprep.subr.bf16.mxu1 %v5399_v53  ;;  %v5217_v53 = vpack.c.bf16 %v1534_v43, %v1528_v40  ;;  %v459_v55 = vrot.slane %v318_v51, 4  ;;  %v1558_v40 = vld [vmem:[%s6806_s30 + $0x1180] sm:$0xff]  ;;  %v1571_v43 = vld [vmem:[%s6806_s30 + $0x11e8] sm:$0xff]  ;;  %v5417_v47 = vpack.c.bf16 %v1750_v41, %v1744_v10  ;;  %v1416_v10 = vld [vmem:[%s6806_s30 + $0xd10] sm:$0xff] }
 0x2d0   : > { %v491_v60 = vrot.slane %v490_v15, 2  ;;  %v454_v62 = vadd.f32 %v453_v54, %v317_v50  ;;  %v5419_v50 = vpack.c.bf16 %v1763_v44, %v1757_v27  ;;  %v1602_v41 = vld [vmem:[%s6806_s30 + $0x12e0] sm:$0xff]  ;;  %v1621_v27 = vld [vmem:[%s6806_s30 + $0x1378] sm:$0xff] }
 0x2d5   : > { %5210 = vmatpush1.bf16.xpose.msra.mxu0 %v5209_v0  ;;  %v460_v0 = vadd.f32 %v459_v55, %v318_v51  ;;  %v352_v51 = vld [vmem:[#allocation2 + $0x14] sm:$0xf]  ;;  %v1564_v55 = vld [vmem:[%s6806_s30 + $0x11b0] sm:$0xff] }
 0x2d6   : > { %5402 = vmatpush1.bf16.xpose.msra.mxu1 %v5401_v3  ;;  %5212 = vmatprep.subr.bf16.mxu0 %v5211_v5  ;;  %v492_v3 = vadd.f32 %v491_v60, %v490_v15  ;;  %v455_v5 = vrot.slane %v454_v62, 2  ;;  %v1387_v60 = vld [vmem:[%s6806_s30 + $0xc28] sm:$0xff] }
 0x2d7   : > { %v2863_v14 = vpop.f32.mrb[0].mxu0  ;;  %5404 = vmatprep.subr.bf16.mxu1 %v5403_v6  ;;  %v461_v6 = vrot.slane %v460_v0, 2 }
 0x2d8   : > { %v6255_v19 = vadd.f32 %v2863_v14, %v2545_v7  ;;  %v3076_v20 = vpop.f32.mrb[0].mxu1  ;;  %v2865_v21 = vpop.f32.mrb[1].mxu0  ;;  %v498_v7 = vadd.f32 %v497_v1, %v496_v57  ;;  %v493_v13 = vrot.slane %v492_v3, 1  ;;  %v1559_v14 = vld [vmem:[%s6806_s30 + $0x1188] sm:$0xff]  ;;  %v456_v16 = vadd.f32 %v455_v5, %v454_v62  ;;  %v1570_v57 = vld [vmem:[%s6806_s30 + $0x11e0] sm:$0xff] }
 0x2d9   : > { %v6257_v24 = vadd.f32 %v3076_v20, %v2553_v8  ;;  %v6256_v25 = vadd.f32 %v2865_v21, %v2549_v9  ;;  %v3078_v26 = vpop.f32.mrb[1].mxu1  ;;  %v1540_v8 = vld [vmem:[%s6806_s30 + $0x10f0] sm:$0xff]  ;;  %v1546_v9 = vld [vmem:[%s6806_s30 + $0x1120] sm:$0xff]  ;;  %v462_v17 = vadd.f32 %v461_v6, %v460_v0  ;;  %v1751_v20 = vld [vmem:[%s6806_s30 + $0x1788] sm:$0xff]  ;;  %v5229_v1 = vpack.c.bf16 %v1570_v57, %v1564_v55 }
 0x2da   : > { %v6258_v30 = vadd.f32 %v3078_v26, %v2557_v11  ;;  %v1732_v11 = vld [vmem:[%s6806_s30 + $0x16f0] sm:$0xff]  ;;  %v499_v18 = vrot.slane %v498_v7, 1  ;;  %v494_v21 = vadd.f32 %v493_v13, %v492_v3  ;;  %v5221_v22 = vpack.c.bf16 %v1546_v9, %v1540_v8  ;;  %v1579_v62 = vld [vmem:[%s6806_s30 + $0x1228] sm:$0xff]  ;;  %v1585_v0 = vld [vmem:[%s6806_s30 + $0x1258] sm:$0xff] }
 0x2db   : > { %v4474_v35 = vcombine.low %v6255_v19, %v6256_v25  ;;  %v1745_v19 = vld [vmem:[%s6806_s30 + $0x1758] sm:$0xff]  ;;  %v457_v23 = vrot.slane %v456_v16, 1  ;;  %v5413_v26 = vpack.c.bf16 %v1738_v28, %v1732_v11  ;;  %v5423_v6 = vpack.c.bf16 %v1585_v0, %v1579_v62  ;;  %v1392_v8 = vld [vmem:[%s6806_s30 + $0xc50] sm:$0xff]  ;;  %v1578_v9 = vld [vmem:[%s6806_s30 + $0x1220] sm:$0xff] }
 0x2dc   : > { %v4475_v37 = vcombine.low %v6257_v24, %v6258_v30  ;;  %v463_v24 = vrot.slane %v462_v17, 1  ;;  %v500_v25 = vadd.f32 %v499_v18, %v498_v7  ;;  %v5415_v30 = vpack.c.bf16 %v1751_v20, %v1745_v19  ;;  %v1386_v7 = vld [vmem:[%s6806_s30 + $0xc20] sm:$0xff]  ;;  %v1584_v13 = vld [vmem:[%s6806_s30 + $0x1250] sm:$0xff]  ;;  %v1399_v28 = vld [vmem:[%s6806_s30 + $0xc88] sm:$0xff] }
 0x2dd   : > { %v4482_v38 = vrot.slane %v4474_v35, %v6911_v34  ;;  %5214 = vmatpush1.bf16.xpose.msra.mxu0 %v5213_v29  ;;  %v5223_v29 = vpack.c.bf16 %v1559_v14, %v1553_v56  ;;  %v1405_v56 = vld [vmem:[%s6806_s30 + $0xcb8] sm:$0xff]  ;;  %v5233_v18 = vpack.c.bf16 %v1392_v8, %v1386_v7  ;;  %v5425_v20 = vpack.c.bf16 %v1584_v13, %v1578_v9  ;;  %v1440_v62 = vld [vmem:[%s6806_s30 + $0xdd0] sm:$0xff]  ;;  %v1626_v0 = vld [vmem:[%s6806_s30 + $0x13a0] sm:$0xff] }
 0x2de   : > { %v4489_v42 = vrot.slane %v4475_v37, %v6911_v34  ;;  %5406 = vmatpush1.bf16.xpose.msra.mxu1 %v5405_v32  ;;  %5216 = vmatprep.subr.bf16.mxu0 %v5215_v33  ;;  %v458_v32 = vadd.f32 %v457_v23, %v456_v16  ;;  %v464_v33 = vadd.f32 %v463_v24, %v462_v17  ;;  %v1591_v16 = vld [vmem:[%s6806_s30 + $0x1288] sm:$0xff]  ;;  %v1597_v17 = vld [vmem:[%s6806_s30 + $0x12b8] sm:$0xff]  ;;  %v1398_v24 = vld [vmem:[%s6806_s30 + $0xc80] sm:$0xff] }
 0x2df   : > { %5408 = vmatprep.subr.bf16.mxu1 %v5407_v36  ;;  %v785_v35 = vcombine.low %v494_v21, %v500_v25  ;;  %v5235_v21 = vpack.c.bf16 %v1405_v56, %v1399_v28  ;;  %v1404_v25 = vld [vmem:[%s6806_s30 + $0xcb0] sm:$0xff]  ;;  %v1633_v55 = vld [vmem:[%s6806_s30 + $0x13d8] sm:$0xff]  ;;  %v1446_v28 = vld [vmem:[%s6806_s30 + $0xe00] sm:$0xff] }
 0x2e0   : > { %v4490_v48 = vcombine.low %v4482_v38, %v4489_v42  ;;  %v760_v36 = vcombine.low %v458_v32, %v464_v33  ;;  %v1552_v38 = vld [vmem:[%s6806_s30 + $0x1150] sm:$0xff]  ;;  %v1565_v42 = vld [vmem:[%s6806_s30 + $0x11b8] sm:$0xff]  ;;  %v1603_v33 = vld [vmem:[%s6806_s30 + $0x12e8] sm:$0xff] }
 0x2e1   : > { %v792_v37 = vrot.slane %v785_v35, %v6911_v34  ;;  %v5225_v45 = vpack.c.bf16 %v1558_v40, %v1552_v38  ;;  %v1417_v32 = vld [vmem:[%s6806_s30 + $0xd18] sm:$0xff]  ;;  %v1410_v40 = vld [vmem:[%s6806_s30 + $0xce0] sm:$0xff]  ;;  %v1452_v56 = vld [vmem:[%s6806_s30 + $0xe30] sm:$0xff] }
 0x2e2   : > { %4546 = vst [vmem:[%s7569_s4] sm:$0xff] %v4490_v48  ;;  %v767_v12 = vrot.slane %v760_v36, %v6911_v34  ;;  %v5227_v48 = vpack.c.bf16 %v1571_v43, %v1565_v42  ;;  %v1609_v35 = vld [vmem:[%s6806_s30 + $0x1318] sm:$0xff]  ;;  %v1608_v42 = vld [vmem:[%s6806_s30 + $0x1310] sm:$0xff]  ;;  %v1423_v43 = vld [vmem:[%s6806_s30 + $0xd48] sm:$0xff]  ;;  %v5241_v44 = vpack.c.bf16 %v1416_v10, %v1410_v40 }
 0x2e3   : > { %v922_v39 = vrot.slane %v792_v37, 7  ;;  %v5431_v38 = vpack.c.bf16 %v1609_v35, %v1603_v33  ;;  %v1645_v7 = vld [vmem:[%s6806_s30 + $0x1438] sm:$0xff]  ;;  %v1471_v33 = vld [vmem:[%s6806_s30 + $0xec8] sm:$0xff] }
 0x2e4   : > { %v1477_v35 = vld [vmem:[%s6806_s30 + $0xef8] sm:$0xff] }
 0x2e5   : > { %5218 = vmatpush1.bf16.xpose.msra.mxu0 %v5217_v53  ;;  %v923_v46 = vsel %vm898_vm0, %v922_v39, %v767_v12  ;;  %v1429_v12 = vld [vmem:[%s6806_s30 + $0xd78] sm:$0xff]  ;;  %v5259_v40 = vpack.c.bf16 %v1477_v35, %v1471_v33  ;;  %v1710_v33 = vld [vmem:[%s6806_s30 + $0x1640] sm:$0xff]  ;;  %v1716_v35 = vld [vmem:[%s6806_s30 + $0x1670] sm:$0xff] }
 0x2e6   : > { %5410 = vmatpush1.bf16.xpose.msra.mxu1 %v5409_v58  ;;  %5220 = vmatprep.subr.bf16.mxu0 %v5219_v59  ;;  %v924_v49 = vsel %vm900_vm1, %v922_v39, %v923_v46  ;;  %v1756_v58 = vld [vmem:[%s6806_s30 + $0x17b0] sm:$0xff]  ;;  %v1762_v59 = vld [vmem:[%s6806_s30 + $0x17e0] sm:$0xff]  ;;  %v5243_v46 = vpack.c.bf16 %v1429_v12, %v1423_v43 }
 0x2e7   : > { %5412 = vmatprep.subr.bf16.mxu1 %v5411_v61  ;;  %v925_v15 = vsel %vm902_vm2, %v922_v39, %v924_v49  ;;  %v1393_v61 = vld [vmem:[%s6806_s30 + $0xc58] sm:$0xff]  ;;  %v5421_v3 = vpack.c.bf16 %v1762_v59, %v1756_v58  ;;  %v1428_v49 = vld [vmem:[%s6806_s30 + $0xd70] sm:$0xff]  ;;  %v1662_v43 = vld [vmem:[%s6806_s30 + $0x14c0] sm:$0xff] }
 0x2e8   : > { %v926_v53 = vsel %vm904_vm3, %v922_v39, %v925_v15  ;;  %v5231_v5 = vpack.c.bf16 %v1393_v61, %v1387_v60  ;;  %v1615_v39 = vld [vmem:[%s6806_s30 + $0x1348] sm:$0xff]  ;;  %v1434_v61 = vld [vmem:[%s6806_s30 + $0xda0] sm:$0xff]  ;;  %v1668_v12 = vld [vmem:[%s6806_s30 + $0x14f0] sm:$0xff] }
 0x2e9   : > { %v966_v54 = vadd.f32 %v926_v53, %v352_v51  ;;  %v1620_v51 = vld [vmem:[%s6806_s30 + $0x1370] sm:$0xff]  ;;  %v1435_v15 = vld [vmem:[%s6806_s30 + $0xda8] sm:$0xff]  ;;  %v1441_v53 = vld [vmem:[%s6806_s30 + $0xdd8] sm:$0xff]  ;;  %v5249_v8 = vpack.c.bf16 %v1440_v62, %v1434_v61 }
 0x2ea   : > { %v5247_v59 = vpack.c.bf16 %v1441_v53, %v1435_v15  ;;  %v1674_v15 = vld [vmem:[%s6806_s30 + $0x1520] sm:$0xff]  ;;  %v1680_v53 = vld [vmem:[%s6806_s30 + $0x1550] sm:$0xff] }
 0x2eb   : > { %974 = vst [vmem:[#allocation2 + $0x14] sm:$0xf] %v966_v54  ;;  %v1627_v54 = vld [vmem:[%s6806_s30 + $0x13a8] sm:$0xff] }
 0x2ec   : > { %v5439_v60 = vpack.c.bf16 %v1633_v55, %v1627_v54  ;;  %v1495_v54 = vld [vmem:[%s6806_s30 + $0xf88] sm:$0xff]  ;;  %v1501_v55 = vld [vmem:[%s6806_s30 + $0xfb8] sm:$0xff] }
 0x2ed   : > { %5222 = vmatpush1.bf16.xpose.msra.mxu0 %v5221_v22  ;;  %v5427_v22 = vpack.c.bf16 %v1597_v17, %v1591_v16  ;;  %v1644_v16 = vld [vmem:[%s6806_s30 + $0x1430] sm:$0xff]  ;;  %v1459_v17 = vld [vmem:[%s6806_s30 + $0xe68] sm:$0xff]  ;;  %v5267_v61 = vpack.c.bf16 %v1501_v55, %v1495_v54  ;;  %v1734_v54 = vld [vmem:[%s6806_s30 + $0x1700] sm:$0xff] }
 0x2ee   : > { %5414 = vmatpush1.bf16.xpose.msra.mxu1 %v5413_v26  ;;  %5224 = vmatprep.subr.bf16.mxu0 %v5223_v29  ;;  %v1590_v26 = vld [vmem:[%s6806_s30 + $0x1280] sm:$0xff]  ;;  %v1596_v29 = vld [vmem:[%s6806_s30 + $0x12b0] sm:$0xff] }
 0x2ef   : > { %5416 = vmatprep.subr.bf16.mxu1 %v5415_v30  ;;  %v1411_v30 = vld [vmem:[%s6806_s30 + $0xce8] sm:$0xff]  ;;  %v5429_v36 = vpack.c.bf16 %v1596_v29, %v1590_v26  ;;  %v1458_v26 = vld [vmem:[%s6806_s30 + $0xe60] sm:$0xff]  ;;  %v1464_v29 = vld [vmem:[%s6806_s30 + $0xe90] sm:$0xff] }
 0x2f0   : > { %v5239_v37 = vpack.c.bf16 %v1417_v32, %v1411_v30  ;;  %v1650_v30 = vld [vmem:[%s6806_s30 + $0x1460] sm:$0xff]  ;;  %v1656_v32 = vld [vmem:[%s6806_s30 + $0x1490] sm:$0xff] }
 0x2f1   : > { %v1740_v55 = vld [vmem:[%s6806_s30 + $0x1730] sm:$0xff] }
 0x2f2   : > { %v985_v11 = vld [vmem:[#allocation2 + $0x14] sm:$0xf] }
 0x2f3   : > { %v993_v14 = vmul.f32 0.125, %v985_v11 }
 0x2f5   : > { %5226 = vmatpush1.bf16.xpose.msra.mxu0 %v5225_v45  ;;  %v7611_v19 = vrot.slane %v993_v14, %v6911_v34  ;;  %v5433_v45 = vpack.c.bf16 %v1608_v42, %v1602_v41  ;;  %v1638_v14 = vld [vmem:[%s6806_s30 + $0x1400] sm:$0xff]  ;;  %v1476_v42 = vld [vmem:[%s6806_s30 + $0xef0] sm:$0xff] }
 0x2f6   : > { %5418 = vmatpush1.bf16.xpose.msra.mxu1 %v5417_v47  ;;  %5228 = vmatprep.subr.bf16.mxu0 %v5227_v48  ;;  %v5435_v47 = vpack.c.bf16 %v1621_v27, %v1615_v39  ;;  %v1422_v48 = vld [vmem:[%s6806_s30 + $0xd40] sm:$0xff]  ;;  %v1483_v39 = vld [vmem:[%s6806_s30 + $0xf28] sm:$0xff]  ;;  %v1489_v27 = vld [vmem:[%s6806_s30 + $0xf58] sm:$0xff] }
 0x2f7   : > { %5420 = vmatprep.subr.bf16.mxu1 %v5419_v50  ;;  %v3107_v23 = vcombine.high %v7611_v19, %v7611_v19  ;;  %v1614_v50 = vld [vmem:[%s6806_s30 + $0x1340] sm:$0xff]  ;;  %v5245_v57 = vpack.c.bf16 %v1428_v49, %v1422_v48  ;;  %v5263_v48 = vpack.c.bf16 %v1489_v27, %v1483_v39  ;;  %v1728_v27 = vld [vmem:[%s6806_s30 + $0x16d0] sm:$0xff] }
 0x2f8   : > { %v5437_v58 = vpack.c.bf16 %v1620_v51, %v1614_v50  ;;  %v1470_v41 = vld [vmem:[%s6806_s30 + $0xec0] sm:$0xff]  ;;  %v1488_v51 = vld [vmem:[%s6806_s30 + $0xf50] sm:$0xff] }
 0x2f9   : > { %v1482_v50 = vld [vmem:[%s6806_s30 + $0xf20] sm:$0xff] }
 0x2fa   : > { %v1722_v39 = vld [vmem:[%s6806_s30 + $0x16a0] sm:$0xff] }
 0x2fd   : > { %5230 = vmatpush1.bf16.xpose.msra.mxu0 %v5229_v1  ;;  %v1632_v1 = vld [vmem:[%s6806_s30 + $0x13d0] sm:$0xff] }
 0x2fe   : > { %5422 = vmatpush1.bf16.xpose.msra.mxu1 %v5421_v3  ;;  %5232 = vmatprep.subr.bf16.mxu0 %v5231_v5  ;;  %v1447_v3 = vld [vmem:[%s6806_s30 + $0xe08] sm:$0xff]  ;;  %v1453_v5 = vld [vmem:[%s6806_s30 + $0xe38] sm:$0xff]  ;;  %v5441_v9 = vpack.c.bf16 %v1632_v1, %v1626_v0  ;;  %v1494_v0 = vld [vmem:[%s6806_s30 + $0xf80] sm:$0xff] }
 0x2ff   : > { %5424 = vmatprep.subr.bf16.mxu1 %v5423_v6  ;;  %v1639_v6 = vld [vmem:[%s6806_s30 + $0x1408] sm:$0xff]  ;;  %v5251_v11 = vpack.c.bf16 %v1453_v5, %v1447_v3  ;;  %v1500_v1 = vld [vmem:[%s6806_s30 + $0xfb0] sm:$0xff]  ;;  %v1686_v3 = vld [vmem:[%s6806_s30 + $0x1580] sm:$0xff] }
 0x300   : > { %v5443_v13 = vpack.c.bf16 %v1645_v7, %v1639_v6  ;;  %v1692_v5 = vld [vmem:[%s6806_s30 + $0x15b0] sm:$0xff]  ;;  %v1507_v6 = vld [vmem:[%s6806_s30 + $0xfe8] sm:$0xff]  ;;  %v1513_v7 = vld [vmem:[%s6806_s30 + $0x1018] sm:$0xff] }
 0x304   : > { %3250 = vmatmul.mubr.f32.vlgmr.msra.gmra.mrb[2].mxu0 %v7440_v63 }
 0x305   : > { %5234 = vmatpush1.bf16.xpose.msra.mxu0 %v5233_v18  ;;  %3463 = vmatmul.mubr.f32.vlgmr.msra.gmra.mrb[2].mxu1 %v7440_v63  ;;  %v5237_v63 = vpack.c.bf16 %v1404_v25, %v1398_v24  ;;  %v1465_v18 = vld [vmem:[%s6806_s30 + $0xe98] sm:$0xff] }
 0x306   : > { %5426 = vmatpush1.bf16.xpose.msra.mxu1 %v5425_v20  ;;  %5236 = vmatprep.subr.bf16.mxu0 %v5235_v21  ;;  %v1651_v20 = vld [vmem:[%s6806_s30 + $0x1468] sm:$0xff]  ;;  %v1657_v21 = vld [vmem:[%s6806_s30 + $0x1498] sm:$0xff]  ;;  %v5255_v24 = vpack.c.bf16 %v1465_v18, %v1459_v17  ;;  %v1698_v17 = vld [vmem:[%s6806_s30 + $0x15e0] sm:$0xff] }
 0x307   : > { %5428 = vmatprep.subr.bf16.mxu1 %v5427_v22  ;;  %3320 = vmatprep.mubr.f32.mxu0 %v3107_v23  ;;  %v5253_v22 = vpack.c.bf16 %v1452_v56, %v1446_v28  ;;  %v5447_v25 = vpack.c.bf16 %v1657_v21, %v1651_v20  ;;  %v5271_v28 = vpack.c.bf16 %v1513_v7, %v1507_v6  ;;  %v1704_v18 = vld [vmem:[%s6806_s30 + $0x1610] sm:$0xff]  ;;  %v1519_v20 = vld [vmem:[%s6806_s30 + $0x1048] sm:$0xff]  ;;  %v1525_v21 = vld [vmem:[%s6806_s30 + $0x1078] sm:$0xff] }
 0x308   : > { %3533 = vmatprep.mubr.f32.mxu1 %v3107_v23  ;;  %v5445_v23 = vpack.c.bf16 %v1644_v16, %v1638_v14  ;;  %v1506_v14 = vld [vmem:[%s6806_s30 + $0xfe0] sm:$0xff]  ;;  %v1512_v16 = vld [vmem:[%s6806_s30 + $0x1010] sm:$0xff] }
 0x30d   : > { %5238 = vmatpush1.bf16.xpose.msra.mxu0 %v5237_v63  ;;  %v1663_v63 = vld [vmem:[%s6806_s30 + $0x14c8] sm:$0xff] }
 0x30e   : > { %5430 = vmatpush1.bf16.xpose.msra.mxu1 %v5429_v36  ;;  %5240 = vmatprep.subr.bf16.mxu0 %v5239_v37  ;;  %v1669_v36 = vld [vmem:[%s6806_s30 + $0x14f8] sm:$0xff]  ;;  %v5257_v37 = vpack.c.bf16 %v1464_v29, %v1458_v26  ;;  %v5275_v26 = vpack.c.bf16 %v1525_v21, %v1519_v20 }
 0x30f   : > { %5432 = vmatprep.subr.bf16.mxu1 %v5431_v38  ;;  %v5449_v38 = vpack.c.bf16 %v1656_v32, %v1650_v30  ;;  %v5451_v10 = vpack.c.bf16 %v1669_v36, %v1663_v63  ;;  %v1518_v30 = vld [vmem:[%s6806_s30 + $0x1040] sm:$0xff]  ;;  %v1524_v32 = vld [vmem:[%s6806_s30 + $0x1070] sm:$0xff]  ;;  %v1531_v63 = vld [vmem:[%s6806_s30 + $0x10a8] sm:$0xff] }
 0x310   : > { %v1537_v36 = vld [vmem:[%s6806_s30 + $0x10d8] sm:$0xff] }
 0x311   : > { %v328_v21 = vld [vmem:[%s6798_s8 + $0xd8] sm:$0xff] }
 0x315   : > { %5242 = vmatpush1.bf16.xpose.msra.mxu0 %v5241_v44  ;;  %v1675_v44 = vld [vmem:[%s6806_s30 + $0x1528] sm:$0xff] }
 0x316   : > { %5434 = vmatpush1.bf16.xpose.msra.mxu1 %v5433_v45  ;;  %5244 = vmatprep.subr.bf16.mxu0 %v5243_v46  ;;  %v1681_v45 = vld [vmem:[%s6806_s30 + $0x1558] sm:$0xff]  ;;  %v5261_v46 = vpack.c.bf16 %v1476_v42, %v1470_v41  ;;  %v5279_v41 = vpack.c.bf16 %v1537_v36, %v1531_v63 }
 0x317   : > { %5436 = vmatprep.subr.bf16.mxu1 %v5435_v47  ;;  %v5453_v47 = vpack.c.bf16 %v1668_v12, %v1662_v43  ;;  %v5455_v49 = vpack.c.bf16 %v1681_v45, %v1675_v44  ;;  %v1530_v43 = vld [vmem:[%s6806_s30 + $0x10a0] sm:$0xff]  ;;  %v1536_v12 = vld [vmem:[%s6806_s30 + $0x10d0] sm:$0xff]  ;;  %v1543_v44 = vld [vmem:[%s6806_s30 + $0x1108] sm:$0xff] }
 0x318   : > { %v1549_v45 = vld [vmem:[%s6806_s30 + $0x1138] sm:$0xff] }
 0x31d   : > { %5246 = vmatpush1.bf16.xpose.msra.mxu0 %v5245_v57  ;;  %v1687_v57 = vld [vmem:[%s6806_s30 + $0x1588] sm:$0xff] }
 0x31e   : > { %5438 = vmatpush1.bf16.xpose.msra.mxu1 %v5437_v58  ;;  %5248 = vmatprep.subr.bf16.mxu0 %v5247_v59  ;;  %v1693_v58 = vld [vmem:[%s6806_s30 + $0x15b8] sm:$0xff]  ;;  %v5265_v59 = vpack.c.bf16 %v1488_v51, %v1482_v50  ;;  %v5283_v50 = vpack.c.bf16 %v1549_v45, %v1543_v44  ;;  %v1542_v51 = vld [vmem:[%s6806_s30 + $0x1100] sm:$0xff] }
 0x31f   : > { %5440 = vmatprep.subr.bf16.mxu1 %v5439_v60  ;;  %v5457_v60 = vpack.c.bf16 %v1680_v53, %v1674_v15  ;;  %v5459_v62 = vpack.c.bf16 %v1693_v58, %v1687_v57  ;;  %v1548_v15 = vld [vmem:[%s6806_s30 + $0x1130] sm:$0xff]  ;;  %v1555_v57 = vld [vmem:[%s6806_s30 + $0x1168] sm:$0xff]  ;;  %v1561_v58 = vld [vmem:[%s6806_s30 + $0x1198] sm:$0xff] }
 0x325   : > { %5250 = vmatpush1.bf16.xpose.msra.mxu0 %v5249_v8  ;;  %v1699_v8 = vld [vmem:[%s6806_s30 + $0x15e8] sm:$0xff] }
 0x326   : > { %5442 = vmatpush1.bf16.xpose.msra.mxu1 %v5441_v9  ;;  %5252 = vmatprep.subr.bf16.mxu0 %v5251_v11  ;;  %v1705_v9 = vld [vmem:[%s6806_s30 + $0x1618] sm:$0xff]  ;;  %v5269_v11 = vpack.c.bf16 %v1500_v1, %v1494_v0  ;;  %v334_v1 = vld [vmem:[%s6798_s8 + $0x108] sm:$0xff] }
 0x327   : > { %5444 = vmatprep.subr.bf16.mxu1 %v5443_v13  ;;  %v5461_v13 = vpack.c.bf16 %v1692_v5, %v1686_v3  ;;  %v5463_v56 = vpack.c.bf16 %v1705_v9, %v1699_v8  ;;  %v1753_v0 = vld [vmem:[%s6806_s30 + $0x1798] sm:$0xff]  ;;  %v555_v7 = vrot.slane %v334_v1, 4  ;;  %v5285_v8 = vpack.c.bf16 %v1548_v15, %v1542_v51  ;;  %v1759_v15 = vld [vmem:[%s6806_s30 + $0x17c8] sm:$0xff] }
 0x329   : > { %v556_v20 = vadd.f32 %v555_v7, %v334_v1 }
 0x32d   : > { %5254 = vmatpush1.bf16.xpose.msra.mxu0 %v5253_v22  ;;  %v1711_v22 = vld [vmem:[%s6806_s30 + $0x1648] sm:$0xff] }
 0x32e   : > { %5446 = vmatpush1.bf16.xpose.msra.mxu1 %v5445_v23  ;;  %5256 = vmatprep.subr.bf16.mxu0 %v5255_v24  ;;  %v1717_v23 = vld [vmem:[%s6806_s30 + $0x1678] sm:$0xff]  ;;  %v5273_v24 = vpack.c.bf16 %v1512_v16, %v1506_v14  ;;  %v325_v16 = vld [vmem:[%s6798_s8 + $0xc0] sm:$0xff] }
 0x32f   : > { %5448 = vmatprep.subr.bf16.mxu1 %v5447_v25  ;;  %v5465_v25 = vpack.c.bf16 %v1704_v18, %v1698_v17  ;;  %v5467_v29 = vpack.c.bf16 %v1717_v23, %v1711_v22  ;;  %v326_v17 = vld [vmem:[%s6798_s8 + $0xc8] sm:$0xff]  ;;  %v327_v18 = vld [vmem:[%s6798_s8 + $0xd0] sm:$0xff]  ;;  %v501_v22 = vrot.slane %v325_v16, 4 }
 0x330   : > { %v507_v23 = vrot.slane %v326_v17, 4 }
 0x332   : > { %v508_v63 = vadd.f32 %v507_v23, %v326_v17  ;;  %v1566_v17 = vld [vmem:[%s6806_s30 + $0x11c0] sm:$0xff] }
 0x334   : > { %v509_v44 = vrot.slane %v508_v63, 2 }
 0x335   : > { %5258 = vmatpush1.bf16.xpose.msra.mxu0 %v5257_v37  ;;  %v1723_v37 = vld [vmem:[%s6806_s30 + $0x16a8] sm:$0xff] }
 0x336   : > { %5450 = vmatpush1.bf16.xpose.msra.mxu1 %v5449_v38  ;;  %5260 = vmatprep.subr.bf16.mxu0 %v5259_v40  ;;  %v1729_v38 = vld [vmem:[%s6806_s30 + $0x16d8] sm:$0xff]  ;;  %v5277_v40 = vpack.c.bf16 %v1524_v32, %v1518_v30  ;;  %v557_v32 = vrot.slane %v556_v20, 2 }
 0x337   : > { %5452 = vmatprep.subr.bf16.mxu1 %v5451_v10  ;;  %v5469_v10 = vpack.c.bf16 %v1716_v35, %v1710_v33  ;;  %v5471_v42 = vpack.c.bf16 %v1729_v38, %v1723_v37  ;;  %v1554_v33 = vld [vmem:[%s6806_s30 + $0x1160] sm:$0xff]  ;;  %v502_v35 = vadd.f32 %v501_v22, %v325_v16  ;;  %v1560_v38 = vld [vmem:[%s6806_s30 + $0x1190] sm:$0xff] }
 0x338   : > { %v5289_v51 = vpack.c.bf16 %v1560_v38, %v1554_v33 }
 0x33d   : > { %5262 = vmatpush1.bf16.xpose.msra.mxu0 %v5261_v46  ;;  %v1735_v46 = vld [vmem:[%s6806_s30 + $0x1708] sm:$0xff] }
 0x33e   : > { %5454 = vmatpush1.bf16.xpose.msra.mxu1 %v5453_v47  ;;  %5264 = vmatprep.subr.bf16.mxu0 %v5263_v48  ;;  %v1741_v47 = vld [vmem:[%s6806_s30 + $0x1738] sm:$0xff]  ;;  %v5281_v48 = vpack.c.bf16 %v1536_v12, %v1530_v43  ;;  %v1567_v12 = vld [vmem:[%s6806_s30 + $0x11c8] sm:$0xff] }
 0x33f   : > { %5456 = vmatprep.subr.bf16.mxu1 %v5455_v49  ;;  %v5473_v49 = vpack.c.bf16 %v1728_v27, %v1722_v39  ;;  %v5475_v53 = vpack.c.bf16 %v1741_v47, %v1735_v46  ;;  %v1573_v39 = vld [vmem:[%s6806_s30 + $0x11f8] sm:$0xff]  ;;  %v503_v27 = vrot.slane %v502_v35, 2 }
 0x345   : > { %5266 = vmatpush1.bf16.xpose.msra.mxu0 %v5265_v59  ;;  %v331_v59 = vld [vmem:[%s6798_s8 + $0xf0] sm:$0xff] }
 0x346   : > { %5458 = vmatpush1.bf16.xpose.msra.mxu1 %v5457_v60  ;;  %5268 = vmatprep.subr.bf16.mxu0 %v5267_v61  ;;  %v332_v60 = vld [vmem:[%s6798_s8 + $0xf8] sm:$0xff]  ;;  %v333_v61 = vld [vmem:[%s6798_s8 + $0x100] sm:$0xff]  ;;  %v537_v3 = vrot.slane %v331_v59, 4 }
 0x347   : > { %5460 = vmatprep.subr.bf16.mxu1 %v5459_v62  ;;  %v1747_v62 = vld [vmem:[%s6806_s30 + $0x1768] sm:$0xff]  ;;  %v543_v5 = vrot.slane %v332_v60, 4  ;;  %v549_v6 = vrot.slane %v333_v61, 4 }
 0x348   : > { %v538_v9 = vadd.f32 %v537_v3, %v331_v59  ;;  %v5479_v14 = vpack.c.bf16 %v1753_v0, %v1747_v62  ;;  %v5291_v59 = vpack.c.bf16 %v1573_v39, %v1567_v12  ;;  %v1958_v12 = vld [vmem:[%s6806_s30 + $0x1e00] sm:$0xff] }
 0x34d   : > { %5270 = vmatpush1.bf16.xpose.msra.mxu0 %v5269_v11  ;;  %v544_v11 = vadd.f32 %v543_v5, %v332_v60 }
 0x34e   : > { %5462 = vmatpush1.bf16.xpose.msra.mxu1 %v5461_v13  ;;  %5272 = vmatprep.subr.bf16.mxu0 %v5271_v28  ;;  %v550_v13 = vadd.f32 %v549_v6, %v333_v61  ;;  %v5477_v28 = vpack.c.bf16 %v1740_v55, %v1734_v54  ;;  %v504_v54 = vadd.f32 %v503_v27, %v502_v35  ;;  %v1964_v27 = vld [vmem:[%s6806_s30 + $0x1e30] sm:$0xff] }
 0x34f   : > { %5464 = vmatprep.subr.bf16.mxu1 %v5463_v56  ;;  %v5287_v56 = vpack.c.bf16 %v1561_v58, %v1555_v57  ;;  %v510_v55 = vadd.f32 %v509_v44, %v508_v63  ;;  %v1779_v44 = vld [vmem:[%s6806_s30 + $0x1868] sm:$0xff] }
 0x350   : > { %v551_v30 = vrot.slane %v550_v13, 2  ;;  %v505_v62 = vrot.slane %v504_v54, 1 }
 0x351   : > { %v511_v0 = vrot.slane %v510_v55, 1 }
 0x352   : > { %v552_v43 = vadd.f32 %v551_v30, %v550_v13  ;;  %v1959_v30 = vld [vmem:[%s6806_s30 + $0x1e08] sm:$0xff] }
 0x355   : > { %5274 = vmatpush1.bf16.xpose.msra.mxu0 %v5273_v24  ;;  %v513_v24 = vrot.slane %v327_v18, 4 }
 0x356   : > { %5466 = vmatpush1.bf16.xpose.msra.mxu1 %v5465_v25  ;;  %5276 = vmatprep.subr.bf16.mxu0 %v5275_v26  ;;  %v539_v25 = vrot.slane %v538_v9, 2  ;;  %v519_v26 = vrot.slane %v328_v21, 4 }
 0x357   : > { %5468 = vmatprep.subr.bf16.mxu1 %v5467_v29  ;;  %v545_v29 = vrot.slane %v544_v11, 2  ;;  %v514_v36 = vadd.f32 %v513_v24, %v327_v18  ;;  %v1572_v18 = vld [vmem:[%s6806_s30 + $0x11f0] sm:$0xff] }
 0x358   : > { %v540_v37 = vadd.f32 %v539_v25, %v538_v9  ;;  %v506_v9 = vadd.f32 %v505_v62, %v504_v54  ;;  %v1764_v24 = vld [vmem:[%s6806_s30 + $0x17f0] sm:$0xff]  ;;  %v1767_v25 = vld [vmem:[%s6806_s30 + $0x1808] sm:$0xff]  ;;  %v5293_v63 = vpack.c.bf16 %v1572_v18, %v1566_v17  ;;  %v2001_v17 = vld [vmem:[%s6806_s30 + $0x1f58] sm:$0xff] }
 0x359   : > { %v515_v45 = vrot.slane %v514_v36, 2  ;;  %v1791_v62 = vld [vmem:[%s6806_s30 + $0x18c8] sm:$0xff] }
 0x35a   : > { %v541_v46 = vrot.slane %v540_v37, 1 }
 0x35b   : > { %v516_v57 = vadd.f32 %v515_v45, %v514_v36  ;;  %v1785_v45 = vld [vmem:[%s6806_s30 + $0x1898] sm:$0xff] }
 0x35c   : > { %v542_v61 = vadd.f32 %v541_v46, %v540_v37 }
 0x35d   : > { %5278 = vmatpush1.bf16.xpose.msra.mxu0 %v5277_v40  ;;  %v1746_v40 = vld [vmem:[%s6806_s30 + $0x1760] sm:$0xff]  ;;  %v517_v1 = vrot.slane %v516_v57, 1 }
 0x35e   : > { %5470 = vmatpush1.bf16.xpose.msra.mxu1 %v5469_v10  ;;  %5280 = vmatprep.subr.bf16.mxu0 %v5279_v41  ;;  %v1752_v10 = vld [vmem:[%s6806_s30 + $0x1790] sm:$0xff]  ;;  %v520_v41 = vadd.f32 %v519_v26, %v328_v21  ;;  %v1773_v26 = vld [vmem:[%s6806_s30 + $0x1838] sm:$0xff] }
 0x35f   : > { %5472 = vmatprep.subr.bf16.mxu1 %v5471_v42  ;;  %v546_v42 = vadd.f32 %v545_v29, %v544_v11  ;;  %v5481_v58 = vpack.c.bf16 %v1752_v10, %v1746_v40  ;;  %v512_v11 = vadd.f32 %v511_v0, %v510_v55  ;;  %v518_v13 = vadd.f32 %v517_v1, %v516_v57  ;;  %v1778_v57 = vld [vmem:[%s6806_s30 + $0x1860] sm:$0xff]  ;;  %v1797_v0 = vld [vmem:[%s6806_s30 + $0x18f8] sm:$0xff]  ;;  %v1983_v1 = vld [vmem:[%s6806_s30 + $0x1ec8] sm:$0xff] }
 0x360   : > { %v521_v47 = vrot.slane %v520_v41, 2  ;;  %v5487_v37 = vpack.c.bf16 %v1773_v26, %v1767_v25  ;;  %v1994_v25 = vld [vmem:[%s6806_s30 + $0x1f20] sm:$0xff]  ;;  %v2000_v26 = vld [vmem:[%s6806_s30 + $0x1f50] sm:$0xff] }
 0x361   : > { %v793_v16 = vcombine.low %v506_v9, %v512_v11  ;;  %v1790_v9 = vld [vmem:[%s6806_s30 + $0x18c0] sm:$0xff]  ;;  %v1796_v11 = vld [vmem:[%s6806_s30 + $0x18f0] sm:$0xff] }
 0x362   : > { %v522_v60 = vadd.f32 %v521_v47, %v520_v41  ;;  %v1971_v47 = vld [vmem:[%s6806_s30 + $0x1e68] sm:$0xff]  ;;  %v5497_v18 = vpack.c.bf16 %v1796_v11, %v1790_v9 }
 0x363   : > { %v801_v29 = vrot.slane %v793_v16, %v6911_v34  ;;  %v1995_v16 = vld [vmem:[%s6806_s30 + $0x1f28] sm:$0xff] }
 0x364   : > { %v523_v6 = vrot.slane %v522_v60, 1 }
 0x365   : > { %5282 = vmatpush1.bf16.xpose.msra.mxu0 %v5281_v48  ;;  %v547_v48 = vrot.slane %v546_v42, 1 }
 0x366   : > { %5474 = vmatpush1.bf16.xpose.msra.mxu1 %v5473_v49  ;;  %5284 = vmatprep.subr.bf16.mxu0 %v5283_v50  ;;  %v553_v49 = vrot.slane %v552_v43, 1  ;;  %v558_v50 = vadd.f32 %v557_v32, %v556_v20  ;;  %v1758_v20 = vld [vmem:[%s6806_s30 + $0x17c0] sm:$0xff]  ;;  %v1965_v32 = vld [vmem:[%s6806_s30 + $0x1e38] sm:$0xff] }
 0x367   : > { %5476 = vmatprep.subr.bf16.mxu1 %v5475_v53  ;;  %v1765_v53 = vld [vmem:[%s6806_s30 + $0x17f8] sm:$0xff]  ;;  %v548_v3 = vadd.f32 %v547_v48, %v546_v42  ;;  %v5485_v36 = vpack.c.bf16 %v1764_v24, %v1758_v20  ;;  %v5679_v10 = vpack.c.bf16 %v1965_v32, %v1959_v30  ;;  %v1766_v42 = vld [vmem:[%s6806_s30 + $0x1800] sm:$0xff]  ;;  %v1808_v24 = vld [vmem:[%s6806_s30 + $0x1950] sm:$0xff] }
 0x368   : > { %v5483_v5 = vpack.c.bf16 %v1765_v53, %v1759_v15  ;;  %v554_v7 = vadd.f32 %v553_v49, %v552_v43  ;;  %v1772_v43 = vld [vmem:[%s6806_s30 + $0x1830] sm:$0xff]  ;;  %v1977_v48 = vld [vmem:[%s6806_s30 + $0x1e98] sm:$0xff]  ;;  %v5681_v15 = vpack.c.bf16 %v1964_v27, %v1958_v12  ;;  %v5491_v53 = vpack.c.bf16 %v1785_v45, %v1779_v44  ;;  %v2007_v32 = vld [vmem:[%s6806_s30 + $0x1f88] sm:$0xff] }
 0x369   : > { %v5683_v54 = vpack.c.bf16 %v1977_v48, %v1971_v47  ;;  %v1821_v30 = vld [vmem:[%s6806_s30 + $0x19b8] sm:$0xff]  ;;  %v2019_v12 = vld [vmem:[%s6806_s30 + $0x1fe8] sm:$0xff]  ;;  %v1826_v47 = vld [vmem:[%s6806_s30 + $0x19e0] sm:$0xff] }
 0x36a   : > { %v1832_v48 = vld [vmem:[%s6806_s30 + $0x1a10] sm:$0xff] }
 0x36d   : > { %5286 = vmatpush1.bf16.xpose.msra.mxu0 %v5285_v8  ;;  %v559_v8 = vrot.slane %v558_v50, 1 }
 0x36e   : > { %5478 = vmatpush1.bf16.xpose.msra.mxu1 %v5477_v28  ;;  %5288 = vmatprep.subr.bf16.mxu0 %v5287_v56  ;;  %v818_v28 = vcombine.low %v542_v61, %v548_v3  ;;  %v524_v56 = vadd.f32 %v523_v6, %v522_v60  ;;  %v1976_v61 = vld [vmem:[%s6806_s30 + $0x1e90] sm:$0xff] }
 0x36f   : > { %5480 = vmatprep.subr.bf16.mxu1 %v5479_v14  ;;  %v560_v14 = vadd.f32 %v559_v8, %v558_v50  ;;  %v5489_v50 = vpack.c.bf16 %v1772_v43, %v1766_v42  ;;  %v1827_v42 = vld [vmem:[%s6806_s30 + $0x19e8] sm:$0xff]  ;;  %v1833_v43 = vld [vmem:[%s6806_s30 + $0x1a18] sm:$0xff] }
 0x370   : > { %v794_v21 = vcombine.low %v518_v13, %v524_v56  ;;  %v826_v23 = vrot.slane %v818_v28, %v6911_v34  ;;  %v1982_v13 = vld [vmem:[%s6806_s30 + $0x1ec0] sm:$0xff]  ;;  %v1988_v28 = vld [vmem:[%s6806_s30 + $0x1ef0] sm:$0xff]  ;;  %v1803_v56 = vld [vmem:[%s6806_s30 + $0x1928] sm:$0xff]  ;;  %v5507_v45 = vpack.c.bf16 %v1833_v43, %v1827_v42 }
 0x371   : > { %v819_v22 = vcombine.low %v554_v7, %v560_v14  ;;  %v5495_v7 = vpack.c.bf16 %v1797_v0, %v1791_v62  ;;  %v1809_v14 = vld [vmem:[%s6806_s30 + $0x1958] sm:$0xff]  ;;  %v5689_v20 = vpack.c.bf16 %v1988_v28, %v1982_v13  ;;  %v1838_v62 = vld [vmem:[%s6806_s30 + $0x1a40] sm:$0xff]  ;;  %v1844_v0 = vld [vmem:[%s6806_s30 + $0x1a70] sm:$0xff] }
 0x372   : > { %v808_v33 = vrot.slane %v794_v21, %v6911_v34  ;;  %v5499_v21 = vpack.c.bf16 %v1809_v14, %v1803_v56  ;;  %v1850_v28 = vld [vmem:[%s6806_s30 + $0x1aa0] sm:$0xff]  ;;  %v1856_v56 = vld [vmem:[%s6806_s30 + $0x1ad0] sm:$0xff] }
 0x373   : > { %v833_v35 = vrot.slane %v819_v22, %v6911_v34  ;;  %v5691_v22 = vpack.c.bf16 %v2001_v17, %v1995_v16  ;;  %v2042_v14 = vld [vmem:[%s6806_s30 + $0x20a0] sm:$0xff]  ;;  %v2048_v16 = vld [vmem:[%s6806_s30 + $0x20d0] sm:$0xff]  ;;  %v1863_v17 = vld [vmem:[%s6806_s30 + $0x1b08] sm:$0xff] }
 0x374   : > { %v809_v38 = vcombine.low %v801_v29, %v808_v33  ;;  %v1815_v29 = vld [vmem:[%s6806_s30 + $0x1988] sm:$0xff]  ;;  %v2013_v33 = vld [vmem:[%s6806_s30 + $0x1fb8] sm:$0xff]  ;;  %v1880_v42 = vld [vmem:[%s6806_s30 + $0x1b90] sm:$0xff] }
 0x375   : > { %5290 = vmatpush1.bf16.xpose.msra.mxu0 %v5289_v51  ;;  %v834_v40 = vcombine.low %v826_v23, %v833_v35  ;;  %v1802_v23 = vld [vmem:[%s6806_s30 + $0x1920] sm:$0xff] }
 0x376   : > { %5482 = vmatpush1.bf16.xpose.msra.mxu1 %v5481_v58  ;;  %5292 = vmatprep.subr.bf16.mxu0 %v5291_v59  ;;  %v1784_v58 = vld [vmem:[%s6806_s30 + $0x1890] sm:$0xff]  ;;  %v1970_v59 = vld [vmem:[%s6806_s30 + $0x1e60] sm:$0xff]  ;;  %v5501_v35 = vpack.c.bf16 %v1808_v24, %v1802_v23  ;;  %v5709_v23 = vpack.c.bf16 %v2048_v16, %v2042_v14 }
 0x377   : > { %5484 = vmatprep.subr.bf16.mxu1 %v5483_v5  ;;  %v929_v41 = vrot.slane %v834_v40, 7  ;;  %v5493_v5 = vpack.c.bf16 %v1784_v58, %v1778_v57  ;;  %v5685_v6 = vpack.c.bf16 %v1976_v61, %v1970_v59  ;;  %v1820_v40 = vld [vmem:[%s6806_s30 + $0x19b0] sm:$0xff]  ;;  %v5509_v57 = vpack.c.bf16 %v1832_v48, %v1826_v47  ;;  %v2066_v43 = vld [vmem:[%s6806_s30 + $0x2160] sm:$0xff] }
 0x378   : > { %v1910_v16 = vld [vmem:[%s6806_s30 + $0x1c80] sm:$0xff] }
 0x379   : > { %v930_v39 = vsel %vm898_vm0, %v929_v41, %v809_v38  ;;  %v1814_v38 = vld [vmem:[%s6806_s30 + $0x1980] sm:$0xff] }
 0x37a   : > { %v931_v46 = vsel %vm900_vm1, %v929_v41, %v930_v39  ;;  %v2025_v39 = vld [vmem:[%s6806_s30 + $0x2018] sm:$0xff]  ;;  %v5505_v27 = vpack.c.bf16 %v1820_v40, %v1814_v38 }
 0x37b   : > { %v932_v49 = vsel %vm902_vm2, %v929_v41, %v931_v46  ;;  %v5699_v46 = vpack.c.bf16 %v2025_v39, %v2019_v12  ;;  %v2072_v12 = vld [vmem:[%s6806_s30 + $0x2190] sm:$0xff]  ;;  %v1887_v39 = vld [vmem:[%s6806_s30 + $0x1bc8] sm:$0xff] }
 0x37c   : > { %v933_v51 = vsel %vm904_vm3, %v929_v41, %v932_v49  ;;  %v2012_v41 = vld [vmem:[%s6806_s30 + $0x1fb0] sm:$0xff]  ;;  %v2018_v49 = vld [vmem:[%s6806_s30 + $0x1fe0] sm:$0xff]  ;;  %v5717_v47 = vpack.c.bf16 %v2072_v12, %v2066_v43 }
 0x37d   : > { %5294 = vmatpush1.bf16.xpose.msra.mxu0 %v5293_v63  ;;  %v7762_v55 = vmul.f32 0.125, %v933_v51  ;;  %v5693_v63 = vpack.c.bf16 %v2000_v26, %v1994_v25  ;;  %v1839_v51 = vld [vmem:[%s6806_s30 + $0x1a48] sm:$0xff]  ;;  %v1862_v26 = vld [vmem:[%s6806_s30 + $0x1b00] sm:$0xff] }
 0x37e   : > { %5486 = vmatpush1.bf16.xpose.msra.mxu1 %v5485_v36  ;;  %5488 = vmatprep.subr.bf16.mxu0 %v5487_v37  ;;  %v5503_v36 = vpack.c.bf16 %v1821_v30, %v1815_v29  ;;  %v5695_v37 = vpack.c.bf16 %v2013_v33, %v2007_v32  ;;  %v1868_v29 = vld [vmem:[%s6806_s30 + $0x1b30] sm:$0xff]  ;;  %v2054_v30 = vld [vmem:[%s6806_s30 + $0x2100] sm:$0xff]  ;;  %v1875_v33 = vld [vmem:[%s6806_s30 + $0x1b68] sm:$0xff] }
 0x37f   : > { %5680 = vmatprep.subr.bf16.mxu1 %v5679_v10  ;;  %v7770_v60 = vrot.slane %v7762_v55, %v6911_v34  ;;  %v2006_v10 = vld [vmem:[%s6806_s30 + $0x1f80] sm:$0xff]  ;;  %v2060_v32 = vld [vmem:[%s6806_s30 + $0x2130] sm:$0xff] }
 0x380   : > { %v5697_v44 = vpack.c.bf16 %v2012_v41, %v2006_v10  ;;  %v5713_v38 = vpack.c.bf16 %v2060_v32, %v2054_v30  ;;  %v1874_v41 = vld [vmem:[%s6806_s30 + $0x1b60] sm:$0xff] }
 0x381   : > { %v3557_v3 = vcombine.high %v7770_v60, %v7770_v60  ;;  %v1922_v32 = vld [vmem:[%s6806_s30 + $0x1ce0] sm:$0xff] }
 0x382   : > { %v1934_v12 = vld [vmem:[%s6806_s30 + $0x1d40] sm:$0xff] }
 0x384   : > { %3321 = vmatmul.mubr.f32.vlgmr.msra.gmra.mrb[2].mxu0 %v7611_v19 }
 0x385   : > { %3534 = vmatmul.mubr.f32.vlgmr.msra.gmra.mrb[2].mxu1 %v7611_v19  ;;  %5490 = vmatpush1.bf16.xpose.msra.mxu0 %v5489_v50  ;;  %v1989_v19 = vld [vmem:[%s6806_s30 + $0x1ef8] sm:$0xff]  ;;  %v2024_v50 = vld [vmem:[%s6806_s30 + $0x2010] sm:$0xff] }
 0x386   : > { %5682 = vmatpush1.bf16.xpose.msra.mxu1 %v5681_v15  ;;  %5492 = vmatprep.subr.bf16.mxu0 %v5491_v53  ;;  %v5687_v8 = vpack.c.bf16 %v1989_v19, %v1983_v1  ;;  %v1845_v15 = vld [vmem:[%s6806_s30 + $0x1a78] sm:$0xff]  ;;  %v2031_v53 = vld [vmem:[%s6806_s30 + $0x2048] sm:$0xff]  ;;  %v5701_v58 = vpack.c.bf16 %v2024_v50, %v2018_v49  ;;  %v2030_v1 = vld [vmem:[%s6806_s30 + $0x2040] sm:$0xff] }
 0x387   : > { %5684 = vmatprep.subr.bf16.mxu1 %v5683_v54  ;;  %3637 = vmatprep.mubr.f32.mxu0 %v3557_v3  ;;  %v2037_v54 = vld [vmem:[%s6806_s30 + $0x2078] sm:$0xff]  ;;  %v5511_v59 = vpack.c.bf16 %v1845_v15, %v1839_v51  ;;  %v2036_v19 = vld [vmem:[%s6806_s30 + $0x2070] sm:$0xff]  ;;  %v1886_v50 = vld [vmem:[%s6806_s30 + $0x1bc0] sm:$0xff] }
 0x388   : > { %3850 = vmatprep.mubr.f32.mxu1 %v3557_v3  ;;  %v5703_v61 = vpack.c.bf16 %v2037_v54, %v2031_v53  ;;  %v1851_v3 = vld [vmem:[%s6806_s30 + $0x1aa8] sm:$0xff]  ;;  %v5705_v9 = vpack.c.bf16 %v2036_v19, %v2030_v1  ;;  %v1892_v51 = vld [vmem:[%s6806_s30 + $0x1bf0] sm:$0xff]  ;;  %v2078_v15 = vld [vmem:[%s6806_s30 + $0x21c0] sm:$0xff] }
 0x389   : > { %v2084_v53 = vld [vmem:[%s6806_s30 + $0x21f0] sm:$0xff]  ;;  %v1899_v54 = vld [vmem:[%s6806_s30 + $0x1c28] sm:$0xff]  ;;  %v1898_v19 = vld [vmem:[%s6806_s30 + $0x1c20] sm:$0xff] }
 0x38d   : > { %5494 = vmatpush1.bf16.xpose.msra.mxu0 %v5493_v5  ;;  %v1857_v5 = vld [vmem:[%s6806_s30 + $0x1ad8] sm:$0xff] }
 0x38e   : > { %5686 = vmatpush1.bf16.xpose.msra.mxu1 %v5685_v6  ;;  %5496 = vmatprep.subr.bf16.mxu0 %v5495_v7  ;;  %v2043_v6 = vld [vmem:[%s6806_s30 + $0x20a8] sm:$0xff]  ;;  %v2049_v7 = vld [vmem:[%s6806_s30 + $0x20d8] sm:$0xff]  ;;  %v5515_v11 = vpack.c.bf16 %v1857_v5, %v1851_v3  ;;  %v1904_v3 = vld [vmem:[%s6806_s30 + $0x1c50] sm:$0xff] }
 0x38f   : > { %5688 = vmatprep.subr.bf16.mxu1 %v5687_v8  ;;  %v5513_v8 = vpack.c.bf16 %v1844_v0, %v1838_v62  ;;  %v5707_v13 = vpack.c.bf16 %v2049_v7, %v2043_v6  ;;  %v5721_v62 = vpack.c.bf16 %v2084_v53, %v2078_v15  ;;  %v2090_v5 = vld [vmem:[%s6806_s30 + $0x2220] sm:$0xff]  ;;  %v2096_v6 = vld [vmem:[%s6806_s30 + $0x2250] sm:$0xff]  ;;  %v1911_v7 = vld [vmem:[%s6806_s30 + $0x1c88] sm:$0xff] }
 0x390   : > { %v1946_v53 = vld [vmem:[%s6806_s30 + $0x1da0] sm:$0xff] }
 0x395   : > { %5498 = vmatpush1.bf16.xpose.msra.mxu0 %v5497_v18  ;;  %v1869_v18 = vld [vmem:[%s6806_s30 + $0x1b38] sm:$0xff] }
 0x396   : > { %5690 = vmatpush1.bf16.xpose.msra.mxu1 %v5689_v20  ;;  %5500 = vmatprep.subr.bf16.mxu0 %v5499_v21  ;;  %v2055_v20 = vld [vmem:[%s6806_s30 + $0x2108] sm:$0xff]  ;;  %v2061_v21 = vld [vmem:[%s6806_s30 + $0x2138] sm:$0xff]  ;;  %v5519_v24 = vpack.c.bf16 %v1869_v18, %v1863_v17  ;;  %v1916_v17 = vld [vmem:[%s6806_s30 + $0x1cb0] sm:$0xff] }
 0x397   : > { %5692 = vmatprep.subr.bf16.mxu1 %v5691_v22  ;;  %v5517_v22 = vpack.c.bf16 %v1856_v56, %v1850_v28  ;;  %v5711_v25 = vpack.c.bf16 %v2061_v21, %v2055_v20  ;;  %v5725_v28 = vpack.c.bf16 %v2096_v6, %v2090_v5  ;;  %v2102_v18 = vld [vmem:[%s6806_s30 + $0x2280] sm:$0xff]  ;;  %v2108_v20 = vld [vmem:[%s6806_s30 + $0x22b0] sm:$0xff]  ;;  %v1923_v21 = vld [vmem:[%s6806_s30 + $0x1ce8] sm:$0xff] }
 0x398   : > { %v1768_v6 = vld [vmem:[%s6806_s30 + $0x1810] sm:$0xff] }
 0x39d   : > { %5502 = vmatpush1.bf16.xpose.msra.mxu0 %v5501_v35  ;;  %v1881_v35 = vld [vmem:[%s6806_s30 + $0x1b98] sm:$0xff] }
 0x39e   : > { %5694 = vmatpush1.bf16.xpose.msra.mxu1 %v5693_v63  ;;  %5504 = vmatprep.subr.bf16.mxu0 %v5503_v36  ;;  %v2067_v63 = vld [vmem:[%s6806_s30 + $0x2168] sm:$0xff]  ;;  %v2073_v36 = vld [vmem:[%s6806_s30 + $0x2198] sm:$0xff]  ;;  %v5523_v40 = vpack.c.bf16 %v1881_v35, %v1875_v33  ;;  %v1928_v33 = vld [vmem:[%s6806_s30 + $0x1d10] sm:$0xff] }
 0x39f   : > { %5696 = vmatprep.subr.bf16.mxu1 %v5695_v37  ;;  %v5521_v37 = vpack.c.bf16 %v1868_v29, %v1862_v26  ;;  %v5715_v10 = vpack.c.bf16 %v2073_v36, %v2067_v63  ;;  %v5729_v26 = vpack.c.bf16 %v2108_v20, %v2102_v18  ;;  %v2114_v35 = vld [vmem:[%s6806_s30 + $0x22e0] sm:$0xff]  ;;  %v2120_v63 = vld [vmem:[%s6806_s30 + $0x2310] sm:$0xff]  ;;  %v1935_v36 = vld [vmem:[%s6806_s30 + $0x1d48] sm:$0xff] }
 0x3a5   : > { %5506 = vmatpush1.bf16.xpose.msra.mxu0 %v5505_v27  ;;  %v1893_v27 = vld [vmem:[%s6806_s30 + $0x1bf8] sm:$0xff] }
 0x3a6   : > { %5698 = vmatpush1.bf16.xpose.msra.mxu1 %v5697_v44  ;;  %5508 = vmatprep.subr.bf16.mxu0 %v5507_v45  ;;  %v2079_v44 = vld [vmem:[%s6806_s30 + $0x21c8] sm:$0xff]  ;;  %v2085_v45 = vld [vmem:[%s6806_s30 + $0x21f8] sm:$0xff]  ;;  %v5527_v48 = vpack.c.bf16 %v1893_v27, %v1887_v39  ;;  %v1940_v39 = vld [vmem:[%s6806_s30 + $0x1d70] sm:$0xff] }
 0x3a7   : > { %5700 = vmatprep.subr.bf16.mxu1 %v5699_v46  ;;  %v5525_v46 = vpack.c.bf16 %v1880_v42, %v1874_v41  ;;  %v5719_v49 = vpack.c.bf16 %v2085_v45, %v2079_v44  ;;  %v5733_v41 = vpack.c.bf16 %v2120_v63, %v2114_v35  ;;  %v2126_v27 = vld [vmem:[%s6806_s30 + $0x2340] sm:$0xff]  ;;  %v2132_v44 = vld [vmem:[%s6806_s30 + $0x2370] sm:$0xff]  ;;  %v1947_v45 = vld [vmem:[%s6806_s30 + $0x1da8] sm:$0xff] }
 0x3ad   : > { %5510 = vmatpush1.bf16.xpose.msra.mxu0 %v5509_v57  ;;  %v1905_v57 = vld [vmem:[%s6806_s30 + $0x1c58] sm:$0xff] }
 0x3ae   : > { %5702 = vmatpush1.bf16.xpose.msra.mxu1 %v5701_v58  ;;  %5512 = vmatprep.subr.bf16.mxu0 %v5511_v59  ;;  %v2091_v58 = vld [vmem:[%s6806_s30 + $0x2228] sm:$0xff]  ;;  %v2097_v59 = vld [vmem:[%s6806_s30 + $0x2258] sm:$0xff]  ;;  %v5531_v0 = vpack.c.bf16 %v1905_v57, %v1899_v54  ;;  %v1952_v54 = vld [vmem:[%s6806_s30 + $0x1dd0] sm:$0xff] }
 0x3af   : > { %5704 = vmatprep.subr.bf16.mxu1 %v5703_v61  ;;  %v5529_v61 = vpack.c.bf16 %v1892_v51, %v1886_v50  ;;  %v5723_v1 = vpack.c.bf16 %v2097_v59, %v2091_v58  ;;  %v5737_v50 = vpack.c.bf16 %v2132_v44, %v2126_v27  ;;  %v2138_v57 = vld [vmem:[%s6806_s30 + $0x23a0] sm:$0xff]  ;;  %v2144_v58 = vld [vmem:[%s6806_s30 + $0x23d0] sm:$0xff]  ;;  %v1769_v59 = vld [vmem:[%s6806_s30 + $0x1818] sm:$0xff] }
 0x3b5   : > { %5514 = vmatpush1.bf16.xpose.msra.mxu0 %v5513_v8  ;;  %v1917_v8 = vld [vmem:[%s6806_s30 + $0x1cb8] sm:$0xff] }
 0x3b6   : > { %5706 = vmatpush1.bf16.xpose.msra.mxu1 %v5705_v9  ;;  %5516 = vmatprep.subr.bf16.mxu0 %v5515_v11  ;;  %v2103_v9 = vld [vmem:[%s6806_s30 + $0x2288] sm:$0xff]  ;;  %v2109_v11 = vld [vmem:[%s6806_s30 + $0x22b8] sm:$0xff]  ;;  %v5535_v56 = vpack.c.bf16 %v1917_v8, %v1911_v7  ;;  %v1774_v7 = vld [vmem:[%s6806_s30 + $0x1840] sm:$0xff] }
 0x3b7   : > { %5708 = vmatprep.subr.bf16.mxu1 %v5707_v13  ;;  %v5533_v13 = vpack.c.bf16 %v1904_v3, %v1898_v19  ;;  %v5727_v14 = vpack.c.bf16 %v2109_v11, %v2103_v9  ;;  %v5741_v19 = vpack.c.bf16 %v2144_v58, %v2138_v57  ;;  %v1960_v8 = vld [vmem:[%s6806_s30 + $0x1e10] sm:$0xff]  ;;  %v3542_v9 = vcombine.high %v7762_v55, %v7762_v55  ;;  %v1966_v11 = vld [vmem:[%s6806_s30 + $0x1e40] sm:$0xff] }
 0x3b8   : > { %v5745_v18 = vpack.c.bf16 %v1966_v11, %v1960_v8  ;;  %v1828_v11 = vld [vmem:[%s6806_s30 + $0x19f0] sm:$0xff] }
 0x3bd   : > { %5518 = vmatpush1.bf16.xpose.msra.mxu0 %v5517_v22  ;;  %v1929_v22 = vld [vmem:[%s6806_s30 + $0x1d18] sm:$0xff] }
 0x3be   : > { %5710 = vmatpush1.bf16.xpose.msra.mxu1 %v5709_v23  ;;  %5520 = vmatprep.subr.bf16.mxu0 %v5519_v24  ;;  %v2115_v23 = vld [vmem:[%s6806_s30 + $0x22e8] sm:$0xff]  ;;  %v2121_v24 = vld [vmem:[%s6806_s30 + $0x2318] sm:$0xff]  ;;  %v5539_v29 = vpack.c.bf16 %v1929_v22, %v1923_v21  ;;  %v1780_v22 = vld [vmem:[%s6806_s30 + $0x1870] sm:$0xff] }
 0x3bf   : > { %5712 = vmatprep.subr.bf16.mxu1 %v5711_v25  ;;  %v5537_v25 = vpack.c.bf16 %v1916_v17, %v1910_v16  ;;  %v5731_v30 = vpack.c.bf16 %v2121_v24, %v2115_v23  ;;  %v7902_v16 = vrot.slane %v3542_v9, %v6911_v34  ;;  %v5553_v17 = vpack.c.bf16 %v1774_v7, %v1768_v6  ;;  %v1786_v23 = vld [vmem:[%s6806_s30 + $0x18a0] sm:$0xff]  ;;  %v1972_v24 = vld [vmem:[%s6806_s30 + $0x1e70] sm:$0xff] }
 0x3c1   : > { %v3558_v21 = vcombine.high %v7902_v16, %v7902_v16 }
 0x3c5   : > { %5522 = vmatpush1.bf16.xpose.msra.mxu0 %v5521_v37  ;;  %v1941_v37 = vld [vmem:[%s6806_s30 + $0x1d78] sm:$0xff] }
 0x3c6   : > { %5714 = vmatpush1.bf16.xpose.msra.mxu1 %v5713_v38  ;;  %5524 = vmatprep.subr.bf16.mxu0 %v5523_v40  ;;  %v2127_v38 = vld [vmem:[%s6806_s30 + $0x2348] sm:$0xff]  ;;  %v2133_v40 = vld [vmem:[%s6806_s30 + $0x2378] sm:$0xff]  ;;  %v5543_v42 = vpack.c.bf16 %v1941_v37, %v1935_v36  ;;  %v1792_v36 = vld [vmem:[%s6806_s30 + $0x18d0] sm:$0xff] }
 0x3c7   : > { %5716 = vmatprep.subr.bf16.mxu1 %v5715_v10  ;;  %v5541_v10 = vpack.c.bf16 %v1928_v33, %v1922_v32  ;;  %v5735_v43 = vpack.c.bf16 %v2133_v40, %v2127_v38  ;;  %v1991_v32 = vld [vmem:[%s6806_s30 + $0x1f08] sm:$0xff]  ;;  %v1798_v37 = vld [vmem:[%s6806_s30 + $0x1900] sm:$0xff]  ;;  %v1984_v38 = vld [vmem:[%s6806_s30 + $0x1ed0] sm:$0xff] }
 0x3c8   : > { %v1990_v40 = vld [vmem:[%s6806_s30 + $0x1f00] sm:$0xff] }
 0x3cd   : > { %5526 = vmatpush1.bf16.xpose.msra.mxu0 %v5525_v46  ;;  %v1953_v46 = vld [vmem:[%s6806_s30 + $0x1dd8] sm:$0xff] }
 0x3ce   : > { %5718 = vmatpush1.bf16.xpose.msra.mxu1 %v5717_v47  ;;  %5528 = vmatprep.subr.bf16.mxu0 %v5527_v48  ;;  %v2139_v47 = vld [vmem:[%s6806_s30 + $0x23a8] sm:$0xff]  ;;  %v2145_v48 = vld [vmem:[%s6806_s30 + $0x23d8] sm:$0xff]  ;;  %v5547_v51 = vpack.c.bf16 %v1953_v46, %v1947_v45  ;;  %v1804_v45 = vld [vmem:[%s6806_s30 + $0x1930] sm:$0xff] }
 0x3cf   : > { %5720 = vmatprep.subr.bf16.mxu1 %v5719_v49  ;;  %v5545_v49 = vpack.c.bf16 %v1940_v39, %v1934_v12  ;;  %v5739_v15 = vpack.c.bf16 %v2145_v48, %v2139_v47  ;;  %v5561_v12 = vpack.c.bf16 %v1798_v37, %v1792_v36  ;;  %v5753_v39 = vpack.c.bf16 %v1990_v40, %v1984_v38  ;;  %v1810_v46 = vld [vmem:[%s6806_s30 + $0x1960] sm:$0xff]  ;;  %v1996_v47 = vld [vmem:[%s6806_s30 + $0x1f30] sm:$0xff] }
 0x3d0   : > { %v2002_v48 = vld [vmem:[%s6806_s30 + $0x1f60] sm:$0xff]  ;;  %v1852_v38 = vld [vmem:[%s6806_s30 + $0x1ab0] sm:$0xff] }
 0x3d1   : > { %v1858_v40 = vld [vmem:[%s6806_s30 + $0x1ae0] sm:$0xff] }
 0x3d5   : > { %5530 = vmatpush1.bf16.xpose.msra.mxu0 %v5529_v61  ;;  %v1775_v61 = vld [vmem:[%s6806_s30 + $0x1848] sm:$0xff] }
 0x3d6   : > { %5722 = vmatpush1.bf16.xpose.msra.mxu1 %v5721_v62  ;;  %5532 = vmatprep.subr.bf16.mxu0 %v5531_v0  ;;  %v1961_v62 = vld [vmem:[%s6806_s30 + $0x1e18] sm:$0xff]  ;;  %v1967_v0 = vld [vmem:[%s6806_s30 + $0x1e48] sm:$0xff]  ;;  %v5551_v3 = vpack.c.bf16 %v1775_v61, %v1769_v59  ;;  %v1816_v59 = vld [vmem:[%s6806_s30 + $0x1990] sm:$0xff] }
 0x3d7   : > { %5724 = vmatprep.subr.bf16.mxu1 %v5723_v1  ;;  %v5549_v1 = vpack.c.bf16 %v1952_v54, %v1946_v53  ;;  %v5743_v5 = vpack.c.bf16 %v1967_v0, %v1961_v62  ;;  %v5565_v53 = vpack.c.bf16 %v1810_v46, %v1804_v45  ;;  %v5757_v54 = vpack.c.bf16 %v2002_v48, %v1996_v47  ;;  %v1822_v61 = vld [vmem:[%s6806_s30 + $0x19c0] sm:$0xff]  ;;  %v2008_v62 = vld [vmem:[%s6806_s30 + $0x1f90] sm:$0xff] }
 0x3d8   : > { %v2014_v0 = vld [vmem:[%s6806_s30 + $0x1fc0] sm:$0xff]  ;;  %v5569_v6 = vpack.c.bf16 %v1822_v61, %v1816_v59  ;;  %v1864_v47 = vld [vmem:[%s6806_s30 + $0x1b10] sm:$0xff] }
 0x3d9   : > { %v5761_v7 = vpack.c.bf16 %v2014_v0, %v2008_v62  ;;  %v1870_v48 = vld [vmem:[%s6806_s30 + $0x1b40] sm:$0xff]  ;;  %v1876_v62 = vld [vmem:[%s6806_s30 + $0x1b70] sm:$0xff] }
 0x3da   : > { %v1882_v0 = vld [vmem:[%s6806_s30 + $0x1ba0] sm:$0xff] }
 0x3dd   : > { %5534 = vmatpush1.bf16.xpose.msra.mxu0 %v5533_v13  ;;  %v1781_v13 = vld [vmem:[%s6806_s30 + $0x1878] sm:$0xff] }
 0x3de   : > { %5726 = vmatpush1.bf16.xpose.msra.mxu1 %v5725_v28  ;;  %5536 = vmatprep.subr.bf16.mxu0 %v5535_v56  ;;  %v1787_v28 = vld [vmem:[%s6806_s30 + $0x18a8] sm:$0xff]  ;;  %v1973_v56 = vld [vmem:[%s6806_s30 + $0x1e78] sm:$0xff] }
 0x3df   : > { %5728 = vmatprep.subr.bf16.mxu1 %v5727_v14  ;;  %v1979_v14 = vld [vmem:[%s6806_s30 + $0x1ea8] sm:$0xff]  ;;  %v5555_v20 = vpack.c.bf16 %v1787_v28, %v1781_v13  ;;  %v1834_v13 = vld [vmem:[%s6806_s30 + $0x1a20] sm:$0xff]  ;;  %v2020_v28 = vld [vmem:[%s6806_s30 + $0x1ff0] sm:$0xff] }
 0x3e0   : > { %v5747_v55 = vpack.c.bf16 %v1979_v14, %v1973_v56  ;;  %v2026_v56 = vld [vmem:[%s6806_s30 + $0x2020] sm:$0xff]  ;;  %v1841_v14 = vld [vmem:[%s6806_s30 + $0x1a58] sm:$0xff] }
 0x3e5   : > { %5538 = vmatpush1.bf16.xpose.msra.mxu0 %v5537_v25  ;;  %v1978_v25 = vld [vmem:[%s6806_s30 + $0x1ea0] sm:$0xff] }
 0x3e6   : > { %5730 = vmatpush1.bf16.xpose.msra.mxu1 %v5729_v26  ;;  %5540 = vmatprep.subr.bf16.mxu0 %v5539_v29  ;;  %v1793_v26 = vld [vmem:[%s6806_s30 + $0x18d8] sm:$0xff]  ;;  %v1799_v29 = vld [vmem:[%s6806_s30 + $0x1908] sm:$0xff]  ;;  %v5749_v33 = vpack.c.bf16 %v1978_v25, %v1972_v24  ;;  %v1840_v24 = vld [vmem:[%s6806_s30 + $0x1a50] sm:$0xff] }
 0x3e7   : > { %5732 = vmatprep.subr.bf16.mxu1 %v5731_v30  ;;  %v1985_v30 = vld [vmem:[%s6806_s30 + $0x1ed8] sm:$0xff]  ;;  %v5559_v35 = vpack.c.bf16 %v1799_v29, %v1793_v26  ;;  %v1846_v25 = vld [vmem:[%s6806_s30 + $0x1a80] sm:$0xff]  ;;  %v2032_v26 = vld [vmem:[%s6806_s30 + $0x2050] sm:$0xff] }
 0x3e8   : > { %v5751_v63 = vpack.c.bf16 %v1991_v32, %v1985_v30  ;;  %v2038_v29 = vld [vmem:[%s6806_s30 + $0x2080] sm:$0xff]  ;;  %v1853_v30 = vld [vmem:[%s6806_s30 + $0x1ab8] sm:$0xff]  ;;  %v1859_v32 = vld [vmem:[%s6806_s30 + $0x1ae8] sm:$0xff] }
 0x3e9   : > { %v5579_v36 = vpack.c.bf16 %v1859_v32, %v1853_v30 }
 0x3ed   : > { %5542 = vmatpush1.bf16.xpose.msra.mxu0 %v5541_v10  ;;  %v1805_v10 = vld [vmem:[%s6806_s30 + $0x1938] sm:$0xff] }
 0x3ee   : > { %5734 = vmatpush1.bf16.xpose.msra.mxu1 %v5733_v41  ;;  %5544 = vmatprep.subr.bf16.mxu0 %v5543_v42  ;;  %v1811_v41 = vld [vmem:[%s6806_s30 + $0x1968] sm:$0xff]  ;;  %v1997_v42 = vld [vmem:[%s6806_s30 + $0x1f38] sm:$0xff] }
 0x3ef   : > { %5736 = vmatprep.subr.bf16.mxu1 %v5735_v43  ;;  %v2003_v43 = vld [vmem:[%s6806_s30 + $0x1f68] sm:$0xff]  ;;  %v5563_v27 = vpack.c.bf16 %v1811_v41, %v1805_v10  ;;  %v2044_v10 = vld [vmem:[%s6806_s30 + $0x20b0] sm:$0xff]  ;;  %v2050_v41 = vld [vmem:[%s6806_s30 + $0x20e0] sm:$0xff] }
 0x3f0   : > { %v5755_v44 = vpack.c.bf16 %v2003_v43, %v1997_v42  ;;  %v1865_v42 = vld [vmem:[%s6806_s30 + $0x1b18] sm:$0xff]  ;;  %v1871_v43 = vld [vmem:[%s6806_s30 + $0x1b48] sm:$0xff] }
 0x3f1   : > { %v5583_v45 = vpack.c.bf16 %v1871_v43, %v1865_v42  ;;  %v2105_v43 = vld [vmem:[%s6806_s30 + $0x2298] sm:$0xff] }
 0x3f5   : > { %5546 = vmatpush1.bf16.xpose.msra.mxu0 %v5545_v49  ;;  %v1817_v49 = vld [vmem:[%s6806_s30 + $0x1998] sm:$0xff] }
 0x3f6   : > { %5738 = vmatpush1.bf16.xpose.msra.mxu1 %v5737_v50  ;;  %5548 = vmatprep.subr.bf16.mxu0 %v5547_v51  ;;  %v1823_v50 = vld [vmem:[%s6806_s30 + $0x19c8] sm:$0xff]  ;;  %v2009_v51 = vld [vmem:[%s6806_s30 + $0x1f98] sm:$0xff] }
 0x3f7   : > { %5740 = vmatprep.subr.bf16.mxu1 %v5739_v15  ;;  %v2015_v15 = vld [vmem:[%s6806_s30 + $0x1fc8] sm:$0xff]  ;;  %v5567_v57 = vpack.c.bf16 %v1823_v50, %v1817_v49  ;;  %v2056_v49 = vld [vmem:[%s6806_s30 + $0x2110] sm:$0xff]  ;;  %v2062_v50 = vld [vmem:[%s6806_s30 + $0x2140] sm:$0xff] }
 0x3f8   : > { %v5759_v58 = vpack.c.bf16 %v2015_v15, %v2009_v51  ;;  %v1877_v51 = vld [vmem:[%s6806_s30 + $0x1b78] sm:$0xff]  ;;  %v1883_v15 = vld [vmem:[%s6806_s30 + $0x1ba8] sm:$0xff] }
 0x3f9   : > { %v5587_v59 = vpack.c.bf16 %v1883_v15, %v1877_v51 }
 0x3fd   : > { %5550 = vmatpush1.bf16.xpose.msra.mxu0 %v5549_v1  ;;  %v1829_v1 = vld [vmem:[%s6806_s30 + $0x19f8] sm:$0xff] }
 0x3fe   : > { %5742 = vmatpush1.bf16.xpose.msra.mxu1 %v5741_v19  ;;  %5552 = vmatprep.subr.bf16.mxu0 %v5551_v3  ;;  %v1835_v19 = vld [vmem:[%s6806_s30 + $0x1a28] sm:$0xff]  ;;  %v2021_v3 = vld [vmem:[%s6806_s30 + $0x1ff8] sm:$0xff] }
 0x3ff   : > { %5744 = vmatprep.subr.bf16.mxu1 %v5743_v5  ;;  %v2027_v5 = vld [vmem:[%s6806_s30 + $0x2028] sm:$0xff]  ;;  %v5571_v8 = vpack.c.bf16 %v1835_v19, %v1829_v1  ;;  %v2068_v1 = vld [vmem:[%s6806_s30 + $0x2170] sm:$0xff]  ;;  %v2074_v19 = vld [vmem:[%s6806_s30 + $0x21a0] sm:$0xff] }
 0x400   : > { %v5763_v9 = vpack.c.bf16 %v2027_v5, %v2021_v3  ;;  %v1889_v3 = vld [vmem:[%s6806_s30 + $0x1bd8] sm:$0xff]  ;;  %v1895_v5 = vld [vmem:[%s6806_s30 + $0x1c08] sm:$0xff] }
 0x404   : > { %3638 = vmatmul.mubr.f32.vlgmr.msra.gmra.mrb[4].mxu0 %v7770_v60 }
 0x405   : > { %5554 = vmatpush1.bf16.xpose.msra.mxu0 %v5553_v17  ;;  %3851 = vmatmul.mubr.f32.vlgmr.msra.gmra.mrb[4].mxu1 %v7770_v60  ;;  %v5557_v60 = vpack.c.bf16 %v1786_v23, %v1780_v22  ;;  %v1847_v17 = vld [vmem:[%s6806_s30 + $0x1a88] sm:$0xff] }
 0x406   : > { %5746 = vmatpush1.bf16.xpose.msra.mxu1 %v5745_v18  ;;  %5556 = vmatprep.subr.bf16.mxu0 %v5555_v20  ;;  %v2033_v18 = vld [vmem:[%s6806_s30 + $0x2058] sm:$0xff]  ;;  %v2039_v20 = vld [vmem:[%s6806_s30 + $0x2088] sm:$0xff]  ;;  %v5575_v22 = vpack.c.bf16 %v1847_v17, %v1841_v14  ;;  %v2080_v14 = vld [vmem:[%s6806_s30 + $0x21d0] sm:$0xff] }
 0x407   : > { %5748 = vmatprep.subr.bf16.mxu1 %v5747_v55  ;;  %3708 = vmatprep.mubr.f32.mxu0 %v3558_v21  ;;  %v5573_v55 = vpack.c.bf16 %v1834_v13, %v1828_v11  ;;  %v5767_v23 = vpack.c.bf16 %v2039_v20, %v2033_v18  ;;  %v5591_v11 = vpack.c.bf16 %v1895_v5, %v1889_v3  ;;  %v2086_v17 = vld [vmem:[%s6806_s30 + $0x2200] sm:$0xff]  ;;  %v1901_v18 = vld [vmem:[%s6806_s30 + $0x1c38] sm:$0xff]  ;;  %v1907_v20 = vld [vmem:[%s6806_s30 + $0x1c68] sm:$0xff] }
 0x408   : > { %3921 = vmatprep.mubr.f32.mxu1 %v3558_v21  ;;  %v5765_v21 = vpack.c.bf16 %v2026_v56, %v2020_v28  ;;  %v1888_v28 = vld [vmem:[%s6806_s30 + $0x1bd0] sm:$0xff]  ;;  %v1894_v56 = vld [vmem:[%s6806_s30 + $0x1c00] sm:$0xff]  ;;  %v1931_v3 = vld [vmem:[%s6806_s30 + $0x1d28] sm:$0xff] }
 0x409   : > { %v2117_v5 = vld [vmem:[%s6806_s30 + $0x22f8] sm:$0xff] }
 0x40d   : > { %5558 = vmatpush1.bf16.xpose.msra.mxu0 %v5557_v60  ;;  %v2045_v60 = vld [vmem:[%s6806_s30 + $0x20b8] sm:$0xff] }
 0x40e   : > { %5750 = vmatpush1.bf16.xpose.msra.mxu1 %v5749_v33  ;;  %5560 = vmatprep.subr.bf16.mxu0 %v5559_v35  ;;  %v2051_v33 = vld [vmem:[%s6806_s30 + $0x20e8] sm:$0xff]  ;;  %v5577_v35 = vpack.c.bf16 %v1846_v25, %v1840_v24  ;;  %v5785_v24 = vpack.c.bf16 %v2086_v17, %v2080_v14  ;;  %v5595_v25 = vpack.c.bf16 %v1907_v20, %v1901_v18 }
 0x40f   : > { %5752 = vmatprep.subr.bf16.mxu1 %v5751_v63  ;;  %v5769_v63 = vpack.c.bf16 %v2038_v29, %v2032_v26  ;;  %v5771_v37 = vpack.c.bf16 %v2051_v33, %v2045_v60  ;;  %v1900_v33 = vld [vmem:[%s6806_s30 + $0x1c30] sm:$0xff] }
 0x415   : > { %5562 = vmatpush1.bf16.xpose.msra.mxu0 %v5561_v12  ;;  %v2057_v12 = vld [vmem:[%s6806_s30 + $0x2118] sm:$0xff] }
 0x416   : > { %5754 = vmatpush1.bf16.xpose.msra.mxu1 %v5753_v39  ;;  %5564 = vmatprep.subr.bf16.mxu0 %v5563_v27  ;;  %v2063_v39 = vld [vmem:[%s6806_s30 + $0x2148] sm:$0xff]  ;;  %v5581_v27 = vpack.c.bf16 %v1858_v40, %v1852_v38  ;;  %v1913_v38 = vld [vmem:[%s6806_s30 + $0x1c98] sm:$0xff] }
 0x417   : > { %5756 = vmatprep.subr.bf16.mxu1 %v5755_v44  ;;  %v5773_v44 = vpack.c.bf16 %v2050_v41, %v2044_v10  ;;  %v5775_v46 = vpack.c.bf16 %v2063_v39, %v2057_v12  ;;  %v1919_v40 = vld [vmem:[%s6806_s30 + $0x1cc8] sm:$0xff] }
 0x418   : > { %v2111_v12 = vld [vmem:[%s6806_s30 + $0x22c8] sm:$0xff] }
 0x41d   : > { %5566 = vmatpush1.bf16.xpose.msra.mxu0 %v5565_v53  ;;  %v2069_v53 = vld [vmem:[%s6806_s30 + $0x2178] sm:$0xff] }
 0x41e   : > { %5758 = vmatpush1.bf16.xpose.msra.mxu1 %v5757_v54  ;;  %5568 = vmatprep.subr.bf16.mxu0 %v5567_v57  ;;  %v2075_v54 = vld [vmem:[%s6806_s30 + $0x21a8] sm:$0xff]  ;;  %v5585_v57 = vpack.c.bf16 %v1870_v48, %v1864_v47  ;;  %v5599_v48 = vpack.c.bf16 %v1919_v40, %v1913_v38 }
 0x41f   : > { %5760 = vmatprep.subr.bf16.mxu1 %v5759_v58  ;;  %v5777_v58 = vpack.c.bf16 %v2062_v50, %v2056_v49  ;;  %v5779_v61 = vpack.c.bf16 %v2075_v54, %v2069_v53  ;;  %v5791_v50 = vpack.c.bf16 %v2111_v12, %v2105_v43  ;;  %v1912_v53 = vld [vmem:[%s6806_s30 + $0x1c90] sm:$0xff] }
 0x420   : > { %v335_v54 = vld [vmem:[%s6798_s8 + $0x110] sm:$0xff] }
 0x425   : > { %5570 = vmatpush1.bf16.xpose.msra.mxu0 %v5569_v6  ;;  %v2081_v6 = vld [vmem:[%s6806_s30 + $0x21d8] sm:$0xff] }
 0x426   : > { %5762 = vmatpush1.bf16.xpose.msra.mxu1 %v5761_v7  ;;  %5572 = vmatprep.subr.bf16.mxu0 %v5571_v8  ;;  %v2087_v7 = vld [vmem:[%s6806_s30 + $0x2208] sm:$0xff]  ;;  %v5589_v8 = vpack.c.bf16 %v1882_v0, %v1876_v62  ;;  %v2110_v62 = vld [vmem:[%s6806_s30 + $0x22c0] sm:$0xff]  ;;  %v561_v0 = vrot.slane %v335_v54, 4 }
 0x427   : > { %5764 = vmatprep.subr.bf16.mxu1 %v5763_v9  ;;  %v5781_v9 = vpack.c.bf16 %v2074_v19, %v2068_v1  ;;  %v5783_v13 = vpack.c.bf16 %v2087_v7, %v2081_v6  ;;  %v1925_v19 = vld [vmem:[%s6806_s30 + $0x1cf8] sm:$0xff]  ;;  %v2123_v7 = vld [vmem:[%s6806_s30 + $0x2328] sm:$0xff] }
 0x428   : > { %v5603_v18 = vpack.c.bf16 %v1931_v3, %v1925_v19 }
 0x42d   : > { %5574 = vmatpush1.bf16.xpose.msra.mxu0 %v5573_v55  ;;  %v2093_v55 = vld [vmem:[%s6806_s30 + $0x2238] sm:$0xff] }
 0x42e   : > { %5766 = vmatpush1.bf16.xpose.msra.mxu1 %v5765_v21  ;;  %5576 = vmatprep.subr.bf16.mxu0 %v5575_v22  ;;  %v2099_v21 = vld [vmem:[%s6806_s30 + $0x2268] sm:$0xff]  ;;  %v5593_v22 = vpack.c.bf16 %v1894_v56, %v1888_v28 }
 0x42f   : > { %5768 = vmatprep.subr.bf16.mxu1 %v5767_v23  ;;  %v2535_v23 = vld [vmem:[%s7530_s23 + $0x4] sm:$0xf]  ;;  %v5787_v26 = vpack.c.bf16 %v2099_v21, %v2093_v55  ;;  %v5795_v55 = vpack.c.bf16 %v2123_v7, %v2117_v5 }
 0x430   : > { %v2561_v29 = vrot.slane %v2535_v23, %v7526_v31  ;;  %v2569_v30 = vrot.slane %v2535_v23, %v7534_v2  ;;  %v2565_v32 = vrot.slane %v2535_v23, %v7537_v52  ;;  %v2573_v60 = vrot.slane %v2535_v23, %v7540_v4 }
 0x435   : > { %5578 = vmatpush1.bf16.xpose.msra.mxu0 %v5577_v35  ;;  %v1906_v35 = vld [vmem:[%s6806_s30 + $0x1c60] sm:$0xff] }
 0x436   : > { %5770 = vmatpush1.bf16.xpose.msra.mxu1 %v5769_v63  ;;  %5580 = vmatprep.subr.bf16.mxu0 %v5579_v36  ;;  %v2092_v63 = vld [vmem:[%s6806_s30 + $0x2230] sm:$0xff] }
 0x437   : > { %5772 = vmatprep.subr.bf16.mxu1 %v5771_v37  ;;  %v2098_v37 = vld [vmem:[%s6806_s30 + $0x2260] sm:$0xff] }
 0x438   : > { %v5789_v47 = vpack.c.bf16 %v2098_v37, %v2092_v63  ;;  %v1937_v63 = vld [vmem:[%s6806_s30 + $0x1d58] sm:$0xff] }
 0x43d   : > { %5582 = vmatpush1.bf16.xpose.msra.mxu0 %v5581_v27 }
 0x43e   : > { %5774 = vmatpush1.bf16.xpose.msra.mxu1 %v5773_v44  ;;  %5584 = vmatprep.subr.bf16.mxu0 %v5583_v45  ;;  %v5597_v45 = vpack.c.bf16 %v1906_v35, %v1900_v33  ;;  %v2122_v35 = vld [vmem:[%s6806_s30 + $0x2320] sm:$0xff] }
 0x43f   : > { %5776 = vmatprep.subr.bf16.mxu1 %v5775_v46 }
 0x445   : > { %5586 = vmatpush1.bf16.xpose.msra.mxu0 %v5585_v57  ;;  %v336_v57 = vld [vmem:[%s6798_s8 + $0x118] sm:$0xff] }
 0x446   : > { %5778 = vmatpush1.bf16.xpose.msra.mxu1 %v5777_v58  ;;  %5588 = vmatprep.subr.bf16.mxu0 %v5587_v59  ;;  %v1918_v59 = vld [vmem:[%s6806_s30 + $0x1cc0] sm:$0xff]  ;;  %v567_v1 = vrot.slane %v336_v57, 4 }
 0x447   : > { %5780 = vmatprep.subr.bf16.mxu1 %v5779_v61  ;;  %v2104_v61 = vld [vmem:[%s6806_s30 + $0x2290] sm:$0xff] }
 0x448   : > { %v568_v14 = vadd.f32 %v567_v1, %v336_v57  ;;  %v5793_v17 = vpack.c.bf16 %v2110_v62, %v2104_v61  ;;  %v2134_v57 = vld [vmem:[%s6806_s30 + $0x2380] sm:$0xff]  ;;  %v2147_v1 = vld [vmem:[%s6806_s30 + $0x23e8] sm:$0xff] }
 0x44a   : > { %v569_v23 = vrot.slane %v568_v14, 2 }
 0x44d   : > { %5590 = vmatpush1.bf16.xpose.msra.mxu0 %v5589_v8  ;;  %v329_v8 = vld [vmem:[%s6798_s8 + $0xe0] sm:$0xff] }
 0x44e   : > { %5782 = vmatpush1.bf16.xpose.msra.mxu1 %v5781_v9  ;;  %5592 = vmatprep.subr.bf16.mxu0 %v5591_v11  ;;  %v330_v9 = vld [vmem:[%s6798_s8 + $0xe8] sm:$0xff]  ;;  %v562_v11 = vadd.f32 %v561_v0, %v335_v54  ;;  %v525_v28 = vrot.slane %v329_v8, 4  ;;  %v2128_v54 = vld [vmem:[%s6806_s30 + $0x2350] sm:$0xff]  ;;  %v2141_v0 = vld [vmem:[%s6806_s30 + $0x23b8] sm:$0xff] }
 0x44f   : > { %5784 = vmatprep.subr.bf16.mxu1 %v5783_v13  ;;  %v5601_v13 = vpack.c.bf16 %v1918_v59, %v1912_v53  ;;  %v531_v56 = vrot.slane %v330_v9, 4  ;;  %v1942_v53 = vld [vmem:[%s6806_s30 + $0x1d80] sm:$0xff]  ;;  %v1955_v59 = vld [vmem:[%s6806_s30 + $0x1de8] sm:$0xff]  ;;  %v5801_v5 = vpack.c.bf16 %v2134_v57, %v2128_v54  ;;  %v1800_v54 = vld [vmem:[%s6806_s30 + $0x1910] sm:$0xff] }
 0x450   : > { %v563_v20 = vrot.slane %v562_v11, 2  ;;  %v526_v21 = vadd.f32 %v525_v28, %v329_v8  ;;  %v5803_v8 = vpack.c.bf16 %v2147_v1, %v2141_v0  ;;  %v1986_v57 = vld [vmem:[%s6806_s30 + $0x1ee0] sm:$0xff]  ;;  %v2005_v0 = vld [vmem:[%s6806_s30 + $0x1f78] sm:$0xff] }
 0x455   : > { %5594 = vmatpush1.bf16.xpose.msra.mxu0 %v5593_v22  ;;  %v532_v22 = vadd.f32 %v531_v56, %v330_v9  ;;  %v354_v9 = vld [vmem:[#allocation2 + $0x20] sm:$0xf] }
 0x456   : > { %5786 = vmatpush1.bf16.xpose.msra.mxu1 %v5785_v24  ;;  %5596 = vmatprep.subr.bf16.mxu0 %v5595_v25  ;;  %v564_v24 = vadd.f32 %v563_v20, %v562_v11  ;;  %v527_v25 = vrot.slane %v526_v21, 2  ;;  %v1948_v56 = vld [vmem:[%s6806_s30 + $0x1db0] sm:$0xff]  ;;  %v1771_v20 = vld [vmem:[%s6806_s30 + $0x1828] sm:$0xff] }
 0x457   : > { %v3322_v36 = vpop.f32.mrb[2].mxu0  ;;  %5788 = vmatprep.subr.bf16.mxu1 %v5787_v26  ;;  %v533_v26 = vrot.slane %v532_v22, 2 }
 0x458   : > { %v6259_v10 = vadd.f32 %v3322_v36, %v2561_v29  ;;  %v3535_v41 = vpop.f32.mrb[2].mxu1  ;;  %v3324_v42 = vpop.f32.mrb[3].mxu0  ;;  %v570_v29 = vadd.f32 %v569_v23, %v568_v14  ;;  %v565_v33 = vrot.slane %v564_v24, 1  ;;  %v1943_v36 = vld [vmem:[%s6806_s30 + $0x1d88] sm:$0xff]  ;;  %v528_v37 = vadd.f32 %v527_v25, %v526_v21  ;;  %v1954_v14 = vld [vmem:[%s6806_s30 + $0x1de0] sm:$0xff] }
 0x459   : > { %v6261_v39 = vadd.f32 %v3535_v41, %v2569_v30  ;;  %v6260_v27 = vadd.f32 %v3324_v42, %v2565_v32  ;;  %v3537_v44 = vpop.f32.mrb[3].mxu1  ;;  %v1924_v30 = vld [vmem:[%s6806_s30 + $0x1cf0] sm:$0xff]  ;;  %v1930_v32 = vld [vmem:[%s6806_s30 + $0x1d20] sm:$0xff]  ;;  %v534_v38 = vadd.f32 %v533_v26, %v532_v22  ;;  %v2135_v41 = vld [vmem:[%s6806_s30 + $0x2388] sm:$0xff]  ;;  %v5613_v23 = vpack.c.bf16 %v1954_v14, %v1948_v56 }
 0x45a   : > { %v6262_v46 = vadd.f32 %v3537_v44, %v2573_v60  ;;  %v2116_v60 = vld [vmem:[%s6806_s30 + $0x22f0] sm:$0xff]  ;;  %v571_v40 = vrot.slane %v570_v29, 1  ;;  %v566_v42 = vadd.f32 %v565_v33, %v564_v24  ;;  %v5605_v43 = vpack.c.bf16 %v1930_v32, %v1924_v30  ;;  %v1963_v21 = vld [vmem:[%s6806_s30 + $0x1e28] sm:$0xff]  ;;  %v1969_v22 = vld [vmem:[%s6806_s30 + $0x1e58] sm:$0xff] }
 0x45b   : > { %v4491_v49 = vcombine.low %v6259_v10, %v6260_v27  ;;  %v2129_v10 = vld [vmem:[%s6806_s30 + $0x2358] sm:$0xff]  ;;  %v529_v12 = vrot.slane %v528_v37, 1  ;;  %v5797_v44 = vpack.c.bf16 %v2122_v35, %v2116_v60  ;;  %v5807_v26 = vpack.c.bf16 %v1969_v22, %v1963_v21  ;;  %v1776_v30 = vld [vmem:[%s6806_s30 + $0x1850] sm:$0xff]  ;;  %v1962_v32 = vld [vmem:[%s6806_s30 + $0x1e20] sm:$0xff] }
 0x45c   : > { %v4492_v51 = vcombine.low %v6261_v39, %v6262_v46  ;;  %v535_v39 = vrot.slane %v534_v38, 1  ;;  %v572_v27 = vadd.f32 %v571_v40, %v570_v29  ;;  %v5799_v46 = vpack.c.bf16 %v2135_v41, %v2129_v10  ;;  %v1770_v29 = vld [vmem:[%s6806_s30 + $0x1820] sm:$0xff]  ;;  %v1968_v33 = vld [vmem:[%s6806_s30 + $0x1e50] sm:$0xff]  ;;  %v1783_v35 = vld [vmem:[%s6806_s30 + $0x1888] sm:$0xff] }
 0x45d   : > { %v4499_v15 = vrot.slane %v4491_v49, %v6911_v34  ;;  %5598 = vmatpush1.bf16.xpose.msra.mxu0 %v5597_v45  ;;  %v5607_v45 = vpack.c.bf16 %v1943_v36, %v1937_v63  ;;  %v1789_v63 = vld [vmem:[%s6806_s30 + $0x18b8] sm:$0xff]  ;;  %v5617_v40 = vpack.c.bf16 %v1776_v30, %v1770_v29  ;;  %v5809_v41 = vpack.c.bf16 %v1968_v33, %v1962_v32  ;;  %v1824_v21 = vld [vmem:[%s6806_s30 + $0x19d0] sm:$0xff]  ;;  %v2010_v22 = vld [vmem:[%s6806_s30 + $0x1fa0] sm:$0xff] }
 0x45e   : > { %v4506_v58 = vrot.slane %v4492_v51, %v6911_v34  ;;  %5790 = vmatpush1.bf16.xpose.msra.mxu1 %v5789_v47  ;;  %5600 = vmatprep.subr.bf16.mxu0 %v5599_v48  ;;  %v530_v47 = vadd.f32 %v529_v12, %v528_v37  ;;  %v536_v48 = vadd.f32 %v535_v39, %v534_v38  ;;  %v1975_v37 = vld [vmem:[%s6806_s30 + $0x1e88] sm:$0xff]  ;;  %v1981_v38 = vld [vmem:[%s6806_s30 + $0x1eb8] sm:$0xff]  ;;  %v1782_v39 = vld [vmem:[%s6806_s30 + $0x1880] sm:$0xff] }
 0x45f   : > { %5792 = vmatprep.subr.bf16.mxu1 %v5791_v50  ;;  %v835_v49 = vcombine.low %v566_v42, %v572_v27  ;;  %v5619_v42 = vpack.c.bf16 %v1789_v63, %v1783_v35  ;;  %v1788_v27 = vld [vmem:[%s6806_s30 + $0x18b0] sm:$0xff]  ;;  %v2017_v56 = vld [vmem:[%s6806_s30 + $0x1fd8] sm:$0xff]  ;;  %v1830_v35 = vld [vmem:[%s6806_s30 + $0x1a00] sm:$0xff] }
 0x460   : > { %v4507_v6 = vcombine.low %v4499_v15, %v4506_v58  ;;  %v810_v50 = vcombine.low %v530_v47, %v536_v48  ;;  %v1936_v15 = vld [vmem:[%s6806_s30 + $0x1d50] sm:$0xff]  ;;  %v1949_v58 = vld [vmem:[%s6806_s30 + $0x1db8] sm:$0xff]  ;;  %v1987_v48 = vld [vmem:[%s6806_s30 + $0x1ee8] sm:$0xff] }
 0x461   : > { %v842_v51 = vrot.slane %v835_v49, %v6911_v34  ;;  %v5609_v19 = vpack.c.bf16 %v1942_v53, %v1936_v15  ;;  %v1801_v47 = vld [vmem:[%s6806_s30 + $0x1918] sm:$0xff]  ;;  %v1794_v53 = vld [vmem:[%s6806_s30 + $0x18e0] sm:$0xff]  ;;  %v1836_v63 = vld [vmem:[%s6806_s30 + $0x1a30] sm:$0xff] }
 0x462   : > { %4547 = vst [vmem:[%s7569_s4 + $0x8] sm:$0xff] %v4507_v6  ;;  %v817_v61 = vrot.slane %v810_v50, %v6911_v34  ;;  %v5611_v6 = vpack.c.bf16 %v1955_v59, %v1949_v58  ;;  %v1993_v49 = vld [vmem:[%s6806_s30 + $0x1f18] sm:$0xff]  ;;  %v1992_v58 = vld [vmem:[%s6806_s30 + $0x1f10] sm:$0xff]  ;;  %v1807_v59 = vld [vmem:[%s6806_s30 + $0x1948] sm:$0xff]  ;;  %v5625_v1 = vpack.c.bf16 %v1800_v54, %v1794_v53 }
 0x463   : > { %v936_v62 = vrot.slane %v842_v51, 7  ;;  %v5815_v15 = vpack.c.bf16 %v1993_v49, %v1987_v48  ;;  %v2029_v29 = vld [vmem:[%s6806_s30 + $0x2038] sm:$0xff]  ;;  %v1855_v48 = vld [vmem:[%s6806_s30 + $0x1ac8] sm:$0xff] }
 0x464   : > { %v1861_v49 = vld [vmem:[%s6806_s30 + $0x1af8] sm:$0xff] }
 0x465   : > { %5602 = vmatpush1.bf16.xpose.msra.mxu0 %v5601_v13  ;;  %v937_v3 = vsel %vm898_vm0, %v936_v62, %v817_v61  ;;  %v1813_v61 = vld [vmem:[%s6806_s30 + $0x1978] sm:$0xff]  ;;  %v5643_v53 = vpack.c.bf16 %v1861_v49, %v1855_v48  ;;  %v2094_v48 = vld [vmem:[%s6806_s30 + $0x2240] sm:$0xff]  ;;  %v2100_v49 = vld [vmem:[%s6806_s30 + $0x2270] sm:$0xff] }
 0x466   : > { %5794 = vmatpush1.bf16.xpose.msra.mxu1 %v5793_v17  ;;  %5604 = vmatprep.subr.bf16.mxu0 %v5603_v18  ;;  %v938_v7 = vsel %vm900_vm1, %v936_v62, %v937_v3  ;;  %v2140_v17 = vld [vmem:[%s6806_s30 + $0x23b0] sm:$0xff]  ;;  %v2146_v18 = vld [vmem:[%s6806_s30 + $0x23e0] sm:$0xff]  ;;  %v5627_v3 = vpack.c.bf16 %v1813_v61, %v1807_v59 }
 0x467   : > { %5796 = vmatprep.subr.bf16.mxu1 %v5795_v55  ;;  %v939_v11 = vsel %vm902_vm2, %v936_v62, %v938_v7  ;;  %v1777_v55 = vld [vmem:[%s6806_s30 + $0x1858] sm:$0xff]  ;;  %v5805_v24 = vpack.c.bf16 %v2146_v18, %v2140_v17  ;;  %v1812_v7 = vld [vmem:[%s6806_s30 + $0x1970] sm:$0xff]  ;;  %v2046_v59 = vld [vmem:[%s6806_s30 + $0x20c0] sm:$0xff] }
 0x468   : > { %v940_v13 = vsel %vm904_vm3, %v936_v62, %v939_v11  ;;  %v5615_v25 = vpack.c.bf16 %v1777_v55, %v1771_v20  ;;  %v1999_v62 = vld [vmem:[%s6806_s30 + $0x1f48] sm:$0xff]  ;;  %v1818_v55 = vld [vmem:[%s6806_s30 + $0x19a0] sm:$0xff]  ;;  %v2052_v61 = vld [vmem:[%s6806_s30 + $0x20f0] sm:$0xff] }
 0x469   : > { %v968_v28 = vadd.f32 %v940_v13, %v354_v9  ;;  %v2004_v9 = vld [vmem:[%s6806_s30 + $0x1f70] sm:$0xff]  ;;  %v1819_v11 = vld [vmem:[%s6806_s30 + $0x19a8] sm:$0xff]  ;;  %v1825_v13 = vld [vmem:[%s6806_s30 + $0x19d8] sm:$0xff]  ;;  %v5633_v30 = vpack.c.bf16 %v1824_v21, %v1818_v55 }
 0x46a   : > { %v5631_v18 = vpack.c.bf16 %v1825_v13, %v1819_v11  ;;  %v2058_v11 = vld [vmem:[%s6806_s30 + $0x2120] sm:$0xff]  ;;  %v2064_v13 = vld [vmem:[%s6806_s30 + $0x2150] sm:$0xff] }
 0x46b   : > { %976 = vst [vmem:[#allocation2 + $0x20] sm:$0xf] %v968_v28  ;;  %v2011_v28 = vld [vmem:[%s6806_s30 + $0x1fa8] sm:$0xff] }
 0x46c   : > { %v5823_v20 = vpack.c.bf16 %v2017_v56, %v2011_v28  ;;  %v1879_v28 = vld [vmem:[%s6806_s30 + $0x1b88] sm:$0xff]  ;;  %v1885_v56 = vld [vmem:[%s6806_s30 + $0x1bb8] sm:$0xff] }
 0x46d   : > { %5606 = vmatpush1.bf16.xpose.msra.mxu0 %v5605_v43  ;;  %v5811_v43 = vpack.c.bf16 %v1981_v38, %v1975_v37  ;;  %v2028_v37 = vld [vmem:[%s6806_s30 + $0x2030] sm:$0xff]  ;;  %v1843_v38 = vld [vmem:[%s6806_s30 + $0x1a68] sm:$0xff]  ;;  %v5651_v55 = vpack.c.bf16 %v1885_v56, %v1879_v28  ;;  %v2118_v28 = vld [vmem:[%s6806_s30 + $0x2300] sm:$0xff] }
 0x46e   : > { %5798 = vmatpush1.bf16.xpose.msra.mxu1 %v5797_v44  ;;  %5608 = vmatprep.subr.bf16.mxu0 %v5607_v45  ;;  %v1974_v44 = vld [vmem:[%s6806_s30 + $0x1e80] sm:$0xff]  ;;  %v1980_v45 = vld [vmem:[%s6806_s30 + $0x1eb0] sm:$0xff] }
 0x46f   : > { %5800 = vmatprep.subr.bf16.mxu1 %v5799_v46  ;;  %v1795_v46 = vld [vmem:[%s6806_s30 + $0x18e8] sm:$0xff]  ;;  %v5813_v50 = vpack.c.bf16 %v1980_v45, %v1974_v44  ;;  %v1842_v44 = vld [vmem:[%s6806_s30 + $0x1a60] sm:$0xff]  ;;  %v1848_v45 = vld [vmem:[%s6806_s30 + $0x1a90] sm:$0xff] }
 0x470   : > { %v5623_v51 = vpack.c.bf16 %v1801_v47, %v1795_v46  ;;  %v2034_v46 = vld [vmem:[%s6806_s30 + $0x2060] sm:$0xff]  ;;  %v2040_v47 = vld [vmem:[%s6806_s30 + $0x2090] sm:$0xff] }
 0x471   : > { %v2124_v56 = vld [vmem:[%s6806_s30 + $0x2330] sm:$0xff] }
 0x472   : > { %v987_v60 = vld [vmem:[#allocation2 + $0x20] sm:$0xf] }
 0x473   : > { %v995_v36 = vmul.f32 0.125, %v987_v60 }
 0x475   : > { %5610 = vmatpush1.bf16.xpose.msra.mxu0 %v5609_v19  ;;  %v8055_v10 = vrot.slane %v995_v36, %v6911_v34  ;;  %v5817_v19 = vpack.c.bf16 %v1992_v58, %v1986_v57  ;;  %v2022_v36 = vld [vmem:[%s6806_s30 + $0x2000] sm:$0xff]  ;;  %v1860_v58 = vld [vmem:[%s6806_s30 + $0x1af0] sm:$0xff] }
 0x476   : > { %5802 = vmatpush1.bf16.xpose.msra.mxu1 %v5801_v5  ;;  %5612 = vmatprep.subr.bf16.mxu0 %v5611_v6  ;;  %v5819_v5 = vpack.c.bf16 %v2005_v0, %v1999_v62  ;;  %v1806_v6 = vld [vmem:[%s6806_s30 + $0x1940] sm:$0xff]  ;;  %v1867_v62 = vld [vmem:[%s6806_s30 + $0x1b28] sm:$0xff]  ;;  %v1873_v0 = vld [vmem:[%s6806_s30 + $0x1b58] sm:$0xff] }
 0x477   : > { %5804 = vmatprep.subr.bf16.mxu1 %v5803_v8  ;;  %v3566_v12 = vcombine.high %v8055_v10, %v8055_v10  ;;  %v1998_v8 = vld [vmem:[%s6806_s30 + $0x1f40] sm:$0xff]  ;;  %v5629_v14 = vpack.c.bf16 %v1812_v7, %v1806_v6  ;;  %v5647_v6 = vpack.c.bf16 %v1873_v0, %v1867_v62  ;;  %v2112_v0 = vld [vmem:[%s6806_s30 + $0x22d0] sm:$0xff] }
 0x478   : > { %v5821_v17 = vpack.c.bf16 %v2004_v9, %v1998_v8  ;;  %v1854_v57 = vld [vmem:[%s6806_s30 + $0x1ac0] sm:$0xff]  ;;  %v1872_v9 = vld [vmem:[%s6806_s30 + $0x1b50] sm:$0xff] }
 0x479   : > { %v1866_v8 = vld [vmem:[%s6806_s30 + $0x1b20] sm:$0xff] }
 0x47a   : > { %v2106_v62 = vld [vmem:[%s6806_s30 + $0x22a0] sm:$0xff] }
 0x47d   : > { %5614 = vmatpush1.bf16.xpose.msra.mxu0 %v5613_v23  ;;  %v2016_v23 = vld [vmem:[%s6806_s30 + $0x1fd0] sm:$0xff] }
 0x47e   : > { %5806 = vmatpush1.bf16.xpose.msra.mxu1 %v5805_v24  ;;  %5616 = vmatprep.subr.bf16.mxu0 %v5615_v25  ;;  %v1831_v24 = vld [vmem:[%s6806_s30 + $0x1a08] sm:$0xff]  ;;  %v1837_v25 = vld [vmem:[%s6806_s30 + $0x1a38] sm:$0xff]  ;;  %v5825_v32 = vpack.c.bf16 %v2016_v23, %v2010_v22  ;;  %v1878_v22 = vld [vmem:[%s6806_s30 + $0x1b80] sm:$0xff] }
 0x47f   : > { %5808 = vmatprep.subr.bf16.mxu1 %v5807_v26  ;;  %v2023_v26 = vld [vmem:[%s6806_s30 + $0x2008] sm:$0xff]  ;;  %v5635_v60 = vpack.c.bf16 %v1837_v25, %v1831_v24  ;;  %v1884_v23 = vld [vmem:[%s6806_s30 + $0x1bb0] sm:$0xff]  ;;  %v2070_v24 = vld [vmem:[%s6806_s30 + $0x2180] sm:$0xff] }
 0x480   : > { %v5827_v33 = vpack.c.bf16 %v2029_v29, %v2023_v26  ;;  %v2076_v25 = vld [vmem:[%s6806_s30 + $0x21b0] sm:$0xff]  ;;  %v1891_v26 = vld [vmem:[%s6806_s30 + $0x1be8] sm:$0xff]  ;;  %v1897_v29 = vld [vmem:[%s6806_s30 + $0x1c18] sm:$0xff] }
 0x484   : > { %3709 = vmatmul.mubr.f32.vlgmr.msra.gmra.mrb[4].mxu0 %v7902_v16 }
 0x485   : > { %5618 = vmatpush1.bf16.xpose.msra.mxu0 %v5617_v40  ;;  %3922 = vmatmul.mubr.f32.vlgmr.msra.gmra.mrb[4].mxu1 %v7902_v16  ;;  %v5621_v16 = vpack.c.bf16 %v1788_v27, %v1782_v39  ;;  %v1849_v40 = vld [vmem:[%s6806_s30 + $0x1a98] sm:$0xff] }
 0x486   : > { %5810 = vmatpush1.bf16.xpose.msra.mxu1 %v5809_v41  ;;  %5620 = vmatprep.subr.bf16.mxu0 %v5619_v42  ;;  %v2035_v41 = vld [vmem:[%s6806_s30 + $0x2068] sm:$0xff]  ;;  %v2041_v42 = vld [vmem:[%s6806_s30 + $0x2098] sm:$0xff]  ;;  %v5639_v39 = vpack.c.bf16 %v1849_v40, %v1843_v38  ;;  %v2082_v38 = vld [vmem:[%s6806_s30 + $0x21e0] sm:$0xff] }
 0x487   : > { %5812 = vmatprep.subr.bf16.mxu1 %v5811_v43  ;;  %3779 = vmatprep.mubr.f32.mxu0 %v3566_v12  ;;  %v5637_v43 = vpack.c.bf16 %v1836_v63, %v1830_v35  ;;  %v5831_v27 = vpack.c.bf16 %v2041_v42, %v2035_v41  ;;  %v5655_v35 = vpack.c.bf16 %v1897_v29, %v1891_v26  ;;  %v2088_v40 = vld [vmem:[%s6806_s30 + $0x2210] sm:$0xff]  ;;  %v1903_v41 = vld [vmem:[%s6806_s30 + $0x1c48] sm:$0xff]  ;;  %v1909_v42 = vld [vmem:[%s6806_s30 + $0x1c78] sm:$0xff] }
 0x488   : > { %3992 = vmatprep.mubr.f32.mxu1 %v3566_v12  ;;  %v5829_v12 = vpack.c.bf16 %v2028_v37, %v2022_v36  ;;  %v1890_v36 = vld [vmem:[%s6806_s30 + $0x1be0] sm:$0xff]  ;;  %v1896_v37 = vld [vmem:[%s6806_s30 + $0x1c10] sm:$0xff] }
 0x48d   : > { %5622 = vmatpush1.bf16.xpose.msra.mxu0 %v5621_v16  ;;  %v2047_v16 = vld [vmem:[%s6806_s30 + $0x20c8] sm:$0xff] }
 0x48e   : > { %5814 = vmatpush1.bf16.xpose.msra.mxu1 %v5813_v50  ;;  %5624 = vmatprep.subr.bf16.mxu0 %v5623_v51  ;;  %v2053_v50 = vld [vmem:[%s6806_s30 + $0x20f8] sm:$0xff]  ;;  %v5641_v51 = vpack.c.bf16 %v1848_v45, %v1842_v44  ;;  %v5659_v44 = vpack.c.bf16 %v1909_v42, %v1903_v41 }
 0x48f   : > { %5816 = vmatprep.subr.bf16.mxu1 %v5815_v15  ;;  %v5833_v15 = vpack.c.bf16 %v2040_v47, %v2034_v46  ;;  %v5835_v54 = vpack.c.bf16 %v2053_v50, %v2047_v16  ;;  %v1902_v46 = vld [vmem:[%s6806_s30 + $0x1c40] sm:$0xff]  ;;  %v1908_v47 = vld [vmem:[%s6806_s30 + $0x1c70] sm:$0xff]  ;;  %v1915_v16 = vld [vmem:[%s6806_s30 + $0x1ca8] sm:$0xff] }
 0x490   : > { %v1921_v50 = vld [vmem:[%s6806_s30 + $0x1cd8] sm:$0xff] }
 0x491   : > { %v340_v42 = vld [vmem:[%s6798_s8 + $0x138] sm:$0xff] }
 0x495   : > { %5626 = vmatpush1.bf16.xpose.msra.mxu0 %v5625_v1  ;;  %v2059_v1 = vld [vmem:[%s6806_s30 + $0x2128] sm:$0xff] }
 0x496   : > { %5818 = vmatpush1.bf16.xpose.msra.mxu1 %v5817_v19  ;;  %5628 = vmatprep.subr.bf16.mxu0 %v5627_v3  ;;  %v2065_v19 = vld [vmem:[%s6806_s30 + $0x2158] sm:$0xff]  ;;  %v5645_v3 = vpack.c.bf16 %v1860_v58, %v1854_v57  ;;  %v5663_v57 = vpack.c.bf16 %v1921_v50, %v1915_v16 }
 0x497   : > { %5820 = vmatprep.subr.bf16.mxu1 %v5819_v5  ;;  %v5837_v5 = vpack.c.bf16 %v2052_v61, %v2046_v59  ;;  %v5839_v7 = vpack.c.bf16 %v2065_v19, %v2059_v1  ;;  %v1914_v59 = vld [vmem:[%s6806_s30 + $0x1ca0] sm:$0xff]  ;;  %v1920_v61 = vld [vmem:[%s6806_s30 + $0x1cd0] sm:$0xff]  ;;  %v1927_v1 = vld [vmem:[%s6806_s30 + $0x1d08] sm:$0xff] }
 0x498   : > { %v1933_v19 = vld [vmem:[%s6806_s30 + $0x1d38] sm:$0xff] }
 0x49d   : > { %5630 = vmatpush1.bf16.xpose.msra.mxu0 %v5629_v14  ;;  %v2071_v14 = vld [vmem:[%s6806_s30 + $0x2188] sm:$0xff] }
 0x49e   : > { %5822 = vmatpush1.bf16.xpose.msra.mxu1 %v5821_v17  ;;  %5632 = vmatprep.subr.bf16.mxu0 %v5631_v18  ;;  %v2077_v17 = vld [vmem:[%s6806_s30 + $0x21b8] sm:$0xff]  ;;  %v5649_v18 = vpack.c.bf16 %v1872_v9, %v1866_v8  ;;  %v5667_v8 = vpack.c.bf16 %v1933_v19, %v1927_v1  ;;  %v1926_v9 = vld [vmem:[%s6806_s30 + $0x1d00] sm:$0xff] }
 0x49f   : > { %5824 = vmatprep.subr.bf16.mxu1 %v5823_v20  ;;  %v5841_v20 = vpack.c.bf16 %v2064_v13, %v2058_v11  ;;  %v5843_v21 = vpack.c.bf16 %v2077_v17, %v2071_v14  ;;  %v1932_v11 = vld [vmem:[%s6806_s30 + $0x1d30] sm:$0xff]  ;;  %v1939_v14 = vld [vmem:[%s6806_s30 + $0x1d68] sm:$0xff]  ;;  %v1945_v17 = vld [vmem:[%s6806_s30 + $0x1d98] sm:$0xff] }
 0x4a5   : > { %5634 = vmatpush1.bf16.xpose.msra.mxu0 %v5633_v30  ;;  %v2083_v30 = vld [vmem:[%s6806_s30 + $0x21e8] sm:$0xff] }
 0x4a6   : > { %5826 = vmatpush1.bf16.xpose.msra.mxu1 %v5825_v32  ;;  %5636 = vmatprep.subr.bf16.mxu0 %v5635_v60  ;;  %v2089_v32 = vld [vmem:[%s6806_s30 + $0x2218] sm:$0xff]  ;;  %v5653_v60 = vpack.c.bf16 %v1884_v23, %v1878_v22  ;;  %v346_v23 = vld [vmem:[%s6798_s8 + $0x168] sm:$0xff] }
 0x4a7   : > { %5828 = vmatprep.subr.bf16.mxu1 %v5827_v33  ;;  %v5845_v33 = vpack.c.bf16 %v2076_v25, %v2070_v24  ;;  %v5847_v63 = vpack.c.bf16 %v2089_v32, %v2083_v30  ;;  %v2137_v22 = vld [vmem:[%s6806_s30 + $0x2398] sm:$0xff]  ;;  %v627_v29 = vrot.slane %v346_v23, 4  ;;  %v5669_v30 = vpack.c.bf16 %v1932_v11, %v1926_v9  ;;  %v2143_v11 = vld [vmem:[%s6806_s30 + $0x23c8] sm:$0xff] }
 0x4a9   : > { %v628_v41 = vadd.f32 %v627_v29, %v346_v23 }
 0x4ad   : > { %5638 = vmatpush1.bf16.xpose.msra.mxu0 %v5637_v43  ;;  %v2095_v43 = vld [vmem:[%s6806_s30 + $0x2248] sm:$0xff] }
 0x4ae   : > { %5830 = vmatpush1.bf16.xpose.msra.mxu1 %v5829_v12  ;;  %5640 = vmatprep.subr.bf16.mxu0 %v5639_v39  ;;  %v2101_v12 = vld [vmem:[%s6806_s30 + $0x2278] sm:$0xff]  ;;  %v5657_v39 = vpack.c.bf16 %v1896_v37, %v1890_v36  ;;  %v337_v37 = vld [vmem:[%s6798_s8 + $0x120] sm:$0xff] }
 0x4af   : > { %5832 = vmatprep.subr.bf16.mxu1 %v5831_v27  ;;  %v5849_v27 = vpack.c.bf16 %v2088_v40, %v2082_v38  ;;  %v5851_v45 = vpack.c.bf16 %v2101_v12, %v2095_v43  ;;  %v338_v38 = vld [vmem:[%s6798_s8 + $0x128] sm:$0xff]  ;;  %v339_v40 = vld [vmem:[%s6798_s8 + $0x130] sm:$0xff]  ;;  %v573_v43 = vrot.slane %v337_v37, 4 }
 0x4b0   : > { %v579_v12 = vrot.slane %v338_v38, 4 }
 0x4b2   : > { %v580_v16 = vadd.f32 %v579_v12, %v338_v38  ;;  %v1950_v38 = vld [vmem:[%s6806_s30 + $0x1dc0] sm:$0xff] }
 0x4b4   : > { %v581_v1 = vrot.slane %v580_v16, 2 }
 0x4b5   : > { %5642 = vmatpush1.bf16.xpose.msra.mxu0 %v5641_v51  ;;  %v2107_v51 = vld [vmem:[%s6806_s30 + $0x22a8] sm:$0xff] }
 0x4b6   : > { %5834 = vmatpush1.bf16.xpose.msra.mxu1 %v5833_v15  ;;  %5644 = vmatprep.subr.bf16.mxu0 %v5643_v53  ;;  %v2113_v15 = vld [vmem:[%s6806_s30 + $0x22d8] sm:$0xff]  ;;  %v5661_v53 = vpack.c.bf16 %v1908_v47, %v1902_v46  ;;  %v629_v47 = vrot.slane %v628_v41, 2 }
 0x4b7   : > { %5836 = vmatprep.subr.bf16.mxu1 %v5835_v54  ;;  %v5853_v54 = vpack.c.bf16 %v2100_v49, %v2094_v48  ;;  %v5855_v58 = vpack.c.bf16 %v2113_v15, %v2107_v51  ;;  %v1938_v48 = vld [vmem:[%s6806_s30 + $0x1d60] sm:$0xff]  ;;  %v574_v49 = vadd.f32 %v573_v43, %v337_v37  ;;  %v1944_v15 = vld [vmem:[%s6806_s30 + $0x1d90] sm:$0xff] }
 0x4b8   : > { %v5673_v9 = vpack.c.bf16 %v1944_v15, %v1938_v48 }
 0x4bd   : > { %5646 = vmatpush1.bf16.xpose.msra.mxu0 %v5645_v3  ;;  %v2119_v3 = vld [vmem:[%s6806_s30 + $0x2308] sm:$0xff] }
 0x4be   : > { %5838 = vmatpush1.bf16.xpose.msra.mxu1 %v5837_v5  ;;  %5648 = vmatprep.subr.bf16.mxu0 %v5647_v6  ;;  %v2125_v5 = vld [vmem:[%s6806_s30 + $0x2338] sm:$0xff]  ;;  %v5665_v6 = vpack.c.bf16 %v1920_v61, %v1914_v59  ;;  %v1951_v61 = vld [vmem:[%s6806_s30 + $0x1dc8] sm:$0xff] }
 0x4bf   : > { %5840 = vmatprep.subr.bf16.mxu1 %v5839_v7  ;;  %v5857_v7 = vpack.c.bf16 %v2112_v0, %v2106_v62  ;;  %v5859_v13 = vpack.c.bf16 %v2125_v5, %v2119_v3  ;;  %v1957_v62 = vld [vmem:[%s6806_s30 + $0x1df8] sm:$0xff]  ;;  %v575_v0 = vrot.slane %v574_v49, 2 }
 0x4c5   : > { %5650 = vmatpush1.bf16.xpose.msra.mxu0 %v5649_v18  ;;  %v343_v18 = vld [vmem:[%s6798_s8 + $0x150] sm:$0xff] }
 0x4c6   : > { %5842 = vmatpush1.bf16.xpose.msra.mxu1 %v5841_v20  ;;  %5652 = vmatprep.subr.bf16.mxu0 %v5651_v55  ;;  %v344_v20 = vld [vmem:[%s6798_s8 + $0x158] sm:$0xff]  ;;  %v345_v55 = vld [vmem:[%s6798_s8 + $0x160] sm:$0xff]  ;;  %v609_v24 = vrot.slane %v343_v18, 4 }
 0x4c7   : > { %5844 = vmatprep.subr.bf16.mxu1 %v5843_v21  ;;  %v2131_v21 = vld [vmem:[%s6806_s30 + $0x2368] sm:$0xff]  ;;  %v615_v25 = vrot.slane %v344_v20, 4  ;;  %v621_v26 = vrot.slane %v345_v55, 4 }
 0x4c8   : > { %v610_v32 = vadd.f32 %v609_v24, %v343_v18  ;;  %v5863_v36 = vpack.c.bf16 %v2137_v22, %v2131_v21  ;;  %v5675_v18 = vpack.c.bf16 %v1957_v62, %v1951_v61  ;;  %v2342_v61 = vld [vmem:[%s6806_s30 + $0x2a00] sm:$0xff] }
 0x4cd   : > { %5654 = vmatpush1.bf16.xpose.msra.mxu0 %v5653_v60  ;;  %v616_v60 = vadd.f32 %v615_v25, %v344_v20 }
 0x4ce   : > { %5846 = vmatpush1.bf16.xpose.msra.mxu1 %v5845_v33  ;;  %5656 = vmatprep.subr.bf16.mxu0 %v5655_v35  ;;  %v622_v33 = vadd.f32 %v621_v26, %v345_v55  ;;  %v5861_v35 = vpack.c.bf16 %v2124_v56, %v2118_v28  ;;  %v576_v28 = vadd.f32 %v575_v0, %v574_v49  ;;  %v2348_v0 = vld [vmem:[%s6806_s30 + $0x2a30] sm:$0xff] }
 0x4cf   : > { %5848 = vmatprep.subr.bf16.mxu1 %v5847_v63  ;;  %v5671_v63 = vpack.c.bf16 %v1945_v17, %v1939_v14  ;;  %v582_v56 = vadd.f32 %v581_v1, %v580_v16  ;;  %v2163_v1 = vld [vmem:[%s6806_s30 + $0x2468] sm:$0xff] }
 0x4d0   : > { %v623_v46 = vrot.slane %v622_v33, 2  ;;  %v577_v21 = vrot.slane %v576_v28, 1 }
 0x4d1   : > { %v583_v22 = vrot.slane %v582_v56, 1 }
 0x4d2   : > { %v624_v59 = vadd.f32 %v623_v46, %v622_v33  ;;  %v2343_v46 = vld [vmem:[%s6806_s30 + $0x2a08] sm:$0xff] }
 0x4d5   : > { %5658 = vmatpush1.bf16.xpose.msra.mxu0 %v5657_v39  ;;  %v585_v39 = vrot.slane %v339_v40, 4 }
 0x4d6   : > { %5850 = vmatpush1.bf16.xpose.msra.mxu1 %v5849_v27  ;;  %5660 = vmatprep.subr.bf16.mxu0 %v5659_v44  ;;  %v611_v27 = vrot.slane %v610_v32, 2  ;;  %v591_v44 = vrot.slane %v340_v42, 4 }
 0x4d7   : > { %5852 = vmatprep.subr.bf16.mxu1 %v5851_v45  ;;  %v617_v45 = vrot.slane %v616_v60, 2  ;;  %v586_v50 = vadd.f32 %v585_v39, %v339_v40  ;;  %v1956_v40 = vld [vmem:[%s6806_s30 + $0x1df0] sm:$0xff] }
 0x4d8   : > { %v612_v51 = vadd.f32 %v611_v27, %v610_v32  ;;  %v578_v32 = vadd.f32 %v577_v21, %v576_v28  ;;  %v2148_v39 = vld [vmem:[%s6806_s30 + $0x23f0] sm:$0xff]  ;;  %v2151_v27 = vld [vmem:[%s6806_s30 + $0x2408] sm:$0xff]  ;;  %v5677_v16 = vpack.c.bf16 %v1956_v40, %v1950_v38  ;;  %v2385_v38 = vld [vmem:[%s6806_s30 + $0x2b58] sm:$0xff] }
 0x4d9   : > { %v587_v19 = vrot.slane %v586_v50, 2  ;;  %v2175_v21 = vld [vmem:[%s6806_s30 + $0x24c8] sm:$0xff] }
 0x4da   : > { %v613_v3 = vrot.slane %v612_v51, 1 }
 0x4db   : > { %v588_v14 = vadd.f32 %v587_v19, %v586_v50  ;;  %v2169_v19 = vld [vmem:[%s6806_s30 + $0x2498] sm:$0xff] }
 0x4dc   : > { %v614_v55 = vadd.f32 %v613_v3, %v612_v51 }
 0x4dd   : > { %5662 = vmatpush1.bf16.xpose.msra.mxu0 %v5661_v53  ;;  %v2130_v53 = vld [vmem:[%s6806_s30 + $0x2360] sm:$0xff]  ;;  %v589_v23 = vrot.slane %v588_v14, 1 }
 0x4de   : > { %5854 = vmatpush1.bf16.xpose.msra.mxu1 %v5853_v54  ;;  %5664 = vmatprep.subr.bf16.mxu0 %v5663_v57  ;;  %v2136_v54 = vld [vmem:[%s6806_s30 + $0x2390] sm:$0xff]  ;;  %v592_v57 = vadd.f32 %v591_v44, %v340_v42  ;;  %v2157_v44 = vld [vmem:[%s6806_s30 + $0x2438] sm:$0xff] }
 0x4df   : > { %5856 = vmatprep.subr.bf16.mxu1 %v5855_v58  ;;  %v618_v58 = vadd.f32 %v617_v45, %v616_v60  ;;  %v5865_v17 = vpack.c.bf16 %v2136_v54, %v2130_v53  ;;  %v584_v60 = vadd.f32 %v583_v22, %v582_v56  ;;  %v590_v33 = vadd.f32 %v589_v23, %v588_v14  ;;  %v2162_v14 = vld [vmem:[%s6806_s30 + $0x2460] sm:$0xff]  ;;  %v2181_v22 = vld [vmem:[%s6806_s30 + $0x24f8] sm:$0xff]  ;;  %v2367_v23 = vld [vmem:[%s6806_s30 + $0x2ac8] sm:$0xff] }
 0x4e0   : > { %v593_v5 = vrot.slane %v592_v57, 2  ;;  %v5871_v51 = vpack.c.bf16 %v2157_v44, %v2151_v27  ;;  %v2378_v27 = vld [vmem:[%s6806_s30 + $0x2b20] sm:$0xff]  ;;  %v2384_v44 = vld [vmem:[%s6806_s30 + $0x2b50] sm:$0xff] }
 0x4e1   : > { %v843_v37 = vcombine.low %v578_v32, %v584_v60  ;;  %v2174_v32 = vld [vmem:[%s6806_s30 + $0x24c0] sm:$0xff]  ;;  %v2180_v60 = vld [vmem:[%s6806_s30 + $0x24f0] sm:$0xff] }
 0x4e2   : > { %v594_v20 = vadd.f32 %v593_v5, %v592_v57  ;;  %v2355_v5 = vld [vmem:[%s6806_s30 + $0x2a68] sm:$0xff]  ;;  %v5881_v40 = vpack.c.bf16 %v2180_v60, %v2174_v32 }
 0x4e3   : > { %v851_v45 = vrot.slane %v843_v37, %v6911_v34  ;;  %v2379_v37 = vld [vmem:[%s6806_s30 + $0x2b28] sm:$0xff] }
 0x4e4   : > { %v595_v26 = vrot.slane %v594_v20, 1 }
 0x4e5   : > { %5666 = vmatpush1.bf16.xpose.msra.mxu0 %v5665_v6  ;;  %v619_v6 = vrot.slane %v618_v58, 1 }
 0x4e6   : > { %5858 = vmatpush1.bf16.xpose.msra.mxu1 %v5857_v7  ;;  %5668 = vmatprep.subr.bf16.mxu0 %v5667_v8  ;;  %v625_v7 = vrot.slane %v624_v59, 1  ;;  %v630_v8 = vadd.f32 %v629_v47, %v628_v41  ;;  %v2142_v41 = vld [vmem:[%s6806_s30 + $0x23c0] sm:$0xff]  ;;  %v2349_v47 = vld [vmem:[%s6806_s30 + $0x2a38] sm:$0xff] }
 0x4e7   : > { %5860 = vmatprep.subr.bf16.mxu1 %v5859_v13  ;;  %v2149_v13 = vld [vmem:[%s6806_s30 + $0x23f8] sm:$0xff]  ;;  %v620_v24 = vadd.f32 %v619_v6, %v618_v58  ;;  %v5869_v50 = vpack.c.bf16 %v2148_v39, %v2142_v41  ;;  %v6063_v54 = vpack.c.bf16 %v2349_v47, %v2343_v46  ;;  %v2150_v58 = vld [vmem:[%s6806_s30 + $0x2400] sm:$0xff]  ;;  %v2192_v39 = vld [vmem:[%s6806_s30 + $0x2550] sm:$0xff] }
 0x4e8   : > { %v5867_v25 = vpack.c.bf16 %v2149_v13, %v2143_v11  ;;  %v626_v29 = vadd.f32 %v625_v7, %v624_v59  ;;  %v2156_v59 = vld [vmem:[%s6806_s30 + $0x2430] sm:$0xff]  ;;  %v2361_v6 = vld [vmem:[%s6806_s30 + $0x2a98] sm:$0xff]  ;;  %v6065_v11 = vpack.c.bf16 %v2348_v0, %v2342_v61  ;;  %v5875_v13 = vpack.c.bf16 %v2169_v19, %v2163_v1  ;;  %v2391_v47 = vld [vmem:[%s6806_s30 + $0x2b88] sm:$0xff] }
 0x4e9   : > { %v6067_v28 = vpack.c.bf16 %v2361_v6, %v2355_v5  ;;  %v2205_v46 = vld [vmem:[%s6806_s30 + $0x25b8] sm:$0xff]  ;;  %v2403_v61 = vld [vmem:[%s6806_s30 + $0x2be8] sm:$0xff]  ;;  %v2210_v5 = vld [vmem:[%s6806_s30 + $0x25e0] sm:$0xff] }
 0x4ea   : > { %v2216_v6 = vld [vmem:[%s6806_s30 + $0x2610] sm:$0xff] }
 0x4ed   : > { %5670 = vmatpush1.bf16.xpose.msra.mxu0 %v5669_v30  ;;  %v631_v30 = vrot.slane %v630_v8, 1 }
 0x4ee   : > { %5862 = vmatpush1.bf16.xpose.msra.mxu1 %v5861_v35  ;;  %5672 = vmatprep.subr.bf16.mxu0 %v5671_v63  ;;  %v868_v35 = vcombine.low %v614_v55, %v620_v24  ;;  %v596_v63 = vadd.f32 %v595_v26, %v594_v20  ;;  %v2360_v55 = vld [vmem:[%s6806_s30 + $0x2a90] sm:$0xff] }
 0x4ef   : > { %5864 = vmatprep.subr.bf16.mxu1 %v5863_v36  ;;  %v632_v36 = vadd.f32 %v631_v30, %v630_v8  ;;  %v5873_v8 = vpack.c.bf16 %v2156_v59, %v2150_v58  ;;  %v2211_v58 = vld [vmem:[%s6806_s30 + $0x25e8] sm:$0xff]  ;;  %v2217_v59 = vld [vmem:[%s6806_s30 + $0x2618] sm:$0xff] }
 0x4f0   : > { %v844_v42 = vcombine.low %v590_v33, %v596_v63  ;;  %v876_v12 = vrot.slane %v868_v35, %v6911_v34  ;;  %v2366_v33 = vld [vmem:[%s6806_s30 + $0x2ac0] sm:$0xff]  ;;  %v2372_v35 = vld [vmem:[%s6806_s30 + $0x2af0] sm:$0xff]  ;;  %v2187_v63 = vld [vmem:[%s6806_s30 + $0x2528] sm:$0xff]  ;;  %v5891_v19 = vpack.c.bf16 %v2217_v59, %v2211_v58 }
 0x4f1   : > { %v869_v43 = vcombine.low %v626_v29, %v632_v36  ;;  %v5879_v29 = vpack.c.bf16 %v2181_v22, %v2175_v21  ;;  %v2193_v36 = vld [vmem:[%s6806_s30 + $0x2558] sm:$0xff]  ;;  %v6073_v41 = vpack.c.bf16 %v2372_v35, %v2366_v33  ;;  %v2222_v21 = vld [vmem:[%s6806_s30 + $0x2640] sm:$0xff]  ;;  %v2228_v22 = vld [vmem:[%s6806_s30 + $0x2670] sm:$0xff] }
 0x4f2   : > { %v858_v48 = vrot.slane %v844_v42, %v6911_v34  ;;  %v5883_v42 = vpack.c.bf16 %v2193_v36, %v2187_v63  ;;  %v2234_v35 = vld [vmem:[%s6806_s30 + $0x26a0] sm:$0xff]  ;;  %v2240_v63 = vld [vmem:[%s6806_s30 + $0x26d0] sm:$0xff] }
 0x4f3   : > { %v883_v49 = vrot.slane %v869_v43, %v6911_v34  ;;  %v6075_v43 = vpack.c.bf16 %v2385_v38, %v2379_v37  ;;  %v2426_v36 = vld [vmem:[%s6806_s30 + $0x2ca0] sm:$0xff]  ;;  %v2432_v37 = vld [vmem:[%s6806_s30 + $0x2cd0] sm:$0xff]  ;;  %v2247_v38 = vld [vmem:[%s6806_s30 + $0x2708] sm:$0xff] }
 0x4f4   : > { %v859_v15 = vcombine.low %v851_v45, %v858_v48  ;;  %v2199_v45 = vld [vmem:[%s6806_s30 + $0x2588] sm:$0xff]  ;;  %v2397_v48 = vld [vmem:[%s6806_s30 + $0x2bb8] sm:$0xff]  ;;  %v2264_v58 = vld [vmem:[%s6806_s30 + $0x2790] sm:$0xff] }
 0x4f5   : > { %5674 = vmatpush1.bf16.xpose.msra.mxu0 %v5673_v9  ;;  %v884_v53 = vcombine.low %v876_v12, %v883_v49  ;;  %v2186_v12 = vld [vmem:[%s6806_s30 + $0x2520] sm:$0xff] }
 0x4f6   : > { %5866 = vmatpush1.bf16.xpose.msra.mxu1 %v5865_v17  ;;  %5676 = vmatprep.subr.bf16.mxu0 %v5675_v18  ;;  %v2168_v17 = vld [vmem:[%s6806_s30 + $0x2490] sm:$0xff]  ;;  %v2354_v18 = vld [vmem:[%s6806_s30 + $0x2a60] sm:$0xff]  ;;  %v5885_v49 = vpack.c.bf16 %v2192_v39, %v2186_v12  ;;  %v6093_v12 = vpack.c.bf16 %v2432_v37, %v2426_v36 }
 0x4f7   : > { %5868 = vmatprep.subr.bf16.mxu1 %v5867_v25  ;;  %v943_v57 = vrot.slane %v884_v53, 7  ;;  %v5877_v25 = vpack.c.bf16 %v2168_v17, %v2162_v14  ;;  %v6069_v26 = vpack.c.bf16 %v2360_v55, %v2354_v18  ;;  %v2204_v53 = vld [vmem:[%s6806_s30 + $0x25b0] sm:$0xff]  ;;  %v5893_v14 = vpack.c.bf16 %v2216_v6, %v2210_v5  ;;  %v2450_v59 = vld [vmem:[%s6806_s30 + $0x2d60] sm:$0xff] }
 0x4f8   : > { %v2294_v37 = vld [vmem:[%s6806_s30 + $0x2880] sm:$0xff] }
 0x4f9   : > { %v944_v62 = vsel %vm898_vm0, %v943_v57, %v859_v15  ;;  %v2198_v15 = vld [vmem:[%s6806_s30 + $0x2580] sm:$0xff] }
 0x4fa   : > { %v945_v3 = vsel %vm900_vm1, %v943_v57, %v944_v62  ;;  %v2409_v62 = vld [vmem:[%s6806_s30 + $0x2c18] sm:$0xff]  ;;  %v5889_v0 = vpack.c.bf16 %v2204_v53, %v2198_v15 }
 0x4fb   : > { %v946_v7 = vsel %vm902_vm2, %v943_v57, %v945_v3  ;;  %v6083_v3 = vpack.c.bf16 %v2409_v62, %v2403_v61  ;;  %v2456_v61 = vld [vmem:[%s6806_s30 + $0x2d90] sm:$0xff]  ;;  %v2271_v62 = vld [vmem:[%s6806_s30 + $0x27c8] sm:$0xff] }
 0x4fc   : > { %v947_v9 = vsel %vm904_vm3, %v943_v57, %v946_v7  ;;  %v2396_v57 = vld [vmem:[%s6806_s30 + $0x2bb0] sm:$0xff]  ;;  %v2402_v7 = vld [vmem:[%s6806_s30 + $0x2be0] sm:$0xff]  ;;  %v6101_v5 = vpack.c.bf16 %v2456_v61, %v2450_v59 }
 0x4fd   : > { %5678 = vmatpush1.bf16.xpose.msra.mxu0 %v5677_v16  ;;  %v8206_v56 = vmul.f32 0.125, %v947_v9  ;;  %v6077_v16 = vpack.c.bf16 %v2384_v44, %v2378_v27  ;;  %v2223_v9 = vld [vmem:[%s6806_s30 + $0x2648] sm:$0xff]  ;;  %v2246_v44 = vld [vmem:[%s6806_s30 + $0x2700] sm:$0xff] }
 0x4fe   : > { %5870 = vmatpush1.bf16.xpose.msra.mxu1 %v5869_v50  ;;  %5872 = vmatprep.subr.bf16.mxu0 %v5871_v51  ;;  %v5887_v50 = vpack.c.bf16 %v2205_v46, %v2199_v45  ;;  %v6079_v51 = vpack.c.bf16 %v2397_v48, %v2391_v47  ;;  %v2252_v45 = vld [vmem:[%s6806_s30 + $0x2730] sm:$0xff]  ;;  %v2438_v46 = vld [vmem:[%s6806_s30 + $0x2d00] sm:$0xff]  ;;  %v2259_v48 = vld [vmem:[%s6806_s30 + $0x2768] sm:$0xff] }
 0x4ff   : > { %6064 = vmatprep.subr.bf16.mxu1 %v6063_v54  ;;  %v8214_v20 = vrot.slane %v8206_v56, %v6911_v34  ;;  %v2390_v54 = vld [vmem:[%s6806_s30 + $0x2b80] sm:$0xff]  ;;  %v2444_v47 = vld [vmem:[%s6806_s30 + $0x2d30] sm:$0xff] }
 0x500   : > { %v6081_v1 = vpack.c.bf16 %v2396_v57, %v2390_v54  ;;  %v6097_v15 = vpack.c.bf16 %v2444_v47, %v2438_v46  ;;  %v2258_v57 = vld [vmem:[%s6806_s30 + $0x2760] sm:$0xff] }
 0x501   : > { %v4016_v24 = vcombine.high %v8214_v20, %v8214_v20  ;;  %v2306_v47 = vld [vmem:[%s6806_s30 + $0x28e0] sm:$0xff] }
 0x502   : > { %v2318_v61 = vld [vmem:[%s6806_s30 + $0x2940] sm:$0xff] }
 0x504   : > { %3780 = vmatmul.mubr.f32.vlgmr.msra.gmra.mrb[4].mxu0 %v8055_v10 }
 0x505   : > { %3993 = vmatmul.mubr.f32.vlgmr.msra.gmra.mrb[4].mxu1 %v8055_v10  ;;  %5874 = vmatpush1.bf16.xpose.msra.mxu0 %v5873_v8  ;;  %v2373_v10 = vld [vmem:[%s6806_s30 + $0x2af8] sm:$0xff]  ;;  %v2408_v8 = vld [vmem:[%s6806_s30 + $0x2c10] sm:$0xff] }
 0x506   : > { %6066 = vmatpush1.bf16.xpose.msra.mxu1 %v6065_v11  ;;  %5876 = vmatprep.subr.bf16.mxu0 %v5875_v13  ;;  %v6071_v30 = vpack.c.bf16 %v2373_v10, %v2367_v23  ;;  %v2229_v11 = vld [vmem:[%s6806_s30 + $0x2678] sm:$0xff]  ;;  %v2415_v13 = vld [vmem:[%s6806_s30 + $0x2c48] sm:$0xff]  ;;  %v6085_v17 = vpack.c.bf16 %v2408_v8, %v2402_v7  ;;  %v2414_v23 = vld [vmem:[%s6806_s30 + $0x2c40] sm:$0xff] }
 0x507   : > { %6068 = vmatprep.subr.bf16.mxu1 %v6067_v28  ;;  %4096 = vmatprep.mubr.f32.mxu0 %v4016_v24  ;;  %v2421_v28 = vld [vmem:[%s6806_s30 + $0x2c78] sm:$0xff]  ;;  %v5895_v18 = vpack.c.bf16 %v2229_v11, %v2223_v9  ;;  %v2420_v10 = vld [vmem:[%s6806_s30 + $0x2c70] sm:$0xff]  ;;  %v2270_v8 = vld [vmem:[%s6806_s30 + $0x27c0] sm:$0xff] }
 0x508   : > { %4309 = vmatprep.mubr.f32.mxu1 %v4016_v24  ;;  %v6087_v55 = vpack.c.bf16 %v2421_v28, %v2415_v13  ;;  %v2235_v24 = vld [vmem:[%s6806_s30 + $0x26a8] sm:$0xff]  ;;  %v6089_v32 = vpack.c.bf16 %v2420_v10, %v2414_v23  ;;  %v2276_v9 = vld [vmem:[%s6806_s30 + $0x27f0] sm:$0xff]  ;;  %v2462_v11 = vld [vmem:[%s6806_s30 + $0x2dc0] sm:$0xff] }
 0x509   : > { %v2468_v13 = vld [vmem:[%s6806_s30 + $0x2df0] sm:$0xff]  ;;  %v2283_v28 = vld [vmem:[%s6806_s30 + $0x2828] sm:$0xff]  ;;  %v2282_v10 = vld [vmem:[%s6806_s30 + $0x2820] sm:$0xff] }
 0x50d   : > { %5878 = vmatpush1.bf16.xpose.msra.mxu0 %v5877_v25  ;;  %v2241_v25 = vld [vmem:[%s6806_s30 + $0x26d8] sm:$0xff] }
 0x50e   : > { %6070 = vmatpush1.bf16.xpose.msra.mxu1 %v6069_v26  ;;  %5880 = vmatprep.subr.bf16.mxu0 %v5879_v29  ;;  %v2427_v26 = vld [vmem:[%s6806_s30 + $0x2ca8] sm:$0xff]  ;;  %v2433_v29 = vld [vmem:[%s6806_s30 + $0x2cd8] sm:$0xff]  ;;  %v5899_v60 = vpack.c.bf16 %v2241_v25, %v2235_v24  ;;  %v2288_v24 = vld [vmem:[%s6806_s30 + $0x2850] sm:$0xff] }
 0x50f   : > { %6072 = vmatprep.subr.bf16.mxu1 %v6071_v30  ;;  %v5897_v30 = vpack.c.bf16 %v2228_v22, %v2222_v21  ;;  %v6091_v33 = vpack.c.bf16 %v2433_v29, %v2427_v26  ;;  %v6105_v21 = vpack.c.bf16 %v2468_v13, %v2462_v11  ;;  %v2474_v25 = vld [vmem:[%s6806_s30 + $0x2e20] sm:$0xff]  ;;  %v2480_v26 = vld [vmem:[%s6806_s30 + $0x2e50] sm:$0xff]  ;;  %v2295_v29 = vld [vmem:[%s6806_s30 + $0x2888] sm:$0xff] }
 0x510   : > { %v2330_v13 = vld [vmem:[%s6806_s30 + $0x29a0] sm:$0xff] }
 0x515   : > { %5882 = vmatpush1.bf16.xpose.msra.mxu0 %v5881_v40  ;;  %v2253_v40 = vld [vmem:[%s6806_s30 + $0x2738] sm:$0xff] }
 0x516   : > { %6074 = vmatpush1.bf16.xpose.msra.mxu1 %v6073_v41  ;;  %5884 = vmatprep.subr.bf16.mxu0 %v5883_v42  ;;  %v2439_v41 = vld [vmem:[%s6806_s30 + $0x2d08] sm:$0xff]  ;;  %v2445_v42 = vld [vmem:[%s6806_s30 + $0x2d38] sm:$0xff]  ;;  %v5903_v39 = vpack.c.bf16 %v2253_v40, %v2247_v38  ;;  %v2300_v38 = vld [vmem:[%s6806_s30 + $0x28b0] sm:$0xff] }
 0x517   : > { %6076 = vmatprep.subr.bf16.mxu1 %v6075_v43  ;;  %v5901_v43 = vpack.c.bf16 %v2240_v63, %v2234_v35  ;;  %v6095_v27 = vpack.c.bf16 %v2445_v42, %v2439_v41  ;;  %v6109_v35 = vpack.c.bf16 %v2480_v26, %v2474_v25  ;;  %v2486_v40 = vld [vmem:[%s6806_s30 + $0x2e80] sm:$0xff]  ;;  %v2492_v41 = vld [vmem:[%s6806_s30 + $0x2eb0] sm:$0xff]  ;;  %v2307_v42 = vld [vmem:[%s6806_s30 + $0x28e8] sm:$0xff] }
 0x518   : > { %v2152_v26 = vld [vmem:[%s6806_s30 + $0x2410] sm:$0xff] }
 0x51d   : > { %5886 = vmatpush1.bf16.xpose.msra.mxu0 %v5885_v49  ;;  %v2265_v49 = vld [vmem:[%s6806_s30 + $0x2798] sm:$0xff] }
 0x51e   : > { %6078 = vmatpush1.bf16.xpose.msra.mxu1 %v6077_v16  ;;  %5888 = vmatprep.subr.bf16.mxu0 %v5887_v50  ;;  %v2451_v16 = vld [vmem:[%s6806_s30 + $0x2d68] sm:$0xff]  ;;  %v2457_v50 = vld [vmem:[%s6806_s30 + $0x2d98] sm:$0xff]  ;;  %v5907_v53 = vpack.c.bf16 %v2265_v49, %v2259_v48  ;;  %v2312_v48 = vld [vmem:[%s6806_s30 + $0x2910] sm:$0xff] }
 0x51f   : > { %6080 = vmatprep.subr.bf16.mxu1 %v6079_v51  ;;  %v5905_v51 = vpack.c.bf16 %v2252_v45, %v2246_v44  ;;  %v6099_v54 = vpack.c.bf16 %v2457_v50, %v2451_v16  ;;  %v6113_v44 = vpack.c.bf16 %v2492_v41, %v2486_v40  ;;  %v2498_v49 = vld [vmem:[%s6806_s30 + $0x2ee0] sm:$0xff]  ;;  %v2504_v16 = vld [vmem:[%s6806_s30 + $0x2f10] sm:$0xff]  ;;  %v2319_v50 = vld [vmem:[%s6806_s30 + $0x2948] sm:$0xff] }
 0x525   : > { %5890 = vmatpush1.bf16.xpose.msra.mxu0 %v5889_v0  ;;  %v2277_v0 = vld [vmem:[%s6806_s30 + $0x27f8] sm:$0xff] }
 0x526   : > { %6082 = vmatpush1.bf16.xpose.msra.mxu1 %v6081_v1  ;;  %5892 = vmatprep.subr.bf16.mxu0 %v5891_v19  ;;  %v2463_v1 = vld [vmem:[%s6806_s30 + $0x2dc8] sm:$0xff]  ;;  %v2469_v19 = vld [vmem:[%s6806_s30 + $0x2df8] sm:$0xff]  ;;  %v5911_v6 = vpack.c.bf16 %v2277_v0, %v2271_v62  ;;  %v2324_v62 = vld [vmem:[%s6806_s30 + $0x2970] sm:$0xff] }
 0x527   : > { %6084 = vmatprep.subr.bf16.mxu1 %v6083_v3  ;;  %v5909_v3 = vpack.c.bf16 %v2264_v58, %v2258_v57  ;;  %v6103_v7 = vpack.c.bf16 %v2469_v19, %v2463_v1  ;;  %v6117_v57 = vpack.c.bf16 %v2504_v16, %v2498_v49  ;;  %v2510_v0 = vld [vmem:[%s6806_s30 + $0x2f40] sm:$0xff]  ;;  %v2516_v1 = vld [vmem:[%s6806_s30 + $0x2f70] sm:$0xff]  ;;  %v2331_v19 = vld [vmem:[%s6806_s30 + $0x29a8] sm:$0xff] }
 0x52d   : > { %5894 = vmatpush1.bf16.xpose.msra.mxu0 %v5893_v14  ;;  %v2289_v14 = vld [vmem:[%s6806_s30 + $0x2858] sm:$0xff] }
 0x52e   : > { %6086 = vmatpush1.bf16.xpose.msra.mxu1 %v6085_v17  ;;  %5896 = vmatprep.subr.bf16.mxu0 %v5895_v18  ;;  %v2475_v17 = vld [vmem:[%s6806_s30 + $0x2e28] sm:$0xff]  ;;  %v2481_v18 = vld [vmem:[%s6806_s30 + $0x2e58] sm:$0xff]  ;;  %v5915_v22 = vpack.c.bf16 %v2289_v14, %v2283_v28  ;;  %v2336_v28 = vld [vmem:[%s6806_s30 + $0x29d0] sm:$0xff] }
 0x52f   : > { %6088 = vmatprep.subr.bf16.mxu1 %v6087_v55  ;;  %v5913_v55 = vpack.c.bf16 %v2276_v9, %v2270_v8  ;;  %v6107_v23 = vpack.c.bf16 %v2481_v18, %v2475_v17  ;;  %v6121_v8 = vpack.c.bf16 %v2516_v1, %v2510_v0  ;;  %v2522_v14 = vld [vmem:[%s6806_s30 + $0x2fa0] sm:$0xff]  ;;  %v2528_v17 = vld [vmem:[%s6806_s30 + $0x2fd0] sm:$0xff]  ;;  %v2153_v18 = vld [vmem:[%s6806_s30 + $0x2418] sm:$0xff] }
 0x535   : > { %5898 = vmatpush1.bf16.xpose.msra.mxu0 %v5897_v30  ;;  %v2301_v30 = vld [vmem:[%s6806_s30 + $0x28b8] sm:$0xff] }
 0x536   : > { %6090 = vmatpush1.bf16.xpose.msra.mxu1 %v6089_v32  ;;  %5900 = vmatprep.subr.bf16.mxu0 %v5899_v60  ;;  %v2487_v32 = vld [vmem:[%s6806_s30 + $0x2e88] sm:$0xff]  ;;  %v2493_v60 = vld [vmem:[%s6806_s30 + $0x2eb8] sm:$0xff]  ;;  %v5919_v63 = vpack.c.bf16 %v2301_v30, %v2295_v29  ;;  %v2158_v29 = vld [vmem:[%s6806_s30 + $0x2440] sm:$0xff] }
 0x537   : > { %6092 = vmatprep.subr.bf16.mxu1 %v6091_v33  ;;  %v5917_v33 = vpack.c.bf16 %v2288_v24, %v2282_v10  ;;  %v6111_v36 = vpack.c.bf16 %v2493_v60, %v2487_v32  ;;  %v6125_v10 = vpack.c.bf16 %v2528_v17, %v2522_v14  ;;  %v2344_v30 = vld [vmem:[%s6806_s30 + $0x2a10] sm:$0xff]  ;;  %v4001_v32 = vcombine.high %v8206_v56, %v8206_v56  ;;  %v2350_v60 = vld [vmem:[%s6806_s30 + $0x2a40] sm:$0xff] }
 0x538   : > { %v6129_v40 = vpack.c.bf16 %v2350_v60, %v2344_v30  ;;  %v2212_v60 = vld [vmem:[%s6806_s30 + $0x25f0] sm:$0xff] }
 0x53d   : > { %5902 = vmatpush1.bf16.xpose.msra.mxu0 %v5901_v43  ;;  %v2313_v43 = vld [vmem:[%s6806_s30 + $0x2918] sm:$0xff] }
 0x53e   : > { %6094 = vmatpush1.bf16.xpose.msra.mxu1 %v6093_v12  ;;  %5904 = vmatprep.subr.bf16.mxu0 %v5903_v39  ;;  %v2499_v12 = vld [vmem:[%s6806_s30 + $0x2ee8] sm:$0xff]  ;;  %v2505_v39 = vld [vmem:[%s6806_s30 + $0x2f18] sm:$0xff]  ;;  %v5923_v45 = vpack.c.bf16 %v2313_v43, %v2307_v42  ;;  %v2164_v43 = vld [vmem:[%s6806_s30 + $0x2470] sm:$0xff] }
 0x53f   : > { %6096 = vmatprep.subr.bf16.mxu1 %v6095_v27  ;;  %v5921_v27 = vpack.c.bf16 %v2300_v38, %v2294_v37  ;;  %v6115_v46 = vpack.c.bf16 %v2505_v39, %v2499_v12  ;;  %v8346_v37 = vrot.slane %v4001_v32, %v6911_v34  ;;  %v5937_v38 = vpack.c.bf16 %v2158_v29, %v2152_v26  ;;  %v2170_v12 = vld [vmem:[%s6806_s30 + $0x24a0] sm:$0xff]  ;;  %v2356_v39 = vld [vmem:[%s6806_s30 + $0x2a70] sm:$0xff] }
 0x541   : > { %v4017_v42 = vcombine.high %v8346_v37, %v8346_v37 }
 0x545   : > { %5906 = vmatpush1.bf16.xpose.msra.mxu0 %v5905_v51  ;;  %v2325_v51 = vld [vmem:[%s6806_s30 + $0x2978] sm:$0xff] }
 0x546   : > { %6098 = vmatpush1.bf16.xpose.msra.mxu1 %v6097_v15  ;;  %5908 = vmatprep.subr.bf16.mxu0 %v5907_v53  ;;  %v2511_v15 = vld [vmem:[%s6806_s30 + $0x2f48] sm:$0xff]  ;;  %v2517_v53 = vld [vmem:[%s6806_s30 + $0x2f78] sm:$0xff]  ;;  %v5927_v58 = vpack.c.bf16 %v2325_v51, %v2319_v50  ;;  %v2176_v50 = vld [vmem:[%s6806_s30 + $0x24d0] sm:$0xff] }
 0x547   : > { %6100 = vmatprep.subr.bf16.mxu1 %v6099_v54  ;;  %v5925_v54 = vpack.c.bf16 %v2312_v48, %v2306_v47  ;;  %v6119_v59 = vpack.c.bf16 %v2517_v53, %v2511_v15  ;;  %v2375_v47 = vld [vmem:[%s6806_s30 + $0x2b08] sm:$0xff]  ;;  %v2182_v51 = vld [vmem:[%s6806_s30 + $0x2500] sm:$0xff]  ;;  %v2368_v15 = vld [vmem:[%s6806_s30 + $0x2ad0] sm:$0xff] }
 0x548   : > { %v2374_v53 = vld [vmem:[%s6806_s30 + $0x2b00] sm:$0xff] }
 0x54d   : > { %5910 = vmatpush1.bf16.xpose.msra.mxu0 %v5909_v3  ;;  %v2337_v3 = vld [vmem:[%s6806_s30 + $0x29d8] sm:$0xff] }
 0x54e   : > { %6102 = vmatpush1.bf16.xpose.msra.mxu1 %v6101_v5  ;;  %5912 = vmatprep.subr.bf16.mxu0 %v5911_v6  ;;  %v2523_v5 = vld [vmem:[%s6806_s30 + $0x2fa8] sm:$0xff]  ;;  %v2529_v6 = vld [vmem:[%s6806_s30 + $0x2fd8] sm:$0xff]  ;;  %v5931_v9 = vpack.c.bf16 %v2337_v3, %v2331_v19  ;;  %v2188_v19 = vld [vmem:[%s6806_s30 + $0x2530] sm:$0xff] }
 0x54f   : > { %6104 = vmatprep.subr.bf16.mxu1 %v6103_v7  ;;  %v5929_v7 = vpack.c.bf16 %v2324_v62, %v2318_v61  ;;  %v6123_v11 = vpack.c.bf16 %v2529_v6, %v2523_v5  ;;  %v5945_v61 = vpack.c.bf16 %v2182_v51, %v2176_v50  ;;  %v6137_v62 = vpack.c.bf16 %v2374_v53, %v2368_v15  ;;  %v2194_v3 = vld [vmem:[%s6806_s30 + $0x2560] sm:$0xff]  ;;  %v2380_v5 = vld [vmem:[%s6806_s30 + $0x2b30] sm:$0xff] }
 0x550   : > { %v2386_v6 = vld [vmem:[%s6806_s30 + $0x2b60] sm:$0xff]  ;;  %v2236_v15 = vld [vmem:[%s6806_s30 + $0x26b0] sm:$0xff] }
 0x551   : > { %v2242_v53 = vld [vmem:[%s6806_s30 + $0x26e0] sm:$0xff] }
 0x555   : > { %5914 = vmatpush1.bf16.xpose.msra.mxu0 %v5913_v55  ;;  %v2159_v55 = vld [vmem:[%s6806_s30 + $0x2448] sm:$0xff] }
 0x556   : > { %6106 = vmatpush1.bf16.xpose.msra.mxu1 %v6105_v21  ;;  %5916 = vmatprep.subr.bf16.mxu0 %v5915_v22  ;;  %v2345_v21 = vld [vmem:[%s6806_s30 + $0x2a18] sm:$0xff]  ;;  %v2351_v22 = vld [vmem:[%s6806_s30 + $0x2a48] sm:$0xff]  ;;  %v5935_v24 = vpack.c.bf16 %v2159_v55, %v2153_v18  ;;  %v2200_v18 = vld [vmem:[%s6806_s30 + $0x2590] sm:$0xff] }
 0x557   : > { %6108 = vmatprep.subr.bf16.mxu1 %v6107_v23  ;;  %v5933_v23 = vpack.c.bf16 %v2336_v28, %v2330_v13  ;;  %v6127_v25 = vpack.c.bf16 %v2351_v22, %v2345_v21  ;;  %v5949_v13 = vpack.c.bf16 %v2194_v3, %v2188_v19  ;;  %v6141_v28 = vpack.c.bf16 %v2386_v6, %v2380_v5  ;;  %v2206_v55 = vld [vmem:[%s6806_s30 + $0x25c0] sm:$0xff]  ;;  %v2392_v21 = vld [vmem:[%s6806_s30 + $0x2b90] sm:$0xff] }
 0x558   : > { %v2398_v22 = vld [vmem:[%s6806_s30 + $0x2bc0] sm:$0xff]  ;;  %v5953_v26 = vpack.c.bf16 %v2206_v55, %v2200_v18  ;;  %v2248_v5 = vld [vmem:[%s6806_s30 + $0x2710] sm:$0xff] }
 0x559   : > { %v6145_v29 = vpack.c.bf16 %v2398_v22, %v2392_v21  ;;  %v2254_v6 = vld [vmem:[%s6806_s30 + $0x2740] sm:$0xff]  ;;  %v2260_v21 = vld [vmem:[%s6806_s30 + $0x2770] sm:$0xff] }
 0x55a   : > { %v2266_v22 = vld [vmem:[%s6806_s30 + $0x27a0] sm:$0xff] }
 0x55d   : > { %5918 = vmatpush1.bf16.xpose.msra.mxu0 %v5917_v33  ;;  %v2165_v33 = vld [vmem:[%s6806_s30 + $0x2478] sm:$0xff] }
 0x55e   : > { %6110 = vmatpush1.bf16.xpose.msra.mxu1 %v6109_v35  ;;  %5920 = vmatprep.subr.bf16.mxu0 %v5919_v63  ;;  %v2171_v35 = vld [vmem:[%s6806_s30 + $0x24a8] sm:$0xff]  ;;  %v2357_v63 = vld [vmem:[%s6806_s30 + $0x2a78] sm:$0xff] }
 0x55f   : > { %6112 = vmatprep.subr.bf16.mxu1 %v6111_v36  ;;  %v2363_v36 = vld [vmem:[%s6806_s30 + $0x2aa8] sm:$0xff]  ;;  %v5939_v41 = vpack.c.bf16 %v2171_v35, %v2165_v33  ;;  %v2218_v33 = vld [vmem:[%s6806_s30 + $0x2620] sm:$0xff]  ;;  %v2404_v35 = vld [vmem:[%s6806_s30 + $0x2bf0] sm:$0xff] }
 0x560   : > { %v6131_v56 = vpack.c.bf16 %v2363_v36, %v2357_v63  ;;  %v2410_v63 = vld [vmem:[%s6806_s30 + $0x2c20] sm:$0xff]  ;;  %v2225_v36 = vld [vmem:[%s6806_s30 + $0x2658] sm:$0xff] }
 0x565   : > { %5922 = vmatpush1.bf16.xpose.msra.mxu0 %v5921_v27  ;;  %v2362_v27 = vld [vmem:[%s6806_s30 + $0x2aa0] sm:$0xff] }
 0x566   : > { %6114 = vmatpush1.bf16.xpose.msra.mxu1 %v6113_v44  ;;  %5924 = vmatprep.subr.bf16.mxu0 %v5923_v45  ;;  %v2177_v44 = vld [vmem:[%s6806_s30 + $0x24d8] sm:$0xff]  ;;  %v2183_v45 = vld [vmem:[%s6806_s30 + $0x2508] sm:$0xff]  ;;  %v6133_v48 = vpack.c.bf16 %v2362_v27, %v2356_v39  ;;  %v2224_v39 = vld [vmem:[%s6806_s30 + $0x2650] sm:$0xff] }
 0x567   : > { %6116 = vmatprep.subr.bf16.mxu1 %v6115_v46  ;;  %v2369_v46 = vld [vmem:[%s6806_s30 + $0x2ad8] sm:$0xff]  ;;  %v5943_v49 = vpack.c.bf16 %v2183_v45, %v2177_v44  ;;  %v2230_v27 = vld [vmem:[%s6806_s30 + $0x2680] sm:$0xff]  ;;  %v2416_v44 = vld [vmem:[%s6806_s30 + $0x2c50] sm:$0xff] }
 0x568   : > { %v6135_v16 = vpack.c.bf16 %v2375_v47, %v2369_v46  ;;  %v2422_v45 = vld [vmem:[%s6806_s30 + $0x2c80] sm:$0xff]  ;;  %v2237_v46 = vld [vmem:[%s6806_s30 + $0x26b8] sm:$0xff]  ;;  %v2243_v47 = vld [vmem:[%s6806_s30 + $0x26e8] sm:$0xff] }
 0x569   : > { %v5963_v50 = vpack.c.bf16 %v2243_v47, %v2237_v46 }
 0x56d   : > { %5926 = vmatpush1.bf16.xpose.msra.mxu0 %v5925_v54  ;;  %v2189_v54 = vld [vmem:[%s6806_s30 + $0x2538] sm:$0xff] }
 0x56e   : > { %6118 = vmatpush1.bf16.xpose.msra.mxu1 %v6117_v57  ;;  %5928 = vmatprep.subr.bf16.mxu0 %v5927_v58  ;;  %v2195_v57 = vld [vmem:[%s6806_s30 + $0x2568] sm:$0xff]  ;;  %v2381_v58 = vld [vmem:[%s6806_s30 + $0x2b38] sm:$0xff] }
 0x56f   : > { %6120 = vmatprep.subr.bf16.mxu1 %v6119_v59  ;;  %v2387_v59 = vld [vmem:[%s6806_s30 + $0x2b68] sm:$0xff]  ;;  %v5947_v0 = vpack.c.bf16 %v2195_v57, %v2189_v54  ;;  %v2428_v54 = vld [vmem:[%s6806_s30 + $0x2cb0] sm:$0xff]  ;;  %v2434_v57 = vld [vmem:[%s6806_s30 + $0x2ce0] sm:$0xff] }
 0x570   : > { %v6139_v1 = vpack.c.bf16 %v2387_v59, %v2381_v58  ;;  %v2249_v58 = vld [vmem:[%s6806_s30 + $0x2718] sm:$0xff]  ;;  %v2255_v59 = vld [vmem:[%s6806_s30 + $0x2748] sm:$0xff] }
 0x571   : > { %v5967_v19 = vpack.c.bf16 %v2255_v59, %v2249_v58  ;;  %v2489_v59 = vld [vmem:[%s6806_s30 + $0x2e98] sm:$0xff] }
 0x575   : > { %5930 = vmatpush1.bf16.xpose.msra.mxu0 %v5929_v7  ;;  %v2201_v7 = vld [vmem:[%s6806_s30 + $0x2598] sm:$0xff] }
 0x576   : > { %6122 = vmatpush1.bf16.xpose.msra.mxu1 %v6121_v8  ;;  %5932 = vmatprep.subr.bf16.mxu0 %v5931_v9  ;;  %v2207_v8 = vld [vmem:[%s6806_s30 + $0x25c8] sm:$0xff]  ;;  %v2393_v9 = vld [vmem:[%s6806_s30 + $0x2b98] sm:$0xff] }
 0x577   : > { %6124 = vmatprep.subr.bf16.mxu1 %v6123_v11  ;;  %v2399_v11 = vld [vmem:[%s6806_s30 + $0x2bc8] sm:$0xff]  ;;  %v5951_v14 = vpack.c.bf16 %v2207_v8, %v2201_v7  ;;  %v2440_v7 = vld [vmem:[%s6806_s30 + $0x2d10] sm:$0xff]  ;;  %v2446_v8 = vld [vmem:[%s6806_s30 + $0x2d40] sm:$0xff] }
 0x578   : > { %v6143_v17 = vpack.c.bf16 %v2399_v11, %v2393_v9  ;;  %v2261_v9 = vld [vmem:[%s6806_s30 + $0x2778] sm:$0xff]  ;;  %v2267_v11 = vld [vmem:[%s6806_s30 + $0x27a8] sm:$0xff] }
 0x579   : > { %v5971_v18 = vpack.c.bf16 %v2267_v11, %v2261_v9 }
 0x57d   : > { %5934 = vmatpush1.bf16.xpose.msra.mxu0 %v5933_v23  ;;  %v2213_v23 = vld [vmem:[%s6806_s30 + $0x25f8] sm:$0xff] }
 0x57e   : > { %6126 = vmatpush1.bf16.xpose.msra.mxu1 %v6125_v10  ;;  %5936 = vmatprep.subr.bf16.mxu0 %v5935_v24  ;;  %v2219_v10 = vld [vmem:[%s6806_s30 + $0x2628] sm:$0xff]  ;;  %v2405_v24 = vld [vmem:[%s6806_s30 + $0x2bf8] sm:$0xff] }
 0x57f   : > { %6128 = vmatprep.subr.bf16.mxu1 %v6127_v25  ;;  %v2411_v25 = vld [vmem:[%s6806_s30 + $0x2c28] sm:$0xff]  ;;  %v5955_v30 = vpack.c.bf16 %v2219_v10, %v2213_v23  ;;  %v2452_v23 = vld [vmem:[%s6806_s30 + $0x2d70] sm:$0xff]  ;;  %v2458_v10 = vld [vmem:[%s6806_s30 + $0x2da0] sm:$0xff] }
 0x580   : > { %v6147_v32 = vpack.c.bf16 %v2411_v25, %v2405_v24  ;;  %v2273_v24 = vld [vmem:[%s6806_s30 + $0x27d8] sm:$0xff]  ;;  %v2279_v25 = vld [vmem:[%s6806_s30 + $0x2808] sm:$0xff] }
 0x584   : > { %4097 = vmatmul.mubr.f32.vlgmr.msra.gmra.mrb[6].mxu0 %v8214_v20 }
 0x585   : > { %5938 = vmatpush1.bf16.xpose.msra.mxu0 %v5937_v38  ;;  %4310 = vmatmul.mubr.f32.vlgmr.msra.gmra.mrb[6].mxu1 %v8214_v20  ;;  %v5941_v20 = vpack.c.bf16 %v2170_v12, %v2164_v43  ;;  %v2231_v38 = vld [vmem:[%s6806_s30 + $0x2688] sm:$0xff] }
 0x586   : > { %6130 = vmatpush1.bf16.xpose.msra.mxu1 %v6129_v40  ;;  %5940 = vmatprep.subr.bf16.mxu0 %v5939_v41  ;;  %v2417_v40 = vld [vmem:[%s6806_s30 + $0x2c58] sm:$0xff]  ;;  %v2423_v41 = vld [vmem:[%s6806_s30 + $0x2c88] sm:$0xff]  ;;  %v5959_v43 = vpack.c.bf16 %v2231_v38, %v2225_v36  ;;  %v2464_v36 = vld [vmem:[%s6806_s30 + $0x2dd0] sm:$0xff] }
 0x587   : > { %6132 = vmatprep.subr.bf16.mxu1 %v6131_v56  ;;  %4167 = vmatprep.mubr.f32.mxu0 %v4017_v42  ;;  %v5957_v56 = vpack.c.bf16 %v2218_v33, %v2212_v60  ;;  %v6151_v12 = vpack.c.bf16 %v2423_v41, %v2417_v40  ;;  %v5975_v60 = vpack.c.bf16 %v2279_v25, %v2273_v24  ;;  %v2470_v38 = vld [vmem:[%s6806_s30 + $0x2e00] sm:$0xff]  ;;  %v2285_v40 = vld [vmem:[%s6806_s30 + $0x2838] sm:$0xff]  ;;  %v2291_v41 = vld [vmem:[%s6806_s30 + $0x2868] sm:$0xff] }
 0x588   : > { %4380 = vmatprep.mubr.f32.mxu1 %v4017_v42  ;;  %v6149_v42 = vpack.c.bf16 %v2410_v63, %v2404_v35  ;;  %v2272_v35 = vld [vmem:[%s6806_s30 + $0x27d0] sm:$0xff]  ;;  %v2278_v63 = vld [vmem:[%s6806_s30 + $0x2800] sm:$0xff]  ;;  %v2315_v24 = vld [vmem:[%s6806_s30 + $0x2928] sm:$0xff] }
 0x589   : > { %v2501_v25 = vld [vmem:[%s6806_s30 + $0x2ef8] sm:$0xff] }
 0x58d   : > { %5942 = vmatpush1.bf16.xpose.msra.mxu0 %v5941_v20  ;;  %v2429_v20 = vld [vmem:[%s6806_s30 + $0x2cb8] sm:$0xff] }
 0x58e   : > { %6134 = vmatpush1.bf16.xpose.msra.mxu1 %v6133_v48  ;;  %5944 = vmatprep.subr.bf16.mxu0 %v5943_v49  ;;  %v2435_v48 = vld [vmem:[%s6806_s30 + $0x2ce8] sm:$0xff]  ;;  %v5961_v49 = vpack.c.bf16 %v2230_v27, %v2224_v39  ;;  %v6169_v39 = vpack.c.bf16 %v2470_v38, %v2464_v36  ;;  %v5979_v27 = vpack.c.bf16 %v2291_v41, %v2285_v40 }
 0x58f   : > { %6136 = vmatprep.subr.bf16.mxu1 %v6135_v16  ;;  %v6153_v16 = vpack.c.bf16 %v2422_v45, %v2416_v44  ;;  %v6155_v51 = vpack.c.bf16 %v2435_v48, %v2429_v20  ;;  %v2284_v48 = vld [vmem:[%s6806_s30 + $0x2830] sm:$0xff] }
 0x595   : > { %5946 = vmatpush1.bf16.xpose.msra.mxu0 %v5945_v61  ;;  %v2441_v61 = vld [vmem:[%s6806_s30 + $0x2d18] sm:$0xff] }
 0x596   : > { %6138 = vmatpush1.bf16.xpose.msra.mxu1 %v6137_v62  ;;  %5948 = vmatprep.subr.bf16.mxu0 %v5947_v0  ;;  %v2447_v62 = vld [vmem:[%s6806_s30 + $0x2d48] sm:$0xff]  ;;  %v5965_v0 = vpack.c.bf16 %v2242_v53, %v2236_v15  ;;  %v2297_v15 = vld [vmem:[%s6806_s30 + $0x2898] sm:$0xff] }
 0x597   : > { %6140 = vmatprep.subr.bf16.mxu1 %v6139_v1  ;;  %v6157_v1 = vpack.c.bf16 %v2434_v57, %v2428_v54  ;;  %v6159_v3 = vpack.c.bf16 %v2447_v62, %v2441_v61  ;;  %v2303_v53 = vld [vmem:[%s6806_s30 + $0x28c8] sm:$0xff] }
 0x598   : > { %v2495_v61 = vld [vmem:[%s6806_s30 + $0x2ec8] sm:$0xff] }
 0x59d   : > { %5950 = vmatpush1.bf16.xpose.msra.mxu0 %v5949_v13  ;;  %v2453_v13 = vld [vmem:[%s6806_s30 + $0x2d78] sm:$0xff] }
 0x59e   : > { %6142 = vmatpush1.bf16.xpose.msra.mxu1 %v6141_v28  ;;  %5952 = vmatprep.subr.bf16.mxu0 %v5951_v14  ;;  %v2459_v28 = vld [vmem:[%s6806_s30 + $0x2da8] sm:$0xff]  ;;  %v5969_v14 = vpack.c.bf16 %v2254_v6, %v2248_v5  ;;  %v5983_v6 = vpack.c.bf16 %v2303_v53, %v2297_v15 }
 0x59f   : > { %6144 = vmatprep.subr.bf16.mxu1 %v6143_v17  ;;  %v6161_v17 = vpack.c.bf16 %v2446_v8, %v2440_v7  ;;  %v6163_v55 = vpack.c.bf16 %v2459_v28, %v2453_v13  ;;  %v6175_v8 = vpack.c.bf16 %v2495_v61, %v2489_v59  ;;  %v2296_v13 = vld [vmem:[%s6806_s30 + $0x2890] sm:$0xff] }
 0x5a0   : > { %v347_v28 = vld [vmem:[%s6798_s8 + $0x170] sm:$0xff] }
 0x5a5   : > { %5954 = vmatpush1.bf16.xpose.msra.mxu0 %v5953_v26  ;;  %v2465_v26 = vld [vmem:[%s6806_s30 + $0x2dd8] sm:$0xff] }
 0x5a6   : > { %6146 = vmatpush1.bf16.xpose.msra.mxu1 %v6145_v29  ;;  %5956 = vmatprep.subr.bf16.mxu0 %v5955_v30  ;;  %v2471_v29 = vld [vmem:[%s6806_s30 + $0x2e08] sm:$0xff]  ;;  %v5973_v30 = vpack.c.bf16 %v2266_v22, %v2260_v21  ;;  %v2494_v21 = vld [vmem:[%s6806_s30 + $0x2ec0] sm:$0xff]  ;;  %v633_v22 = vrot.slane %v347_v28, 4 }
 0x5a7   : > { %6148 = vmatprep.subr.bf16.mxu1 %v6147_v32  ;;  %v6165_v32 = vpack.c.bf16 %v2458_v10, %v2452_v23  ;;  %v6167_v33 = vpack.c.bf16 %v2471_v29, %v2465_v26  ;;  %v2309_v10 = vld [vmem:[%s6806_s30 + $0x28f8] sm:$0xff]  ;;  %v2507_v29 = vld [vmem:[%s6806_s30 + $0x2f28] sm:$0xff] }
 0x5a8   : > { %v5987_v40 = vpack.c.bf16 %v2315_v24, %v2309_v10 }
 0x5ad   : > { %5958 = vmatpush1.bf16.xpose.msra.mxu0 %v5957_v56  ;;  %v2477_v56 = vld [vmem:[%s6806_s30 + $0x2e38] sm:$0xff] }
 0x5ae   : > { %6150 = vmatpush1.bf16.xpose.msra.mxu1 %v6149_v42  ;;  %5960 = vmatprep.subr.bf16.mxu0 %v5959_v43  ;;  %v2483_v42 = vld [vmem:[%s6806_s30 + $0x2e68] sm:$0xff]  ;;  %v5977_v43 = vpack.c.bf16 %v2278_v63, %v2272_v35 }
 0x5af   : > { %6152 = vmatprep.subr.bf16.mxu1 %v6151_v12  ;;  %v2536_v12 = vld [vmem:[%s7530_s23 + $0x8] sm:$0xf]  ;;  %v6171_v44 = vpack.c.bf16 %v2483_v42, %v2477_v56  ;;  %v6179_v56 = vpack.c.bf16 %v2507_v29, %v2501_v25 }
 0x5b0   : > { %v2577_v45 = vrot.slane %v2536_v12, %v7526_v31  ;;  %v2585_v46 = vrot.slane %v2536_v12, %v7534_v2  ;;  %v2581_v47 = vrot.slane %v2536_v12, %v7537_v52  ;;  %v2589_v20 = vrot.slane %v2536_v12, %v7540_v4 }
 0x5b5   : > { %5962 = vmatpush1.bf16.xpose.msra.mxu0 %v5961_v49  ;;  %v2290_v49 = vld [vmem:[%s6806_s30 + $0x2860] sm:$0xff] }
 0x5b6   : > { %6154 = vmatpush1.bf16.xpose.msra.mxu1 %v6153_v16  ;;  %5964 = vmatprep.subr.bf16.mxu0 %v5963_v50  ;;  %v2476_v16 = vld [vmem:[%s6806_s30 + $0x2e30] sm:$0xff] }
 0x5b7   : > { %6156 = vmatprep.subr.bf16.mxu1 %v6155_v51  ;;  %v2482_v51 = vld [vmem:[%s6806_s30 + $0x2e60] sm:$0xff] }
 0x5b8   : > { %v6173_v5 = vpack.c.bf16 %v2482_v51, %v2476_v16  ;;  %v2321_v16 = vld [vmem:[%s6806_s30 + $0x2958] sm:$0xff] }
 0x5bd   : > { %5966 = vmatpush1.bf16.xpose.msra.mxu0 %v5965_v0 }
 0x5be   : > { %6158 = vmatpush1.bf16.xpose.msra.mxu1 %v6157_v1  ;;  %5968 = vmatprep.subr.bf16.mxu0 %v5967_v19  ;;  %v5981_v19 = vpack.c.bf16 %v2290_v49, %v2284_v48  ;;  %v2506_v49 = vld [vmem:[%s6806_s30 + $0x2f20] sm:$0xff] }
 0x5bf   : > { %6160 = vmatprep.subr.bf16.mxu1 %v6159_v3 }
 0x5c5   : > { %5970 = vmatpush1.bf16.xpose.msra.mxu0 %v5969_v14  ;;  %v348_v14 = vld [vmem:[%s6798_s8 + $0x178] sm:$0xff] }
 0x5c6   : > { %6162 = vmatpush1.bf16.xpose.msra.mxu1 %v6161_v17  ;;  %5972 = vmatprep.subr.bf16.mxu0 %v5971_v18  ;;  %v2302_v18 = vld [vmem:[%s6806_s30 + $0x28c0] sm:$0xff]  ;;  %v639_v23 = vrot.slane %v348_v14, 4 }
 0x5c7   : > { %6164 = vmatprep.subr.bf16.mxu1 %v6163_v55  ;;  %v2488_v55 = vld [vmem:[%s6806_s30 + $0x2e90] sm:$0xff] }
 0x5c8   : > { %v640_v36 = vadd.f32 %v639_v23, %v348_v14  ;;  %v6177_v38 = vpack.c.bf16 %v2494_v21, %v2488_v55  ;;  %v2518_v14 = vld [vmem:[%s6806_s30 + $0x2f80] sm:$0xff]  ;;  %v2531_v23 = vld [vmem:[%s6806_s30 + $0x2fe8] sm:$0xff] }
 0x5ca   : > { %v641_v12 = vrot.slane %v640_v36, 2 }
 0x5cd   : > { %5974 = vmatpush1.bf16.xpose.msra.mxu0 %v5973_v30  ;;  %v341_v30 = vld [vmem:[%s6798_s8 + $0x140] sm:$0xff] }
 0x5ce   : > { %6166 = vmatpush1.bf16.xpose.msra.mxu1 %v6165_v32  ;;  %5976 = vmatprep.subr.bf16.mxu0 %v5975_v60  ;;  %v342_v32 = vld [vmem:[%s6798_s8 + $0x148] sm:$0xff]  ;;  %v634_v60 = vadd.f32 %v633_v22, %v347_v28  ;;  %v597_v35 = vrot.slane %v341_v30, 4  ;;  %v2512_v28 = vld [vmem:[%s6806_s30 + $0x2f50] sm:$0xff]  ;;  %v2525_v22 = vld [vmem:[%s6806_s30 + $0x2fb8] sm:$0xff] }
 0x5cf   : > { %6168 = vmatprep.subr.bf16.mxu1 %v6167_v33  ;;  %v5985_v33 = vpack.c.bf16 %v2302_v18, %v2296_v13  ;;  %v603_v63 = vrot.slane %v342_v32, 4  ;;  %v2326_v13 = vld [vmem:[%s6806_s30 + $0x2980] sm:$0xff]  ;;  %v2339_v18 = vld [vmem:[%s6806_s30 + $0x29e8] sm:$0xff]  ;;  %v6185_v25 = vpack.c.bf16 %v2518_v14, %v2512_v28  ;;  %v2184_v28 = vld [vmem:[%s6806_s30 + $0x2510] sm:$0xff] }
 0x5d0   : > { %v635_v41 = vrot.slane %v634_v60, 2  ;;  %v598_v42 = vadd.f32 %v597_v35, %v341_v30  ;;  %v6187_v30 = vpack.c.bf16 %v2531_v23, %v2525_v22  ;;  %v2370_v14 = vld [vmem:[%s6806_s30 + $0x2ae0] sm:$0xff]  ;;  %v2389_v22 = vld [vmem:[%s6806_s30 + $0x2b78] sm:$0xff] }
 0x5d5   : > { %5978 = vmatpush1.bf16.xpose.msra.mxu0 %v5977_v43  ;;  %v604_v43 = vadd.f32 %v603_v63, %v342_v32  ;;  %v356_v32 = vld [vmem:[#allocation2 + $0x2c] sm:$0xf]  ;;  %v2332_v63 = vld [vmem:[%s6806_s30 + $0x29b0] sm:$0xff] }
 0x5d6   : > { %6170 = vmatpush1.bf16.xpose.msra.mxu1 %v6169_v39  ;;  %5980 = vmatprep.subr.bf16.mxu0 %v5979_v27  ;;  %v636_v39 = vadd.f32 %v635_v41, %v634_v60  ;;  %v599_v27 = vrot.slane %v598_v42, 2  ;;  %v2155_v41 = vld [vmem:[%s6806_s30 + $0x2428] sm:$0xff] }
 0x5d7   : > { %v3781_v50 = vpop.f32.mrb[4].mxu0  ;;  %6172 = vmatprep.subr.bf16.mxu1 %v6171_v44  ;;  %v605_v44 = vrot.slane %v604_v43, 2 }
 0x5d8   : > { %v6263_v54 = vadd.f32 %v3781_v50, %v2577_v45  ;;  %v3994_v57 = vpop.f32.mrb[4].mxu1  ;;  %v3783_v58 = vpop.f32.mrb[5].mxu0  ;;  %v642_v45 = vadd.f32 %v641_v12, %v640_v36  ;;  %v637_v48 = vrot.slane %v636_v39, 1  ;;  %v2327_v50 = vld [vmem:[%s6806_s30 + $0x2988] sm:$0xff]  ;;  %v600_v51 = vadd.f32 %v599_v27, %v598_v42  ;;  %v2338_v36 = vld [vmem:[%s6806_s30 + $0x29e0] sm:$0xff] }
 0x5d9   : > { %v6265_v62 = vadd.f32 %v3994_v57, %v2585_v46  ;;  %v6264_v0 = vadd.f32 %v3783_v58, %v2581_v47  ;;  %v3996_v1 = vpop.f32.mrb[5].mxu1  ;;  %v2308_v46 = vld [vmem:[%s6806_s30 + $0x28f0] sm:$0xff]  ;;  %v2314_v47 = vld [vmem:[%s6806_s30 + $0x2920] sm:$0xff]  ;;  %v606_v15 = vadd.f32 %v605_v44, %v604_v43  ;;  %v2519_v57 = vld [vmem:[%s6806_s30 + $0x2f88] sm:$0xff]  ;;  %v5997_v12 = vpack.c.bf16 %v2338_v36, %v2332_v63 }
 0x5da   : > { %v6266_v3 = vadd.f32 %v3996_v1, %v2589_v20  ;;  %v2500_v20 = vld [vmem:[%s6806_s30 + $0x2ef0] sm:$0xff]  ;;  %v643_v53 = vrot.slane %v642_v45, 1  ;;  %v638_v58 = vadd.f32 %v637_v48, %v636_v39  ;;  %v5989_v59 = vpack.c.bf16 %v2314_v47, %v2308_v46  ;;  %v2347_v42 = vld [vmem:[%s6806_s30 + $0x2a28] sm:$0xff]  ;;  %v2353_v43 = vld [vmem:[%s6806_s30 + $0x2a58] sm:$0xff] }
 0x5db   : > { %v4508_v7 = vcombine.low %v6263_v54, %v6264_v0  ;;  %v2513_v54 = vld [vmem:[%s6806_s30 + $0x2f58] sm:$0xff]  ;;  %v601_v61 = vrot.slane %v600_v51, 1  ;;  %v6181_v1 = vpack.c.bf16 %v2506_v49, %v2500_v20  ;;  %v6191_v44 = vpack.c.bf16 %v2353_v43, %v2347_v42  ;;  %v2160_v46 = vld [vmem:[%s6806_s30 + $0x2450] sm:$0xff]  ;;  %v2346_v47 = vld [vmem:[%s6806_s30 + $0x2a20] sm:$0xff] }
 0x5dc   : > { %v4509_v9 = vcombine.low %v6265_v62, %v6266_v3  ;;  %v607_v62 = vrot.slane %v606_v15, 1  ;;  %v644_v0 = vadd.f32 %v643_v53, %v642_v45  ;;  %v6183_v3 = vpack.c.bf16 %v2519_v57, %v2513_v54  ;;  %v2154_v45 = vld [vmem:[%s6806_s30 + $0x2420] sm:$0xff]  ;;  %v2352_v48 = vld [vmem:[%s6806_s30 + $0x2a50] sm:$0xff]  ;;  %v2167_v49 = vld [vmem:[%s6806_s30 + $0x2488] sm:$0xff] }
 0x5dd   : > { %v4516_v11 = vrot.slane %v4508_v7, %v6911_v34  ;;  %5982 = vmatpush1.bf16.xpose.msra.mxu0 %v5981_v19  ;;  %v5991_v19 = vpack.c.bf16 %v2327_v50, %v2321_v16  ;;  %v2173_v16 = vld [vmem:[%s6806_s30 + $0x24b8] sm:$0xff]  ;;  %v6001_v53 = vpack.c.bf16 %v2160_v46, %v2154_v45  ;;  %v6193_v57 = vpack.c.bf16 %v2352_v48, %v2346_v47  ;;  %v2208_v42 = vld [vmem:[%s6806_s30 + $0x25d0] sm:$0xff]  ;;  %v2394_v43 = vld [vmem:[%s6806_s30 + $0x2ba0] sm:$0xff] }
 0x5de   : > { %v4523_v17 = vrot.slane %v4509_v9, %v6911_v34  ;;  %6174 = vmatpush1.bf16.xpose.msra.mxu1 %v6173_v5  ;;  %5984 = vmatprep.subr.bf16.mxu0 %v5983_v6  ;;  %v602_v5 = vadd.f32 %v601_v61, %v600_v51  ;;  %v608_v6 = vadd.f32 %v607_v62, %v606_v15  ;;  %v2359_v51 = vld [vmem:[%s6806_s30 + $0x2a88] sm:$0xff]  ;;  %v2365_v15 = vld [vmem:[%s6806_s30 + $0x2ab8] sm:$0xff]  ;;  %v2166_v62 = vld [vmem:[%s6806_s30 + $0x2480] sm:$0xff] }
 0x5df   : > { %6176 = vmatprep.subr.bf16.mxu1 %v6175_v8  ;;  %v885_v7 = vcombine.low %v638_v58, %v644_v0  ;;  %v6003_v58 = vpack.c.bf16 %v2173_v16, %v2167_v49  ;;  %v2172_v0 = vld [vmem:[%s6806_s30 + $0x24b0] sm:$0xff]  ;;  %v2401_v63 = vld [vmem:[%s6806_s30 + $0x2bd8] sm:$0xff]  ;;  %v2214_v49 = vld [vmem:[%s6806_s30 + $0x2600] sm:$0xff] }
 0x5e0   : > { %v4524_v26 = vcombine.low %v4516_v11, %v4523_v17  ;;  %v860_v8 = vcombine.low %v602_v5, %v608_v6  ;;  %v2320_v11 = vld [vmem:[%s6806_s30 + $0x2950] sm:$0xff]  ;;  %v2333_v17 = vld [vmem:[%s6806_s30 + $0x29b8] sm:$0xff]  ;;  %v2371_v6 = vld [vmem:[%s6806_s30 + $0x2ae8] sm:$0xff] }
 0x5e1   : > { %v892_v9 = vrot.slane %v885_v7, %v6911_v34  ;;  %v5993_v10 = vpack.c.bf16 %v2326_v13, %v2320_v11  ;;  %v2185_v5 = vld [vmem:[%s6806_s30 + $0x2518] sm:$0xff]  ;;  %v2178_v13 = vld [vmem:[%s6806_s30 + $0x24e0] sm:$0xff]  ;;  %v2220_v16 = vld [vmem:[%s6806_s30 + $0x2630] sm:$0xff] }
 0x5e2   : > { %4548 = vst [vmem:[%s7569_s4 + $0x10] sm:$0xff] %v4524_v26  ;;  %v867_v55 = vrot.slane %v860_v8, %v6911_v34  ;;  %v5995_v26 = vpack.c.bf16 %v2339_v18, %v2333_v17  ;;  %v2377_v7 = vld [vmem:[%s6806_s30 + $0x2b18] sm:$0xff]  ;;  %v2376_v17 = vld [vmem:[%s6806_s30 + $0x2b10] sm:$0xff]  ;;  %v2191_v18 = vld [vmem:[%s6806_s30 + $0x2548] sm:$0xff]  ;;  %v6009_v23 = vpack.c.bf16 %v2184_v28, %v2178_v13 }
 0x5e3   : > { %v950_v21 = vrot.slane %v892_v9, 7  ;;  %v6199_v11 = vpack.c.bf16 %v2377_v7, %v2371_v6  ;;  %v2413_v45 = vld [vmem:[%s6806_s30 + $0x2c38] sm:$0xff]  ;;  %v2239_v6 = vld [vmem:[%s6806_s30 + $0x26c8] sm:$0xff] }
 0x5e4   : > { %v2245_v7 = vld [vmem:[%s6806_s30 + $0x26f8] sm:$0xff] }
 0x5e5   : > { %5986 = vmatpush1.bf16.xpose.msra.mxu0 %v5985_v33  ;;  %v951_v24 = vsel %vm898_vm0, %v950_v21, %v867_v55  ;;  %v2197_v55 = vld [vmem:[%s6806_s30 + $0x2578] sm:$0xff]  ;;  %v6027_v13 = vpack.c.bf16 %v2245_v7, %v2239_v6  ;;  %v2478_v6 = vld [vmem:[%s6806_s30 + $0x2e40] sm:$0xff]  ;;  %v2484_v7 = vld [vmem:[%s6806_s30 + $0x2e70] sm:$0xff] }
 0x5e6   : > { %6178 = vmatpush1.bf16.xpose.msra.mxu1 %v6177_v38  ;;  %5988 = vmatprep.subr.bf16.mxu0 %v5987_v40  ;;  %v952_v29 = vsel %vm900_vm1, %v950_v21, %v951_v24  ;;  %v2524_v38 = vld [vmem:[%s6806_s30 + $0x2fb0] sm:$0xff]  ;;  %v2530_v40 = vld [vmem:[%s6806_s30 + $0x2fe0] sm:$0xff]  ;;  %v6011_v24 = vpack.c.bf16 %v2197_v55, %v2191_v18 }
 0x5e7   : > { %6180 = vmatprep.subr.bf16.mxu1 %v6179_v56  ;;  %v953_v60 = vsel %vm902_vm2, %v950_v21, %v952_v29  ;;  %v2161_v56 = vld [vmem:[%s6806_s30 + $0x2458] sm:$0xff]  ;;  %v6189_v39 = vpack.c.bf16 %v2530_v40, %v2524_v38  ;;  %v2196_v29 = vld [vmem:[%s6806_s30 + $0x2570] sm:$0xff]  ;;  %v2430_v18 = vld [vmem:[%s6806_s30 + $0x2cc0] sm:$0xff] }
 0x5e8   : > { %v954_v33 = vsel %vm904_vm3, %v950_v21, %v953_v60  ;;  %v5999_v27 = vpack.c.bf16 %v2161_v56, %v2155_v41  ;;  %v2383_v21 = vld [vmem:[%s6806_s30 + $0x2b48] sm:$0xff]  ;;  %v2202_v56 = vld [vmem:[%s6806_s30 + $0x25a0] sm:$0xff]  ;;  %v2436_v55 = vld [vmem:[%s6806_s30 + $0x2cf0] sm:$0xff] }
 0x5e9   : > { %v970_v35 = vadd.f32 %v954_v33, %v356_v32  ;;  %v2388_v32 = vld [vmem:[%s6806_s30 + $0x2b70] sm:$0xff]  ;;  %v2203_v60 = vld [vmem:[%s6806_s30 + $0x25a8] sm:$0xff]  ;;  %v2209_v33 = vld [vmem:[%s6806_s30 + $0x25d8] sm:$0xff]  ;;  %v6017_v46 = vpack.c.bf16 %v2208_v42, %v2202_v56 }
 0x5ea   : > { %v6015_v40 = vpack.c.bf16 %v2209_v33, %v2203_v60  ;;  %v2442_v60 = vld [vmem:[%s6806_s30 + $0x2d20] sm:$0xff]  ;;  %v2448_v33 = vld [vmem:[%s6806_s30 + $0x2d50] sm:$0xff] }
 0x5eb   : > { %978 = vst [vmem:[#allocation2 + $0x2c] sm:$0xf] %v970_v35  ;;  %v2395_v35 = vld [vmem:[%s6806_s30 + $0x2ba8] sm:$0xff] }
 0x5ec   : > { %v6207_v41 = vpack.c.bf16 %v2401_v63, %v2395_v35  ;;  %v2263_v35 = vld [vmem:[%s6806_s30 + $0x2788] sm:$0xff]  ;;  %v2269_v63 = vld [vmem:[%s6806_s30 + $0x27b8] sm:$0xff] }
 0x5ed   : > { %5990 = vmatpush1.bf16.xpose.msra.mxu0 %v5989_v59  ;;  %v6195_v59 = vpack.c.bf16 %v2365_v15, %v2359_v51  ;;  %v2412_v51 = vld [vmem:[%s6806_s30 + $0x2c30] sm:$0xff]  ;;  %v2227_v15 = vld [vmem:[%s6806_s30 + $0x2668] sm:$0xff]  ;;  %v6035_v56 = vpack.c.bf16 %v2269_v63, %v2263_v35  ;;  %v2502_v35 = vld [vmem:[%s6806_s30 + $0x2f00] sm:$0xff] }
 0x5ee   : > { %6182 = vmatpush1.bf16.xpose.msra.mxu1 %v6181_v1  ;;  %5992 = vmatprep.subr.bf16.mxu0 %v5991_v19  ;;  %v2358_v1 = vld [vmem:[%s6806_s30 + $0x2a80] sm:$0xff]  ;;  %v2364_v19 = vld [vmem:[%s6806_s30 + $0x2ab0] sm:$0xff] }
 0x5ef   : > { %6184 = vmatprep.subr.bf16.mxu1 %v6183_v3  ;;  %v2179_v3 = vld [vmem:[%s6806_s30 + $0x24e8] sm:$0xff]  ;;  %v6197_v8 = vpack.c.bf16 %v2364_v19, %v2358_v1  ;;  %v2226_v1 = vld [vmem:[%s6806_s30 + $0x2660] sm:$0xff]  ;;  %v2232_v19 = vld [vmem:[%s6806_s30 + $0x2690] sm:$0xff] }
 0x5f0   : > { %v6007_v9 = vpack.c.bf16 %v2185_v5, %v2179_v3  ;;  %v2418_v3 = vld [vmem:[%s6806_s30 + $0x2c60] sm:$0xff]  ;;  %v2424_v5 = vld [vmem:[%s6806_s30 + $0x2c90] sm:$0xff] }
 0x5f1   : > { %v2508_v63 = vld [vmem:[%s6806_s30 + $0x2f30] sm:$0xff] }
 0x5f2   : > { %v989_v20 = vld [vmem:[#allocation2 + $0x2c] sm:$0xf] }
 0x5f3   : > { %v997_v50 = vmul.f32 0.125, %v989_v20 }
 0x5f5   : > { %5994 = vmatpush1.bf16.xpose.msra.mxu0 %v5993_v10  ;;  %v8499_v54 = vrot.slane %v997_v50, %v6911_v34  ;;  %v6201_v10 = vpack.c.bf16 %v2376_v17, %v2370_v14  ;;  %v2406_v50 = vld [vmem:[%s6806_s30 + $0x2c00] sm:$0xff]  ;;  %v2244_v17 = vld [vmem:[%s6806_s30 + $0x26f0] sm:$0xff] }
 0x5f6   : > { %6186 = vmatpush1.bf16.xpose.msra.mxu1 %v6185_v25  ;;  %5996 = vmatprep.subr.bf16.mxu0 %v5995_v26  ;;  %v6203_v25 = vpack.c.bf16 %v2389_v22, %v2383_v21  ;;  %v2190_v26 = vld [vmem:[%s6806_s30 + $0x2540] sm:$0xff]  ;;  %v2251_v21 = vld [vmem:[%s6806_s30 + $0x2728] sm:$0xff]  ;;  %v2257_v22 = vld [vmem:[%s6806_s30 + $0x2758] sm:$0xff] }
 0x5f7   : > { %6188 = vmatprep.subr.bf16.mxu1 %v6187_v30  ;;  %v4025_v61 = vcombine.high %v8499_v54, %v8499_v54  ;;  %v2382_v30 = vld [vmem:[%s6806_s30 + $0x2b40] sm:$0xff]  ;;  %v6013_v36 = vpack.c.bf16 %v2196_v29, %v2190_v26  ;;  %v6031_v26 = vpack.c.bf16 %v2257_v22, %v2251_v21  ;;  %v2496_v22 = vld [vmem:[%s6806_s30 + $0x2ed0] sm:$0xff] }
 0x5f8   : > { %v6205_v38 = vpack.c.bf16 %v2388_v32, %v2382_v30  ;;  %v2238_v14 = vld [vmem:[%s6806_s30 + $0x26c0] sm:$0xff]  ;;  %v2256_v32 = vld [vmem:[%s6806_s30 + $0x2750] sm:$0xff] }
 0x5f9   : > { %v2250_v30 = vld [vmem:[%s6806_s30 + $0x2720] sm:$0xff] }
 0x5fa   : > { %v2490_v21 = vld [vmem:[%s6806_s30 + $0x2ea0] sm:$0xff] }
 0x5fd   : > { %5998 = vmatpush1.bf16.xpose.msra.mxu0 %v5997_v12  ;;  %v2400_v12 = vld [vmem:[%s6806_s30 + $0x2bd0] sm:$0xff] }
 0x5fe   : > { %6190 = vmatpush1.bf16.xpose.msra.mxu1 %v6189_v39  ;;  %6000 = vmatprep.subr.bf16.mxu0 %v5999_v27  ;;  %v2215_v39 = vld [vmem:[%s6806_s30 + $0x2608] sm:$0xff]  ;;  %v2221_v27 = vld [vmem:[%s6806_s30 + $0x2638] sm:$0xff]  ;;  %v6209_v47 = vpack.c.bf16 %v2400_v12, %v2394_v43  ;;  %v2262_v43 = vld [vmem:[%s6806_s30 + $0x2780] sm:$0xff] }
 0x5ff   : > { %6192 = vmatprep.subr.bf16.mxu1 %v6191_v44  ;;  %v2407_v44 = vld [vmem:[%s6806_s30 + $0x2c08] sm:$0xff]  ;;  %v6019_v20 = vpack.c.bf16 %v2221_v27, %v2215_v39  ;;  %v2268_v12 = vld [vmem:[%s6806_s30 + $0x27b0] sm:$0xff]  ;;  %v2454_v39 = vld [vmem:[%s6806_s30 + $0x2d80] sm:$0xff] }
 0x600   : > { %v6211_v48 = vpack.c.bf16 %v2413_v45, %v2407_v44  ;;  %v2460_v27 = vld [vmem:[%s6806_s30 + $0x2db0] sm:$0xff]  ;;  %v2275_v44 = vld [vmem:[%s6806_s30 + $0x27e8] sm:$0xff]  ;;  %v2281_v45 = vld [vmem:[%s6806_s30 + $0x2818] sm:$0xff] }
 0x604   : > { %4168 = vmatmul.mubr.f32.vlgmr.msra.gmra.mrb[6].mxu0 %v8346_v37 }
 0x605   : > { %6002 = vmatpush1.bf16.xpose.msra.mxu0 %v6001_v53  ;;  %4381 = vmatmul.mubr.f32.vlgmr.msra.gmra.mrb[6].mxu1 %v8346_v37  ;;  %v6005_v37 = vpack.c.bf16 %v2172_v0, %v2166_v62  ;;  %v2233_v53 = vld [vmem:[%s6806_s30 + $0x2698] sm:$0xff] }
 0x606   : > { %6194 = vmatpush1.bf16.xpose.msra.mxu1 %v6193_v57  ;;  %6004 = vmatprep.subr.bf16.mxu0 %v6003_v58  ;;  %v2419_v57 = vld [vmem:[%s6806_s30 + $0x2c68] sm:$0xff]  ;;  %v2425_v58 = vld [vmem:[%s6806_s30 + $0x2c98] sm:$0xff]  ;;  %v6023_v62 = vpack.c.bf16 %v2233_v53, %v2227_v15  ;;  %v2466_v15 = vld [vmem:[%s6806_s30 + $0x2de0] sm:$0xff] }
 0x607   : > { %6196 = vmatprep.subr.bf16.mxu1 %v6195_v59  ;;  %4238 = vmatprep.mubr.f32.mxu0 %v4025_v61  ;;  %v6021_v59 = vpack.c.bf16 %v2220_v16, %v2214_v49  ;;  %v6215_v0 = vpack.c.bf16 %v2425_v58, %v2419_v57  ;;  %v6039_v49 = vpack.c.bf16 %v2281_v45, %v2275_v44  ;;  %v2472_v53 = vld [vmem:[%s6806_s30 + $0x2e10] sm:$0xff]  ;;  %v2287_v57 = vld [vmem:[%s6806_s30 + $0x2848] sm:$0xff]  ;;  %v2293_v58 = vld [vmem:[%s6806_s30 + $0x2878] sm:$0xff] }
 0x608   : > { %4451 = vmatprep.mubr.f32.mxu1 %v4025_v61  ;;  %v6213_v61 = vpack.c.bf16 %v2412_v51, %v2406_v50  ;;  %v2274_v50 = vld [vmem:[%s6806_s30 + $0x27e0] sm:$0xff]  ;;  %v2280_v51 = vld [vmem:[%s6806_s30 + $0x2810] sm:$0xff] }
 0x609   : > { %v2514_v44 = vld [vmem:[%s6806_s30 + $0x2f60] sm:$0xff]  ;;  %v2520_v45 = vld [vmem:[%s6806_s30 + $0x2f90] sm:$0xff] }
 0x60d   : > { %6006 = vmatpush1.bf16.xpose.msra.mxu0 %v6005_v37  ;;  %v2431_v37 = vld [vmem:[%s6806_s30 + $0x2cc8] sm:$0xff] }
 0x60e   : > { %6198 = vmatpush1.bf16.xpose.msra.mxu1 %v6197_v8  ;;  %6008 = vmatprep.subr.bf16.mxu0 %v6007_v9  ;;  %v2437_v8 = vld [vmem:[%s6806_s30 + $0x2cf8] sm:$0xff]  ;;  %v6025_v9 = vpack.c.bf16 %v2232_v19, %v2226_v1  ;;  %v6043_v1 = vpack.c.bf16 %v2293_v58, %v2287_v57  ;;  %v2526_v57 = vld [vmem:[%s6806_s30 + $0x2fc0] sm:$0xff]  ;;  %v2532_v58 = vld [vmem:[%s6806_s30 + $0x2ff0] sm:$0xff] }
 0x60f   : > { %6200 = vmatprep.subr.bf16.mxu1 %v6199_v11  ;;  %v6217_v11 = vpack.c.bf16 %v2424_v5, %v2418_v3  ;;  %v6219_v28 = vpack.c.bf16 %v2437_v8, %v2431_v37  ;;  %v2286_v3 = vld [vmem:[%s6806_s30 + $0x2840] sm:$0xff]  ;;  %v2292_v5 = vld [vmem:[%s6806_s30 + $0x2870] sm:$0xff]  ;;  %v2299_v37 = vld [vmem:[%s6806_s30 + $0x28a8] sm:$0xff] }
 0x610   : > { %v2305_v8 = vld [vmem:[%s6806_s30 + $0x28d8] sm:$0xff] }
 0x615   : > { %6010 = vmatpush1.bf16.xpose.msra.mxu0 %v6009_v23  ;;  %v2443_v23 = vld [vmem:[%s6806_s30 + $0x2d28] sm:$0xff] }
 0x616   : > { %6202 = vmatpush1.bf16.xpose.msra.mxu1 %v6201_v10  ;;  %6012 = vmatprep.subr.bf16.mxu0 %v6011_v24  ;;  %v2449_v10 = vld [vmem:[%s6806_s30 + $0x2d58] sm:$0xff]  ;;  %v6029_v24 = vpack.c.bf16 %v2244_v17, %v2238_v14  ;;  %v6047_v14 = vpack.c.bf16 %v2305_v8, %v2299_v37 }
 0x617   : > { %6204 = vmatprep.subr.bf16.mxu1 %v6203_v25  ;;  %v6221_v25 = vpack.c.bf16 %v2436_v55, %v2430_v18  ;;  %v6223_v29 = vpack.c.bf16 %v2449_v10, %v2443_v23  ;;  %v2298_v18 = vld [vmem:[%s6806_s30 + $0x28a0] sm:$0xff]  ;;  %v2304_v55 = vld [vmem:[%s6806_s30 + $0x28d0] sm:$0xff]  ;;  %v2311_v23 = vld [vmem:[%s6806_s30 + $0x2908] sm:$0xff] }
 0x618   : > { %v2317_v10 = vld [vmem:[%s6806_s30 + $0x2938] sm:$0xff] }
 0x61d   : > { %6014 = vmatpush1.bf16.xpose.msra.mxu0 %v6013_v36  ;;  %v2455_v36 = vld [vmem:[%s6806_s30 + $0x2d88] sm:$0xff] }
 0x61e   : > { %6206 = vmatpush1.bf16.xpose.msra.mxu1 %v6205_v38  ;;  %6016 = vmatprep.subr.bf16.mxu0 %v6015_v40  ;;  %v2461_v38 = vld [vmem:[%s6806_s30 + $0x2db8] sm:$0xff]  ;;  %v6033_v40 = vpack.c.bf16 %v2256_v32, %v2250_v30  ;;  %v6051_v30 = vpack.c.bf16 %v2317_v10, %v2311_v23 }
 0x61f   : > { %6208 = vmatprep.subr.bf16.mxu1 %v6207_v41  ;;  %v6225_v41 = vpack.c.bf16 %v2448_v33, %v2442_v60  ;;  %v6227_v42 = vpack.c.bf16 %v2461_v38, %v2455_v36  ;;  %v2310_v60 = vld [vmem:[%s6806_s30 + $0x2900] sm:$0xff]  ;;  %v2316_v33 = vld [vmem:[%s6806_s30 + $0x2930] sm:$0xff]  ;;  %v2323_v36 = vld [vmem:[%s6806_s30 + $0x2968] sm:$0xff] }
 0x620   : > { %v2329_v38 = vld [vmem:[%s6806_s30 + $0x2998] sm:$0xff] }
 0x625   : > { %6018 = vmatpush1.bf16.xpose.msra.mxu0 %v6017_v46  ;;  %v2467_v46 = vld [vmem:[%s6806_s30 + $0x2de8] sm:$0xff] }
 0x626   : > { %6210 = vmatpush1.bf16.xpose.msra.mxu1 %v6209_v47  ;;  %6020 = vmatprep.subr.bf16.mxu0 %v6019_v20  ;;  %v2473_v47 = vld [vmem:[%s6806_s30 + $0x2e18] sm:$0xff]  ;;  %v6037_v20 = vpack.c.bf16 %v2268_v12, %v2262_v43  ;;  %v6055_v43 = vpack.c.bf16 %v2329_v38, %v2323_v36 }
 0x627   : > { %6212 = vmatprep.subr.bf16.mxu1 %v6211_v48  ;;  %v6229_v48 = vpack.c.bf16 %v2460_v27, %v2454_v39  ;;  %v6231_v16 = vpack.c.bf16 %v2473_v47, %v2467_v46  ;;  %v2322_v39 = vld [vmem:[%s6806_s30 + $0x2960] sm:$0xff]  ;;  %v2328_v27 = vld [vmem:[%s6806_s30 + $0x2990] sm:$0xff]  ;;  %v2335_v46 = vld [vmem:[%s6806_s30 + $0x29c8] sm:$0xff] }
 0x628   : > { %v2341_v47 = vld [vmem:[%s6806_s30 + $0x29f8] sm:$0xff] }
 0x62d   : > { %6022 = vmatpush1.bf16.xpose.msra.mxu0 %v6021_v59  ;;  %v2479_v59 = vld [vmem:[%s6806_s30 + $0x2e48] sm:$0xff] }
 0x62e   : > { %6214 = vmatpush1.bf16.xpose.msra.mxu1 %v6213_v61  ;;  %6024 = vmatprep.subr.bf16.mxu0 %v6023_v62  ;;  %v2485_v61 = vld [vmem:[%s6806_s30 + $0x2e78] sm:$0xff]  ;;  %v6041_v62 = vpack.c.bf16 %v2280_v51, %v2274_v50  ;;  %v6059_v50 = vpack.c.bf16 %v2341_v47, %v2335_v46 }
 0x62f   : > { %6216 = vmatprep.subr.bf16.mxu1 %v6215_v0  ;;  %v6233_v0 = vpack.c.bf16 %v2472_v53, %v2466_v15  ;;  %v6235_v19 = vpack.c.bf16 %v2485_v61, %v2479_v59  ;;  %v2334_v15 = vld [vmem:[%s6806_s30 + $0x29c0] sm:$0xff]  ;;  %v2340_v53 = vld [vmem:[%s6806_s30 + $0x29f0] sm:$0xff]  ;;  %v6253_v61 = vpack.c.bf16 %v2532_v58, %v2526_v57 }
 0x630   : > { %v6061_v59 = vpack.c.bf16 %v2340_v53, %v2334_v15 }
 0x635   : > { %6026 = vmatpush1.bf16.xpose.msra.mxu0 %v6025_v9  ;;  %v2491_v9 = vld [vmem:[%s6806_s30 + $0x2ea8] sm:$0xff] }
 0x636   : > { %6218 = vmatpush1.bf16.xpose.msra.mxu1 %v6217_v11  ;;  %6028 = vmatprep.subr.bf16.mxu0 %v6027_v13  ;;  %v2497_v11 = vld [vmem:[%s6806_s30 + $0x2ed8] sm:$0xff]  ;;  %v6045_v13 = vpack.c.bf16 %v2292_v5, %v2286_v3 }
 0x637   : > { %6220 = vmatprep.subr.bf16.mxu1 %v6219_v28  ;;  %v6237_v28 = vpack.c.bf16 %v2484_v7, %v2478_v6  ;;  %v6239_v17 = vpack.c.bf16 %v2497_v11, %v2491_v9 }
 0x63d   : > { %6030 = vmatpush1.bf16.xpose.msra.mxu0 %v6029_v24  ;;  %v2503_v24 = vld [vmem:[%s6806_s30 + $0x2f08] sm:$0xff] }
 0x63e   : > { %6222 = vmatpush1.bf16.xpose.msra.mxu1 %v6221_v25  ;;  %6032 = vmatprep.subr.bf16.mxu0 %v6031_v26  ;;  %v2509_v25 = vld [vmem:[%s6806_s30 + $0x2f38] sm:$0xff]  ;;  %v6049_v26 = vpack.c.bf16 %v2304_v55, %v2298_v18 }
 0x63f   : > { %6224 = vmatprep.subr.bf16.mxu1 %v6223_v29  ;;  %v6241_v29 = vpack.c.bf16 %v2496_v22, %v2490_v21  ;;  %v6243_v32 = vpack.c.bf16 %v2509_v25, %v2503_v24 }
 0x645   : > { %6034 = vmatpush1.bf16.xpose.msra.mxu0 %v6033_v40  ;;  %v2515_v40 = vld [vmem:[%s6806_s30 + $0x2f68] sm:$0xff] }
 0x646   : > { %6226 = vmatpush1.bf16.xpose.msra.mxu1 %v6225_v41  ;;  %6036 = vmatprep.subr.bf16.mxu0 %v6035_v56  ;;  %v2521_v41 = vld [vmem:[%s6806_s30 + $0x2f98] sm:$0xff]  ;;  %v6053_v56 = vpack.c.bf16 %v2316_v33, %v2310_v60 }
 0x647   : > { %6228 = vmatprep.subr.bf16.mxu1 %v6227_v42  ;;  %v6245_v42 = vpack.c.bf16 %v2508_v63, %v2502_v35  ;;  %v6247_v12 = vpack.c.bf16 %v2521_v41, %v2515_v40 }
 0x64d   : > { %6038 = vmatpush1.bf16.xpose.msra.mxu0 %v6037_v20  ;;  %v2527_v20 = vld [vmem:[%s6806_s30 + $0x2fc8] sm:$0xff] }
 0x64e   : > { %6230 = vmatpush1.bf16.xpose.msra.mxu1 %v6229_v48  ;;  %6040 = vmatprep.subr.bf16.mxu0 %v6039_v49  ;;  %v2533_v48 = vld [vmem:[%s6806_s30 + $0x2ff8] sm:$0xff]  ;;  %v6057_v49 = vpack.c.bf16 %v2328_v27, %v2322_v39 }
 0x64f   : > { %6232 = vmatprep.subr.bf16.mxu1 %v6231_v16  ;;  %v6249_v16 = vpack.c.bf16 %v2520_v45, %v2514_v44  ;;  %v6251_v51 = vpack.c.bf16 %v2533_v48, %v2527_v20 }
 0x655   : > { %6042 = vmatpush1.bf16.xpose.msra.mxu0 %v6041_v62  ;;  %v2537_v62 = vld [vmem:[%s7530_s23 + $0xc] sm:$0xf] }
 0x656   : > { %6234 = vmatpush1.bf16.xpose.msra.mxu1 %v6233_v0  ;;  %6044 = vmatprep.subr.bf16.mxu0 %v6043_v1  ;;  %v2593_v0 = vrot.slane %v2537_v62, %v7526_v31  ;;  %v2601_v1 = vrot.slane %v2537_v62, %v7534_v2  ;;  %v2605_v3 = vrot.slane %v2537_v62, %v7540_v4 }
 0x657   : > { %6236 = vmatprep.subr.bf16.mxu1 %v6235_v19  ;;  %v2597_v19 = vrot.slane %v2537_v62, %v7537_v52 }
 0x65d   : > { %6046 = vmatpush1.bf16.xpose.msra.mxu0 %v6045_v13 }
 0x65e   : > { %6238 = vmatpush1.bf16.xpose.msra.mxu1 %v6237_v28  ;;  %6048 = vmatprep.subr.bf16.mxu0 %v6047_v14 }
 0x65f   : > { %6240 = vmatprep.subr.bf16.mxu1 %v6239_v17 }
 0x665   : > { %6050 = vmatpush1.bf16.xpose.msra.mxu0 %v6049_v26 }
 0x666   : > { %6242 = vmatpush1.bf16.xpose.msra.mxu1 %v6241_v29  ;;  %6052 = vmatprep.subr.bf16.mxu0 %v6051_v30 }
 0x667   : > { %6244 = vmatprep.subr.bf16.mxu1 %v6243_v32 }
 0x66d   : > { %6054 = vmatpush1.bf16.xpose.msra.mxu0 %v6053_v56 }
 0x66e   : > { %6246 = vmatpush1.bf16.xpose.msra.mxu1 %v6245_v42  ;;  %6056 = vmatprep.subr.bf16.mxu0 %v6055_v43 }
 0x66f   : > { %6248 = vmatprep.subr.bf16.mxu1 %v6247_v12 }
 0x675   : > { %6058 = vmatpush1.bf16.xpose.msra.mxu0 %v6057_v49 }
 0x676   : > { %6250 = vmatpush1.bf16.xpose.msra.mxu1 %v6249_v16  ;;  %6060 = vmatprep.subr.bf16.mxu0 %v6059_v50 }
 0x677   : > { %6252 = vmatprep.subr.bf16.mxu1 %v6251_v51 }
 0x67d   : > { %6062 = vmatpush1.bf16.xpose.msra.mxu0 %v6061_v59 }
 0x67e   : > { %6254 = vmatpush1.bf16.xpose.msra.mxu1 %v6253_v61 }
 0x684   : > { %4239 = vmatmul.mubr.f32.vlgmr.msra.gmra.mrb[6].mxu0 %v8499_v54 }
 0x685   : > { %4452 = vmatmul.mubr.f32.vlgmr.msra.gmra.mrb[6].mxu1 %v8499_v54 }
 0x757   : > { %v4240_v5 = vpop.f32.mrb[6].mxu0 }
 0x758   : > { %v6267_v6 = vadd.f32 %v4240_v5, %v2593_v0  ;;  %v4453_v7 = vpop.f32.mrb[6].mxu1  ;;  %v4242_v37 = vpop.f32.mrb[7].mxu0 }
 0x759   : > { %v6269_v8 = vadd.f32 %v4453_v7, %v2601_v1  ;;  %v6268_v9 = vadd.f32 %v4242_v37, %v2597_v19  ;;  %v4455_v54 = vpop.f32.mrb[7].mxu1 }
 0x75a   : > { %v6270_v11 = vadd.f32 %v4455_v54, %v2605_v3 }
 0x75b   : > { %v4525_v13 = vcombine.low %v6267_v6, %v6268_v9 }
 0x75c   : > { %v4526_v31 = vcombine.low %v6269_v8, %v6270_v11 }
 0x75d   : > { %v4533_v2 = vrot.slane %v4525_v13, %v6911_v34 }
 0x75e   : > { %v4540_v52 = vrot.slane %v4526_v31, %v6911_v34 }
 0x760   : > { %v4541_v4 = vcombine.low %v4533_v2, %v4540_v52 }
 0x762   : > { %4549 = vst [vmem:[%s7569_s4 + $0x18] sm:$0xff] %v4541_v4 }
 0x763   : > { %6492 = shalt.err (!%p6489_p12)
}
 0x764   : > { %s6493_s16 = scalar_lea.hbm %s8637_s1, 512  ;;  %s6497_s8 = scalar_lea.hbm %s8689_s3, 1536 }
 0x765   : > { %p6494_p11 = scmp.ne.s32.totalorder %s8637_s1, %s6493_s16  ;;  %p6498_p6 = scmp.lt.u32.totalorder %s8637_s1, %s8689_s3 }
 0x766   : > { %p6499_p3 = scmp.lt.u32.totalorder %s6497_s8, %s6493_s16  ;;  %p6501_p13 = scmp.lt.u32.totalorder %s6493_s16, %s8637_s1 }
 0x767   : > { %p6495_p5 = pnand %p6494_p11, %p8716_p7 }
 0x768   : > { %p6500_p2 = por %p6499_p3, %p6498_p6 }
 0x769   : > { %p6496_p4 = pneg %p6495_p5 }
 0x76a   : > { %p6502_p8 = por %p6501_p13, %p6500_p2 }
 0x76c   : > { %p6503_p9 = pnand %p6502_p8, %p6496_p4 }
 0x76e   : > { %6506 = shalt.err (!%p6503_p9)
}
 0x76f   : > { %s6577_s10 = smov 128   ;;  %s6578_s30 = smov 8  }
 0x770   : > { %6315 = dma.vmem_to_hbm [thread:$0]  (%p8716_p7), %s8631_s11, 512, %s8637_s1, %s4551_s27, %s6577_s10, %s6577_s10, %s6578_s30  }
 0x771 PF: > { %p6332_p0 = scmp.ge.s32.totalorder %s6565_s17, 2  ;;  %s4580_s18 = sand.u32 1, %s6545_s12  }
 0x772   : > { %p8717_p1 = scmp.ne.s32.totalorder %s8703_s26, 0  ;;  %s4581_s23 = scalar_lea.sflag [#allocation5], %s4580_s18 }
 0x774   : > { %p6328_p10 = pnand %p6332_p0, %p8717_p1 }
 0x776   : > { %6540 = dma.done.wait (!%p6328_p10), %s4581_s23, 512  }
 0x777   : > { %6542 = vsyncadd (!%p6328_p10), %s4581_s23, 4294966784  ;;  %s22_s17 = sadd.s32 1, %s6565_s17   ;;  %s8718_s21 = sld [smem:[#allocation15_spill]] }
 0x778   : > { %p19_p12 = scmp.ge.s32.totalorder %s22_s17, 5   ;;  %s8719_s15 = sld [smem:[#allocation13_spill]] }
 0x779   : > { %s8720_s16 = sld [smem:[#allocation14_spill]]  ;;  %s8721_s12 = smov %s6549_s13 }
 0x77a   : > { %s8722_s13 = smov %s6553_s14  ;;  %21 = sbr.rel (!%p19_p12) target bundleno = 11 (0xb), region = 109 }
 0x77d   : > { %s8723_s14 = smov %s8718_s21 }
 0x781   :  { %4586 = vsyncpa [#allocation4], 1 }
 0x782   :  { %4588 = vsyncpa [#allocation4 + $0x1], 1 }
 0x783   :  { %4589 = vsyncpa [#allocation7], 1 }
 0x784   :  { %4591 = vsyncpa [#allocation7 + $0x1], 1 }
 0x785   :  { %4592 = vsyncpa [#allocation5], 1 }
 0x786   :  { %4594 = vsyncpa [#allocation5 + $0x1], 1 }

</bundles_post_ra>
